<compile_context>
chip_gen: v7x
topology: tpu7x:2x2x1
jax: 0.10.0
libtpu: 0.0.40
codegen_flags: <defaults>
</compile_context>

<pallas_src>
import functools

import jax
import jax.numpy as jnp
from jax.experimental import pallas as pl
from jax.experimental.pallas import tpu as pltpu

# ----------------------------- configuration ------------------------------ #
E = 32                 # embedding_dim
T = 8                  # nodes per graph (sequence length)
B = 2                  # number of graphs (batch size of packed sequence)
N = T * B              # total nodes
NE = 24                # total edges
DEPTH = 3              # message passing depth
NUM_GRU_LAYERS = 3
NUM_NODE_TYPES = 16    # stand-in for len(target.NODE_TYPES)
NUM_EDGE_TYPES = 4     # stand-in for len(target.EDGE_TYPES)
ETAB_ROWS = max(8, NUM_EDGE_TYPES)   # pad edge table rows so the one-hot matmul K >= 8


# ------------------------------ fused kernel ------------------------------- #
def _fused_core_kernel(
        # index inputs
        ntype_col_ref, etype_col_ref, perm_col_ref, src_col_ref, tgt_row_ref, gidx_row_ref,
        # embedding tables
        ntab_ref, etab_ref,
        # GRU stack (gate order r|z|n along 96 lanes)
        wih0_ref, wihf_ref, wihb_ref, whh_ref, bi_ref, bhhn_ref,
        # merge_direction (split weights)
        wmdf_ref, wmdb_ref, bmd_ref,
        # message-passing message fn (split ConcatenateLinear)
        wmsrc_ref, wmedge_ref, bm_ref,
        # message-passing GRUCell (fused gates)
        mpwih_ref, mpwhh_ref, mpbi_ref, mpbhhn_ref,
        # graph readout
        wg_ref, bg_ref, wv_ref, bv_ref,
        # merge_global (split weights)
        wmgf_ref, wmgb_ref, wmgp_ref, bmg_ref,
        # outputs
        node_ref, merged_ref,
        # VMEM scratch: two (fwd,bwd) slab pairs, ping-ponged across GRU layers
        sf0, sb0, sf1, sb1,
        *, t_len, b_sz, num_layers, depth):
    f32 = jnp.float32
    e = ntab_ref.shape[1]
    tb = t_len * b_sz
    n_nodes = node_ref.shape[0]
    n_edges = etype_col_ref.shape[0]
    n_graphs = merged_ref.shape[0]
    n_types = ntab_ref.shape[0]
    e_types = etab_ref.shape[0]

    # ---- in-kernel dense embedding lookups (one-hot matmuls) ----
    node_oh = (jax.lax.broadcasted_iota(jnp.int32, (tb, n_types), 1)
               == ntype_col_ref[...]).astype(f32)                         # (T*B, NT)
    node_pre = jnp.dot(node_oh, ntab_ref[...], preferred_element_type=f32)  # (T*B, E)
    edge_oh = (jax.lax.broadcasted_iota(jnp.int32, (n_edges, e_types), 1)
               == etype_col_ref[...]).astype(f32)                         # (NE, 8)
    edge_emb = jnp.dot(edge_oh, etab_ref[...], preferred_element_type=f32)  # (NE, E)

    # ---- 3-layer bidirectional GRU, fully unrolled, fused gates ----
    slabs = ((sf0, sb0), (sf1, sb1))
    finals = [None, None]   # last-layer final states (fwd carry at t=T-1, bwd carry at t=0)

    for layer in range(num_layers):
        out_f, out_b = slabs[layer % 2]
        if layer > 0:
            in_f, in_b = slabs[(layer - 1) % 2]
            x_f = in_f[...]                                               # (T*B, E)
            x_b = in_b[...]                                               # (T*B, E)
        for d in range(2):                                                # 0=fwd, 1=bwd
            ld = layer * 2 + d
            # hoisted input projection for the whole sequence (one fused 96-lane matmul;
            # b_hh for the r,z gates is already folded into bi).
            if layer == 0:
                gi = (jnp.dot(node_pre, wih0_ref[d], preferred_element_type=f32)
                      + bi_ref[ld:ld + 1, :])                             # (T*B, 3E)
            else:
                j = (layer - 1) * 2 + d
                gi = (jnp.dot(x_f, wihf_ref[j], preferred_element_type=f32)
                      + jnp.dot(x_b, wihb_ref[j], preferred_element_type=f32)
                      + bi_ref[ld:ld + 1, :])                             # (T*B, 3E)
            whh = whh_ref[ld]                                             # (E, 3E)
            bhhn_b = jnp.broadcast_to(bhhn_ref[ld:ld + 1, :], (b_sz, e))  # hoisted bcast
            out_ref = out_f if d == 0 else out_b

            h = jnp.zeros((b_sz, e), f32)
            t_iter = range(t_len) if d == 0 else range(t_len - 1, -1, -1)
            for t in t_iter:                                              # static unroll
                gi_t = gi[t * b_sz:(t + 1) * b_sz, :]
                gh = jnp.dot(h, whh, preferred_element_type=f32)          # (B, 3E)
                rz = jax.nn.sigmoid(gi_t[:, :2 * e] + gh[:, :2 * e])
                r = rz[:, :e]
                z = rz[:, e:]
                n = jnp.tanh(gi_t[:, 2 * e:] + r * (gh[:, 2 * e:] + bhhn_b))
                h = (1.0 - z) * n + z * h
                out_ref[t * b_sz:(t + 1) * b_sz, :] = h                   # off critical path
            finals[d] = h

    y_f, y_b = slabs[(num_layers - 1) % 2]

    # ---- merge_direction in packed order, then permute into graph node order ----
    ymerge = (jnp.dot(y_f[...], wmdf_ref[...], preferred_element_type=f32)
              + jnp.dot(y_b[...], wmdb_ref[...], preferred_element_type=f32)
              + bmd_ref[...])                                             # (T*B, E)
    perm_oh = (jax.lax.broadcasted_iota(jnp.int32, (n_nodes, tb), 1)
               == perm_col_ref[...]).astype(f32)                          # (N, T*B)
    h = jnp.dot(perm_oh, ymerge, preferred_element_type=f32)              # (N, E)

    # ---- loop-invariants for message passing ----
    src_oh = (jax.lax.broadcasted_iota(jnp.int32, (n_edges, n_nodes), 1)
              == src_col_ref[...]).astype(f32)                            # (NE, N) gather
    tgt_oh = (jax.lax.broadcasted_iota(jnp.int32, (n_nodes, n_edges), 0)
              == tgt_row_ref[...]).astype(f32)                            # (N, NE) scatter
    edge_part = (jnp.dot(edge_emb, wmedge_ref[...], preferred_element_type=f32)
                 + bm_ref[...])                                           # (NE, E)
    mp_bi_b = jnp.broadcast_to(mpbi_ref[...], (n_nodes, 3 * e))           # hoisted bcasts
    mp_bhhn_b = jnp.broadcast_to(mpbhhn_ref[...], (n_nodes, e))
    mp_wih = mpwih_ref[...]
    mp_whh = mpwhh_ref[...]

    # ---- message passing, fused-gate GRUCell, fully unrolled ----
    for _ in range(depth):
        src_emb = jnp.dot(src_oh, h, preferred_element_type=f32)          # (NE, E)
        msg = jnp.dot(src_emb, wmsrc_ref[...], preferred_element_type=f32) + edge_part
        agg = jnp.dot(tgt_oh, msg, preferred_element_type=f32)            # (N, E)
        ga = jnp.dot(agg, mp_wih, preferred_element_type=f32) + mp_bi_b   # (N, 3E)
        gh = jnp.dot(h, mp_whh, preferred_element_type=f32)               # (N, 3E)
        rz = jax.nn.sigmoid(ga[:, :2 * e] + gh[:, :2 * e])
        r = rz[:, :e]
        z = rz[:, e:]
        nn = jnp.tanh(ga[:, 2 * e:] + r * (gh[:, 2 * e:] + mp_bhhn_b))
        h = (1.0 - z) * nn + z * h
    node_ref[...] = h

    # ---- GraphPostEmbedding: gated sum readout to 2E per graph ----
    gate = jax.nn.sigmoid(jnp.dot(h, wg_ref[...], preferred_element_type=f32) + bg_ref[...])
    value = jnp.dot(h, wv_ref[...], preferred_element_type=f32) + bv_ref[...]
    gated = gate * value                                                  # (N, 2E)
    g_oh = (jax.lax.broadcasted_iota(jnp.int32, (n_graphs, n_nodes), 0)
            == gidx_row_ref[...]).astype(f32)                             # (G, N)
    graph_post = jnp.dot(g_oh, gated, preferred_element_type=f32)         # (G, 2E)

    # ---- merge_global_embedding: split-weight ConcatenateLinear(2E, 2E, E) ----
    merged_ref[...] = (
        jnp.dot(finals[0], wmgf_ref[...], preferred_element_type=f32)
        + jnp.dot(finals[1], wmgb_ref[...], preferred_element_type=f32)
        + jnp.dot(graph_post, wmgp_ref[...], preferred_element_type=f32)
        + bmg_ref[...])


# ------------------------------ parameters --------------------------------- #
def init_params(key):
    keys = iter(jax.random.split(key, 64))

    def w(shape):
        fan_in = shape[0]
        return (jax.random.normal(next(keys), shape, dtype=jnp.float32)
                / jnp.sqrt(jnp.float32(fan_in)))

    def b(shape):
        return 0.01 * jax.random.normal(next(keys), shape, dtype=jnp.float32)

    p = {}
    p["node_embed_table"] = w((NUM_NODE_TYPES, E))
    p["edge_embed_table"] = w((NUM_EDGE_TYPES, E))

    # 3-layer bidirectional GRU, raw per-(layer, dir) weights, gate order r|z|n in columns.
    gru_raw = []
    for layer in range(NUM_GRU_LAYERS):
        din = E if layer == 0 else 2 * E
        for _ in range(2):
            gru_raw.append({"w_ih": w((din, 3 * E)), "w_hh": w((E, 3 * E)),
                            "b_ih": b((3 * E,)), "b_hh": b((3 * E,))})
    p["gru_raw"] = gru_raw

    p["merge_dir_w"] = w((2 * E, E))
    p["merge_dir_b"] = b((1, E))

    # MessagePassingNetwork: ConcatenateLinear(E, E, E) message + GRUCell(E, E).
    p["mp_w_msg"] = w((2 * E, E))
    p["mp_b_msg"] = b((1, E))
    p["mp_wih"] = w((E, 3 * E))
    p["mp_whh"] = w((E, 3 * E))
    p["mp_bih"] = b((3 * E,))
    p["mp_bhh"] = b((3 * E,))

    # GraphPostEmbedding(E) -> gated sum readout to 2E.
    p["ro_w_gate"] = w((E, 2 * E))
    p["ro_b_gate"] = b((1, 2 * E))
    p["ro_w_val"] = w((E, 2 * E))
    p["ro_b_val"] = b((1, 2 * E))

    # merge_global_embedding: ConcatenateLinear(2E, 2E, E).
    p["merge_global_w"] = w((4 * E, E))
    p["merge_global_b"] = b((1, E))
    return p


def pack_params(p):
    """One-time packing of raw params into the fused kernel's operand layout."""
    k = {}
    k["ntab"] = p["node_embed_table"]
    etab = jnp.zeros((ETAB_ROWS, E), jnp.float32)
    k["etab"] = etab.at[:NUM_EDGE_TYPES].set(p["edge_embed_table"])

    wih0, wihf, wihb, whh, bi, bhhn = [], [], [], [], [], []
    for layer in range(NUM_GRU_LAYERS):
        for d in range(2):
            raw = p["gru_raw"][layer * 2 + d]
            if layer == 0:
                wih0.append(raw["w_ih"])                       # (E, 3E)
            else:
                wihf.append(raw["w_ih"][:E])                   # fwd-slab rows
                wihb.append(raw["w_ih"][E:])                   # bwd-slab rows
            whh.append(raw["w_hh"])                            # (E, 3E)
            # fold b_hh for the r,z gates into the hoisted input-projection bias
            bi.append(raw["b_ih"] + jnp.concatenate(
                [raw["b_hh"][:2 * E], jnp.zeros((E,), jnp.float32)]))
            bhhn.append(raw["b_hh"][2 * E:])
    k["gru_wih0"] = jnp.stack(wih0)    # (2, E, 3E)
    k["gru_wihf"] = jnp.stack(wihf)    # (4, E, 3E)
    k["gru_wihb"] = jnp.stack(wihb)    # (4, E, 3E)
    k["gru_whh"] = jnp.stack(whh)      # (6, E, 3E)
    k["gru_bi"] = jnp.stack(bi)        # (6, 3E)
    k["gru_bhhn"] = jnp.stack(bhhn)    # (6, E)

    k["merge_dir_wf"] = p["merge_dir_w"][:E]
    k["merge_dir_wb"] = p["merge_dir_w"][E:]
    k["merge_dir_b"] = p["merge_dir_b"]

    k["mp_w_msg_src"] = p["mp_w_msg"][:E]
    k["mp_w_msg_edge"] = p["mp_w_msg"][E:]
    k["mp_b_msg"] = p["mp_b_msg"]
    k["mp_wih"] = p["mp_wih"]
    k["mp_whh"] = p["mp_whh"]
    k["mp_bi"] = (p["mp_bih"] + jnp.concatenate(
        [p["mp_bhh"][:2 * E], jnp.zeros((E,), jnp.float32)])).reshape(1, 3 * E)
    k["mp_bhhn"] = p["mp_bhh"][2 * E:].reshape(1, E)

    k["ro_w_gate"] = p["ro_w_gate"]
    k["ro_b_gate"] = p["ro_b_gate"]
    k["ro_w_val"] = p["ro_w_val"]
    k["ro_b_val"] = p["ro_b_val"]

    k["mg_w_globf"] = p["merge_global_w"][:E]
    k["mg_w_globb"] = p["merge_global_w"][E:2 * E]
    k["mg_w_post"] = p["merge_global_w"][2 * E:]
    k["mg_b"] = p["merge_global_b"]
    return k


# ------------------------------- forward ----------------------------------- #
@jax.jit
def forward(kern, ntype_col, etype_col, perm_col, src_col, tgt_row, gidx_row):
    kernel = functools.partial(_fused_core_kernel, t_len=T, b_sz=B,
                               num_layers=NUM_GRU_LAYERS, depth=DEPTH)
    return pl.pallas_call(
        kernel,
        out_shape=(jax.ShapeDtypeStruct((N, E), jnp.float32),
                   jax.ShapeDtypeStruct((B, E), jnp.float32)),
        scratch_shapes=[pltpu.VMEM((T * B, E), jnp.float32)] * 4,
    )(ntype_col, etype_col, perm_col, src_col, tgt_row, gidx_row,
      kern["ntab"], kern["etab"],
      kern["gru_wih0"], kern["gru_wihf"], kern["gru_wihb"],
      kern["gru_whh"], kern["gru_bi"], kern["gru_bhhn"],
      kern["merge_dir_wf"], kern["merge_dir_wb"], kern["merge_dir_b"],
      kern["mp_w_msg_src"], kern["mp_w_msg_edge"], kern["mp_b_msg"],
      kern["mp_wih"], kern["mp_whh"], kern["mp_bi"], kern["mp_bhhn"],
      kern["ro_w_gate"], kern["ro_b_gate"], kern["ro_w_val"], kern["ro_b_val"],
      kern["mg_w_globf"], kern["mg_w_globb"], kern["mg_w_post"], kern["mg_b"])


# --------------------------- pure-JAX reference ----------------------------- #
@jax.jit
def reference_forward(p, node_type_ids, perm, edge_types, src, tgt, graph_index):
    node_pre = p["node_embed_table"][node_type_ids]                       # (T*B, E)
    x_all = node_pre
    finals = [None, None]
    for layer in range(NUM_GRU_LAYERS):
        outs = [[None] * T for _ in range(2)]
        for d in range(2):
            raw = p["gru_raw"][layer * 2 + d]
            h = jnp.zeros((B, E), jnp.float32)
            t_iter = range(T) if d == 0 else range(T - 1, -1, -1)
            for t in t_iter:
                xt = x_all[t * B:(t + 1) * B]
                gi = xt @ raw["w_ih"] + raw["b_ih"]
                gh = h @ raw["w_hh"] + raw["b_hh"]
                r = jax.nn.sigmoid(gi[:, :E] + gh[:, :E])
                z = jax.nn.sigmoid(gi[:, E:2 * E] + gh[:, E:2 * E])
                n = jnp.tanh(gi[:, 2 * E:] + r * gh[:, 2 * E:])
                h = (1.0 - z) * n + z * h
                outs[d][t] = h
            finals[d] = h
        x_all = jnp.concatenate(
            [jnp.concatenate([outs[0][t], outs[1][t]], axis=1) for t in range(T)], axis=0)
    y = x_all
    glob = jnp.concatenate(finals, axis=1)

    edge_emb = p["edge_embed_table"][edge_types]
    h = y[perm] @ p["merge_dir_w"] + p["merge_dir_b"]
    edge_part = edge_emb @ p["mp_w_msg"][E:] + p["mp_b_msg"]
    for _ in range(DEPTH):
        msg = h[src] @ p["mp_w_msg"][:E] + edge_part
        agg = jnp.zeros_like(h).at[tgt].add(msg)
        gi = agg @ p["mp_wih"] + p["mp_bih"]
        gh = h @ p["mp_whh"] + p["mp_bhh"]
        r = jax.nn.sigmoid(gi[:, :E] + gh[:, :E])
        z = jax.nn.sigmoid(gi[:, E:2 * E] + gh[:, E:2 * E])
        n = jnp.tanh(gi[:, 2 * E:] + r * gh[:, 2 * E:])
        h = (1.0 - z) * n + z * h
    node_post = h
    gate = jax.nn.sigmoid(h @ p["ro_w_gate"] + p["ro_b_gate"])
    value = h @ p["ro_w_val"] + p["ro_b_val"]
    graph_post = jnp.zeros((B, 2 * E), jnp.float32).at[graph_index].add(gate * value)
    merged = (glob @ p["merge_global_w"][:2 * E]
              + graph_post @ p["merge_global_w"][2 * E:]
              + p["merge_global_b"])
    return node_post, merged


# --------------------------------- main ------------------------------------ #
if __name__ == "__main__":
    key = jax.random.PRNGKey(0)
    k_param, k_nodes, k_edges, k_src, k_tgt = jax.random.split(key, 5)

    params = init_params(k_param)
    kern_params = pack_params(params)

    # packed-sequence-ordered node type ids (packed row (t, b) -> t*B + b).
    node_type_ids = jax.random.randint(k_nodes, (T * B,), 0, NUM_NODE_TYPES, jnp.int32)

    # node_features_graph_index: graph order (graph b, node t) -> packed row t*B + b.
    node_features_graph_index = jnp.array(
        [t * B + b for b in range(B) for t in range(T)], dtype=jnp.int32)

    # edges: NE//B edges per graph, endpoints within that graph's node range (graph order).
    edge_types = jax.random.randint(k_edges, (NE,), 0, NUM_EDGE_TYPES, jnp.int32)
    per_graph = NE // B
    src_local = jax.random.randint(k_src, (NE,), 0, T, jnp.int32)
    tgt_local = jax.random.randint(k_tgt, (NE,), 0, T, jnp.int32)
    graph_of_edge = jnp.repeat(jnp.arange(B, dtype=jnp.int32), per_graph)
    src = src_local + graph_of_edge * T     # incidence[0] (gather sources)
    tgt = tgt_local + graph_of_edge * T     # incidence[1] (scatter-add targets)
    graph_index = jnp.arange(N, dtype=jnp.int32) // T

    # kernel-side index layouts
    ntype_col = node_type_ids.reshape(N, 1)
    etype_col = edge_types.reshape(NE, 1)
    perm_col = node_features_graph_index.reshape(N, 1)
    src_col = src.reshape(NE, 1)
    tgt_row = tgt.reshape(1, NE)
    gidx_row = graph_index.reshape(1, N)

    node_post, merged_global = forward(
        kern_params, ntype_col, etype_col, perm_col, src_col, tgt_row, gidx_row)
    jax.block_until_ready((node_post, merged_global))

    assert node_post.shape == (N, E)
    assert merged_global.shape == (B, E)
    assert bool(jnp.all(jnp.isfinite(node_post)))
    assert bool(jnp.all(jnp.isfinite(merged_global)))

    # sanity check against a pure-JAX reference (loose tolerance: MXU vs XLA precision).
    ref_node, ref_merged = reference_forward(
        params, node_type_ids, node_features_graph_index, edge_types, src, tgt, graph_index)
    assert float(jnp.max(jnp.abs(node_post - ref_node))) < 5e-2
    assert float(jnp.max(jnp.abs(merged_global - ref_merged))) < 5e-2

    print("KERNEL_OK")
</pallas_src>

<mosaic_0001>
module attributes {stable_mosaic.version = 11 : i64} {
  func.func @_fused_core_kernel(%arg0: memref<16x1xi32, #tpu.memory_space<vmem>>, %arg1: memref<24x1xi32, #tpu.memory_space<vmem>>, %arg2: memref<16x1xi32, #tpu.memory_space<vmem>>, %arg3: memref<24x1xi32, #tpu.memory_space<vmem>>, %arg4: memref<1x24xi32, #tpu.memory_space<vmem>>, %arg5: memref<1x16xi32, #tpu.memory_space<vmem>>, %arg6: memref<16x32xf32, #tpu.memory_space<vmem>>, %arg7: memref<8x32xf32, #tpu.memory_space<vmem>>, %arg8: memref<2x32x96xf32, #tpu.memory_space<vmem>>, %arg9: memref<4x32x96xf32, #tpu.memory_space<vmem>>, %arg10: memref<4x32x96xf32, #tpu.memory_space<vmem>>, %arg11: memref<6x32x96xf32, #tpu.memory_space<vmem>>, %arg12: memref<6x96xf32, #tpu.memory_space<vmem>>, %arg13: memref<6x32xf32, #tpu.memory_space<vmem>>, %arg14: memref<32x32xf32, #tpu.memory_space<vmem>>, %arg15: memref<32x32xf32, #tpu.memory_space<vmem>>, %arg16: memref<1x32xf32, #tpu.memory_space<vmem>>, %arg17: memref<32x32xf32, #tpu.memory_space<vmem>>, %arg18: memref<32x32xf32, #tpu.memory_space<vmem>>, %arg19: memref<1x32xf32, #tpu.memory_space<vmem>>, %arg20: memref<32x96xf32, #tpu.memory_space<vmem>>, %arg21: memref<32x96xf32, #tpu.memory_space<vmem>>, %arg22: memref<1x96xf32, #tpu.memory_space<vmem>>, %arg23: memref<1x32xf32, #tpu.memory_space<vmem>>, %arg24: memref<32x64xf32, #tpu.memory_space<vmem>>, %arg25: memref<1x64xf32, #tpu.memory_space<vmem>>, %arg26: memref<32x64xf32, #tpu.memory_space<vmem>>, %arg27: memref<1x64xf32, #tpu.memory_space<vmem>>, %arg28: memref<32x32xf32, #tpu.memory_space<vmem>>, %arg29: memref<32x32xf32, #tpu.memory_space<vmem>>, %arg30: memref<64x32xf32, #tpu.memory_space<vmem>>, %arg31: memref<1x32xf32, #tpu.memory_space<vmem>>, %arg32: memref<16x32xf32, #tpu.memory_space<vmem>>, %arg33: memref<2x32xf32, #tpu.memory_space<vmem>>, %arg34: memref<16x32xf32, #tpu.memory_space<vmem>>, %arg35: memref<16x32xf32, #tpu.memory_space<vmem>>, %arg36: memref<16x32xf32, #tpu.memory_space<vmem>>, %arg37: memref<16x32xf32, #tpu.memory_space<vmem>>) attributes {dimension_semantics = [], scalar_prefetch = 0 : i64, scratch_operands = 4 : i64, tpu.core_type = #tpu.core_type<tc>} {
    %0 = tpu.iota {dimensions = array<i32: 1>} : vector<16x16xi32>
    %c0 = arith.constant 0 : index
    %c0_0 = arith.constant 0 : index
    %1 = vector.load %arg0[%c0, %c0_0] : memref<16x1xi32, #tpu.memory_space<vmem>>, vector<16x1xi32>
    %2 = vector.broadcast %1 : vector<16x1xi32> to vector<16x16xi32>
    %3 = arith.cmpi eq, %0, %2 : vector<16x16xi32>
    %4 = arith.extui %3 : vector<16x16xi1> to vector<16x16xi32>
    %5 = arith.sitofp %4 : vector<16x16xi32> to vector<16x16xf32>
    %c0_1 = arith.constant 0 : index
    %c0_2 = arith.constant 0 : index
    %6 = vector.load %arg6[%c0_1, %c0_2] : memref<16x32xf32, #tpu.memory_space<vmem>>, vector<16x32xf32>
    %cst = arith.constant dense<0.000000e+00> : vector<16x32xf32>
    %7 = tpu.matmul %5, %6, %cst {dimension_numbers = #tpu.dot_dimension_numbers<[1], [0], [0], [1], [0, 0, 1, 1], [], []>} : vector<16x16xf32>, vector<16x32xf32>, vector<16x32xf32> -> vector<16x32xf32>
    %8 = tpu.iota {dimensions = array<i32: 1>} : vector<24x8xi32>
    %c0_3 = arith.constant 0 : index
    %c0_4 = arith.constant 0 : index
    %9 = vector.load %arg1[%c0_3, %c0_4] : memref<24x1xi32, #tpu.memory_space<vmem>>, vector<24x1xi32>
    %10 = vector.broadcast %9 : vector<24x1xi32> to vector<24x8xi32>
    %11 = arith.cmpi eq, %8, %10 : vector<24x8xi32>
    %12 = arith.extui %11 : vector<24x8xi1> to vector<24x8xi32>
    %13 = arith.sitofp %12 : vector<24x8xi32> to vector<24x8xf32>
    %c0_5 = arith.constant 0 : index
    %c0_6 = arith.constant 0 : index
    %14 = vector.load %arg7[%c0_5, %c0_6] : memref<8x32xf32, #tpu.memory_space<vmem>>, vector<8x32xf32>
    %cst_7 = arith.constant dense<0.000000e+00> : vector<24x32xf32>
    %15 = tpu.matmul %13, %14, %cst_7 {dimension_numbers = #tpu.dot_dimension_numbers<[1], [0], [0], [1], [0, 0, 1, 1], [], []>} : vector<24x8xf32>, vector<8x32xf32>, vector<24x32xf32> -> vector<24x32xf32>
    %c0_8 = arith.constant 0 : index
    %c0_9 = arith.constant 0 : index
    %c0_10 = arith.constant 0 : index
    %16 = vector.load %arg8[%c0_8, %c0_9, %c0_10] : memref<2x32x96xf32, #tpu.memory_space<vmem>>, vector<1x32x96xf32>
    %17 = vector.shape_cast %16 : vector<1x32x96xf32> to vector<32x96xf32>
    %cst_11 = arith.constant dense<0.000000e+00> : vector<16x96xf32>
    %18 = tpu.matmul %7, %17, %cst_11 {dimension_numbers = #tpu.dot_dimension_numbers<[1], [0], [0], [1], [0, 0, 1, 1], [], []>} : vector<16x32xf32>, vector<32x96xf32>, vector<16x96xf32> -> vector<16x96xf32>
    %c0_12 = arith.constant 0 : index
    %c0_13 = arith.constant 0 : index
    %19 = vector.load %arg12[%c0_12, %c0_13] : memref<6x96xf32, #tpu.memory_space<vmem>>, vector<1x96xf32>
    %20 = vector.broadcast %19 : vector<1x96xf32> to vector<16x96xf32>
    %21 = arith.addf %18, %20 : vector<16x96xf32>
    %c0_14 = arith.constant 0 : index
    %c0_15 = arith.constant 0 : index
    %c0_16 = arith.constant 0 : index
    %22 = vector.load %arg11[%c0_14, %c0_15, %c0_16] : memref<6x32x96xf32, #tpu.memory_space<vmem>>, vector<1x32x96xf32>
    %23 = vector.shape_cast %22 : vector<1x32x96xf32> to vector<32x96xf32>
    %c0_17 = arith.constant 0 : index
    %c0_18 = arith.constant 0 : index
    %24 = vector.load %arg13[%c0_17, %c0_18] : memref<6x32xf32, #tpu.memory_space<vmem>>, vector<1x32xf32>
    %25 = vector.shape_cast %24 : vector<1x32xf32> to vector<1x32xf32>
    %26 = vector.broadcast %25 : vector<1x32xf32> to vector<2x32xf32>
    %cst_19 = arith.constant 0.000000e+00 : f32
    %27 = vector.broadcast %cst_19 : f32 to vector<2x32xf32>
    %28 = vector.extract_strided_slice %21 {offsets = [0, 0], sizes = [2, 96], strides = [1, 1]} : vector<16x96xf32> to vector<2x96xf32>
    %cst_20 = arith.constant dense<0.000000e+00> : vector<2x96xf32>
    %29 = tpu.matmul %27, %23, %cst_20 {dimension_numbers = #tpu.dot_dimension_numbers<[1], [0], [0], [1], [0, 0, 1, 1], [], []>} : vector<2x32xf32>, vector<32x96xf32>, vector<2x96xf32> -> vector<2x96xf32>
    %30 = vector.extract_strided_slice %28 {offsets = [0, 0], sizes = [2, 64], strides = [1, 1]} : vector<2x96xf32> to vector<2x64xf32>
    %31 = vector.extract_strided_slice %29 {offsets = [0, 0], sizes = [2, 64], strides = [1, 1]} : vector<2x96xf32> to vector<2x64xf32>
    %32 = arith.addf %30, %31 : vector<2x64xf32>
    %33 = arith.negf %32 : vector<2x64xf32>
    %34 = math.exp %33 : vector<2x64xf32>
    %cst_21 = arith.constant 1.000000e+00 : f32
    %35 = vector.broadcast %cst_21 : f32 to vector<2x64xf32>
    %36 = arith.addf %35, %34 : vector<2x64xf32>
    %37 = arith.divf %35, %36 : vector<2x64xf32>
    %38 = vector.extract_strided_slice %37 {offsets = [0, 0], sizes = [2, 32], strides = [1, 1]} : vector<2x64xf32> to vector<2x32xf32>
    %39 = vector.extract_strided_slice %37 {offsets = [0, 32], sizes = [2, 32], strides = [1, 1]} : vector<2x64xf32> to vector<2x32xf32>
    %40 = vector.extract_strided_slice %28 {offsets = [0, 64], sizes = [2, 32], strides = [1, 1]} : vector<2x96xf32> to vector<2x32xf32>
    %41 = vector.extract_strided_slice %29 {offsets = [0, 64], sizes = [2, 32], strides = [1, 1]} : vector<2x96xf32> to vector<2x32xf32>
    %42 = arith.addf %41, %26 : vector<2x32xf32>
    %43 = arith.mulf %38, %42 : vector<2x32xf32>
    %44 = arith.addf %40, %43 : vector<2x32xf32>
    %45 = math.tanh %44 : vector<2x32xf32>
    %cst_22 = arith.constant 1.000000e+00 : f32
    %46 = vector.broadcast %cst_22 : f32 to vector<2x32xf32>
    %47 = arith.subf %46, %39 : vector<2x32xf32>
    %48 = arith.mulf %47, %45 : vector<2x32xf32>
    %49 = arith.mulf %39, %27 : vector<2x32xf32>
    %50 = arith.addf %48, %49 : vector<2x32xf32>
    %c0_23 = arith.constant 0 : index
    %c0_24 = arith.constant 0 : index
    %51 = vector.load %arg34[%c0_23, %c0_24] : memref<16x32xf32, #tpu.memory_space<vmem>>, vector<2x32xf32>
    tpu.vector_store %arg34[%c0_23, %c0_24], %50 {strides = array<i32>} : memref<16x32xf32, #tpu.memory_space<vmem>>, vector<2x32xf32>,
    %52 = vector.extract_strided_slice %21 {offsets = [2, 0], sizes = [2, 96], strides = [1, 1]} : vector<16x96xf32> to vector<2x96xf32>
    %cst_25 = arith.constant dense<0.000000e+00> : vector<2x96xf32>
    %53 = tpu.matmul %50, %23, %cst_25 {dimension_numbers = #tpu.dot_dimension_numbers<[1], [0], [0], [1], [0, 0, 1, 1], [], []>} : vector<2x32xf32>, vector<32x96xf32>, vector<2x96xf32> -> vector<2x96xf32>
    %54 = vector.extract_strided_slice %52 {offsets = [0, 0], sizes = [2, 64], strides = [1, 1]} : vector<2x96xf32> to vector<2x64xf32>
    %55 = vector.extract_strided_slice %53 {offsets = [0, 0], sizes = [2, 64], strides = [1, 1]} : vector<2x96xf32> to vector<2x64xf32>
    %56 = arith.addf %54, %55 : vector<2x64xf32>
    %57 = arith.negf %56 : vector<2x64xf32>
    %58 = math.exp %57 : vector<2x64xf32>
    %cst_26 = arith.constant 1.000000e+00 : f32
    %59 = vector.broadcast %cst_26 : f32 to vector<2x64xf32>
    %60 = arith.addf %59, %58 : vector<2x64xf32>
    %61 = arith.divf %59, %60 : vector<2x64xf32>
    %62 = vector.extract_strided_slice %61 {offsets = [0, 0], sizes = [2, 32], strides = [1, 1]} : vector<2x64xf32> to vector<2x32xf32>
    %63 = vector.extract_strided_slice %61 {offsets = [0, 32], sizes = [2, 32], strides = [1, 1]} : vector<2x64xf32> to vector<2x32xf32>
    %64 = vector.extract_strided_slice %52 {offsets = [0, 64], sizes = [2, 32], strides = [1, 1]} : vector<2x96xf32> to vector<2x32xf32>
    %65 = vector.extract_strided_slice %53 {offsets = [0, 64], sizes = [2, 32], strides = [1, 1]} : vector<2x96xf32> to vector<2x32xf32>
    %66 = arith.addf %65, %26 : vector<2x32xf32>
    %67 = arith.mulf %62, %66 : vector<2x32xf32>
    %68 = arith.addf %64, %67 : vector<2x32xf32>
    %69 = math.tanh %68 : vector<2x32xf32>
    %cst_27 = arith.constant 1.000000e+00 : f32
    %70 = vector.broadcast %cst_27 : f32 to vector<2x32xf32>
    %71 = arith.subf %70, %63 : vector<2x32xf32>
    %72 = arith.mulf %71, %69 : vector<2x32xf32>
    %73 = arith.mulf %63, %50 : vector<2x32xf32>
    %74 = arith.addf %72, %73 : vector<2x32xf32>
    %c2 = arith.constant 2 : index
    %c0_28 = arith.constant 0 : index
    %75 = vector.load %arg34[%c2, %c0_28] : memref<16x32xf32, #tpu.memory_space<vmem>>, vector<2x32xf32>
    tpu.vector_store %arg34[%c2, %c0_28], %74 {strides = array<i32>} : memref<16x32xf32, #tpu.memory_space<vmem>>, vector<2x32xf32>,
    %76 = vector.extract_strided_slice %21 {offsets = [4, 0], sizes = [2, 96], strides = [1, 1]} : vector<16x96xf32> to vector<2x96xf32>
    %cst_29 = arith.constant dense<0.000000e+00> : vector<2x96xf32>
    %77 = tpu.matmul %74, %23, %cst_29 {dimension_numbers = #tpu.dot_dimension_numbers<[1], [0], [0], [1], [0, 0, 1, 1], [], []>} : vector<2x32xf32>, vector<32x96xf32>, vector<2x96xf32> -> vector<2x96xf32>
    %78 = vector.extract_strided_slice %76 {offsets = [0, 0], sizes = [2, 64], strides = [1, 1]} : vector<2x96xf32> to vector<2x64xf32>
    %79 = vector.extract_strided_slice %77 {offsets = [0, 0], sizes = [2, 64], strides = [1, 1]} : vector<2x96xf32> to vector<2x64xf32>
    %80 = arith.addf %78, %79 : vector<2x64xf32>
    %81 = arith.negf %80 : vector<2x64xf32>
    %82 = math.exp %81 : vector<2x64xf32>
    %cst_30 = arith.constant 1.000000e+00 : f32
    %83 = vector.broadcast %cst_30 : f32 to vector<2x64xf32>
    %84 = arith.addf %83, %82 : vector<2x64xf32>
    %85 = arith.divf %83, %84 : vector<2x64xf32>
    %86 = vector.extract_strided_slice %85 {offsets = [0, 0], sizes = [2, 32], strides = [1, 1]} : vector<2x64xf32> to vector<2x32xf32>
    %87 = vector.extract_strided_slice %85 {offsets = [0, 32], sizes = [2, 32], strides = [1, 1]} : vector<2x64xf32> to vector<2x32xf32>
    %88 = vector.extract_strided_slice %76 {offsets = [0, 64], sizes = [2, 32], strides = [1, 1]} : vector<2x96xf32> to vector<2x32xf32>
    %89 = vector.extract_strided_slice %77 {offsets = [0, 64], sizes = [2, 32], strides = [1, 1]} : vector<2x96xf32> to vector<2x32xf32>
    %90 = arith.addf %89, %26 : vector<2x32xf32>
    %91 = arith.mulf %86, %90 : vector<2x32xf32>
    %92 = arith.addf %88, %91 : vector<2x32xf32>
    %93 = math.tanh %92 : vector<2x32xf32>
    %cst_31 = arith.constant 1.000000e+00 : f32
    %94 = vector.broadcast %cst_31 : f32 to vector<2x32xf32>
    %95 = arith.subf %94, %87 : vector<2x32xf32>
    %96 = arith.mulf %95, %93 : vector<2x32xf32>
    %97 = arith.mulf %87, %74 : vector<2x32xf32>
    %98 = arith.addf %96, %97 : vector<2x32xf32>
    %c4 = arith.constant 4 : index
    %c0_32 = arith.constant 0 : index
    %99 = vector.load %arg34[%c4, %c0_32] : memref<16x32xf32, #tpu.memory_space<vmem>>, vector<2x32xf32>
    tpu.vector_store %arg34[%c4, %c0_32], %98 {strides = array<i32>} : memref<16x32xf32, #tpu.memory_space<vmem>>, vector<2x32xf32>,
    %100 = vector.extract_strided_slice %21 {offsets = [6, 0], sizes = [2, 96], strides = [1, 1]} : vector<16x96xf32> to vector<2x96xf32>
    %cst_33 = arith.constant dense<0.000000e+00> : vector<2x96xf32>
    %101 = tpu.matmul %98, %23, %cst_33 {dimension_numbers = #tpu.dot_dimension_numbers<[1], [0], [0], [1], [0, 0, 1, 1], [], []>} : vector<2x32xf32>, vector<32x96xf32>, vector<2x96xf32> -> vector<2x96xf32>
    %102 = vector.extract_strided_slice %100 {offsets = [0, 0], sizes = [2, 64], strides = [1, 1]} : vector<2x96xf32> to vector<2x64xf32>
    %103 = vector.extract_strided_slice %101 {offsets = [0, 0], sizes = [2, 64], strides = [1, 1]} : vector<2x96xf32> to vector<2x64xf32>
    %104 = arith.addf %102, %103 : vector<2x64xf32>
    %105 = arith.negf %104 : vector<2x64xf32>
    %106 = math.exp %105 : vector<2x64xf32>
    %cst_34 = arith.constant 1.000000e+00 : f32
    %107 = vector.broadcast %cst_34 : f32 to vector<2x64xf32>
    %108 = arith.addf %107, %106 : vector<2x64xf32>
    %109 = arith.divf %107, %108 : vector<2x64xf32>
    %110 = vector.extract_strided_slice %109 {offsets = [0, 0], sizes = [2, 32], strides = [1, 1]} : vector<2x64xf32> to vector<2x32xf32>
    %111 = vector.extract_strided_slice %109 {offsets = [0, 32], sizes = [2, 32], strides = [1, 1]} : vector<2x64xf32> to vector<2x32xf32>
    %112 = vector.extract_strided_slice %100 {offsets = [0, 64], sizes = [2, 32], strides = [1, 1]} : vector<2x96xf32> to vector<2x32xf32>
    %113 = vector.extract_strided_slice %101 {offsets = [0, 64], sizes = [2, 32], strides = [1, 1]} : vector<2x96xf32> to vector<2x32xf32>
    %114 = arith.addf %113, %26 : vector<2x32xf32>
    %115 = arith.mulf %110, %114 : vector<2x32xf32>
    %116 = arith.addf %112, %115 : vector<2x32xf32>
    %117 = math.tanh %116 : vector<2x32xf32>
    %cst_35 = arith.constant 1.000000e+00 : f32
    %118 = vector.broadcast %cst_35 : f32 to vector<2x32xf32>
    %119 = arith.subf %118, %111 : vector<2x32xf32>
    %120 = arith.mulf %119, %117 : vector<2x32xf32>
    %121 = arith.mulf %111, %98 : vector<2x32xf32>
    %122 = arith.addf %120, %121 : vector<2x32xf32>
    %c6 = arith.constant 6 : index
    %c0_36 = arith.constant 0 : index
    %123 = vector.load %arg34[%c6, %c0_36] : memref<16x32xf32, #tpu.memory_space<vmem>>, vector<2x32xf32>
    tpu.vector_store %arg34[%c6, %c0_36], %122 {strides = array<i32>} : memref<16x32xf32, #tpu.memory_space<vmem>>, vector<2x32xf32>,
    %124 = vector.extract_strided_slice %21 {offsets = [8, 0], sizes = [2, 96], strides = [1, 1]} : vector<16x96xf32> to vector<2x96xf32>
    %cst_37 = arith.constant dense<0.000000e+00> : vector<2x96xf32>
    %125 = tpu.matmul %122, %23, %cst_37 {dimension_numbers = #tpu.dot_dimension_numbers<[1], [0], [0], [1], [0, 0, 1, 1], [], []>} : vector<2x32xf32>, vector<32x96xf32>, vector<2x96xf32> -> vector<2x96xf32>
    %126 = vector.extract_strided_slice %124 {offsets = [0, 0], sizes = [2, 64], strides = [1, 1]} : vector<2x96xf32> to vector<2x64xf32>
    %127 = vector.extract_strided_slice %125 {offsets = [0, 0], sizes = [2, 64], strides = [1, 1]} : vector<2x96xf32> to vector<2x64xf32>
    %128 = arith.addf %126, %127 : vector<2x64xf32>
    %129 = arith.negf %128 : vector<2x64xf32>
    %130 = math.exp %129 : vector<2x64xf32>
    %cst_38 = arith.constant 1.000000e+00 : f32
    %131 = vector.broadcast %cst_38 : f32 to vector<2x64xf32>
    %132 = arith.addf %131, %130 : vector<2x64xf32>
    %133 = arith.divf %131, %132 : vector<2x64xf32>
    %134 = vector.extract_strided_slice %133 {offsets = [0, 0], sizes = [2, 32], strides = [1, 1]} : vector<2x64xf32> to vector<2x32xf32>
    %135 = vector.extract_strided_slice %133 {offsets = [0, 32], sizes = [2, 32], strides = [1, 1]} : vector<2x64xf32> to vector<2x32xf32>
    %136 = vector.extract_strided_slice %124 {offsets = [0, 64], sizes = [2, 32], strides = [1, 1]} : vector<2x96xf32> to vector<2x32xf32>
    %137 = vector.extract_strided_slice %125 {offsets = [0, 64], sizes = [2, 32], strides = [1, 1]} : vector<2x96xf32> to vector<2x32xf32>
    %138 = arith.addf %137, %26 : vector<2x32xf32>
    %139 = arith.mulf %134, %138 : vector<2x32xf32>
    %140 = arith.addf %136, %139 : vector<2x32xf32>
    %141 = math.tanh %140 : vector<2x32xf32>
    %cst_39 = arith.constant 1.000000e+00 : f32
    %142 = vector.broadcast %cst_39 : f32 to vector<2x32xf32>
    %143 = arith.subf %142, %135 : vector<2x32xf32>
    %144 = arith.mulf %143, %141 : vector<2x32xf32>
    %145 = arith.mulf %135, %122 : vector<2x32xf32>
    %146 = arith.addf %144, %145 : vector<2x32xf32>
    %c8 = arith.constant 8 : index
    %c0_40 = arith.constant 0 : index
    %147 = vector.load %arg34[%c8, %c0_40] : memref<16x32xf32, #tpu.memory_space<vmem>>, vector<2x32xf32>
    tpu.vector_store %arg34[%c8, %c0_40], %146 {strides = array<i32>} : memref<16x32xf32, #tpu.memory_space<vmem>>, vector<2x32xf32>,
    %148 = vector.extract_strided_slice %21 {offsets = [10, 0], sizes = [2, 96], strides = [1, 1]} : vector<16x96xf32> to vector<2x96xf32>
    %cst_41 = arith.constant dense<0.000000e+00> : vector<2x96xf32>
    %149 = tpu.matmul %146, %23, %cst_41 {dimension_numbers = #tpu.dot_dimension_numbers<[1], [0], [0], [1], [0, 0, 1, 1], [], []>} : vector<2x32xf32>, vector<32x96xf32>, vector<2x96xf32> -> vector<2x96xf32>
    %150 = vector.extract_strided_slice %148 {offsets = [0, 0], sizes = [2, 64], strides = [1, 1]} : vector<2x96xf32> to vector<2x64xf32>
    %151 = vector.extract_strided_slice %149 {offsets = [0, 0], sizes = [2, 64], strides = [1, 1]} : vector<2x96xf32> to vector<2x64xf32>
    %152 = arith.addf %150, %151 : vector<2x64xf32>
    %153 = arith.negf %152 : vector<2x64xf32>
    %154 = math.exp %153 : vector<2x64xf32>
    %cst_42 = arith.constant 1.000000e+00 : f32
    %155 = vector.broadcast %cst_42 : f32 to vector<2x64xf32>
    %156 = arith.addf %155, %154 : vector<2x64xf32>
    %157 = arith.divf %155, %156 : vector<2x64xf32>
    %158 = vector.extract_strided_slice %157 {offsets = [0, 0], sizes = [2, 32], strides = [1, 1]} : vector<2x64xf32> to vector<2x32xf32>
    %159 = vector.extract_strided_slice %157 {offsets = [0, 32], sizes = [2, 32], strides = [1, 1]} : vector<2x64xf32> to vector<2x32xf32>
    %160 = vector.extract_strided_slice %148 {offsets = [0, 64], sizes = [2, 32], strides = [1, 1]} : vector<2x96xf32> to vector<2x32xf32>
    %161 = vector.extract_strided_slice %149 {offsets = [0, 64], sizes = [2, 32], strides = [1, 1]} : vector<2x96xf32> to vector<2x32xf32>
    %162 = arith.addf %161, %26 : vector<2x32xf32>
    %163 = arith.mulf %158, %162 : vector<2x32xf32>
    %164 = arith.addf %160, %163 : vector<2x32xf32>
    %165 = math.tanh %164 : vector<2x32xf32>
    %cst_43 = arith.constant 1.000000e+00 : f32
    %166 = vector.broadcast %cst_43 : f32 to vector<2x32xf32>
    %167 = arith.subf %166, %159 : vector<2x32xf32>
    %168 = arith.mulf %167, %165 : vector<2x32xf32>
    %169 = arith.mulf %159, %146 : vector<2x32xf32>
    %170 = arith.addf %168, %169 : vector<2x32xf32>
    %c10 = arith.constant 10 : index
    %c0_44 = arith.constant 0 : index
    %171 = vector.load %arg34[%c10, %c0_44] : memref<16x32xf32, #tpu.memory_space<vmem>>, vector<2x32xf32>
    tpu.vector_store %arg34[%c10, %c0_44], %170 {strides = array<i32>} : memref<16x32xf32, #tpu.memory_space<vmem>>, vector<2x32xf32>,
    %172 = vector.extract_strided_slice %21 {offsets = [12, 0], sizes = [2, 96], strides = [1, 1]} : vector<16x96xf32> to vector<2x96xf32>
    %cst_45 = arith.constant dense<0.000000e+00> : vector<2x96xf32>
    %173 = tpu.matmul %170, %23, %cst_45 {dimension_numbers = #tpu.dot_dimension_numbers<[1], [0], [0], [1], [0, 0, 1, 1], [], []>} : vector<2x32xf32>, vector<32x96xf32>, vector<2x96xf32> -> vector<2x96xf32>
    %174 = vector.extract_strided_slice %172 {offsets = [0, 0], sizes = [2, 64], strides = [1, 1]} : vector<2x96xf32> to vector<2x64xf32>
    %175 = vector.extract_strided_slice %173 {offsets = [0, 0], sizes = [2, 64], strides = [1, 1]} : vector<2x96xf32> to vector<2x64xf32>
    %176 = arith.addf %174, %175 : vector<2x64xf32>
    %177 = arith.negf %176 : vector<2x64xf32>
    %178 = math.exp %177 : vector<2x64xf32>
    %cst_46 = arith.constant 1.000000e+00 : f32
    %179 = vector.broadcast %cst_46 : f32 to vector<2x64xf32>
    %180 = arith.addf %179, %178 : vector<2x64xf32>
    %181 = arith.divf %179, %180 : vector<2x64xf32>
    %182 = vector.extract_strided_slice %181 {offsets = [0, 0], sizes = [2, 32], strides = [1, 1]} : vector<2x64xf32> to vector<2x32xf32>
    %183 = vector.extract_strided_slice %181 {offsets = [0, 32], sizes = [2, 32], strides = [1, 1]} : vector<2x64xf32> to vector<2x32xf32>
    %184 = vector.extract_strided_slice %172 {offsets = [0, 64], sizes = [2, 32], strides = [1, 1]} : vector<2x96xf32> to vector<2x32xf32>
    %185 = vector.extract_strided_slice %173 {offsets = [0, 64], sizes = [2, 32], strides = [1, 1]} : vector<2x96xf32> to vector<2x32xf32>
    %186 = arith.addf %185, %26 : vector<2x32xf32>
    %187 = arith.mulf %182, %186 : vector<2x32xf32>
    %188 = arith.addf %184, %187 : vector<2x32xf32>
    %189 = math.tanh %188 : vector<2x32xf32>
    %cst_47 = arith.constant 1.000000e+00 : f32
    %190 = vector.broadcast %cst_47 : f32 to vector<2x32xf32>
    %191 = arith.subf %190, %183 : vector<2x32xf32>
    %192 = arith.mulf %191, %189 : vector<2x32xf32>
    %193 = arith.mulf %183, %170 : vector<2x32xf32>
    %194 = arith.addf %192, %193 : vector<2x32xf32>
    %c12 = arith.constant 12 : index
    %c0_48 = arith.constant 0 : index
    %195 = vector.load %arg34[%c12, %c0_48] : memref<16x32xf32, #tpu.memory_space<vmem>>, vector<2x32xf32>
    tpu.vector_store %arg34[%c12, %c0_48], %194 {strides = array<i32>} : memref<16x32xf32, #tpu.memory_space<vmem>>, vector<2x32xf32>,
    %196 = vector.extract_strided_slice %21 {offsets = [14, 0], sizes = [2, 96], strides = [1, 1]} : vector<16x96xf32> to vector<2x96xf32>
    %cst_49 = arith.constant dense<0.000000e+00> : vector<2x96xf32>
    %197 = tpu.matmul %194, %23, %cst_49 {dimension_numbers = #tpu.dot_dimension_numbers<[1], [0], [0], [1], [0, 0, 1, 1], [], []>} : vector<2x32xf32>, vector<32x96xf32>, vector<2x96xf32> -> vector<2x96xf32>
    %198 = vector.extract_strided_slice %196 {offsets = [0, 0], sizes = [2, 64], strides = [1, 1]} : vector<2x96xf32> to vector<2x64xf32>
    %199 = vector.extract_strided_slice %197 {offsets = [0, 0], sizes = [2, 64], strides = [1, 1]} : vector<2x96xf32> to vector<2x64xf32>
    %200 = arith.addf %198, %199 : vector<2x64xf32>
    %201 = arith.negf %200 : vector<2x64xf32>
    %202 = math.exp %201 : vector<2x64xf32>
    %cst_50 = arith.constant 1.000000e+00 : f32
    %203 = vector.broadcast %cst_50 : f32 to vector<2x64xf32>
    %204 = arith.addf %203, %202 : vector<2x64xf32>
    %205 = arith.divf %203, %204 : vector<2x64xf32>
    %206 = vector.extract_strided_slice %205 {offsets = [0, 0], sizes = [2, 32], strides = [1, 1]} : vector<2x64xf32> to vector<2x32xf32>
    %207 = vector.extract_strided_slice %205 {offsets = [0, 32], sizes = [2, 32], strides = [1, 1]} : vector<2x64xf32> to vector<2x32xf32>
    %208 = vector.extract_strided_slice %196 {offsets = [0, 64], sizes = [2, 32], strides = [1, 1]} : vector<2x96xf32> to vector<2x32xf32>
    %209 = vector.extract_strided_slice %197 {offsets = [0, 64], sizes = [2, 32], strides = [1, 1]} : vector<2x96xf32> to vector<2x32xf32>
    %210 = arith.addf %209, %26 : vector<2x32xf32>
    %211 = arith.mulf %206, %210 : vector<2x32xf32>
    %212 = arith.addf %208, %211 : vector<2x32xf32>
    %213 = math.tanh %212 : vector<2x32xf32>
    %cst_51 = arith.constant 1.000000e+00 : f32
    %214 = vector.broadcast %cst_51 : f32 to vector<2x32xf32>
    %215 = arith.subf %214, %207 : vector<2x32xf32>
    %216 = arith.mulf %215, %213 : vector<2x32xf32>
    %217 = arith.mulf %207, %194 : vector<2x32xf32>
    %218 = arith.addf %216, %217 : vector<2x32xf32>
    %c14 = arith.constant 14 : index
    %c0_52 = arith.constant 0 : index
    %219 = vector.load %arg34[%c14, %c0_52] : memref<16x32xf32, #tpu.memory_space<vmem>>, vector<2x32xf32>
    tpu.vector_store %arg34[%c14, %c0_52], %218 {strides = array<i32>} : memref<16x32xf32, #tpu.memory_space<vmem>>, vector<2x32xf32>,
    %c1 = arith.constant 1 : index
    %c0_53 = arith.constant 0 : index
    %c0_54 = arith.constant 0 : index
    %220 = vector.load %arg8[%c1, %c0_53, %c0_54] : memref<2x32x96xf32, #tpu.memory_space<vmem>>, vector<1x32x96xf32>
    %221 = vector.shape_cast %220 : vector<1x32x96xf32> to vector<32x96xf32>
    %cst_55 = arith.constant dense<0.000000e+00> : vector<16x96xf32>
    %222 = tpu.matmul %7, %221, %cst_55 {dimension_numbers = #tpu.dot_dimension_numbers<[1], [0], [0], [1], [0, 0, 1, 1], [], []>} : vector<16x32xf32>, vector<32x96xf32>, vector<16x96xf32> -> vector<16x96xf32>
    %c1_56 = arith.constant 1 : index
    %c0_57 = arith.constant 0 : index
    %223 = vector.load %arg12[%c1_56, %c0_57] : memref<6x96xf32, #tpu.memory_space<vmem>>, vector<1x96xf32>
    %224 = vector.broadcast %223 : vector<1x96xf32> to vector<16x96xf32>
    %225 = arith.addf %222, %224 : vector<16x96xf32>
    %c1_58 = arith.constant 1 : index
    %c0_59 = arith.constant 0 : index
    %c0_60 = arith.constant 0 : index
    %226 = vector.load %arg11[%c1_58, %c0_59, %c0_60] : memref<6x32x96xf32, #tpu.memory_space<vmem>>, vector<1x32x96xf32>
    %227 = vector.shape_cast %226 : vector<1x32x96xf32> to vector<32x96xf32>
    %c1_61 = arith.constant 1 : index
    %c0_62 = arith.constant 0 : index
    %228 = vector.load %arg13[%c1_61, %c0_62] : memref<6x32xf32, #tpu.memory_space<vmem>>, vector<1x32xf32>
    %229 = vector.shape_cast %228 : vector<1x32xf32> to vector<1x32xf32>
    %230 = vector.broadcast %229 : vector<1x32xf32> to vector<2x32xf32>
    %cst_63 = arith.constant 0.000000e+00 : f32
    %231 = vector.broadcast %cst_63 : f32 to vector<2x32xf32>
    %232 = vector.extract_strided_slice %225 {offsets = [14, 0], sizes = [2, 96], strides = [1, 1]} : vector<16x96xf32> to vector<2x96xf32>
    %cst_64 = arith.constant dense<0.000000e+00> : vector<2x96xf32>
    %233 = tpu.matmul %231, %227, %cst_64 {dimension_numbers = #tpu.dot_dimension_numbers<[1], [0], [0], [1], [0, 0, 1, 1], [], []>} : vector<2x32xf32>, vector<32x96xf32>, vector<2x96xf32> -> vector<2x96xf32>
    %234 = vector.extract_strided_slice %232 {offsets = [0, 0], sizes = [2, 64], strides = [1, 1]} : vector<2x96xf32> to vector<2x64xf32>
    %235 = vector.extract_strided_slice %233 {offsets = [0, 0], sizes = [2, 64], strides = [1, 1]} : vector<2x96xf32> to vector<2x64xf32>
    %236 = arith.addf %234, %235 : vector<2x64xf32>
    %237 = arith.negf %236 : vector<2x64xf32>
    %238 = math.exp %237 : vector<2x64xf32>
    %cst_65 = arith.constant 1.000000e+00 : f32
    %239 = vector.broadcast %cst_65 : f32 to vector<2x64xf32>
    %240 = arith.addf %239, %238 : vector<2x64xf32>
    %241 = arith.divf %239, %240 : vector<2x64xf32>
    %242 = vector.extract_strided_slice %241 {offsets = [0, 0], sizes = [2, 32], strides = [1, 1]} : vector<2x64xf32> to vector<2x32xf32>
    %243 = vector.extract_strided_slice %241 {offsets = [0, 32], sizes = [2, 32], strides = [1, 1]} : vector<2x64xf32> to vector<2x32xf32>
    %244 = vector.extract_strided_slice %232 {offsets = [0, 64], sizes = [2, 32], strides = [1, 1]} : vector<2x96xf32> to vector<2x32xf32>
    %245 = vector.extract_strided_slice %233 {offsets = [0, 64], sizes = [2, 32], strides = [1, 1]} : vector<2x96xf32> to vector<2x32xf32>
    %246 = arith.addf %245, %230 : vector<2x32xf32>
    %247 = arith.mulf %242, %246 : vector<2x32xf32>
    %248 = arith.addf %244, %247 : vector<2x32xf32>
    %249 = math.tanh %248 : vector<2x32xf32>
    %cst_66 = arith.constant 1.000000e+00 : f32
    %250 = vector.broadcast %cst_66 : f32 to vector<2x32xf32>
    %251 = arith.subf %250, %243 : vector<2x32xf32>
    %252 = arith.mulf %251, %249 : vector<2x32xf32>
    %253 = arith.mulf %243, %231 : vector<2x32xf32>
    %254 = arith.addf %252, %253 : vector<2x32xf32>
    %c14_67 = arith.constant 14 : index
    %c0_68 = arith.constant 0 : index
    %255 = vector.load %arg35[%c14_67, %c0_68] : memref<16x32xf32, #tpu.memory_space<vmem>>, vector<2x32xf32>
    tpu.vector_store %arg35[%c14_67, %c0_68], %254 {strides = array<i32>} : memref<16x32xf32, #tpu.memory_space<vmem>>, vector<2x32xf32>,
    %256 = vector.extract_strided_slice %225 {offsets = [12, 0], sizes = [2, 96], strides = [1, 1]} : vector<16x96xf32> to vector<2x96xf32>
    %cst_69 = arith.constant dense<0.000000e+00> : vector<2x96xf32>
    %257 = tpu.matmul %254, %227, %cst_69 {dimension_numbers = #tpu.dot_dimension_numbers<[1], [0], [0], [1], [0, 0, 1, 1], [], []>} : vector<2x32xf32>, vector<32x96xf32>, vector<2x96xf32> -> vector<2x96xf32>
    %258 = vector.extract_strided_slice %256 {offsets = [0, 0], sizes = [2, 64], strides = [1, 1]} : vector<2x96xf32> to vector<2x64xf32>
    %259 = vector.extract_strided_slice %257 {offsets = [0, 0], sizes = [2, 64], strides = [1, 1]} : vector<2x96xf32> to vector<2x64xf32>
    %260 = arith.addf %258, %259 : vector<2x64xf32>
    %261 = arith.negf %260 : vector<2x64xf32>
    %262 = math.exp %261 : vector<2x64xf32>
    %cst_70 = arith.constant 1.000000e+00 : f32
    %263 = vector.broadcast %cst_70 : f32 to vector<2x64xf32>
    %264 = arith.addf %263, %262 : vector<2x64xf32>
    %265 = arith.divf %263, %264 : vector<2x64xf32>
    %266 = vector.extract_strided_slice %265 {offsets = [0, 0], sizes = [2, 32], strides = [1, 1]} : vector<2x64xf32> to vector<2x32xf32>
    %267 = vector.extract_strided_slice %265 {offsets = [0, 32], sizes = [2, 32], strides = [1, 1]} : vector<2x64xf32> to vector<2x32xf32>
    %268 = vector.extract_strided_slice %256 {offsets = [0, 64], sizes = [2, 32], strides = [1, 1]} : vector<2x96xf32> to vector<2x32xf32>
    %269 = vector.extract_strided_slice %257 {offsets = [0, 64], sizes = [2, 32], strides = [1, 1]} : vector<2x96xf32> to vector<2x32xf32>
    %270 = arith.addf %269, %230 : vector<2x32xf32>
    %271 = arith.mulf %266, %270 : vector<2x32xf32>
    %272 = arith.addf %268, %271 : vector<2x32xf32>
    %273 = math.tanh %272 : vector<2x32xf32>
    %cst_71 = arith.constant 1.000000e+00 : f32
    %274 = vector.broadcast %cst_71 : f32 to vector<2x32xf32>
    %275 = arith.subf %274, %267 : vector<2x32xf32>
    %276 = arith.mulf %275, %273 : vector<2x32xf32>
    %277 = arith.mulf %267, %254 : vector<2x32xf32>
    %278 = arith.addf %276, %277 : vector<2x32xf32>
    %c12_72 = arith.constant 12 : index
    %c0_73 = arith.constant 0 : index
    %279 = vector.load %arg35[%c12_72, %c0_73] : memref<16x32xf32, #tpu.memory_space<vmem>>, vector<2x32xf32>
    tpu.vector_store %arg35[%c12_72, %c0_73], %278 {strides = array<i32>} : memref<16x32xf32, #tpu.memory_space<vmem>>, vector<2x32xf32>,
    %280 = vector.extract_strided_slice %225 {offsets = [10, 0], sizes = [2, 96], strides = [1, 1]} : vector<16x96xf32> to vector<2x96xf32>
    %cst_74 = arith.constant dense<0.000000e+00> : vector<2x96xf32>
    %281 = tpu.matmul %278, %227, %cst_74 {dimension_numbers = #tpu.dot_dimension_numbers<[1], [0], [0], [1], [0, 0, 1, 1], [], []>} : vector<2x32xf32>, vector<32x96xf32>, vector<2x96xf32> -> vector<2x96xf32>
    %282 = vector.extract_strided_slice %280 {offsets = [0, 0], sizes = [2, 64], strides = [1, 1]} : vector<2x96xf32> to vector<2x64xf32>
    %283 = vector.extract_strided_slice %281 {offsets = [0, 0], sizes = [2, 64], strides = [1, 1]} : vector<2x96xf32> to vector<2x64xf32>
    %284 = arith.addf %282, %283 : vector<2x64xf32>
    %285 = arith.negf %284 : vector<2x64xf32>
    %286 = math.exp %285 : vector<2x64xf32>
    %cst_75 = arith.constant 1.000000e+00 : f32
    %287 = vector.broadcast %cst_75 : f32 to vector<2x64xf32>
    %288 = arith.addf %287, %286 : vector<2x64xf32>
    %289 = arith.divf %287, %288 : vector<2x64xf32>
    %290 = vector.extract_strided_slice %289 {offsets = [0, 0], sizes = [2, 32], strides = [1, 1]} : vector<2x64xf32> to vector<2x32xf32>
    %291 = vector.extract_strided_slice %289 {offsets = [0, 32], sizes = [2, 32], strides = [1, 1]} : vector<2x64xf32> to vector<2x32xf32>
    %292 = vector.extract_strided_slice %280 {offsets = [0, 64], sizes = [2, 32], strides = [1, 1]} : vector<2x96xf32> to vector<2x32xf32>
    %293 = vector.extract_strided_slice %281 {offsets = [0, 64], sizes = [2, 32], strides = [1, 1]} : vector<2x96xf32> to vector<2x32xf32>
    %294 = arith.addf %293, %230 : vector<2x32xf32>
    %295 = arith.mulf %290, %294 : vector<2x32xf32>
    %296 = arith.addf %292, %295 : vector<2x32xf32>
    %297 = math.tanh %296 : vector<2x32xf32>
    %cst_76 = arith.constant 1.000000e+00 : f32
    %298 = vector.broadcast %cst_76 : f32 to vector<2x32xf32>
    %299 = arith.subf %298, %291 : vector<2x32xf32>
    %300 = arith.mulf %299, %297 : vector<2x32xf32>
    %301 = arith.mulf %291, %278 : vector<2x32xf32>
    %302 = arith.addf %300, %301 : vector<2x32xf32>
    %c10_77 = arith.constant 10 : index
    %c0_78 = arith.constant 0 : index
    %303 = vector.load %arg35[%c10_77, %c0_78] : memref<16x32xf32, #tpu.memory_space<vmem>>, vector<2x32xf32>
    tpu.vector_store %arg35[%c10_77, %c0_78], %302 {strides = array<i32>} : memref<16x32xf32, #tpu.memory_space<vmem>>, vector<2x32xf32>,
    %304 = vector.extract_strided_slice %225 {offsets = [8, 0], sizes = [2, 96], strides = [1, 1]} : vector<16x96xf32> to vector<2x96xf32>
    %cst_79 = arith.constant dense<0.000000e+00> : vector<2x96xf32>
    %305 = tpu.matmul %302, %227, %cst_79 {dimension_numbers = #tpu.dot_dimension_numbers<[1], [0], [0], [1], [0, 0, 1, 1], [], []>} : vector<2x32xf32>, vector<32x96xf32>, vector<2x96xf32> -> vector<2x96xf32>
    %306 = vector.extract_strided_slice %304 {offsets = [0, 0], sizes = [2, 64], strides = [1, 1]} : vector<2x96xf32> to vector<2x64xf32>
    %307 = vector.extract_strided_slice %305 {offsets = [0, 0], sizes = [2, 64], strides = [1, 1]} : vector<2x96xf32> to vector<2x64xf32>
    %308 = arith.addf %306, %307 : vector<2x64xf32>
    %309 = arith.negf %308 : vector<2x64xf32>
    %310 = math.exp %309 : vector<2x64xf32>
    %cst_80 = arith.constant 1.000000e+00 : f32
    %311 = vector.broadcast %cst_80 : f32 to vector<2x64xf32>
    %312 = arith.addf %311, %310 : vector<2x64xf32>
    %313 = arith.divf %311, %312 : vector<2x64xf32>
    %314 = vector.extract_strided_slice %313 {offsets = [0, 0], sizes = [2, 32], strides = [1, 1]} : vector<2x64xf32> to vector<2x32xf32>
    %315 = vector.extract_strided_slice %313 {offsets = [0, 32], sizes = [2, 32], strides = [1, 1]} : vector<2x64xf32> to vector<2x32xf32>
    %316 = vector.extract_strided_slice %304 {offsets = [0, 64], sizes = [2, 32], strides = [1, 1]} : vector<2x96xf32> to vector<2x32xf32>
    %317 = vector.extract_strided_slice %305 {offsets = [0, 64], sizes = [2, 32], strides = [1, 1]} : vector<2x96xf32> to vector<2x32xf32>
    %318 = arith.addf %317, %230 : vector<2x32xf32>
    %319 = arith.mulf %314, %318 : vector<2x32xf32>
    %320 = arith.addf %316, %319 : vector<2x32xf32>
    %321 = math.tanh %320 : vector<2x32xf32>
    %cst_81 = arith.constant 1.000000e+00 : f32
    %322 = vector.broadcast %cst_81 : f32 to vector<2x32xf32>
    %323 = arith.subf %322, %315 : vector<2x32xf32>
    %324 = arith.mulf %323, %321 : vector<2x32xf32>
    %325 = arith.mulf %315, %302 : vector<2x32xf32>
    %326 = arith.addf %324, %325 : vector<2x32xf32>
    %c8_82 = arith.constant 8 : index
    %c0_83 = arith.constant 0 : index
    %327 = vector.load %arg35[%c8_82, %c0_83] : memref<16x32xf32, #tpu.memory_space<vmem>>, vector<2x32xf32>
    tpu.vector_store %arg35[%c8_82, %c0_83], %326 {strides = array<i32>} : memref<16x32xf32, #tpu.memory_space<vmem>>, vector<2x32xf32>,
    %328 = vector.extract_strided_slice %225 {offsets = [6, 0], sizes = [2, 96], strides = [1, 1]} : vector<16x96xf32> to vector<2x96xf32>
    %cst_84 = arith.constant dense<0.000000e+00> : vector<2x96xf32>
    %329 = tpu.matmul %326, %227, %cst_84 {dimension_numbers = #tpu.dot_dimension_numbers<[1], [0], [0], [1], [0, 0, 1, 1], [], []>} : vector<2x32xf32>, vector<32x96xf32>, vector<2x96xf32> -> vector<2x96xf32>
    %330 = vector.extract_strided_slice %328 {offsets = [0, 0], sizes = [2, 64], strides = [1, 1]} : vector<2x96xf32> to vector<2x64xf32>
    %331 = vector.extract_strided_slice %329 {offsets = [0, 0], sizes = [2, 64], strides = [1, 1]} : vector<2x96xf32> to vector<2x64xf32>
    %332 = arith.addf %330, %331 : vector<2x64xf32>
    %333 = arith.negf %332 : vector<2x64xf32>
    %334 = math.exp %333 : vector<2x64xf32>
    %cst_85 = arith.constant 1.000000e+00 : f32
    %335 = vector.broadcast %cst_85 : f32 to vector<2x64xf32>
    %336 = arith.addf %335, %334 : vector<2x64xf32>
    %337 = arith.divf %335, %336 : vector<2x64xf32>
    %338 = vector.extract_strided_slice %337 {offsets = [0, 0], sizes = [2, 32], strides = [1, 1]} : vector<2x64xf32> to vector<2x32xf32>
    %339 = vector.extract_strided_slice %337 {offsets = [0, 32], sizes = [2, 32], strides = [1, 1]} : vector<2x64xf32> to vector<2x32xf32>
    %340 = vector.extract_strided_slice %328 {offsets = [0, 64], sizes = [2, 32], strides = [1, 1]} : vector<2x96xf32> to vector<2x32xf32>
    %341 = vector.extract_strided_slice %329 {offsets = [0, 64], sizes = [2, 32], strides = [1, 1]} : vector<2x96xf32> to vector<2x32xf32>
    %342 = arith.addf %341, %230 : vector<2x32xf32>
    %343 = arith.mulf %338, %342 : vector<2x32xf32>
    %344 = arith.addf %340, %343 : vector<2x32xf32>
    %345 = math.tanh %344 : vector<2x32xf32>
    %cst_86 = arith.constant 1.000000e+00 : f32
    %346 = vector.broadcast %cst_86 : f32 to vector<2x32xf32>
    %347 = arith.subf %346, %339 : vector<2x32xf32>
    %348 = arith.mulf %347, %345 : vector<2x32xf32>
    %349 = arith.mulf %339, %326 : vector<2x32xf32>
    %350 = arith.addf %348, %349 : vector<2x32xf32>
    %c6_87 = arith.constant 6 : index
    %c0_88 = arith.constant 0 : index
    %351 = vector.load %arg35[%c6_87, %c0_88] : memref<16x32xf32, #tpu.memory_space<vmem>>, vector<2x32xf32>
    tpu.vector_store %arg35[%c6_87, %c0_88], %350 {strides = array<i32>} : memref<16x32xf32, #tpu.memory_space<vmem>>, vector<2x32xf32>,
    %352 = vector.extract_strided_slice %225 {offsets = [4, 0], sizes = [2, 96], strides = [1, 1]} : vector<16x96xf32> to vector<2x96xf32>
    %cst_89 = arith.constant dense<0.000000e+00> : vector<2x96xf32>
    %353 = tpu.matmul %350, %227, %cst_89 {dimension_numbers = #tpu.dot_dimension_numbers<[1], [0], [0], [1], [0, 0, 1, 1], [], []>} : vector<2x32xf32>, vector<32x96xf32>, vector<2x96xf32> -> vector<2x96xf32>
    %354 = vector.extract_strided_slice %352 {offsets = [0, 0], sizes = [2, 64], strides = [1, 1]} : vector<2x96xf32> to vector<2x64xf32>
    %355 = vector.extract_strided_slice %353 {offsets = [0, 0], sizes = [2, 64], strides = [1, 1]} : vector<2x96xf32> to vector<2x64xf32>
    %356 = arith.addf %354, %355 : vector<2x64xf32>
    %357 = arith.negf %356 : vector<2x64xf32>
    %358 = math.exp %357 : vector<2x64xf32>
    %cst_90 = arith.constant 1.000000e+00 : f32
    %359 = vector.broadcast %cst_90 : f32 to vector<2x64xf32>
    %360 = arith.addf %359, %358 : vector<2x64xf32>
    %361 = arith.divf %359, %360 : vector<2x64xf32>
    %362 = vector.extract_strided_slice %361 {offsets = [0, 0], sizes = [2, 32], strides = [1, 1]} : vector<2x64xf32> to vector<2x32xf32>
    %363 = vector.extract_strided_slice %361 {offsets = [0, 32], sizes = [2, 32], strides = [1, 1]} : vector<2x64xf32> to vector<2x32xf32>
    %364 = vector.extract_strided_slice %352 {offsets = [0, 64], sizes = [2, 32], strides = [1, 1]} : vector<2x96xf32> to vector<2x32xf32>
    %365 = vector.extract_strided_slice %353 {offsets = [0, 64], sizes = [2, 32], strides = [1, 1]} : vector<2x96xf32> to vector<2x32xf32>
    %366 = arith.addf %365, %230 : vector<2x32xf32>
    %367 = arith.mulf %362, %366 : vector<2x32xf32>
    %368 = arith.addf %364, %367 : vector<2x32xf32>
    %369 = math.tanh %368 : vector<2x32xf32>
    %cst_91 = arith.constant 1.000000e+00 : f32
    %370 = vector.broadcast %cst_91 : f32 to vector<2x32xf32>
    %371 = arith.subf %370, %363 : vector<2x32xf32>
    %372 = arith.mulf %371, %369 : vector<2x32xf32>
    %373 = arith.mulf %363, %350 : vector<2x32xf32>
    %374 = arith.addf %372, %373 : vector<2x32xf32>
    %c4_92 = arith.constant 4 : index
    %c0_93 = arith.constant 0 : index
    %375 = vector.load %arg35[%c4_92, %c0_93] : memref<16x32xf32, #tpu.memory_space<vmem>>, vector<2x32xf32>
    tpu.vector_store %arg35[%c4_92, %c0_93], %374 {strides = array<i32>} : memref<16x32xf32, #tpu.memory_space<vmem>>, vector<2x32xf32>,
    %376 = vector.extract_strided_slice %225 {offsets = [2, 0], sizes = [2, 96], strides = [1, 1]} : vector<16x96xf32> to vector<2x96xf32>
    %cst_94 = arith.constant dense<0.000000e+00> : vector<2x96xf32>
    %377 = tpu.matmul %374, %227, %cst_94 {dimension_numbers = #tpu.dot_dimension_numbers<[1], [0], [0], [1], [0, 0, 1, 1], [], []>} : vector<2x32xf32>, vector<32x96xf32>, vector<2x96xf32> -> vector<2x96xf32>
    %378 = vector.extract_strided_slice %376 {offsets = [0, 0], sizes = [2, 64], strides = [1, 1]} : vector<2x96xf32> to vector<2x64xf32>
    %379 = vector.extract_strided_slice %377 {offsets = [0, 0], sizes = [2, 64], strides = [1, 1]} : vector<2x96xf32> to vector<2x64xf32>
    %380 = arith.addf %378, %379 : vector<2x64xf32>
    %381 = arith.negf %380 : vector<2x64xf32>
    %382 = math.exp %381 : vector<2x64xf32>
    %cst_95 = arith.constant 1.000000e+00 : f32
    %383 = vector.broadcast %cst_95 : f32 to vector<2x64xf32>
    %384 = arith.addf %383, %382 : vector<2x64xf32>
    %385 = arith.divf %383, %384 : vector<2x64xf32>
    %386 = vector.extract_strided_slice %385 {offsets = [0, 0], sizes = [2, 32], strides = [1, 1]} : vector<2x64xf32> to vector<2x32xf32>
    %387 = vector.extract_strided_slice %385 {offsets = [0, 32], sizes = [2, 32], strides = [1, 1]} : vector<2x64xf32> to vector<2x32xf32>
    %388 = vector.extract_strided_slice %376 {offsets = [0, 64], sizes = [2, 32], strides = [1, 1]} : vector<2x96xf32> to vector<2x32xf32>
    %389 = vector.extract_strided_slice %377 {offsets = [0, 64], sizes = [2, 32], strides = [1, 1]} : vector<2x96xf32> to vector<2x32xf32>
    %390 = arith.addf %389, %230 : vector<2x32xf32>
    %391 = arith.mulf %386, %390 : vector<2x32xf32>
    %392 = arith.addf %388, %391 : vector<2x32xf32>
    %393 = math.tanh %392 : vector<2x32xf32>
    %cst_96 = arith.constant 1.000000e+00 : f32
    %394 = vector.broadcast %cst_96 : f32 to vector<2x32xf32>
    %395 = arith.subf %394, %387 : vector<2x32xf32>
    %396 = arith.mulf %395, %393 : vector<2x32xf32>
    %397 = arith.mulf %387, %374 : vector<2x32xf32>
    %398 = arith.addf %396, %397 : vector<2x32xf32>
    %c2_97 = arith.constant 2 : index
    %c0_98 = arith.constant 0 : index
    %399 = vector.load %arg35[%c2_97, %c0_98] : memref<16x32xf32, #tpu.memory_space<vmem>>, vector<2x32xf32>
    tpu.vector_store %arg35[%c2_97, %c0_98], %398 {strides = array<i32>} : memref<16x32xf32, #tpu.memory_space<vmem>>, vector<2x32xf32>,
    %400 = vector.extract_strided_slice %225 {offsets = [0, 0], sizes = [2, 96], strides = [1, 1]} : vector<16x96xf32> to vector<2x96xf32>
    %cst_99 = arith.constant dense<0.000000e+00> : vector<2x96xf32>
    %401 = tpu.matmul %398, %227, %cst_99 {dimension_numbers = #tpu.dot_dimension_numbers<[1], [0], [0], [1], [0, 0, 1, 1], [], []>} : vector<2x32xf32>, vector<32x96xf32>, vector<2x96xf32> -> vector<2x96xf32>
    %402 = vector.extract_strided_slice %400 {offsets = [0, 0], sizes = [2, 64], strides = [1, 1]} : vector<2x96xf32> to vector<2x64xf32>
    %403 = vector.extract_strided_slice %401 {offsets = [0, 0], sizes = [2, 64], strides = [1, 1]} : vector<2x96xf32> to vector<2x64xf32>
    %404 = arith.addf %402, %403 : vector<2x64xf32>
    %405 = arith.negf %404 : vector<2x64xf32>
    %406 = math.exp %405 : vector<2x64xf32>
    %cst_100 = arith.constant 1.000000e+00 : f32
    %407 = vector.broadcast %cst_100 : f32 to vector<2x64xf32>
    %408 = arith.addf %407, %406 : vector<2x64xf32>
    %409 = arith.divf %407, %408 : vector<2x64xf32>
    %410 = vector.extract_strided_slice %409 {offsets = [0, 0], sizes = [2, 32], strides = [1, 1]} : vector<2x64xf32> to vector<2x32xf32>
    %411 = vector.extract_strided_slice %409 {offsets = [0, 32], sizes = [2, 32], strides = [1, 1]} : vector<2x64xf32> to vector<2x32xf32>
    %412 = vector.extract_strided_slice %400 {offsets = [0, 64], sizes = [2, 32], strides = [1, 1]} : vector<2x96xf32> to vector<2x32xf32>
    %413 = vector.extract_strided_slice %401 {offsets = [0, 64], sizes = [2, 32], strides = [1, 1]} : vector<2x96xf32> to vector<2x32xf32>
    %414 = arith.addf %413, %230 : vector<2x32xf32>
    %415 = arith.mulf %410, %414 : vector<2x32xf32>
    %416 = arith.addf %412, %415 : vector<2x32xf32>
    %417 = math.tanh %416 : vector<2x32xf32>
    %cst_101 = arith.constant 1.000000e+00 : f32
    %418 = vector.broadcast %cst_101 : f32 to vector<2x32xf32>
    %419 = arith.subf %418, %411 : vector<2x32xf32>
    %420 = arith.mulf %419, %417 : vector<2x32xf32>
    %421 = arith.mulf %411, %398 : vector<2x32xf32>
    %422 = arith.addf %420, %421 : vector<2x32xf32>
    %c0_102 = arith.constant 0 : index
    %c0_103 = arith.constant 0 : index
    %423 = vector.load %arg35[%c0_102, %c0_103] : memref<16x32xf32, #tpu.memory_space<vmem>>, vector<2x32xf32>
    tpu.vector_store %arg35[%c0_102, %c0_103], %422 {strides = array<i32>} : memref<16x32xf32, #tpu.memory_space<vmem>>, vector<2x32xf32>,
    %c0_104 = arith.constant 0 : index
    %c0_105 = arith.constant 0 : index
    %424 = vector.load %arg34[%c0_104, %c0_105] : memref<16x32xf32, #tpu.memory_space<vmem>>, vector<16x32xf32>
    %c0_106 = arith.constant 0 : index
    %c0_107 = arith.constant 0 : index
    %425 = vector.load %arg35[%c0_106, %c0_107] : memref<16x32xf32, #tpu.memory_space<vmem>>, vector<16x32xf32>
    %c0_108 = arith.constant 0 : index
    %c0_109 = arith.constant 0 : index
    %c0_110 = arith.constant 0 : index
    %426 = vector.load %arg9[%c0_108, %c0_109, %c0_110] : memref<4x32x96xf32, #tpu.memory_space<vmem>>, vector<1x32x96xf32>
    %427 = vector.shape_cast %426 : vector<1x32x96xf32> to vector<32x96xf32>
    %cst_111 = arith.constant dense<0.000000e+00> : vector<16x96xf32>
    %428 = tpu.matmul %424, %427, %cst_111 {dimension_numbers = #tpu.dot_dimension_numbers<[1], [0], [0], [1], [0, 0, 1, 1], [], []>} : vector<16x32xf32>, vector<32x96xf32>, vector<16x96xf32> -> vector<16x96xf32>
    %c0_112 = arith.constant 0 : index
    %c0_113 = arith.constant 0 : index
    %c0_114 = arith.constant 0 : index
    %429 = vector.load %arg10[%c0_112, %c0_113, %c0_114] : memref<4x32x96xf32, #tpu.memory_space<vmem>>, vector<1x32x96xf32>
    %430 = vector.shape_cast %429 : vector<1x32x96xf32> to vector<32x96xf32>
    %cst_115 = arith.constant dense<0.000000e+00> : vector<16x96xf32>
    %431 = tpu.matmul %425, %430, %cst_115 {dimension_numbers = #tpu.dot_dimension_numbers<[1], [0], [0], [1], [0, 0, 1, 1], [], []>} : vector<16x32xf32>, vector<32x96xf32>, vector<16x96xf32> -> vector<16x96xf32>
    %432 = arith.addf %428, %431 : vector<16x96xf32>
    %c2_116 = arith.constant 2 : index
    %c0_117 = arith.constant 0 : index
    %433 = vector.load %arg12[%c2_116, %c0_117] : memref<6x96xf32, #tpu.memory_space<vmem>>, vector<1x96xf32>
    %434 = vector.broadcast %433 : vector<1x96xf32> to vector<16x96xf32>
    %435 = arith.addf %432, %434 : vector<16x96xf32>
    %c2_118 = arith.constant 2 : index
    %c0_119 = arith.constant 0 : index
    %c0_120 = arith.constant 0 : index
    %436 = vector.load %arg11[%c2_118, %c0_119, %c0_120] : memref<6x32x96xf32, #tpu.memory_space<vmem>>, vector<1x32x96xf32>
    %437 = vector.shape_cast %436 : vector<1x32x96xf32> to vector<32x96xf32>
    %c2_121 = arith.constant 2 : index
    %c0_122 = arith.constant 0 : index
    %438 = vector.load %arg13[%c2_121, %c0_122] : memref<6x32xf32, #tpu.memory_space<vmem>>, vector<1x32xf32>
    %439 = vector.shape_cast %438 : vector<1x32xf32> to vector<1x32xf32>
    %440 = vector.broadcast %439 : vector<1x32xf32> to vector<2x32xf32>
    %cst_123 = arith.constant 0.000000e+00 : f32
    %441 = vector.broadcast %cst_123 : f32 to vector<2x32xf32>
    %442 = vector.extract_strided_slice %435 {offsets = [0, 0], sizes = [2, 96], strides = [1, 1]} : vector<16x96xf32> to vector<2x96xf32>
    %cst_124 = arith.constant dense<0.000000e+00> : vector<2x96xf32>
    %443 = tpu.matmul %441, %437, %cst_124 {dimension_numbers = #tpu.dot_dimension_numbers<[1], [0], [0], [1], [0, 0, 1, 1], [], []>} : vector<2x32xf32>, vector<32x96xf32>, vector<2x96xf32> -> vector<2x96xf32>
    %444 = vector.extract_strided_slice %442 {offsets = [0, 0], sizes = [2, 64], strides = [1, 1]} : vector<2x96xf32> to vector<2x64xf32>
    %445 = vector.extract_strided_slice %443 {offsets = [0, 0], sizes = [2, 64], strides = [1, 1]} : vector<2x96xf32> to vector<2x64xf32>
    %446 = arith.addf %444, %445 : vector<2x64xf32>
    %447 = arith.negf %446 : vector<2x64xf32>
    %448 = math.exp %447 : vector<2x64xf32>
    %cst_125 = arith.constant 1.000000e+00 : f32
    %449 = vector.broadcast %cst_125 : f32 to vector<2x64xf32>
    %450 = arith.addf %449, %448 : vector<2x64xf32>
    %451 = arith.divf %449, %450 : vector<2x64xf32>
    %452 = vector.extract_strided_slice %451 {offsets = [0, 0], sizes = [2, 32], strides = [1, 1]} : vector<2x64xf32> to vector<2x32xf32>
    %453 = vector.extract_strided_slice %451 {offsets = [0, 32], sizes = [2, 32], strides = [1, 1]} : vector<2x64xf32> to vector<2x32xf32>
    %454 = vector.extract_strided_slice %442 {offsets = [0, 64], sizes = [2, 32], strides = [1, 1]} : vector<2x96xf32> to vector<2x32xf32>
    %455 = vector.extract_strided_slice %443 {offsets = [0, 64], sizes = [2, 32], strides = [1, 1]} : vector<2x96xf32> to vector<2x32xf32>
    %456 = arith.addf %455, %440 : vector<2x32xf32>
    %457 = arith.mulf %452, %456 : vector<2x32xf32>
    %458 = arith.addf %454, %457 : vector<2x32xf32>
    %459 = math.tanh %458 : vector<2x32xf32>
    %cst_126 = arith.constant 1.000000e+00 : f32
    %460 = vector.broadcast %cst_126 : f32 to vector<2x32xf32>
    %461 = arith.subf %460, %453 : vector<2x32xf32>
    %462 = arith.mulf %461, %459 : vector<2x32xf32>
    %463 = arith.mulf %453, %441 : vector<2x32xf32>
    %464 = arith.addf %462, %463 : vector<2x32xf32>
    %c0_127 = arith.constant 0 : index
    %c0_128 = arith.constant 0 : index
    %465 = vector.load %arg36[%c0_127, %c0_128] : memref<16x32xf32, #tpu.memory_space<vmem>>, vector<2x32xf32>
    tpu.vector_store %arg36[%c0_127, %c0_128], %464 {strides = array<i32>} : memref<16x32xf32, #tpu.memory_space<vmem>>, vector<2x32xf32>,
    %466 = vector.extract_strided_slice %435 {offsets = [2, 0], sizes = [2, 96], strides = [1, 1]} : vector<16x96xf32> to vector<2x96xf32>
    %cst_129 = arith.constant dense<0.000000e+00> : vector<2x96xf32>
    %467 = tpu.matmul %464, %437, %cst_129 {dimension_numbers = #tpu.dot_dimension_numbers<[1], [0], [0], [1], [0, 0, 1, 1], [], []>} : vector<2x32xf32>, vector<32x96xf32>, vector<2x96xf32> -> vector<2x96xf32>
    %468 = vector.extract_strided_slice %466 {offsets = [0, 0], sizes = [2, 64], strides = [1, 1]} : vector<2x96xf32> to vector<2x64xf32>
    %469 = vector.extract_strided_slice %467 {offsets = [0, 0], sizes = [2, 64], strides = [1, 1]} : vector<2x96xf32> to vector<2x64xf32>
    %470 = arith.addf %468, %469 : vector<2x64xf32>
    %471 = arith.negf %470 : vector<2x64xf32>
    %472 = math.exp %471 : vector<2x64xf32>
    %cst_130 = arith.constant 1.000000e+00 : f32
    %473 = vector.broadcast %cst_130 : f32 to vector<2x64xf32>
    %474 = arith.addf %473, %472 : vector<2x64xf32>
    %475 = arith.divf %473, %474 : vector<2x64xf32>
    %476 = vector.extract_strided_slice %475 {offsets = [0, 0], sizes = [2, 32], strides = [1, 1]} : vector<2x64xf32> to vector<2x32xf32>
    %477 = vector.extract_strided_slice %475 {offsets = [0, 32], sizes = [2, 32], strides = [1, 1]} : vector<2x64xf32> to vector<2x32xf32>
    %478 = vector.extract_strided_slice %466 {offsets = [0, 64], sizes = [2, 32], strides = [1, 1]} : vector<2x96xf32> to vector<2x32xf32>
    %479 = vector.extract_strided_slice %467 {offsets = [0, 64], sizes = [2, 32], strides = [1, 1]} : vector<2x96xf32> to vector<2x32xf32>
    %480 = arith.addf %479, %440 : vector<2x32xf32>
    %481 = arith.mulf %476, %480 : vector<2x32xf32>
    %482 = arith.addf %478, %481 : vector<2x32xf32>
    %483 = math.tanh %482 : vector<2x32xf32>
    %cst_131 = arith.constant 1.000000e+00 : f32
    %484 = vector.broadcast %cst_131 : f32 to vector<2x32xf32>
    %485 = arith.subf %484, %477 : vector<2x32xf32>
    %486 = arith.mulf %485, %483 : vector<2x32xf32>
    %487 = arith.mulf %477, %464 : vector<2x32xf32>
    %488 = arith.addf %486, %487 : vector<2x32xf32>
    %c2_132 = arith.constant 2 : index
    %c0_133 = arith.constant 0 : index
    %489 = vector.load %arg36[%c2_132, %c0_133] : memref<16x32xf32, #tpu.memory_space<vmem>>, vector<2x32xf32>
    tpu.vector_store %arg36[%c2_132, %c0_133], %488 {strides = array<i32>} : memref<16x32xf32, #tpu.memory_space<vmem>>, vector<2x32xf32>,
    %490 = vector.extract_strided_slice %435 {offsets = [4, 0], sizes = [2, 96], strides = [1, 1]} : vector<16x96xf32> to vector<2x96xf32>
    %cst_134 = arith.constant dense<0.000000e+00> : vector<2x96xf32>
    %491 = tpu.matmul %488, %437, %cst_134 {dimension_numbers = #tpu.dot_dimension_numbers<[1], [0], [0], [1], [0, 0, 1, 1], [], []>} : vector<2x32xf32>, vector<32x96xf32>, vector<2x96xf32> -> vector<2x96xf32>
    %492 = vector.extract_strided_slice %490 {offsets = [0, 0], sizes = [2, 64], strides = [1, 1]} : vector<2x96xf32> to vector<2x64xf32>
    %493 = vector.extract_strided_slice %491 {offsets = [0, 0], sizes = [2, 64], strides = [1, 1]} : vector<2x96xf32> to vector<2x64xf32>
    %494 = arith.addf %492, %493 : vector<2x64xf32>
    %495 = arith.negf %494 : vector<2x64xf32>
    %496 = math.exp %495 : vector<2x64xf32>
    %cst_135 = arith.constant 1.000000e+00 : f32
    %497 = vector.broadcast %cst_135 : f32 to vector<2x64xf32>
    %498 = arith.addf %497, %496 : vector<2x64xf32>
    %499 = arith.divf %497, %498 : vector<2x64xf32>
    %500 = vector.extract_strided_slice %499 {offsets = [0, 0], sizes = [2, 32], strides = [1, 1]} : vector<2x64xf32> to vector<2x32xf32>
    %501 = vector.extract_strided_slice %499 {offsets = [0, 32], sizes = [2, 32], strides = [1, 1]} : vector<2x64xf32> to vector<2x32xf32>
    %502 = vector.extract_strided_slice %490 {offsets = [0, 64], sizes = [2, 32], strides = [1, 1]} : vector<2x96xf32> to vector<2x32xf32>
    %503 = vector.extract_strided_slice %491 {offsets = [0, 64], sizes = [2, 32], strides = [1, 1]} : vector<2x96xf32> to vector<2x32xf32>
    %504 = arith.addf %503, %440 : vector<2x32xf32>
    %505 = arith.mulf %500, %504 : vector<2x32xf32>
    %506 = arith.addf %502, %505 : vector<2x32xf32>
    %507 = math.tanh %506 : vector<2x32xf32>
    %cst_136 = arith.constant 1.000000e+00 : f32
    %508 = vector.broadcast %cst_136 : f32 to vector<2x32xf32>
    %509 = arith.subf %508, %501 : vector<2x32xf32>
    %510 = arith.mulf %509, %507 : vector<2x32xf32>
    %511 = arith.mulf %501, %488 : vector<2x32xf32>
    %512 = arith.addf %510, %511 : vector<2x32xf32>
    %c4_137 = arith.constant 4 : index
    %c0_138 = arith.constant 0 : index
    %513 = vector.load %arg36[%c4_137, %c0_138] : memref<16x32xf32, #tpu.memory_space<vmem>>, vector<2x32xf32>
    tpu.vector_store %arg36[%c4_137, %c0_138], %512 {strides = array<i32>} : memref<16x32xf32, #tpu.memory_space<vmem>>, vector<2x32xf32>,
    %514 = vector.extract_strided_slice %435 {offsets = [6, 0], sizes = [2, 96], strides = [1, 1]} : vector<16x96xf32> to vector<2x96xf32>
    %cst_139 = arith.constant dense<0.000000e+00> : vector<2x96xf32>
    %515 = tpu.matmul %512, %437, %cst_139 {dimension_numbers = #tpu.dot_dimension_numbers<[1], [0], [0], [1], [0, 0, 1, 1], [], []>} : vector<2x32xf32>, vector<32x96xf32>, vector<2x96xf32> -> vector<2x96xf32>
    %516 = vector.extract_strided_slice %514 {offsets = [0, 0], sizes = [2, 64], strides = [1, 1]} : vector<2x96xf32> to vector<2x64xf32>
    %517 = vector.extract_strided_slice %515 {offsets = [0, 0], sizes = [2, 64], strides = [1, 1]} : vector<2x96xf32> to vector<2x64xf32>
    %518 = arith.addf %516, %517 : vector<2x64xf32>
    %519 = arith.negf %518 : vector<2x64xf32>
    %520 = math.exp %519 : vector<2x64xf32>
    %cst_140 = arith.constant 1.000000e+00 : f32
    %521 = vector.broadcast %cst_140 : f32 to vector<2x64xf32>
    %522 = arith.addf %521, %520 : vector<2x64xf32>
    %523 = arith.divf %521, %522 : vector<2x64xf32>
    %524 = vector.extract_strided_slice %523 {offsets = [0, 0], sizes = [2, 32], strides = [1, 1]} : vector<2x64xf32> to vector<2x32xf32>
    %525 = vector.extract_strided_slice %523 {offsets = [0, 32], sizes = [2, 32], strides = [1, 1]} : vector<2x64xf32> to vector<2x32xf32>
    %526 = vector.extract_strided_slice %514 {offsets = [0, 64], sizes = [2, 32], strides = [1, 1]} : vector<2x96xf32> to vector<2x32xf32>
    %527 = vector.extract_strided_slice %515 {offsets = [0, 64], sizes = [2, 32], strides = [1, 1]} : vector<2x96xf32> to vector<2x32xf32>
    %528 = arith.addf %527, %440 : vector<2x32xf32>
    %529 = arith.mulf %524, %528 : vector<2x32xf32>
    %530 = arith.addf %526, %529 : vector<2x32xf32>
    %531 = math.tanh %530 : vector<2x32xf32>
    %cst_141 = arith.constant 1.000000e+00 : f32
    %532 = vector.broadcast %cst_141 : f32 to vector<2x32xf32>
    %533 = arith.subf %532, %525 : vector<2x32xf32>
    %534 = arith.mulf %533, %531 : vector<2x32xf32>
    %535 = arith.mulf %525, %512 : vector<2x32xf32>
    %536 = arith.addf %534, %535 : vector<2x32xf32>
    %c6_142 = arith.constant 6 : index
    %c0_143 = arith.constant 0 : index
    %537 = vector.load %arg36[%c6_142, %c0_143] : memref<16x32xf32, #tpu.memory_space<vmem>>, vector<2x32xf32>
    tpu.vector_store %arg36[%c6_142, %c0_143], %536 {strides = array<i32>} : memref<16x32xf32, #tpu.memory_space<vmem>>, vector<2x32xf32>,
    %538 = vector.extract_strided_slice %435 {offsets = [8, 0], sizes = [2, 96], strides = [1, 1]} : vector<16x96xf32> to vector<2x96xf32>
    %cst_144 = arith.constant dense<0.000000e+00> : vector<2x96xf32>
    %539 = tpu.matmul %536, %437, %cst_144 {dimension_numbers = #tpu.dot_dimension_numbers<[1], [0], [0], [1], [0, 0, 1, 1], [], []>} : vector<2x32xf32>, vector<32x96xf32>, vector<2x96xf32> -> vector<2x96xf32>
    %540 = vector.extract_strided_slice %538 {offsets = [0, 0], sizes = [2, 64], strides = [1, 1]} : vector<2x96xf32> to vector<2x64xf32>
    %541 = vector.extract_strided_slice %539 {offsets = [0, 0], sizes = [2, 64], strides = [1, 1]} : vector<2x96xf32> to vector<2x64xf32>
    %542 = arith.addf %540, %541 : vector<2x64xf32>
    %543 = arith.negf %542 : vector<2x64xf32>
    %544 = math.exp %543 : vector<2x64xf32>
    %cst_145 = arith.constant 1.000000e+00 : f32
    %545 = vector.broadcast %cst_145 : f32 to vector<2x64xf32>
    %546 = arith.addf %545, %544 : vector<2x64xf32>
    %547 = arith.divf %545, %546 : vector<2x64xf32>
    %548 = vector.extract_strided_slice %547 {offsets = [0, 0], sizes = [2, 32], strides = [1, 1]} : vector<2x64xf32> to vector<2x32xf32>
    %549 = vector.extract_strided_slice %547 {offsets = [0, 32], sizes = [2, 32], strides = [1, 1]} : vector<2x64xf32> to vector<2x32xf32>
    %550 = vector.extract_strided_slice %538 {offsets = [0, 64], sizes = [2, 32], strides = [1, 1]} : vector<2x96xf32> to vector<2x32xf32>
    %551 = vector.extract_strided_slice %539 {offsets = [0, 64], sizes = [2, 32], strides = [1, 1]} : vector<2x96xf32> to vector<2x32xf32>
    %552 = arith.addf %551, %440 : vector<2x32xf32>
    %553 = arith.mulf %548, %552 : vector<2x32xf32>
    %554 = arith.addf %550, %553 : vector<2x32xf32>
    %555 = math.tanh %554 : vector<2x32xf32>
    %cst_146 = arith.constant 1.000000e+00 : f32
    %556 = vector.broadcast %cst_146 : f32 to vector<2x32xf32>
    %557 = arith.subf %556, %549 : vector<2x32xf32>
    %558 = arith.mulf %557, %555 : vector<2x32xf32>
    %559 = arith.mulf %549, %536 : vector<2x32xf32>
    %560 = arith.addf %558, %559 : vector<2x32xf32>
    %c8_147 = arith.constant 8 : index
    %c0_148 = arith.constant 0 : index
    %561 = vector.load %arg36[%c8_147, %c0_148] : memref<16x32xf32, #tpu.memory_space<vmem>>, vector<2x32xf32>
    tpu.vector_store %arg36[%c8_147, %c0_148], %560 {strides = array<i32>} : memref<16x32xf32, #tpu.memory_space<vmem>>, vector<2x32xf32>,
    %562 = vector.extract_strided_slice %435 {offsets = [10, 0], sizes = [2, 96], strides = [1, 1]} : vector<16x96xf32> to vector<2x96xf32>
    %cst_149 = arith.constant dense<0.000000e+00> : vector<2x96xf32>
    %563 = tpu.matmul %560, %437, %cst_149 {dimension_numbers = #tpu.dot_dimension_numbers<[1], [0], [0], [1], [0, 0, 1, 1], [], []>} : vector<2x32xf32>, vector<32x96xf32>, vector<2x96xf32> -> vector<2x96xf32>
    %564 = vector.extract_strided_slice %562 {offsets = [0, 0], sizes = [2, 64], strides = [1, 1]} : vector<2x96xf32> to vector<2x64xf32>
    %565 = vector.extract_strided_slice %563 {offsets = [0, 0], sizes = [2, 64], strides = [1, 1]} : vector<2x96xf32> to vector<2x64xf32>
    %566 = arith.addf %564, %565 : vector<2x64xf32>
    %567 = arith.negf %566 : vector<2x64xf32>
    %568 = math.exp %567 : vector<2x64xf32>
    %cst_150 = arith.constant 1.000000e+00 : f32
    %569 = vector.broadcast %cst_150 : f32 to vector<2x64xf32>
    %570 = arith.addf %569, %568 : vector<2x64xf32>
    %571 = arith.divf %569, %570 : vector<2x64xf32>
    %572 = vector.extract_strided_slice %571 {offsets = [0, 0], sizes = [2, 32], strides = [1, 1]} : vector<2x64xf32> to vector<2x32xf32>
    %573 = vector.extract_strided_slice %571 {offsets = [0, 32], sizes = [2, 32], strides = [1, 1]} : vector<2x64xf32> to vector<2x32xf32>
    %574 = vector.extract_strided_slice %562 {offsets = [0, 64], sizes = [2, 32], strides = [1, 1]} : vector<2x96xf32> to vector<2x32xf32>
    %575 = vector.extract_strided_slice %563 {offsets = [0, 64], sizes = [2, 32], strides = [1, 1]} : vector<2x96xf32> to vector<2x32xf32>
    %576 = arith.addf %575, %440 : vector<2x32xf32>
    %577 = arith.mulf %572, %576 : vector<2x32xf32>
    %578 = arith.addf %574, %577 : vector<2x32xf32>
    %579 = math.tanh %578 : vector<2x32xf32>
    %cst_151 = arith.constant 1.000000e+00 : f32
    %580 = vector.broadcast %cst_151 : f32 to vector<2x32xf32>
    %581 = arith.subf %580, %573 : vector<2x32xf32>
    %582 = arith.mulf %581, %579 : vector<2x32xf32>
    %583 = arith.mulf %573, %560 : vector<2x32xf32>
    %584 = arith.addf %582, %583 : vector<2x32xf32>
    %c10_152 = arith.constant 10 : index
    %c0_153 = arith.constant 0 : index
    %585 = vector.load %arg36[%c10_152, %c0_153] : memref<16x32xf32, #tpu.memory_space<vmem>>, vector<2x32xf32>
    tpu.vector_store %arg36[%c10_152, %c0_153], %584 {strides = array<i32>} : memref<16x32xf32, #tpu.memory_space<vmem>>, vector<2x32xf32>,
    %586 = vector.extract_strided_slice %435 {offsets = [12, 0], sizes = [2, 96], strides = [1, 1]} : vector<16x96xf32> to vector<2x96xf32>
    %cst_154 = arith.constant dense<0.000000e+00> : vector<2x96xf32>
    %587 = tpu.matmul %584, %437, %cst_154 {dimension_numbers = #tpu.dot_dimension_numbers<[1], [0], [0], [1], [0, 0, 1, 1], [], []>} : vector<2x32xf32>, vector<32x96xf32>, vector<2x96xf32> -> vector<2x96xf32>
    %588 = vector.extract_strided_slice %586 {offsets = [0, 0], sizes = [2, 64], strides = [1, 1]} : vector<2x96xf32> to vector<2x64xf32>
    %589 = vector.extract_strided_slice %587 {offsets = [0, 0], sizes = [2, 64], strides = [1, 1]} : vector<2x96xf32> to vector<2x64xf32>
    %590 = arith.addf %588, %589 : vector<2x64xf32>
    %591 = arith.negf %590 : vector<2x64xf32>
    %592 = math.exp %591 : vector<2x64xf32>
    %cst_155 = arith.constant 1.000000e+00 : f32
    %593 = vector.broadcast %cst_155 : f32 to vector<2x64xf32>
    %594 = arith.addf %593, %592 : vector<2x64xf32>
    %595 = arith.divf %593, %594 : vector<2x64xf32>
    %596 = vector.extract_strided_slice %595 {offsets = [0, 0], sizes = [2, 32], strides = [1, 1]} : vector<2x64xf32> to vector<2x32xf32>
    %597 = vector.extract_strided_slice %595 {offsets = [0, 32], sizes = [2, 32], strides = [1, 1]} : vector<2x64xf32> to vector<2x32xf32>
    %598 = vector.extract_strided_slice %586 {offsets = [0, 64], sizes = [2, 32], strides = [1, 1]} : vector<2x96xf32> to vector<2x32xf32>
    %599 = vector.extract_strided_slice %587 {offsets = [0, 64], sizes = [2, 32], strides = [1, 1]} : vector<2x96xf32> to vector<2x32xf32>
    %600 = arith.addf %599, %440 : vector<2x32xf32>
    %601 = arith.mulf %596, %600 : vector<2x32xf32>
    %602 = arith.addf %598, %601 : vector<2x32xf32>
    %603 = math.tanh %602 : vector<2x32xf32>
    %cst_156 = arith.constant 1.000000e+00 : f32
    %604 = vector.broadcast %cst_156 : f32 to vector<2x32xf32>
    %605 = arith.subf %604, %597 : vector<2x32xf32>
    %606 = arith.mulf %605, %603 : vector<2x32xf32>
    %607 = arith.mulf %597, %584 : vector<2x32xf32>
    %608 = arith.addf %606, %607 : vector<2x32xf32>
    %c12_157 = arith.constant 12 : index
    %c0_158 = arith.constant 0 : index
    %609 = vector.load %arg36[%c12_157, %c0_158] : memref<16x32xf32, #tpu.memory_space<vmem>>, vector<2x32xf32>
    tpu.vector_store %arg36[%c12_157, %c0_158], %608 {strides = array<i32>} : memref<16x32xf32, #tpu.memory_space<vmem>>, vector<2x32xf32>,
    %610 = vector.extract_strided_slice %435 {offsets = [14, 0], sizes = [2, 96], strides = [1, 1]} : vector<16x96xf32> to vector<2x96xf32>
    %cst_159 = arith.constant dense<0.000000e+00> : vector<2x96xf32>
    %611 = tpu.matmul %608, %437, %cst_159 {dimension_numbers = #tpu.dot_dimension_numbers<[1], [0], [0], [1], [0, 0, 1, 1], [], []>} : vector<2x32xf32>, vector<32x96xf32>, vector<2x96xf32> -> vector<2x96xf32>
    %612 = vector.extract_strided_slice %610 {offsets = [0, 0], sizes = [2, 64], strides = [1, 1]} : vector<2x96xf32> to vector<2x64xf32>
    %613 = vector.extract_strided_slice %611 {offsets = [0, 0], sizes = [2, 64], strides = [1, 1]} : vector<2x96xf32> to vector<2x64xf32>
    %614 = arith.addf %612, %613 : vector<2x64xf32>
    %615 = arith.negf %614 : vector<2x64xf32>
    %616 = math.exp %615 : vector<2x64xf32>
    %cst_160 = arith.constant 1.000000e+00 : f32
    %617 = vector.broadcast %cst_160 : f32 to vector<2x64xf32>
    %618 = arith.addf %617, %616 : vector<2x64xf32>
    %619 = arith.divf %617, %618 : vector<2x64xf32>
    %620 = vector.extract_strided_slice %619 {offsets = [0, 0], sizes = [2, 32], strides = [1, 1]} : vector<2x64xf32> to vector<2x32xf32>
    %621 = vector.extract_strided_slice %619 {offsets = [0, 32], sizes = [2, 32], strides = [1, 1]} : vector<2x64xf32> to vector<2x32xf32>
    %622 = vector.extract_strided_slice %610 {offsets = [0, 64], sizes = [2, 32], strides = [1, 1]} : vector<2x96xf32> to vector<2x32xf32>
    %623 = vector.extract_strided_slice %611 {offsets = [0, 64], sizes = [2, 32], strides = [1, 1]} : vector<2x96xf32> to vector<2x32xf32>
    %624 = arith.addf %623, %440 : vector<2x32xf32>
    %625 = arith.mulf %620, %624 : vector<2x32xf32>
    %626 = arith.addf %622, %625 : vector<2x32xf32>
    %627 = math.tanh %626 : vector<2x32xf32>
    %cst_161 = arith.constant 1.000000e+00 : f32
    %628 = vector.broadcast %cst_161 : f32 to vector<2x32xf32>
    %629 = arith.subf %628, %621 : vector<2x32xf32>
    %630 = arith.mulf %629, %627 : vector<2x32xf32>
    %631 = arith.mulf %621, %608 : vector<2x32xf32>
    %632 = arith.addf %630, %631 : vector<2x32xf32>
    %c14_162 = arith.constant 14 : index
    %c0_163 = arith.constant 0 : index
    %633 = vector.load %arg36[%c14_162, %c0_163] : memref<16x32xf32, #tpu.memory_space<vmem>>, vector<2x32xf32>
    tpu.vector_store %arg36[%c14_162, %c0_163], %632 {strides = array<i32>} : memref<16x32xf32, #tpu.memory_space<vmem>>, vector<2x32xf32>,
    %c1_164 = arith.constant 1 : index
    %c0_165 = arith.constant 0 : index
    %c0_166 = arith.constant 0 : index
    %634 = vector.load %arg9[%c1_164, %c0_165, %c0_166] : memref<4x32x96xf32, #tpu.memory_space<vmem>>, vector<1x32x96xf32>
    %635 = vector.shape_cast %634 : vector<1x32x96xf32> to vector<32x96xf32>
    %cst_167 = arith.constant dense<0.000000e+00> : vector<16x96xf32>
    %636 = tpu.matmul %424, %635, %cst_167 {dimension_numbers = #tpu.dot_dimension_numbers<[1], [0], [0], [1], [0, 0, 1, 1], [], []>} : vector<16x32xf32>, vector<32x96xf32>, vector<16x96xf32> -> vector<16x96xf32>
    %c1_168 = arith.constant 1 : index
    %c0_169 = arith.constant 0 : index
    %c0_170 = arith.constant 0 : index
    %637 = vector.load %arg10[%c1_168, %c0_169, %c0_170] : memref<4x32x96xf32, #tpu.memory_space<vmem>>, vector<1x32x96xf32>
    %638 = vector.shape_cast %637 : vector<1x32x96xf32> to vector<32x96xf32>
    %cst_171 = arith.constant dense<0.000000e+00> : vector<16x96xf32>
    %639 = tpu.matmul %425, %638, %cst_171 {dimension_numbers = #tpu.dot_dimension_numbers<[1], [0], [0], [1], [0, 0, 1, 1], [], []>} : vector<16x32xf32>, vector<32x96xf32>, vector<16x96xf32> -> vector<16x96xf32>
    %640 = arith.addf %636, %639 : vector<16x96xf32>
    %c3 = arith.constant 3 : index
    %c0_172 = arith.constant 0 : index
    %641 = vector.load %arg12[%c3, %c0_172] : memref<6x96xf32, #tpu.memory_space<vmem>>, vector<1x96xf32>
    %642 = vector.broadcast %641 : vector<1x96xf32> to vector<16x96xf32>
    %643 = arith.addf %640, %642 : vector<16x96xf32>
    %c3_173 = arith.constant 3 : index
    %c0_174 = arith.constant 0 : index
    %c0_175 = arith.constant 0 : index
    %644 = vector.load %arg11[%c3_173, %c0_174, %c0_175] : memref<6x32x96xf32, #tpu.memory_space<vmem>>, vector<1x32x96xf32>
    %645 = vector.shape_cast %644 : vector<1x32x96xf32> to vector<32x96xf32>
    %c3_176 = arith.constant 3 : index
    %c0_177 = arith.constant 0 : index
    %646 = vector.load %arg13[%c3_176, %c0_177] : memref<6x32xf32, #tpu.memory_space<vmem>>, vector<1x32xf32>
    %647 = vector.shape_cast %646 : vector<1x32xf32> to vector<1x32xf32>
    %648 = vector.broadcast %647 : vector<1x32xf32> to vector<2x32xf32>
    %cst_178 = arith.constant 0.000000e+00 : f32
    %649 = vector.broadcast %cst_178 : f32 to vector<2x32xf32>
    %650 = vector.extract_strided_slice %643 {offsets = [14, 0], sizes = [2, 96], strides = [1, 1]} : vector<16x96xf32> to vector<2x96xf32>
    %cst_179 = arith.constant dense<0.000000e+00> : vector<2x96xf32>
    %651 = tpu.matmul %649, %645, %cst_179 {dimension_numbers = #tpu.dot_dimension_numbers<[1], [0], [0], [1], [0, 0, 1, 1], [], []>} : vector<2x32xf32>, vector<32x96xf32>, vector<2x96xf32> -> vector<2x96xf32>
    %652 = vector.extract_strided_slice %650 {offsets = [0, 0], sizes = [2, 64], strides = [1, 1]} : vector<2x96xf32> to vector<2x64xf32>
    %653 = vector.extract_strided_slice %651 {offsets = [0, 0], sizes = [2, 64], strides = [1, 1]} : vector<2x96xf32> to vector<2x64xf32>
    %654 = arith.addf %652, %653 : vector<2x64xf32>
    %655 = arith.negf %654 : vector<2x64xf32>
    %656 = math.exp %655 : vector<2x64xf32>
    %cst_180 = arith.constant 1.000000e+00 : f32
    %657 = vector.broadcast %cst_180 : f32 to vector<2x64xf32>
    %658 = arith.addf %657, %656 : vector<2x64xf32>
    %659 = arith.divf %657, %658 : vector<2x64xf32>
    %660 = vector.extract_strided_slice %659 {offsets = [0, 0], sizes = [2, 32], strides = [1, 1]} : vector<2x64xf32> to vector<2x32xf32>
    %661 = vector.extract_strided_slice %659 {offsets = [0, 32], sizes = [2, 32], strides = [1, 1]} : vector<2x64xf32> to vector<2x32xf32>
    %662 = vector.extract_strided_slice %650 {offsets = [0, 64], sizes = [2, 32], strides = [1, 1]} : vector<2x96xf32> to vector<2x32xf32>
    %663 = vector.extract_strided_slice %651 {offsets = [0, 64], sizes = [2, 32], strides = [1, 1]} : vector<2x96xf32> to vector<2x32xf32>
    %664 = arith.addf %663, %648 : vector<2x32xf32>
    %665 = arith.mulf %660, %664 : vector<2x32xf32>
    %666 = arith.addf %662, %665 : vector<2x32xf32>
    %667 = math.tanh %666 : vector<2x32xf32>
    %cst_181 = arith.constant 1.000000e+00 : f32
    %668 = vector.broadcast %cst_181 : f32 to vector<2x32xf32>
    %669 = arith.subf %668, %661 : vector<2x32xf32>
    %670 = arith.mulf %669, %667 : vector<2x32xf32>
    %671 = arith.mulf %661, %649 : vector<2x32xf32>
    %672 = arith.addf %670, %671 : vector<2x32xf32>
    %c14_182 = arith.constant 14 : index
    %c0_183 = arith.constant 0 : index
    %673 = vector.load %arg37[%c14_182, %c0_183] : memref<16x32xf32, #tpu.memory_space<vmem>>, vector<2x32xf32>
    tpu.vector_store %arg37[%c14_182, %c0_183], %672 {strides = array<i32>} : memref<16x32xf32, #tpu.memory_space<vmem>>, vector<2x32xf32>,
    %674 = vector.extract_strided_slice %643 {offsets = [12, 0], sizes = [2, 96], strides = [1, 1]} : vector<16x96xf32> to vector<2x96xf32>
    %cst_184 = arith.constant dense<0.000000e+00> : vector<2x96xf32>
    %675 = tpu.matmul %672, %645, %cst_184 {dimension_numbers = #tpu.dot_dimension_numbers<[1], [0], [0], [1], [0, 0, 1, 1], [], []>} : vector<2x32xf32>, vector<32x96xf32>, vector<2x96xf32> -> vector<2x96xf32>
    %676 = vector.extract_strided_slice %674 {offsets = [0, 0], sizes = [2, 64], strides = [1, 1]} : vector<2x96xf32> to vector<2x64xf32>
    %677 = vector.extract_strided_slice %675 {offsets = [0, 0], sizes = [2, 64], strides = [1, 1]} : vector<2x96xf32> to vector<2x64xf32>
    %678 = arith.addf %676, %677 : vector<2x64xf32>
    %679 = arith.negf %678 : vector<2x64xf32>
    %680 = math.exp %679 : vector<2x64xf32>
    %cst_185 = arith.constant 1.000000e+00 : f32
    %681 = vector.broadcast %cst_185 : f32 to vector<2x64xf32>
    %682 = arith.addf %681, %680 : vector<2x64xf32>
    %683 = arith.divf %681, %682 : vector<2x64xf32>
    %684 = vector.extract_strided_slice %683 {offsets = [0, 0], sizes = [2, 32], strides = [1, 1]} : vector<2x64xf32> to vector<2x32xf32>
    %685 = vector.extract_strided_slice %683 {offsets = [0, 32], sizes = [2, 32], strides = [1, 1]} : vector<2x64xf32> to vector<2x32xf32>
    %686 = vector.extract_strided_slice %674 {offsets = [0, 64], sizes = [2, 32], strides = [1, 1]} : vector<2x96xf32> to vector<2x32xf32>
    %687 = vector.extract_strided_slice %675 {offsets = [0, 64], sizes = [2, 32], strides = [1, 1]} : vector<2x96xf32> to vector<2x32xf32>
    %688 = arith.addf %687, %648 : vector<2x32xf32>
    %689 = arith.mulf %684, %688 : vector<2x32xf32>
    %690 = arith.addf %686, %689 : vector<2x32xf32>
    %691 = math.tanh %690 : vector<2x32xf32>
    %cst_186 = arith.constant 1.000000e+00 : f32
    %692 = vector.broadcast %cst_186 : f32 to vector<2x32xf32>
    %693 = arith.subf %692, %685 : vector<2x32xf32>
    %694 = arith.mulf %693, %691 : vector<2x32xf32>
    %695 = arith.mulf %685, %672 : vector<2x32xf32>
    %696 = arith.addf %694, %695 : vector<2x32xf32>
    %c12_187 = arith.constant 12 : index
    %c0_188 = arith.constant 0 : index
    %697 = vector.load %arg37[%c12_187, %c0_188] : memref<16x32xf32, #tpu.memory_space<vmem>>, vector<2x32xf32>
    tpu.vector_store %arg37[%c12_187, %c0_188], %696 {strides = array<i32>} : memref<16x32xf32, #tpu.memory_space<vmem>>, vector<2x32xf32>,
    %698 = vector.extract_strided_slice %643 {offsets = [10, 0], sizes = [2, 96], strides = [1, 1]} : vector<16x96xf32> to vector<2x96xf32>
    %cst_189 = arith.constant dense<0.000000e+00> : vector<2x96xf32>
    %699 = tpu.matmul %696, %645, %cst_189 {dimension_numbers = #tpu.dot_dimension_numbers<[1], [0], [0], [1], [0, 0, 1, 1], [], []>} : vector<2x32xf32>, vector<32x96xf32>, vector<2x96xf32> -> vector<2x96xf32>
    %700 = vector.extract_strided_slice %698 {offsets = [0, 0], sizes = [2, 64], strides = [1, 1]} : vector<2x96xf32> to vector<2x64xf32>
    %701 = vector.extract_strided_slice %699 {offsets = [0, 0], sizes = [2, 64], strides = [1, 1]} : vector<2x96xf32> to vector<2x64xf32>
    %702 = arith.addf %700, %701 : vector<2x64xf32>
    %703 = arith.negf %702 : vector<2x64xf32>
    %704 = math.exp %703 : vector<2x64xf32>
    %cst_190 = arith.constant 1.000000e+00 : f32
    %705 = vector.broadcast %cst_190 : f32 to vector<2x64xf32>
    %706 = arith.addf %705, %704 : vector<2x64xf32>
    %707 = arith.divf %705, %706 : vector<2x64xf32>
    %708 = vector.extract_strided_slice %707 {offsets = [0, 0], sizes = [2, 32], strides = [1, 1]} : vector<2x64xf32> to vector<2x32xf32>
    %709 = vector.extract_strided_slice %707 {offsets = [0, 32], sizes = [2, 32], strides = [1, 1]} : vector<2x64xf32> to vector<2x32xf32>
    %710 = vector.extract_strided_slice %698 {offsets = [0, 64], sizes = [2, 32], strides = [1, 1]} : vector<2x96xf32> to vector<2x32xf32>
    %711 = vector.extract_strided_slice %699 {offsets = [0, 64], sizes = [2, 32], strides = [1, 1]} : vector<2x96xf32> to vector<2x32xf32>
    %712 = arith.addf %711, %648 : vector<2x32xf32>
    %713 = arith.mulf %708, %712 : vector<2x32xf32>
    %714 = arith.addf %710, %713 : vector<2x32xf32>
    %715 = math.tanh %714 : vector<2x32xf32>
    %cst_191 = arith.constant 1.000000e+00 : f32
    %716 = vector.broadcast %cst_191 : f32 to vector<2x32xf32>
    %717 = arith.subf %716, %709 : vector<2x32xf32>
    %718 = arith.mulf %717, %715 : vector<2x32xf32>
    %719 = arith.mulf %709, %696 : vector<2x32xf32>
    %720 = arith.addf %718, %719 : vector<2x32xf32>
    %c10_192 = arith.constant 10 : index
    %c0_193 = arith.constant 0 : index
    %721 = vector.load %arg37[%c10_192, %c0_193] : memref<16x32xf32, #tpu.memory_space<vmem>>, vector<2x32xf32>
    tpu.vector_store %arg37[%c10_192, %c0_193], %720 {strides = array<i32>} : memref<16x32xf32, #tpu.memory_space<vmem>>, vector<2x32xf32>,
    %722 = vector.extract_strided_slice %643 {offsets = [8, 0], sizes = [2, 96], strides = [1, 1]} : vector<16x96xf32> to vector<2x96xf32>
    %cst_194 = arith.constant dense<0.000000e+00> : vector<2x96xf32>
    %723 = tpu.matmul %720, %645, %cst_194 {dimension_numbers = #tpu.dot_dimension_numbers<[1], [0], [0], [1], [0, 0, 1, 1], [], []>} : vector<2x32xf32>, vector<32x96xf32>, vector<2x96xf32> -> vector<2x96xf32>
    %724 = vector.extract_strided_slice %722 {offsets = [0, 0], sizes = [2, 64], strides = [1, 1]} : vector<2x96xf32> to vector<2x64xf32>
    %725 = vector.extract_strided_slice %723 {offsets = [0, 0], sizes = [2, 64], strides = [1, 1]} : vector<2x96xf32> to vector<2x64xf32>
    %726 = arith.addf %724, %725 : vector<2x64xf32>
    %727 = arith.negf %726 : vector<2x64xf32>
    %728 = math.exp %727 : vector<2x64xf32>
    %cst_195 = arith.constant 1.000000e+00 : f32
    %729 = vector.broadcast %cst_195 : f32 to vector<2x64xf32>
    %730 = arith.addf %729, %728 : vector<2x64xf32>
    %731 = arith.divf %729, %730 : vector<2x64xf32>
    %732 = vector.extract_strided_slice %731 {offsets = [0, 0], sizes = [2, 32], strides = [1, 1]} : vector<2x64xf32> to vector<2x32xf32>
    %733 = vector.extract_strided_slice %731 {offsets = [0, 32], sizes = [2, 32], strides = [1, 1]} : vector<2x64xf32> to vector<2x32xf32>
    %734 = vector.extract_strided_slice %722 {offsets = [0, 64], sizes = [2, 32], strides = [1, 1]} : vector<2x96xf32> to vector<2x32xf32>
    %735 = vector.extract_strided_slice %723 {offsets = [0, 64], sizes = [2, 32], strides = [1, 1]} : vector<2x96xf32> to vector<2x32xf32>
    %736 = arith.addf %735, %648 : vector<2x32xf32>
    %737 = arith.mulf %732, %736 : vector<2x32xf32>
    %738 = arith.addf %734, %737 : vector<2x32xf32>
    %739 = math.tanh %738 : vector<2x32xf32>
    %cst_196 = arith.constant 1.000000e+00 : f32
    %740 = vector.broadcast %cst_196 : f32 to vector<2x32xf32>
    %741 = arith.subf %740, %733 : vector<2x32xf32>
    %742 = arith.mulf %741, %739 : vector<2x32xf32>
    %743 = arith.mulf %733, %720 : vector<2x32xf32>
    %744 = arith.addf %742, %743 : vector<2x32xf32>
    %c8_197 = arith.constant 8 : index
    %c0_198 = arith.constant 0 : index
    %745 = vector.load %arg37[%c8_197, %c0_198] : memref<16x32xf32, #tpu.memory_space<vmem>>, vector<2x32xf32>
    tpu.vector_store %arg37[%c8_197, %c0_198], %744 {strides = array<i32>} : memref<16x32xf32, #tpu.memory_space<vmem>>, vector<2x32xf32>,
    %746 = vector.extract_strided_slice %643 {offsets = [6, 0], sizes = [2, 96], strides = [1, 1]} : vector<16x96xf32> to vector<2x96xf32>
    %cst_199 = arith.constant dense<0.000000e+00> : vector<2x96xf32>
    %747 = tpu.matmul %744, %645, %cst_199 {dimension_numbers = #tpu.dot_dimension_numbers<[1], [0], [0], [1], [0, 0, 1, 1], [], []>} : vector<2x32xf32>, vector<32x96xf32>, vector<2x96xf32> -> vector<2x96xf32>
    %748 = vector.extract_strided_slice %746 {offsets = [0, 0], sizes = [2, 64], strides = [1, 1]} : vector<2x96xf32> to vector<2x64xf32>
    %749 = vector.extract_strided_slice %747 {offsets = [0, 0], sizes = [2, 64], strides = [1, 1]} : vector<2x96xf32> to vector<2x64xf32>
    %750 = arith.addf %748, %749 : vector<2x64xf32>
    %751 = arith.negf %750 : vector<2x64xf32>
    %752 = math.exp %751 : vector<2x64xf32>
    %cst_200 = arith.constant 1.000000e+00 : f32
    %753 = vector.broadcast %cst_200 : f32 to vector<2x64xf32>
    %754 = arith.addf %753, %752 : vector<2x64xf32>
    %755 = arith.divf %753, %754 : vector<2x64xf32>
    %756 = vector.extract_strided_slice %755 {offsets = [0, 0], sizes = [2, 32], strides = [1, 1]} : vector<2x64xf32> to vector<2x32xf32>
    %757 = vector.extract_strided_slice %755 {offsets = [0, 32], sizes = [2, 32], strides = [1, 1]} : vector<2x64xf32> to vector<2x32xf32>
    %758 = vector.extract_strided_slice %746 {offsets = [0, 64], sizes = [2, 32], strides = [1, 1]} : vector<2x96xf32> to vector<2x32xf32>
    %759 = vector.extract_strided_slice %747 {offsets = [0, 64], sizes = [2, 32], strides = [1, 1]} : vector<2x96xf32> to vector<2x32xf32>
    %760 = arith.addf %759, %648 : vector<2x32xf32>
    %761 = arith.mulf %756, %760 : vector<2x32xf32>
    %762 = arith.addf %758, %761 : vector<2x32xf32>
    %763 = math.tanh %762 : vector<2x32xf32>
    %cst_201 = arith.constant 1.000000e+00 : f32
    %764 = vector.broadcast %cst_201 : f32 to vector<2x32xf32>
    %765 = arith.subf %764, %757 : vector<2x32xf32>
    %766 = arith.mulf %765, %763 : vector<2x32xf32>
    %767 = arith.mulf %757, %744 : vector<2x32xf32>
    %768 = arith.addf %766, %767 : vector<2x32xf32>
    %c6_202 = arith.constant 6 : index
    %c0_203 = arith.constant 0 : index
    %769 = vector.load %arg37[%c6_202, %c0_203] : memref<16x32xf32, #tpu.memory_space<vmem>>, vector<2x32xf32>
    tpu.vector_store %arg37[%c6_202, %c0_203], %768 {strides = array<i32>} : memref<16x32xf32, #tpu.memory_space<vmem>>, vector<2x32xf32>,
    %770 = vector.extract_strided_slice %643 {offsets = [4, 0], sizes = [2, 96], strides = [1, 1]} : vector<16x96xf32> to vector<2x96xf32>
    %cst_204 = arith.constant dense<0.000000e+00> : vector<2x96xf32>
    %771 = tpu.matmul %768, %645, %cst_204 {dimension_numbers = #tpu.dot_dimension_numbers<[1], [0], [0], [1], [0, 0, 1, 1], [], []>} : vector<2x32xf32>, vector<32x96xf32>, vector<2x96xf32> -> vector<2x96xf32>
    %772 = vector.extract_strided_slice %770 {offsets = [0, 0], sizes = [2, 64], strides = [1, 1]} : vector<2x96xf32> to vector<2x64xf32>
    %773 = vector.extract_strided_slice %771 {offsets = [0, 0], sizes = [2, 64], strides = [1, 1]} : vector<2x96xf32> to vector<2x64xf32>
    %774 = arith.addf %772, %773 : vector<2x64xf32>
    %775 = arith.negf %774 : vector<2x64xf32>
    %776 = math.exp %775 : vector<2x64xf32>
    %cst_205 = arith.constant 1.000000e+00 : f32
    %777 = vector.broadcast %cst_205 : f32 to vector<2x64xf32>
    %778 = arith.addf %777, %776 : vector<2x64xf32>
    %779 = arith.divf %777, %778 : vector<2x64xf32>
    %780 = vector.extract_strided_slice %779 {offsets = [0, 0], sizes = [2, 32], strides = [1, 1]} : vector<2x64xf32> to vector<2x32xf32>
    %781 = vector.extract_strided_slice %779 {offsets = [0, 32], sizes = [2, 32], strides = [1, 1]} : vector<2x64xf32> to vector<2x32xf32>
    %782 = vector.extract_strided_slice %770 {offsets = [0, 64], sizes = [2, 32], strides = [1, 1]} : vector<2x96xf32> to vector<2x32xf32>
    %783 = vector.extract_strided_slice %771 {offsets = [0, 64], sizes = [2, 32], strides = [1, 1]} : vector<2x96xf32> to vector<2x32xf32>
    %784 = arith.addf %783, %648 : vector<2x32xf32>
    %785 = arith.mulf %780, %784 : vector<2x32xf32>
    %786 = arith.addf %782, %785 : vector<2x32xf32>
    %787 = math.tanh %786 : vector<2x32xf32>
    %cst_206 = arith.constant 1.000000e+00 : f32
    %788 = vector.broadcast %cst_206 : f32 to vector<2x32xf32>
    %789 = arith.subf %788, %781 : vector<2x32xf32>
    %790 = arith.mulf %789, %787 : vector<2x32xf32>
    %791 = arith.mulf %781, %768 : vector<2x32xf32>
    %792 = arith.addf %790, %791 : vector<2x32xf32>
    %c4_207 = arith.constant 4 : index
    %c0_208 = arith.constant 0 : index
    %793 = vector.load %arg37[%c4_207, %c0_208] : memref<16x32xf32, #tpu.memory_space<vmem>>, vector<2x32xf32>
    tpu.vector_store %arg37[%c4_207, %c0_208], %792 {strides = array<i32>} : memref<16x32xf32, #tpu.memory_space<vmem>>, vector<2x32xf32>,
    %794 = vector.extract_strided_slice %643 {offsets = [2, 0], sizes = [2, 96], strides = [1, 1]} : vector<16x96xf32> to vector<2x96xf32>
    %cst_209 = arith.constant dense<0.000000e+00> : vector<2x96xf32>
    %795 = tpu.matmul %792, %645, %cst_209 {dimension_numbers = #tpu.dot_dimension_numbers<[1], [0], [0], [1], [0, 0, 1, 1], [], []>} : vector<2x32xf32>, vector<32x96xf32>, vector<2x96xf32> -> vector<2x96xf32>
    %796 = vector.extract_strided_slice %794 {offsets = [0, 0], sizes = [2, 64], strides = [1, 1]} : vector<2x96xf32> to vector<2x64xf32>
    %797 = vector.extract_strided_slice %795 {offsets = [0, 0], sizes = [2, 64], strides = [1, 1]} : vector<2x96xf32> to vector<2x64xf32>
    %798 = arith.addf %796, %797 : vector<2x64xf32>
    %799 = arith.negf %798 : vector<2x64xf32>
    %800 = math.exp %799 : vector<2x64xf32>
    %cst_210 = arith.constant 1.000000e+00 : f32
    %801 = vector.broadcast %cst_210 : f32 to vector<2x64xf32>
    %802 = arith.addf %801, %800 : vector<2x64xf32>
    %803 = arith.divf %801, %802 : vector<2x64xf32>
    %804 = vector.extract_strided_slice %803 {offsets = [0, 0], sizes = [2, 32], strides = [1, 1]} : vector<2x64xf32> to vector<2x32xf32>
    %805 = vector.extract_strided_slice %803 {offsets = [0, 32], sizes = [2, 32], strides = [1, 1]} : vector<2x64xf32> to vector<2x32xf32>
    %806 = vector.extract_strided_slice %794 {offsets = [0, 64], sizes = [2, 32], strides = [1, 1]} : vector<2x96xf32> to vector<2x32xf32>
    %807 = vector.extract_strided_slice %795 {offsets = [0, 64], sizes = [2, 32], strides = [1, 1]} : vector<2x96xf32> to vector<2x32xf32>
    %808 = arith.addf %807, %648 : vector<2x32xf32>
    %809 = arith.mulf %804, %808 : vector<2x32xf32>
    %810 = arith.addf %806, %809 : vector<2x32xf32>
    %811 = math.tanh %810 : vector<2x32xf32>
    %cst_211 = arith.constant 1.000000e+00 : f32
    %812 = vector.broadcast %cst_211 : f32 to vector<2x32xf32>
    %813 = arith.subf %812, %805 : vector<2x32xf32>
    %814 = arith.mulf %813, %811 : vector<2x32xf32>
    %815 = arith.mulf %805, %792 : vector<2x32xf32>
    %816 = arith.addf %814, %815 : vector<2x32xf32>
    %c2_212 = arith.constant 2 : index
    %c0_213 = arith.constant 0 : index
    %817 = vector.load %arg37[%c2_212, %c0_213] : memref<16x32xf32, #tpu.memory_space<vmem>>, vector<2x32xf32>
    tpu.vector_store %arg37[%c2_212, %c0_213], %816 {strides = array<i32>} : memref<16x32xf32, #tpu.memory_space<vmem>>, vector<2x32xf32>,
    %818 = vector.extract_strided_slice %643 {offsets = [0, 0], sizes = [2, 96], strides = [1, 1]} : vector<16x96xf32> to vector<2x96xf32>
    %cst_214 = arith.constant dense<0.000000e+00> : vector<2x96xf32>
    %819 = tpu.matmul %816, %645, %cst_214 {dimension_numbers = #tpu.dot_dimension_numbers<[1], [0], [0], [1], [0, 0, 1, 1], [], []>} : vector<2x32xf32>, vector<32x96xf32>, vector<2x96xf32> -> vector<2x96xf32>
    %820 = vector.extract_strided_slice %818 {offsets = [0, 0], sizes = [2, 64], strides = [1, 1]} : vector<2x96xf32> to vector<2x64xf32>
    %821 = vector.extract_strided_slice %819 {offsets = [0, 0], sizes = [2, 64], strides = [1, 1]} : vector<2x96xf32> to vector<2x64xf32>
    %822 = arith.addf %820, %821 : vector<2x64xf32>
    %823 = arith.negf %822 : vector<2x64xf32>
    %824 = math.exp %823 : vector<2x64xf32>
    %cst_215 = arith.constant 1.000000e+00 : f32
    %825 = vector.broadcast %cst_215 : f32 to vector<2x64xf32>
    %826 = arith.addf %825, %824 : vector<2x64xf32>
    %827 = arith.divf %825, %826 : vector<2x64xf32>
    %828 = vector.extract_strided_slice %827 {offsets = [0, 0], sizes = [2, 32], strides = [1, 1]} : vector<2x64xf32> to vector<2x32xf32>
    %829 = vector.extract_strided_slice %827 {offsets = [0, 32], sizes = [2, 32], strides = [1, 1]} : vector<2x64xf32> to vector<2x32xf32>
    %830 = vector.extract_strided_slice %818 {offsets = [0, 64], sizes = [2, 32], strides = [1, 1]} : vector<2x96xf32> to vector<2x32xf32>
    %831 = vector.extract_strided_slice %819 {offsets = [0, 64], sizes = [2, 32], strides = [1, 1]} : vector<2x96xf32> to vector<2x32xf32>
    %832 = arith.addf %831, %648 : vector<2x32xf32>
    %833 = arith.mulf %828, %832 : vector<2x32xf32>
    %834 = arith.addf %830, %833 : vector<2x32xf32>
    %835 = math.tanh %834 : vector<2x32xf32>
    %cst_216 = arith.constant 1.000000e+00 : f32
    %836 = vector.broadcast %cst_216 : f32 to vector<2x32xf32>
    %837 = arith.subf %836, %829 : vector<2x32xf32>
    %838 = arith.mulf %837, %835 : vector<2x32xf32>
    %839 = arith.mulf %829, %816 : vector<2x32xf32>
    %840 = arith.addf %838, %839 : vector<2x32xf32>
    %c0_217 = arith.constant 0 : index
    %c0_218 = arith.constant 0 : index
    %841 = vector.load %arg37[%c0_217, %c0_218] : memref<16x32xf32, #tpu.memory_space<vmem>>, vector<2x32xf32>
    tpu.vector_store %arg37[%c0_217, %c0_218], %840 {strides = array<i32>} : memref<16x32xf32, #tpu.memory_space<vmem>>, vector<2x32xf32>,
    %c0_219 = arith.constant 0 : index
    %c0_220 = arith.constant 0 : index
    %842 = vector.load %arg36[%c0_219, %c0_220] : memref<16x32xf32, #tpu.memory_space<vmem>>, vector<16x32xf32>
    %c0_221 = arith.constant 0 : index
    %c0_222 = arith.constant 0 : index
    %843 = vector.load %arg37[%c0_221, %c0_222] : memref<16x32xf32, #tpu.memory_space<vmem>>, vector<16x32xf32>
    %c2_223 = arith.constant 2 : index
    %c0_224 = arith.constant 0 : index
    %c0_225 = arith.constant 0 : index
    %844 = vector.load %arg9[%c2_223, %c0_224, %c0_225] : memref<4x32x96xf32, #tpu.memory_space<vmem>>, vector<1x32x96xf32>
    %845 = vector.shape_cast %844 : vector<1x32x96xf32> to vector<32x96xf32>
    %cst_226 = arith.constant dense<0.000000e+00> : vector<16x96xf32>
    %846 = tpu.matmul %842, %845, %cst_226 {dimension_numbers = #tpu.dot_dimension_numbers<[1], [0], [0], [1], [0, 0, 1, 1], [], []>} : vector<16x32xf32>, vector<32x96xf32>, vector<16x96xf32> -> vector<16x96xf32>
    %c2_227 = arith.constant 2 : index
    %c0_228 = arith.constant 0 : index
    %c0_229 = arith.constant 0 : index
    %847 = vector.load %arg10[%c2_227, %c0_228, %c0_229] : memref<4x32x96xf32, #tpu.memory_space<vmem>>, vector<1x32x96xf32>
    %848 = vector.shape_cast %847 : vector<1x32x96xf32> to vector<32x96xf32>
    %cst_230 = arith.constant dense<0.000000e+00> : vector<16x96xf32>
    %849 = tpu.matmul %843, %848, %cst_230 {dimension_numbers = #tpu.dot_dimension_numbers<[1], [0], [0], [1], [0, 0, 1, 1], [], []>} : vector<16x32xf32>, vector<32x96xf32>, vector<16x96xf32> -> vector<16x96xf32>
    %850 = arith.addf %846, %849 : vector<16x96xf32>
    %c4_231 = arith.constant 4 : index
    %c0_232 = arith.constant 0 : index
    %851 = vector.load %arg12[%c4_231, %c0_232] : memref<6x96xf32, #tpu.memory_space<vmem>>, vector<1x96xf32>
    %852 = vector.broadcast %851 : vector<1x96xf32> to vector<16x96xf32>
    %853 = arith.addf %850, %852 : vector<16x96xf32>
    %c4_233 = arith.constant 4 : index
    %c0_234 = arith.constant 0 : index
    %c0_235 = arith.constant 0 : index
    %854 = vector.load %arg11[%c4_233, %c0_234, %c0_235] : memref<6x32x96xf32, #tpu.memory_space<vmem>>, vector<1x32x96xf32>
    %855 = vector.shape_cast %854 : vector<1x32x96xf32> to vector<32x96xf32>
    %c4_236 = arith.constant 4 : index
    %c0_237 = arith.constant 0 : index
    %856 = vector.load %arg13[%c4_236, %c0_237] : memref<6x32xf32, #tpu.memory_space<vmem>>, vector<1x32xf32>
    %857 = vector.shape_cast %856 : vector<1x32xf32> to vector<1x32xf32>
    %858 = vector.broadcast %857 : vector<1x32xf32> to vector<2x32xf32>
    %cst_238 = arith.constant 0.000000e+00 : f32
    %859 = vector.broadcast %cst_238 : f32 to vector<2x32xf32>
    %860 = vector.extract_strided_slice %853 {offsets = [0, 0], sizes = [2, 96], strides = [1, 1]} : vector<16x96xf32> to vector<2x96xf32>
    %cst_239 = arith.constant dense<0.000000e+00> : vector<2x96xf32>
    %861 = tpu.matmul %859, %855, %cst_239 {dimension_numbers = #tpu.dot_dimension_numbers<[1], [0], [0], [1], [0, 0, 1, 1], [], []>} : vector<2x32xf32>, vector<32x96xf32>, vector<2x96xf32> -> vector<2x96xf32>
    %862 = vector.extract_strided_slice %860 {offsets = [0, 0], sizes = [2, 64], strides = [1, 1]} : vector<2x96xf32> to vector<2x64xf32>
    %863 = vector.extract_strided_slice %861 {offsets = [0, 0], sizes = [2, 64], strides = [1, 1]} : vector<2x96xf32> to vector<2x64xf32>
    %864 = arith.addf %862, %863 : vector<2x64xf32>
    %865 = arith.negf %864 : vector<2x64xf32>
    %866 = math.exp %865 : vector<2x64xf32>
    %cst_240 = arith.constant 1.000000e+00 : f32
    %867 = vector.broadcast %cst_240 : f32 to vector<2x64xf32>
    %868 = arith.addf %867, %866 : vector<2x64xf32>
    %869 = arith.divf %867, %868 : vector<2x64xf32>
    %870 = vector.extract_strided_slice %869 {offsets = [0, 0], sizes = [2, 32], strides = [1, 1]} : vector<2x64xf32> to vector<2x32xf32>
    %871 = vector.extract_strided_slice %869 {offsets = [0, 32], sizes = [2, 32], strides = [1, 1]} : vector<2x64xf32> to vector<2x32xf32>
    %872 = vector.extract_strided_slice %860 {offsets = [0, 64], sizes = [2, 32], strides = [1, 1]} : vector<2x96xf32> to vector<2x32xf32>
    %873 = vector.extract_strided_slice %861 {offsets = [0, 64], sizes = [2, 32], strides = [1, 1]} : vector<2x96xf32> to vector<2x32xf32>
    %874 = arith.addf %873, %858 : vector<2x32xf32>
    %875 = arith.mulf %870, %874 : vector<2x32xf32>
    %876 = arith.addf %872, %875 : vector<2x32xf32>
    %877 = math.tanh %876 : vector<2x32xf32>
    %cst_241 = arith.constant 1.000000e+00 : f32
    %878 = vector.broadcast %cst_241 : f32 to vector<2x32xf32>
    %879 = arith.subf %878, %871 : vector<2x32xf32>
    %880 = arith.mulf %879, %877 : vector<2x32xf32>
    %881 = arith.mulf %871, %859 : vector<2x32xf32>
    %882 = arith.addf %880, %881 : vector<2x32xf32>
    %c0_242 = arith.constant 0 : index
    %c0_243 = arith.constant 0 : index
    %883 = vector.load %arg34[%c0_242, %c0_243] : memref<16x32xf32, #tpu.memory_space<vmem>>, vector<2x32xf32>
    tpu.vector_store %arg34[%c0_242, %c0_243], %882 {strides = array<i32>} : memref<16x32xf32, #tpu.memory_space<vmem>>, vector<2x32xf32>,
    %884 = vector.extract_strided_slice %853 {offsets = [2, 0], sizes = [2, 96], strides = [1, 1]} : vector<16x96xf32> to vector<2x96xf32>
    %cst_244 = arith.constant dense<0.000000e+00> : vector<2x96xf32>
    %885 = tpu.matmul %882, %855, %cst_244 {dimension_numbers = #tpu.dot_dimension_numbers<[1], [0], [0], [1], [0, 0, 1, 1], [], []>} : vector<2x32xf32>, vector<32x96xf32>, vector<2x96xf32> -> vector<2x96xf32>
    %886 = vector.extract_strided_slice %884 {offsets = [0, 0], sizes = [2, 64], strides = [1, 1]} : vector<2x96xf32> to vector<2x64xf32>
    %887 = vector.extract_strided_slice %885 {offsets = [0, 0], sizes = [2, 64], strides = [1, 1]} : vector<2x96xf32> to vector<2x64xf32>
    %888 = arith.addf %886, %887 : vector<2x64xf32>
    %889 = arith.negf %888 : vector<2x64xf32>
    %890 = math.exp %889 : vector<2x64xf32>
    %cst_245 = arith.constant 1.000000e+00 : f32
    %891 = vector.broadcast %cst_245 : f32 to vector<2x64xf32>
    %892 = arith.addf %891, %890 : vector<2x64xf32>
    %893 = arith.divf %891, %892 : vector<2x64xf32>
    %894 = vector.extract_strided_slice %893 {offsets = [0, 0], sizes = [2, 32], strides = [1, 1]} : vector<2x64xf32> to vector<2x32xf32>
    %895 = vector.extract_strided_slice %893 {offsets = [0, 32], sizes = [2, 32], strides = [1, 1]} : vector<2x64xf32> to vector<2x32xf32>
    %896 = vector.extract_strided_slice %884 {offsets = [0, 64], sizes = [2, 32], strides = [1, 1]} : vector<2x96xf32> to vector<2x32xf32>
    %897 = vector.extract_strided_slice %885 {offsets = [0, 64], sizes = [2, 32], strides = [1, 1]} : vector<2x96xf32> to vector<2x32xf32>
    %898 = arith.addf %897, %858 : vector<2x32xf32>
    %899 = arith.mulf %894, %898 : vector<2x32xf32>
    %900 = arith.addf %896, %899 : vector<2x32xf32>
    %901 = math.tanh %900 : vector<2x32xf32>
    %cst_246 = arith.constant 1.000000e+00 : f32
    %902 = vector.broadcast %cst_246 : f32 to vector<2x32xf32>
    %903 = arith.subf %902, %895 : vector<2x32xf32>
    %904 = arith.mulf %903, %901 : vector<2x32xf32>
    %905 = arith.mulf %895, %882 : vector<2x32xf32>
    %906 = arith.addf %904, %905 : vector<2x32xf32>
    %c2_247 = arith.constant 2 : index
    %c0_248 = arith.constant 0 : index
    %907 = vector.load %arg34[%c2_247, %c0_248] : memref<16x32xf32, #tpu.memory_space<vmem>>, vector<2x32xf32>
    tpu.vector_store %arg34[%c2_247, %c0_248], %906 {strides = array<i32>} : memref<16x32xf32, #tpu.memory_space<vmem>>, vector<2x32xf32>,
    %908 = vector.extract_strided_slice %853 {offsets = [4, 0], sizes = [2, 96], strides = [1, 1]} : vector<16x96xf32> to vector<2x96xf32>
    %cst_249 = arith.constant dense<0.000000e+00> : vector<2x96xf32>
    %909 = tpu.matmul %906, %855, %cst_249 {dimension_numbers = #tpu.dot_dimension_numbers<[1], [0], [0], [1], [0, 0, 1, 1], [], []>} : vector<2x32xf32>, vector<32x96xf32>, vector<2x96xf32> -> vector<2x96xf32>
    %910 = vector.extract_strided_slice %908 {offsets = [0, 0], sizes = [2, 64], strides = [1, 1]} : vector<2x96xf32> to vector<2x64xf32>
    %911 = vector.extract_strided_slice %909 {offsets = [0, 0], sizes = [2, 64], strides = [1, 1]} : vector<2x96xf32> to vector<2x64xf32>
    %912 = arith.addf %910, %911 : vector<2x64xf32>
    %913 = arith.negf %912 : vector<2x64xf32>
    %914 = math.exp %913 : vector<2x64xf32>
    %cst_250 = arith.constant 1.000000e+00 : f32
    %915 = vector.broadcast %cst_250 : f32 to vector<2x64xf32>
    %916 = arith.addf %915, %914 : vector<2x64xf32>
    %917 = arith.divf %915, %916 : vector<2x64xf32>
    %918 = vector.extract_strided_slice %917 {offsets = [0, 0], sizes = [2, 32], strides = [1, 1]} : vector<2x64xf32> to vector<2x32xf32>
    %919 = vector.extract_strided_slice %917 {offsets = [0, 32], sizes = [2, 32], strides = [1, 1]} : vector<2x64xf32> to vector<2x32xf32>
    %920 = vector.extract_strided_slice %908 {offsets = [0, 64], sizes = [2, 32], strides = [1, 1]} : vector<2x96xf32> to vector<2x32xf32>
    %921 = vector.extract_strided_slice %909 {offsets = [0, 64], sizes = [2, 32], strides = [1, 1]} : vector<2x96xf32> to vector<2x32xf32>
    %922 = arith.addf %921, %858 : vector<2x32xf32>
    %923 = arith.mulf %918, %922 : vector<2x32xf32>
    %924 = arith.addf %920, %923 : vector<2x32xf32>
    %925 = math.tanh %924 : vector<2x32xf32>
    %cst_251 = arith.constant 1.000000e+00 : f32
    %926 = vector.broadcast %cst_251 : f32 to vector<2x32xf32>
    %927 = arith.subf %926, %919 : vector<2x32xf32>
    %928 = arith.mulf %927, %925 : vector<2x32xf32>
    %929 = arith.mulf %919, %906 : vector<2x32xf32>
    %930 = arith.addf %928, %929 : vector<2x32xf32>
    %c4_252 = arith.constant 4 : index
    %c0_253 = arith.constant 0 : index
    %931 = vector.load %arg34[%c4_252, %c0_253] : memref<16x32xf32, #tpu.memory_space<vmem>>, vector<2x32xf32>
    tpu.vector_store %arg34[%c4_252, %c0_253], %930 {strides = array<i32>} : memref<16x32xf32, #tpu.memory_space<vmem>>, vector<2x32xf32>,
    %932 = vector.extract_strided_slice %853 {offsets = [6, 0], sizes = [2, 96], strides = [1, 1]} : vector<16x96xf32> to vector<2x96xf32>
    %cst_254 = arith.constant dense<0.000000e+00> : vector<2x96xf32>
    %933 = tpu.matmul %930, %855, %cst_254 {dimension_numbers = #tpu.dot_dimension_numbers<[1], [0], [0], [1], [0, 0, 1, 1], [], []>} : vector<2x32xf32>, vector<32x96xf32>, vector<2x96xf32> -> vector<2x96xf32>
    %934 = vector.extract_strided_slice %932 {offsets = [0, 0], sizes = [2, 64], strides = [1, 1]} : vector<2x96xf32> to vector<2x64xf32>
    %935 = vector.extract_strided_slice %933 {offsets = [0, 0], sizes = [2, 64], strides = [1, 1]} : vector<2x96xf32> to vector<2x64xf32>
    %936 = arith.addf %934, %935 : vector<2x64xf32>
    %937 = arith.negf %936 : vector<2x64xf32>
    %938 = math.exp %937 : vector<2x64xf32>
    %cst_255 = arith.constant 1.000000e+00 : f32
    %939 = vector.broadcast %cst_255 : f32 to vector<2x64xf32>
    %940 = arith.addf %939, %938 : vector<2x64xf32>
    %941 = arith.divf %939, %940 : vector<2x64xf32>
    %942 = vector.extract_strided_slice %941 {offsets = [0, 0], sizes = [2, 32], strides = [1, 1]} : vector<2x64xf32> to vector<2x32xf32>
    %943 = vector.extract_strided_slice %941 {offsets = [0, 32], sizes = [2, 32], strides = [1, 1]} : vector<2x64xf32> to vector<2x32xf32>
    %944 = vector.extract_strided_slice %932 {offsets = [0, 64], sizes = [2, 32], strides = [1, 1]} : vector<2x96xf32> to vector<2x32xf32>
    %945 = vector.extract_strided_slice %933 {offsets = [0, 64], sizes = [2, 32], strides = [1, 1]} : vector<2x96xf32> to vector<2x32xf32>
    %946 = arith.addf %945, %858 : vector<2x32xf32>
    %947 = arith.mulf %942, %946 : vector<2x32xf32>
    %948 = arith.addf %944, %947 : vector<2x32xf32>
    %949 = math.tanh %948 : vector<2x32xf32>
    %cst_256 = arith.constant 1.000000e+00 : f32
    %950 = vector.broadcast %cst_256 : f32 to vector<2x32xf32>
    %951 = arith.subf %950, %943 : vector<2x32xf32>
    %952 = arith.mulf %951, %949 : vector<2x32xf32>
    %953 = arith.mulf %943, %930 : vector<2x32xf32>
    %954 = arith.addf %952, %953 : vector<2x32xf32>
    %c6_257 = arith.constant 6 : index
    %c0_258 = arith.constant 0 : index
    %955 = vector.load %arg34[%c6_257, %c0_258] : memref<16x32xf32, #tpu.memory_space<vmem>>, vector<2x32xf32>
    tpu.vector_store %arg34[%c6_257, %c0_258], %954 {strides = array<i32>} : memref<16x32xf32, #tpu.memory_space<vmem>>, vector<2x32xf32>,
    %956 = vector.extract_strided_slice %853 {offsets = [8, 0], sizes = [2, 96], strides = [1, 1]} : vector<16x96xf32> to vector<2x96xf32>
    %cst_259 = arith.constant dense<0.000000e+00> : vector<2x96xf32>
    %957 = tpu.matmul %954, %855, %cst_259 {dimension_numbers = #tpu.dot_dimension_numbers<[1], [0], [0], [1], [0, 0, 1, 1], [], []>} : vector<2x32xf32>, vector<32x96xf32>, vector<2x96xf32> -> vector<2x96xf32>
    %958 = vector.extract_strided_slice %956 {offsets = [0, 0], sizes = [2, 64], strides = [1, 1]} : vector<2x96xf32> to vector<2x64xf32>
    %959 = vector.extract_strided_slice %957 {offsets = [0, 0], sizes = [2, 64], strides = [1, 1]} : vector<2x96xf32> to vector<2x64xf32>
    %960 = arith.addf %958, %959 : vector<2x64xf32>
    %961 = arith.negf %960 : vector<2x64xf32>
    %962 = math.exp %961 : vector<2x64xf32>
    %cst_260 = arith.constant 1.000000e+00 : f32
    %963 = vector.broadcast %cst_260 : f32 to vector<2x64xf32>
    %964 = arith.addf %963, %962 : vector<2x64xf32>
    %965 = arith.divf %963, %964 : vector<2x64xf32>
    %966 = vector.extract_strided_slice %965 {offsets = [0, 0], sizes = [2, 32], strides = [1, 1]} : vector<2x64xf32> to vector<2x32xf32>
    %967 = vector.extract_strided_slice %965 {offsets = [0, 32], sizes = [2, 32], strides = [1, 1]} : vector<2x64xf32> to vector<2x32xf32>
    %968 = vector.extract_strided_slice %956 {offsets = [0, 64], sizes = [2, 32], strides = [1, 1]} : vector<2x96xf32> to vector<2x32xf32>
    %969 = vector.extract_strided_slice %957 {offsets = [0, 64], sizes = [2, 32], strides = [1, 1]} : vector<2x96xf32> to vector<2x32xf32>
    %970 = arith.addf %969, %858 : vector<2x32xf32>
    %971 = arith.mulf %966, %970 : vector<2x32xf32>
    %972 = arith.addf %968, %971 : vector<2x32xf32>
    %973 = math.tanh %972 : vector<2x32xf32>
    %cst_261 = arith.constant 1.000000e+00 : f32
    %974 = vector.broadcast %cst_261 : f32 to vector<2x32xf32>
    %975 = arith.subf %974, %967 : vector<2x32xf32>
    %976 = arith.mulf %975, %973 : vector<2x32xf32>
    %977 = arith.mulf %967, %954 : vector<2x32xf32>
    %978 = arith.addf %976, %977 : vector<2x32xf32>
    %c8_262 = arith.constant 8 : index
    %c0_263 = arith.constant 0 : index
    %979 = vector.load %arg34[%c8_262, %c0_263] : memref<16x32xf32, #tpu.memory_space<vmem>>, vector<2x32xf32>
    tpu.vector_store %arg34[%c8_262, %c0_263], %978 {strides = array<i32>} : memref<16x32xf32, #tpu.memory_space<vmem>>, vector<2x32xf32>,
    %980 = vector.extract_strided_slice %853 {offsets = [10, 0], sizes = [2, 96], strides = [1, 1]} : vector<16x96xf32> to vector<2x96xf32>
    %cst_264 = arith.constant dense<0.000000e+00> : vector<2x96xf32>
    %981 = tpu.matmul %978, %855, %cst_264 {dimension_numbers = #tpu.dot_dimension_numbers<[1], [0], [0], [1], [0, 0, 1, 1], [], []>} : vector<2x32xf32>, vector<32x96xf32>, vector<2x96xf32> -> vector<2x96xf32>
    %982 = vector.extract_strided_slice %980 {offsets = [0, 0], sizes = [2, 64], strides = [1, 1]} : vector<2x96xf32> to vector<2x64xf32>
    %983 = vector.extract_strided_slice %981 {offsets = [0, 0], sizes = [2, 64], strides = [1, 1]} : vector<2x96xf32> to vector<2x64xf32>
    %984 = arith.addf %982, %983 : vector<2x64xf32>
    %985 = arith.negf %984 : vector<2x64xf32>
    %986 = math.exp %985 : vector<2x64xf32>
    %cst_265 = arith.constant 1.000000e+00 : f32
    %987 = vector.broadcast %cst_265 : f32 to vector<2x64xf32>
    %988 = arith.addf %987, %986 : vector<2x64xf32>
    %989 = arith.divf %987, %988 : vector<2x64xf32>
    %990 = vector.extract_strided_slice %989 {offsets = [0, 0], sizes = [2, 32], strides = [1, 1]} : vector<2x64xf32> to vector<2x32xf32>
    %991 = vector.extract_strided_slice %989 {offsets = [0, 32], sizes = [2, 32], strides = [1, 1]} : vector<2x64xf32> to vector<2x32xf32>
    %992 = vector.extract_strided_slice %980 {offsets = [0, 64], sizes = [2, 32], strides = [1, 1]} : vector<2x96xf32> to vector<2x32xf32>
    %993 = vector.extract_strided_slice %981 {offsets = [0, 64], sizes = [2, 32], strides = [1, 1]} : vector<2x96xf32> to vector<2x32xf32>
    %994 = arith.addf %993, %858 : vector<2x32xf32>
    %995 = arith.mulf %990, %994 : vector<2x32xf32>
    %996 = arith.addf %992, %995 : vector<2x32xf32>
    %997 = math.tanh %996 : vector<2x32xf32>
    %cst_266 = arith.constant 1.000000e+00 : f32
    %998 = vector.broadcast %cst_266 : f32 to vector<2x32xf32>
    %999 = arith.subf %998, %991 : vector<2x32xf32>
    %1000 = arith.mulf %999, %997 : vector<2x32xf32>
    %1001 = arith.mulf %991, %978 : vector<2x32xf32>
    %1002 = arith.addf %1000, %1001 : vector<2x32xf32>
    %c10_267 = arith.constant 10 : index
    %c0_268 = arith.constant 0 : index
    %1003 = vector.load %arg34[%c10_267, %c0_268] : memref<16x32xf32, #tpu.memory_space<vmem>>, vector<2x32xf32>
    tpu.vector_store %arg34[%c10_267, %c0_268], %1002 {strides = array<i32>} : memref<16x32xf32, #tpu.memory_space<vmem>>, vector<2x32xf32>,
    %1004 = vector.extract_strided_slice %853 {offsets = [12, 0], sizes = [2, 96], strides = [1, 1]} : vector<16x96xf32> to vector<2x96xf32>
    %cst_269 = arith.constant dense<0.000000e+00> : vector<2x96xf32>
    %1005 = tpu.matmul %1002, %855, %cst_269 {dimension_numbers = #tpu.dot_dimension_numbers<[1], [0], [0], [1], [0, 0, 1, 1], [], []>} : vector<2x32xf32>, vector<32x96xf32>, vector<2x96xf32> -> vector<2x96xf32>
    %1006 = vector.extract_strided_slice %1004 {offsets = [0, 0], sizes = [2, 64], strides = [1, 1]} : vector<2x96xf32> to vector<2x64xf32>
    %1007 = vector.extract_strided_slice %1005 {offsets = [0, 0], sizes = [2, 64], strides = [1, 1]} : vector<2x96xf32> to vector<2x64xf32>
    %1008 = arith.addf %1006, %1007 : vector<2x64xf32>
    %1009 = arith.negf %1008 : vector<2x64xf32>
    %1010 = math.exp %1009 : vector<2x64xf32>
    %cst_270 = arith.constant 1.000000e+00 : f32
    %1011 = vector.broadcast %cst_270 : f32 to vector<2x64xf32>
    %1012 = arith.addf %1011, %1010 : vector<2x64xf32>
    %1013 = arith.divf %1011, %1012 : vector<2x64xf32>
    %1014 = vector.extract_strided_slice %1013 {offsets = [0, 0], sizes = [2, 32], strides = [1, 1]} : vector<2x64xf32> to vector<2x32xf32>
    %1015 = vector.extract_strided_slice %1013 {offsets = [0, 32], sizes = [2, 32], strides = [1, 1]} : vector<2x64xf32> to vector<2x32xf32>
    %1016 = vector.extract_strided_slice %1004 {offsets = [0, 64], sizes = [2, 32], strides = [1, 1]} : vector<2x96xf32> to vector<2x32xf32>
    %1017 = vector.extract_strided_slice %1005 {offsets = [0, 64], sizes = [2, 32], strides = [1, 1]} : vector<2x96xf32> to vector<2x32xf32>
    %1018 = arith.addf %1017, %858 : vector<2x32xf32>
    %1019 = arith.mulf %1014, %1018 : vector<2x32xf32>
    %1020 = arith.addf %1016, %1019 : vector<2x32xf32>
    %1021 = math.tanh %1020 : vector<2x32xf32>
    %cst_271 = arith.constant 1.000000e+00 : f32
    %1022 = vector.broadcast %cst_271 : f32 to vector<2x32xf32>
    %1023 = arith.subf %1022, %1015 : vector<2x32xf32>
    %1024 = arith.mulf %1023, %1021 : vector<2x32xf32>
    %1025 = arith.mulf %1015, %1002 : vector<2x32xf32>
    %1026 = arith.addf %1024, %1025 : vector<2x32xf32>
    %c12_272 = arith.constant 12 : index
    %c0_273 = arith.constant 0 : index
    %1027 = vector.load %arg34[%c12_272, %c0_273] : memref<16x32xf32, #tpu.memory_space<vmem>>, vector<2x32xf32>
    tpu.vector_store %arg34[%c12_272, %c0_273], %1026 {strides = array<i32>} : memref<16x32xf32, #tpu.memory_space<vmem>>, vector<2x32xf32>,
    %1028 = vector.extract_strided_slice %853 {offsets = [14, 0], sizes = [2, 96], strides = [1, 1]} : vector<16x96xf32> to vector<2x96xf32>
    %cst_274 = arith.constant dense<0.000000e+00> : vector<2x96xf32>
    %1029 = tpu.matmul %1026, %855, %cst_274 {dimension_numbers = #tpu.dot_dimension_numbers<[1], [0], [0], [1], [0, 0, 1, 1], [], []>} : vector<2x32xf32>, vector<32x96xf32>, vector<2x96xf32> -> vector<2x96xf32>
    %1030 = vector.extract_strided_slice %1028 {offsets = [0, 0], sizes = [2, 64], strides = [1, 1]} : vector<2x96xf32> to vector<2x64xf32>
    %1031 = vector.extract_strided_slice %1029 {offsets = [0, 0], sizes = [2, 64], strides = [1, 1]} : vector<2x96xf32> to vector<2x64xf32>
    %1032 = arith.addf %1030, %1031 : vector<2x64xf32>
    %1033 = arith.negf %1032 : vector<2x64xf32>
    %1034 = math.exp %1033 : vector<2x64xf32>
    %cst_275 = arith.constant 1.000000e+00 : f32
    %1035 = vector.broadcast %cst_275 : f32 to vector<2x64xf32>
    %1036 = arith.addf %1035, %1034 : vector<2x64xf32>
    %1037 = arith.divf %1035, %1036 : vector<2x64xf32>
    %1038 = vector.extract_strided_slice %1037 {offsets = [0, 0], sizes = [2, 32], strides = [1, 1]} : vector<2x64xf32> to vector<2x32xf32>
    %1039 = vector.extract_strided_slice %1037 {offsets = [0, 32], sizes = [2, 32], strides = [1, 1]} : vector<2x64xf32> to vector<2x32xf32>
    %1040 = vector.extract_strided_slice %1028 {offsets = [0, 64], sizes = [2, 32], strides = [1, 1]} : vector<2x96xf32> to vector<2x32xf32>
    %1041 = vector.extract_strided_slice %1029 {offsets = [0, 64], sizes = [2, 32], strides = [1, 1]} : vector<2x96xf32> to vector<2x32xf32>
    %1042 = arith.addf %1041, %858 : vector<2x32xf32>
    %1043 = arith.mulf %1038, %1042 : vector<2x32xf32>
    %1044 = arith.addf %1040, %1043 : vector<2x32xf32>
    %1045 = math.tanh %1044 : vector<2x32xf32>
    %cst_276 = arith.constant 1.000000e+00 : f32
    %1046 = vector.broadcast %cst_276 : f32 to vector<2x32xf32>
    %1047 = arith.subf %1046, %1039 : vector<2x32xf32>
    %1048 = arith.mulf %1047, %1045 : vector<2x32xf32>
    %1049 = arith.mulf %1039, %1026 : vector<2x32xf32>
    %1050 = arith.addf %1048, %1049 : vector<2x32xf32>
    %c14_277 = arith.constant 14 : index
    %c0_278 = arith.constant 0 : index
    %1051 = vector.load %arg34[%c14_277, %c0_278] : memref<16x32xf32, #tpu.memory_space<vmem>>, vector<2x32xf32>
    tpu.vector_store %arg34[%c14_277, %c0_278], %1050 {strides = array<i32>} : memref<16x32xf32, #tpu.memory_space<vmem>>, vector<2x32xf32>,
    %c3_279 = arith.constant 3 : index
    %c0_280 = arith.constant 0 : index
    %c0_281 = arith.constant 0 : index
    %1052 = vector.load %arg9[%c3_279, %c0_280, %c0_281] : memref<4x32x96xf32, #tpu.memory_space<vmem>>, vector<1x32x96xf32>
    %1053 = vector.shape_cast %1052 : vector<1x32x96xf32> to vector<32x96xf32>
    %cst_282 = arith.constant dense<0.000000e+00> : vector<16x96xf32>
    %1054 = tpu.matmul %842, %1053, %cst_282 {dimension_numbers = #tpu.dot_dimension_numbers<[1], [0], [0], [1], [0, 0, 1, 1], [], []>} : vector<16x32xf32>, vector<32x96xf32>, vector<16x96xf32> -> vector<16x96xf32>
    %c3_283 = arith.constant 3 : index
    %c0_284 = arith.constant 0 : index
    %c0_285 = arith.constant 0 : index
    %1055 = vector.load %arg10[%c3_283, %c0_284, %c0_285] : memref<4x32x96xf32, #tpu.memory_space<vmem>>, vector<1x32x96xf32>
    %1056 = vector.shape_cast %1055 : vector<1x32x96xf32> to vector<32x96xf32>
    %cst_286 = arith.constant dense<0.000000e+00> : vector<16x96xf32>
    %1057 = tpu.matmul %843, %1056, %cst_286 {dimension_numbers = #tpu.dot_dimension_numbers<[1], [0], [0], [1], [0, 0, 1, 1], [], []>} : vector<16x32xf32>, vector<32x96xf32>, vector<16x96xf32> -> vector<16x96xf32>
    %1058 = arith.addf %1054, %1057 : vector<16x96xf32>
    %c5 = arith.constant 5 : index
    %c0_287 = arith.constant 0 : index
    %1059 = vector.load %arg12[%c5, %c0_287] : memref<6x96xf32, #tpu.memory_space<vmem>>, vector<1x96xf32>
    %1060 = vector.broadcast %1059 : vector<1x96xf32> to vector<16x96xf32>
    %1061 = arith.addf %1058, %1060 : vector<16x96xf32>
    %c5_288 = arith.constant 5 : index
    %c0_289 = arith.constant 0 : index
    %c0_290 = arith.constant 0 : index
    %1062 = vector.load %arg11[%c5_288, %c0_289, %c0_290] : memref<6x32x96xf32, #tpu.memory_space<vmem>>, vector<1x32x96xf32>
    %1063 = vector.shape_cast %1062 : vector<1x32x96xf32> to vector<32x96xf32>
    %c5_291 = arith.constant 5 : index
    %c0_292 = arith.constant 0 : index
    %1064 = vector.load %arg13[%c5_291, %c0_292] : memref<6x32xf32, #tpu.memory_space<vmem>>, vector<1x32xf32>
    %1065 = vector.shape_cast %1064 : vector<1x32xf32> to vector<1x32xf32>
    %1066 = vector.broadcast %1065 : vector<1x32xf32> to vector<2x32xf32>
    %cst_293 = arith.constant 0.000000e+00 : f32
    %1067 = vector.broadcast %cst_293 : f32 to vector<2x32xf32>
    %1068 = vector.extract_strided_slice %1061 {offsets = [14, 0], sizes = [2, 96], strides = [1, 1]} : vector<16x96xf32> to vector<2x96xf32>
    %cst_294 = arith.constant dense<0.000000e+00> : vector<2x96xf32>
    %1069 = tpu.matmul %1067, %1063, %cst_294 {dimension_numbers = #tpu.dot_dimension_numbers<[1], [0], [0], [1], [0, 0, 1, 1], [], []>} : vector<2x32xf32>, vector<32x96xf32>, vector<2x96xf32> -> vector<2x96xf32>
    %1070 = vector.extract_strided_slice %1068 {offsets = [0, 0], sizes = [2, 64], strides = [1, 1]} : vector<2x96xf32> to vector<2x64xf32>
    %1071 = vector.extract_strided_slice %1069 {offsets = [0, 0], sizes = [2, 64], strides = [1, 1]} : vector<2x96xf32> to vector<2x64xf32>
    %1072 = arith.addf %1070, %1071 : vector<2x64xf32>
    %1073 = arith.negf %1072 : vector<2x64xf32>
    %1074 = math.exp %1073 : vector<2x64xf32>
    %cst_295 = arith.constant 1.000000e+00 : f32
    %1075 = vector.broadcast %cst_295 : f32 to vector<2x64xf32>
    %1076 = arith.addf %1075, %1074 : vector<2x64xf32>
    %1077 = arith.divf %1075, %1076 : vector<2x64xf32>
    %1078 = vector.extract_strided_slice %1077 {offsets = [0, 0], sizes = [2, 32], strides = [1, 1]} : vector<2x64xf32> to vector<2x32xf32>
    %1079 = vector.extract_strided_slice %1077 {offsets = [0, 32], sizes = [2, 32], strides = [1, 1]} : vector<2x64xf32> to vector<2x32xf32>
    %1080 = vector.extract_strided_slice %1068 {offsets = [0, 64], sizes = [2, 32], strides = [1, 1]} : vector<2x96xf32> to vector<2x32xf32>
    %1081 = vector.extract_strided_slice %1069 {offsets = [0, 64], sizes = [2, 32], strides = [1, 1]} : vector<2x96xf32> to vector<2x32xf32>
    %1082 = arith.addf %1081, %1066 : vector<2x32xf32>
    %1083 = arith.mulf %1078, %1082 : vector<2x32xf32>
    %1084 = arith.addf %1080, %1083 : vector<2x32xf32>
    %1085 = math.tanh %1084 : vector<2x32xf32>
    %cst_296 = arith.constant 1.000000e+00 : f32
    %1086 = vector.broadcast %cst_296 : f32 to vector<2x32xf32>
    %1087 = arith.subf %1086, %1079 : vector<2x32xf32>
    %1088 = arith.mulf %1087, %1085 : vector<2x32xf32>
    %1089 = arith.mulf %1079, %1067 : vector<2x32xf32>
    %1090 = arith.addf %1088, %1089 : vector<2x32xf32>
    %c14_297 = arith.constant 14 : index
    %c0_298 = arith.constant 0 : index
    %1091 = vector.load %arg35[%c14_297, %c0_298] : memref<16x32xf32, #tpu.memory_space<vmem>>, vector<2x32xf32>
    tpu.vector_store %arg35[%c14_297, %c0_298], %1090 {strides = array<i32>} : memref<16x32xf32, #tpu.memory_space<vmem>>, vector<2x32xf32>,
    %1092 = vector.extract_strided_slice %1061 {offsets = [12, 0], sizes = [2, 96], strides = [1, 1]} : vector<16x96xf32> to vector<2x96xf32>
    %cst_299 = arith.constant dense<0.000000e+00> : vector<2x96xf32>
    %1093 = tpu.matmul %1090, %1063, %cst_299 {dimension_numbers = #tpu.dot_dimension_numbers<[1], [0], [0], [1], [0, 0, 1, 1], [], []>} : vector<2x32xf32>, vector<32x96xf32>, vector<2x96xf32> -> vector<2x96xf32>
    %1094 = vector.extract_strided_slice %1092 {offsets = [0, 0], sizes = [2, 64], strides = [1, 1]} : vector<2x96xf32> to vector<2x64xf32>
    %1095 = vector.extract_strided_slice %1093 {offsets = [0, 0], sizes = [2, 64], strides = [1, 1]} : vector<2x96xf32> to vector<2x64xf32>
    %1096 = arith.addf %1094, %1095 : vector<2x64xf32>
    %1097 = arith.negf %1096 : vector<2x64xf32>
    %1098 = math.exp %1097 : vector<2x64xf32>
    %cst_300 = arith.constant 1.000000e+00 : f32
    %1099 = vector.broadcast %cst_300 : f32 to vector<2x64xf32>
    %1100 = arith.addf %1099, %1098 : vector<2x64xf32>
    %1101 = arith.divf %1099, %1100 : vector<2x64xf32>
    %1102 = vector.extract_strided_slice %1101 {offsets = [0, 0], sizes = [2, 32], strides = [1, 1]} : vector<2x64xf32> to vector<2x32xf32>
    %1103 = vector.extract_strided_slice %1101 {offsets = [0, 32], sizes = [2, 32], strides = [1, 1]} : vector<2x64xf32> to vector<2x32xf32>
    %1104 = vector.extract_strided_slice %1092 {offsets = [0, 64], sizes = [2, 32], strides = [1, 1]} : vector<2x96xf32> to vector<2x32xf32>
    %1105 = vector.extract_strided_slice %1093 {offsets = [0, 64], sizes = [2, 32], strides = [1, 1]} : vector<2x96xf32> to vector<2x32xf32>
    %1106 = arith.addf %1105, %1066 : vector<2x32xf32>
    %1107 = arith.mulf %1102, %1106 : vector<2x32xf32>
    %1108 = arith.addf %1104, %1107 : vector<2x32xf32>
    %1109 = math.tanh %1108 : vector<2x32xf32>
    %cst_301 = arith.constant 1.000000e+00 : f32
    %1110 = vector.broadcast %cst_301 : f32 to vector<2x32xf32>
    %1111 = arith.subf %1110, %1103 : vector<2x32xf32>
    %1112 = arith.mulf %1111, %1109 : vector<2x32xf32>
    %1113 = arith.mulf %1103, %1090 : vector<2x32xf32>
    %1114 = arith.addf %1112, %1113 : vector<2x32xf32>
    %c12_302 = arith.constant 12 : index
    %c0_303 = arith.constant 0 : index
    %1115 = vector.load %arg35[%c12_302, %c0_303] : memref<16x32xf32, #tpu.memory_space<vmem>>, vector<2x32xf32>
    tpu.vector_store %arg35[%c12_302, %c0_303], %1114 {strides = array<i32>} : memref<16x32xf32, #tpu.memory_space<vmem>>, vector<2x32xf32>,
    %1116 = vector.extract_strided_slice %1061 {offsets = [10, 0], sizes = [2, 96], strides = [1, 1]} : vector<16x96xf32> to vector<2x96xf32>
    %cst_304 = arith.constant dense<0.000000e+00> : vector<2x96xf32>
    %1117 = tpu.matmul %1114, %1063, %cst_304 {dimension_numbers = #tpu.dot_dimension_numbers<[1], [0], [0], [1], [0, 0, 1, 1], [], []>} : vector<2x32xf32>, vector<32x96xf32>, vector<2x96xf32> -> vector<2x96xf32>
    %1118 = vector.extract_strided_slice %1116 {offsets = [0, 0], sizes = [2, 64], strides = [1, 1]} : vector<2x96xf32> to vector<2x64xf32>
    %1119 = vector.extract_strided_slice %1117 {offsets = [0, 0], sizes = [2, 64], strides = [1, 1]} : vector<2x96xf32> to vector<2x64xf32>
    %1120 = arith.addf %1118, %1119 : vector<2x64xf32>
    %1121 = arith.negf %1120 : vector<2x64xf32>
    %1122 = math.exp %1121 : vector<2x64xf32>
    %cst_305 = arith.constant 1.000000e+00 : f32
    %1123 = vector.broadcast %cst_305 : f32 to vector<2x64xf32>
    %1124 = arith.addf %1123, %1122 : vector<2x64xf32>
    %1125 = arith.divf %1123, %1124 : vector<2x64xf32>
    %1126 = vector.extract_strided_slice %1125 {offsets = [0, 0], sizes = [2, 32], strides = [1, 1]} : vector<2x64xf32> to vector<2x32xf32>
    %1127 = vector.extract_strided_slice %1125 {offsets = [0, 32], sizes = [2, 32], strides = [1, 1]} : vector<2x64xf32> to vector<2x32xf32>
    %1128 = vector.extract_strided_slice %1116 {offsets = [0, 64], sizes = [2, 32], strides = [1, 1]} : vector<2x96xf32> to vector<2x32xf32>
    %1129 = vector.extract_strided_slice %1117 {offsets = [0, 64], sizes = [2, 32], strides = [1, 1]} : vector<2x96xf32> to vector<2x32xf32>
    %1130 = arith.addf %1129, %1066 : vector<2x32xf32>
    %1131 = arith.mulf %1126, %1130 : vector<2x32xf32>
    %1132 = arith.addf %1128, %1131 : vector<2x32xf32>
    %1133 = math.tanh %1132 : vector<2x32xf32>
    %cst_306 = arith.constant 1.000000e+00 : f32
    %1134 = vector.broadcast %cst_306 : f32 to vector<2x32xf32>
    %1135 = arith.subf %1134, %1127 : vector<2x32xf32>
    %1136 = arith.mulf %1135, %1133 : vector<2x32xf32>
    %1137 = arith.mulf %1127, %1114 : vector<2x32xf32>
    %1138 = arith.addf %1136, %1137 : vector<2x32xf32>
    %c10_307 = arith.constant 10 : index
    %c0_308 = arith.constant 0 : index
    %1139 = vector.load %arg35[%c10_307, %c0_308] : memref<16x32xf32, #tpu.memory_space<vmem>>, vector<2x32xf32>
    tpu.vector_store %arg35[%c10_307, %c0_308], %1138 {strides = array<i32>} : memref<16x32xf32, #tpu.memory_space<vmem>>, vector<2x32xf32>,
    %1140 = vector.extract_strided_slice %1061 {offsets = [8, 0], sizes = [2, 96], strides = [1, 1]} : vector<16x96xf32> to vector<2x96xf32>
    %cst_309 = arith.constant dense<0.000000e+00> : vector<2x96xf32>
    %1141 = tpu.matmul %1138, %1063, %cst_309 {dimension_numbers = #tpu.dot_dimension_numbers<[1], [0], [0], [1], [0, 0, 1, 1], [], []>} : vector<2x32xf32>, vector<32x96xf32>, vector<2x96xf32> -> vector<2x96xf32>
    %1142 = vector.extract_strided_slice %1140 {offsets = [0, 0], sizes = [2, 64], strides = [1, 1]} : vector<2x96xf32> to vector<2x64xf32>
    %1143 = vector.extract_strided_slice %1141 {offsets = [0, 0], sizes = [2, 64], strides = [1, 1]} : vector<2x96xf32> to vector<2x64xf32>
    %1144 = arith.addf %1142, %1143 : vector<2x64xf32>
    %1145 = arith.negf %1144 : vector<2x64xf32>
    %1146 = math.exp %1145 : vector<2x64xf32>
    %cst_310 = arith.constant 1.000000e+00 : f32
    %1147 = vector.broadcast %cst_310 : f32 to vector<2x64xf32>
    %1148 = arith.addf %1147, %1146 : vector<2x64xf32>
    %1149 = arith.divf %1147, %1148 : vector<2x64xf32>
    %1150 = vector.extract_strided_slice %1149 {offsets = [0, 0], sizes = [2, 32], strides = [1, 1]} : vector<2x64xf32> to vector<2x32xf32>
    %1151 = vector.extract_strided_slice %1149 {offsets = [0, 32], sizes = [2, 32], strides = [1, 1]} : vector<2x64xf32> to vector<2x32xf32>
    %1152 = vector.extract_strided_slice %1140 {offsets = [0, 64], sizes = [2, 32], strides = [1, 1]} : vector<2x96xf32> to vector<2x32xf32>
    %1153 = vector.extract_strided_slice %1141 {offsets = [0, 64], sizes = [2, 32], strides = [1, 1]} : vector<2x96xf32> to vector<2x32xf32>
    %1154 = arith.addf %1153, %1066 : vector<2x32xf32>
    %1155 = arith.mulf %1150, %1154 : vector<2x32xf32>
    %1156 = arith.addf %1152, %1155 : vector<2x32xf32>
    %1157 = math.tanh %1156 : vector<2x32xf32>
    %cst_311 = arith.constant 1.000000e+00 : f32
    %1158 = vector.broadcast %cst_311 : f32 to vector<2x32xf32>
    %1159 = arith.subf %1158, %1151 : vector<2x32xf32>
    %1160 = arith.mulf %1159, %1157 : vector<2x32xf32>
    %1161 = arith.mulf %1151, %1138 : vector<2x32xf32>
    %1162 = arith.addf %1160, %1161 : vector<2x32xf32>
    %c8_312 = arith.constant 8 : index
    %c0_313 = arith.constant 0 : index
    %1163 = vector.load %arg35[%c8_312, %c0_313] : memref<16x32xf32, #tpu.memory_space<vmem>>, vector<2x32xf32>
    tpu.vector_store %arg35[%c8_312, %c0_313], %1162 {strides = array<i32>} : memref<16x32xf32, #tpu.memory_space<vmem>>, vector<2x32xf32>,
    %1164 = vector.extract_strided_slice %1061 {offsets = [6, 0], sizes = [2, 96], strides = [1, 1]} : vector<16x96xf32> to vector<2x96xf32>
    %cst_314 = arith.constant dense<0.000000e+00> : vector<2x96xf32>
    %1165 = tpu.matmul %1162, %1063, %cst_314 {dimension_numbers = #tpu.dot_dimension_numbers<[1], [0], [0], [1], [0, 0, 1, 1], [], []>} : vector<2x32xf32>, vector<32x96xf32>, vector<2x96xf32> -> vector<2x96xf32>
    %1166 = vector.extract_strided_slice %1164 {offsets = [0, 0], sizes = [2, 64], strides = [1, 1]} : vector<2x96xf32> to vector<2x64xf32>
    %1167 = vector.extract_strided_slice %1165 {offsets = [0, 0], sizes = [2, 64], strides = [1, 1]} : vector<2x96xf32> to vector<2x64xf32>
    %1168 = arith.addf %1166, %1167 : vector<2x64xf32>
    %1169 = arith.negf %1168 : vector<2x64xf32>
    %1170 = math.exp %1169 : vector<2x64xf32>
    %cst_315 = arith.constant 1.000000e+00 : f32
    %1171 = vector.broadcast %cst_315 : f32 to vector<2x64xf32>
    %1172 = arith.addf %1171, %1170 : vector<2x64xf32>
    %1173 = arith.divf %1171, %1172 : vector<2x64xf32>
    %1174 = vector.extract_strided_slice %1173 {offsets = [0, 0], sizes = [2, 32], strides = [1, 1]} : vector<2x64xf32> to vector<2x32xf32>
    %1175 = vector.extract_strided_slice %1173 {offsets = [0, 32], sizes = [2, 32], strides = [1, 1]} : vector<2x64xf32> to vector<2x32xf32>
    %1176 = vector.extract_strided_slice %1164 {offsets = [0, 64], sizes = [2, 32], strides = [1, 1]} : vector<2x96xf32> to vector<2x32xf32>
    %1177 = vector.extract_strided_slice %1165 {offsets = [0, 64], sizes = [2, 32], strides = [1, 1]} : vector<2x96xf32> to vector<2x32xf32>
    %1178 = arith.addf %1177, %1066 : vector<2x32xf32>
    %1179 = arith.mulf %1174, %1178 : vector<2x32xf32>
    %1180 = arith.addf %1176, %1179 : vector<2x32xf32>
    %1181 = math.tanh %1180 : vector<2x32xf32>
    %cst_316 = arith.constant 1.000000e+00 : f32
    %1182 = vector.broadcast %cst_316 : f32 to vector<2x32xf32>
    %1183 = arith.subf %1182, %1175 : vector<2x32xf32>
    %1184 = arith.mulf %1183, %1181 : vector<2x32xf32>
    %1185 = arith.mulf %1175, %1162 : vector<2x32xf32>
    %1186 = arith.addf %1184, %1185 : vector<2x32xf32>
    %c6_317 = arith.constant 6 : index
    %c0_318 = arith.constant 0 : index
    %1187 = vector.load %arg35[%c6_317, %c0_318] : memref<16x32xf32, #tpu.memory_space<vmem>>, vector<2x32xf32>
    tpu.vector_store %arg35[%c6_317, %c0_318], %1186 {strides = array<i32>} : memref<16x32xf32, #tpu.memory_space<vmem>>, vector<2x32xf32>,
    %1188 = vector.extract_strided_slice %1061 {offsets = [4, 0], sizes = [2, 96], strides = [1, 1]} : vector<16x96xf32> to vector<2x96xf32>
    %cst_319 = arith.constant dense<0.000000e+00> : vector<2x96xf32>
    %1189 = tpu.matmul %1186, %1063, %cst_319 {dimension_numbers = #tpu.dot_dimension_numbers<[1], [0], [0], [1], [0, 0, 1, 1], [], []>} : vector<2x32xf32>, vector<32x96xf32>, vector<2x96xf32> -> vector<2x96xf32>
    %1190 = vector.extract_strided_slice %1188 {offsets = [0, 0], sizes = [2, 64], strides = [1, 1]} : vector<2x96xf32> to vector<2x64xf32>
    %1191 = vector.extract_strided_slice %1189 {offsets = [0, 0], sizes = [2, 64], strides = [1, 1]} : vector<2x96xf32> to vector<2x64xf32>
    %1192 = arith.addf %1190, %1191 : vector<2x64xf32>
    %1193 = arith.negf %1192 : vector<2x64xf32>
    %1194 = math.exp %1193 : vector<2x64xf32>
    %cst_320 = arith.constant 1.000000e+00 : f32
    %1195 = vector.broadcast %cst_320 : f32 to vector<2x64xf32>
    %1196 = arith.addf %1195, %1194 : vector<2x64xf32>
    %1197 = arith.divf %1195, %1196 : vector<2x64xf32>
    %1198 = vector.extract_strided_slice %1197 {offsets = [0, 0], sizes = [2, 32], strides = [1, 1]} : vector<2x64xf32> to vector<2x32xf32>
    %1199 = vector.extract_strided_slice %1197 {offsets = [0, 32], sizes = [2, 32], strides = [1, 1]} : vector<2x64xf32> to vector<2x32xf32>
    %1200 = vector.extract_strided_slice %1188 {offsets = [0, 64], sizes = [2, 32], strides = [1, 1]} : vector<2x96xf32> to vector<2x32xf32>
    %1201 = vector.extract_strided_slice %1189 {offsets = [0, 64], sizes = [2, 32], strides = [1, 1]} : vector<2x96xf32> to vector<2x32xf32>
    %1202 = arith.addf %1201, %1066 : vector<2x32xf32>
    %1203 = arith.mulf %1198, %1202 : vector<2x32xf32>
    %1204 = arith.addf %1200, %1203 : vector<2x32xf32>
    %1205 = math.tanh %1204 : vector<2x32xf32>
    %cst_321 = arith.constant 1.000000e+00 : f32
    %1206 = vector.broadcast %cst_321 : f32 to vector<2x32xf32>
    %1207 = arith.subf %1206, %1199 : vector<2x32xf32>
    %1208 = arith.mulf %1207, %1205 : vector<2x32xf32>
    %1209 = arith.mulf %1199, %1186 : vector<2x32xf32>
    %1210 = arith.addf %1208, %1209 : vector<2x32xf32>
    %c4_322 = arith.constant 4 : index
    %c0_323 = arith.constant 0 : index
    %1211 = vector.load %arg35[%c4_322, %c0_323] : memref<16x32xf32, #tpu.memory_space<vmem>>, vector<2x32xf32>
    tpu.vector_store %arg35[%c4_322, %c0_323], %1210 {strides = array<i32>} : memref<16x32xf32, #tpu.memory_space<vmem>>, vector<2x32xf32>,
    %1212 = vector.extract_strided_slice %1061 {offsets = [2, 0], sizes = [2, 96], strides = [1, 1]} : vector<16x96xf32> to vector<2x96xf32>
    %cst_324 = arith.constant dense<0.000000e+00> : vector<2x96xf32>
    %1213 = tpu.matmul %1210, %1063, %cst_324 {dimension_numbers = #tpu.dot_dimension_numbers<[1], [0], [0], [1], [0, 0, 1, 1], [], []>} : vector<2x32xf32>, vector<32x96xf32>, vector<2x96xf32> -> vector<2x96xf32>
    %1214 = vector.extract_strided_slice %1212 {offsets = [0, 0], sizes = [2, 64], strides = [1, 1]} : vector<2x96xf32> to vector<2x64xf32>
    %1215 = vector.extract_strided_slice %1213 {offsets = [0, 0], sizes = [2, 64], strides = [1, 1]} : vector<2x96xf32> to vector<2x64xf32>
    %1216 = arith.addf %1214, %1215 : vector<2x64xf32>
    %1217 = arith.negf %1216 : vector<2x64xf32>
    %1218 = math.exp %1217 : vector<2x64xf32>
    %cst_325 = arith.constant 1.000000e+00 : f32
    %1219 = vector.broadcast %cst_325 : f32 to vector<2x64xf32>
    %1220 = arith.addf %1219, %1218 : vector<2x64xf32>
    %1221 = arith.divf %1219, %1220 : vector<2x64xf32>
    %1222 = vector.extract_strided_slice %1221 {offsets = [0, 0], sizes = [2, 32], strides = [1, 1]} : vector<2x64xf32> to vector<2x32xf32>
    %1223 = vector.extract_strided_slice %1221 {offsets = [0, 32], sizes = [2, 32], strides = [1, 1]} : vector<2x64xf32> to vector<2x32xf32>
    %1224 = vector.extract_strided_slice %1212 {offsets = [0, 64], sizes = [2, 32], strides = [1, 1]} : vector<2x96xf32> to vector<2x32xf32>
    %1225 = vector.extract_strided_slice %1213 {offsets = [0, 64], sizes = [2, 32], strides = [1, 1]} : vector<2x96xf32> to vector<2x32xf32>
    %1226 = arith.addf %1225, %1066 : vector<2x32xf32>
    %1227 = arith.mulf %1222, %1226 : vector<2x32xf32>
    %1228 = arith.addf %1224, %1227 : vector<2x32xf32>
    %1229 = math.tanh %1228 : vector<2x32xf32>
    %cst_326 = arith.constant 1.000000e+00 : f32
    %1230 = vector.broadcast %cst_326 : f32 to vector<2x32xf32>
    %1231 = arith.subf %1230, %1223 : vector<2x32xf32>
    %1232 = arith.mulf %1231, %1229 : vector<2x32xf32>
    %1233 = arith.mulf %1223, %1210 : vector<2x32xf32>
    %1234 = arith.addf %1232, %1233 : vector<2x32xf32>
    %c2_327 = arith.constant 2 : index
    %c0_328 = arith.constant 0 : index
    %1235 = vector.load %arg35[%c2_327, %c0_328] : memref<16x32xf32, #tpu.memory_space<vmem>>, vector<2x32xf32>
    tpu.vector_store %arg35[%c2_327, %c0_328], %1234 {strides = array<i32>} : memref<16x32xf32, #tpu.memory_space<vmem>>, vector<2x32xf32>,
    %1236 = vector.extract_strided_slice %1061 {offsets = [0, 0], sizes = [2, 96], strides = [1, 1]} : vector<16x96xf32> to vector<2x96xf32>
    %cst_329 = arith.constant dense<0.000000e+00> : vector<2x96xf32>
    %1237 = tpu.matmul %1234, %1063, %cst_329 {dimension_numbers = #tpu.dot_dimension_numbers<[1], [0], [0], [1], [0, 0, 1, 1], [], []>} : vector<2x32xf32>, vector<32x96xf32>, vector<2x96xf32> -> vector<2x96xf32>
    %1238 = vector.extract_strided_slice %1236 {offsets = [0, 0], sizes = [2, 64], strides = [1, 1]} : vector<2x96xf32> to vector<2x64xf32>
    %1239 = vector.extract_strided_slice %1237 {offsets = [0, 0], sizes = [2, 64], strides = [1, 1]} : vector<2x96xf32> to vector<2x64xf32>
    %1240 = arith.addf %1238, %1239 : vector<2x64xf32>
    %1241 = arith.negf %1240 : vector<2x64xf32>
    %1242 = math.exp %1241 : vector<2x64xf32>
    %cst_330 = arith.constant 1.000000e+00 : f32
    %1243 = vector.broadcast %cst_330 : f32 to vector<2x64xf32>
    %1244 = arith.addf %1243, %1242 : vector<2x64xf32>
    %1245 = arith.divf %1243, %1244 : vector<2x64xf32>
    %1246 = vector.extract_strided_slice %1245 {offsets = [0, 0], sizes = [2, 32], strides = [1, 1]} : vector<2x64xf32> to vector<2x32xf32>
    %1247 = vector.extract_strided_slice %1245 {offsets = [0, 32], sizes = [2, 32], strides = [1, 1]} : vector<2x64xf32> to vector<2x32xf32>
    %1248 = vector.extract_strided_slice %1236 {offsets = [0, 64], sizes = [2, 32], strides = [1, 1]} : vector<2x96xf32> to vector<2x32xf32>
    %1249 = vector.extract_strided_slice %1237 {offsets = [0, 64], sizes = [2, 32], strides = [1, 1]} : vector<2x96xf32> to vector<2x32xf32>
    %1250 = arith.addf %1249, %1066 : vector<2x32xf32>
    %1251 = arith.mulf %1246, %1250 : vector<2x32xf32>
    %1252 = arith.addf %1248, %1251 : vector<2x32xf32>
    %1253 = math.tanh %1252 : vector<2x32xf32>
    %cst_331 = arith.constant 1.000000e+00 : f32
    %1254 = vector.broadcast %cst_331 : f32 to vector<2x32xf32>
    %1255 = arith.subf %1254, %1247 : vector<2x32xf32>
    %1256 = arith.mulf %1255, %1253 : vector<2x32xf32>
    %1257 = arith.mulf %1247, %1234 : vector<2x32xf32>
    %1258 = arith.addf %1256, %1257 : vector<2x32xf32>
    %c0_332 = arith.constant 0 : index
    %c0_333 = arith.constant 0 : index
    %1259 = vector.load %arg35[%c0_332, %c0_333] : memref<16x32xf32, #tpu.memory_space<vmem>>, vector<2x32xf32>
    tpu.vector_store %arg35[%c0_332, %c0_333], %1258 {strides = array<i32>} : memref<16x32xf32, #tpu.memory_space<vmem>>, vector<2x32xf32>,
    %c0_334 = arith.constant 0 : index
    %c0_335 = arith.constant 0 : index
    %1260 = vector.load %arg34[%c0_334, %c0_335] : memref<16x32xf32, #tpu.memory_space<vmem>>, vector<16x32xf32>
    %c0_336 = arith.constant 0 : index
    %c0_337 = arith.constant 0 : index
    %1261 = vector.load %arg14[%c0_336, %c0_337] : memref<32x32xf32, #tpu.memory_space<vmem>>, vector<32x32xf32>
    %cst_338 = arith.constant dense<0.000000e+00> : vector<16x32xf32>
    %1262 = tpu.matmul %1260, %1261, %cst_338 {dimension_numbers = #tpu.dot_dimension_numbers<[1], [0], [0], [1], [0, 0, 1, 1], [], []>} : vector<16x32xf32>, vector<32x32xf32>, vector<16x32xf32> -> vector<16x32xf32>
    %c0_339 = arith.constant 0 : index
    %c0_340 = arith.constant 0 : index
    %1263 = vector.load %arg35[%c0_339, %c0_340] : memref<16x32xf32, #tpu.memory_space<vmem>>, vector<16x32xf32>
    %c0_341 = arith.constant 0 : index
    %c0_342 = arith.constant 0 : index
    %1264 = vector.load %arg15[%c0_341, %c0_342] : memref<32x32xf32, #tpu.memory_space<vmem>>, vector<32x32xf32>
    %cst_343 = arith.constant dense<0.000000e+00> : vector<16x32xf32>
    %1265 = tpu.matmul %1263, %1264, %cst_343 {dimension_numbers = #tpu.dot_dimension_numbers<[1], [0], [0], [1], [0, 0, 1, 1], [], []>} : vector<16x32xf32>, vector<32x32xf32>, vector<16x32xf32> -> vector<16x32xf32>
    %1266 = arith.addf %1262, %1265 : vector<16x32xf32>
    %c0_344 = arith.constant 0 : index
    %c0_345 = arith.constant 0 : index
    %1267 = vector.load %arg16[%c0_344, %c0_345] : memref<1x32xf32, #tpu.memory_space<vmem>>, vector<1x32xf32>
    %1268 = vector.broadcast %1267 : vector<1x32xf32> to vector<16x32xf32>
    %1269 = arith.addf %1266, %1268 : vector<16x32xf32>
    %1270 = tpu.iota {dimensions = array<i32: 1>} : vector<16x16xi32>
    %c0_346 = arith.constant 0 : index
    %c0_347 = arith.constant 0 : index
    %1271 = vector.load %arg2[%c0_346, %c0_347] : memref<16x1xi32, #tpu.memory_space<vmem>>, vector<16x1xi32>
    %1272 = vector.broadcast %1271 : vector<16x1xi32> to vector<16x16xi32>
    %1273 = arith.cmpi eq, %1270, %1272 : vector<16x16xi32>
    %1274 = arith.extui %1273 : vector<16x16xi1> to vector<16x16xi32>
    %1275 = arith.sitofp %1274 : vector<16x16xi32> to vector<16x16xf32>
    %cst_348 = arith.constant dense<0.000000e+00> : vector<16x32xf32>
    %1276 = tpu.matmul %1275, %1269, %cst_348 {dimension_numbers = #tpu.dot_dimension_numbers<[1], [0], [0], [1], [0, 0, 1, 1], [], []>} : vector<16x16xf32>, vector<16x32xf32>, vector<16x32xf32> -> vector<16x32xf32>
    %1277 = tpu.iota {dimensions = array<i32: 1>} : vector<24x16xi32>
    %c0_349 = arith.constant 0 : index
    %c0_350 = arith.constant 0 : index
    %1278 = vector.load %arg3[%c0_349, %c0_350] : memref<24x1xi32, #tpu.memory_space<vmem>>, vector<24x1xi32>
    %1279 = vector.broadcast %1278 : vector<24x1xi32> to vector<24x16xi32>
    %1280 = arith.cmpi eq, %1277, %1279 : vector<24x16xi32>
    %1281 = arith.extui %1280 : vector<24x16xi1> to vector<24x16xi32>
    %1282 = arith.sitofp %1281 : vector<24x16xi32> to vector<24x16xf32>
    %1283 = tpu.iota {dimensions = array<i32: 0>} : vector<16x24xi32>
    %c0_351 = arith.constant 0 : index
    %c0_352 = arith.constant 0 : index
    %1284 = vector.load %arg4[%c0_351, %c0_352] : memref<1x24xi32, #tpu.memory_space<vmem>>, vector<1x24xi32>
    %1285 = vector.broadcast %1284 : vector<1x24xi32> to vector<16x24xi32>
    %1286 = arith.cmpi eq, %1283, %1285 : vector<16x24xi32>
    %1287 = arith.extui %1286 : vector<16x24xi1> to vector<16x24xi32>
    %1288 = arith.sitofp %1287 : vector<16x24xi32> to vector<16x24xf32>
    %c0_353 = arith.constant 0 : index
    %c0_354 = arith.constant 0 : index
    %1289 = vector.load %arg18[%c0_353, %c0_354] : memref<32x32xf32, #tpu.memory_space<vmem>>, vector<32x32xf32>
    %cst_355 = arith.constant dense<0.000000e+00> : vector<24x32xf32>
    %1290 = tpu.matmul %15, %1289, %cst_355 {dimension_numbers = #tpu.dot_dimension_numbers<[1], [0], [0], [1], [0, 0, 1, 1], [], []>} : vector<24x32xf32>, vector<32x32xf32>, vector<24x32xf32> -> vector<24x32xf32>
    %c0_356 = arith.constant 0 : index
    %c0_357 = arith.constant 0 : index
    %1291 = vector.load %arg19[%c0_356, %c0_357] : memref<1x32xf32, #tpu.memory_space<vmem>>, vector<1x32xf32>
    %1292 = vector.broadcast %1291 : vector<1x32xf32> to vector<24x32xf32>
    %1293 = arith.addf %1290, %1292 : vector<24x32xf32>
    %c0_358 = arith.constant 0 : index
    %c0_359 = arith.constant 0 : index
    %1294 = vector.load %arg22[%c0_358, %c0_359] : memref<1x96xf32, #tpu.memory_space<vmem>>, vector<1x96xf32>
    %1295 = vector.shape_cast %1294 : vector<1x96xf32> to vector<1x96xf32>
    %1296 = vector.broadcast %1295 : vector<1x96xf32> to vector<16x96xf32>
    %c0_360 = arith.constant 0 : index
    %c0_361 = arith.constant 0 : index
    %1297 = vector.load %arg23[%c0_360, %c0_361] : memref<1x32xf32, #tpu.memory_space<vmem>>, vector<1x32xf32>
    %1298 = vector.shape_cast %1297 : vector<1x32xf32> to vector<1x32xf32>
    %1299 = vector.broadcast %1298 : vector<1x32xf32> to vector<16x32xf32>
    %c0_362 = arith.constant 0 : index
    %c0_363 = arith.constant 0 : index
    %1300 = vector.load %arg20[%c0_362, %c0_363] : memref<32x96xf32, #tpu.memory_space<vmem>>, vector<32x96xf32>
    %c0_364 = arith.constant 0 : index
    %c0_365 = arith.constant 0 : index
    %1301 = vector.load %arg21[%c0_364, %c0_365] : memref<32x96xf32, #tpu.memory_space<vmem>>, vector<32x96xf32>
    %cst_366 = arith.constant dense<0.000000e+00> : vector<24x32xf32>
    %1302 = tpu.matmul %1282, %1276, %cst_366 {dimension_numbers = #tpu.dot_dimension_numbers<[1], [0], [0], [1], [0, 0, 1, 1], [], []>} : vector<24x16xf32>, vector<16x32xf32>, vector<24x32xf32> -> vector<24x32xf32>
    %c0_367 = arith.constant 0 : index
    %c0_368 = arith.constant 0 : index
    %1303 = vector.load %arg17[%c0_367, %c0_368] : memref<32x32xf32, #tpu.memory_space<vmem>>, vector<32x32xf32>
    %cst_369 = arith.constant dense<0.000000e+00> : vector<24x32xf32>
    %1304 = tpu.matmul %1302, %1303, %cst_369 {dimension_numbers = #tpu.dot_dimension_numbers<[1], [0], [0], [1], [0, 0, 1, 1], [], []>} : vector<24x32xf32>, vector<32x32xf32>, vector<24x32xf32> -> vector<24x32xf32>
    %1305 = arith.addf %1304, %1293 : vector<24x32xf32>
    %cst_370 = arith.constant dense<0.000000e+00> : vector<16x32xf32>
    %1306 = tpu.matmul %1288, %1305, %cst_370 {dimension_numbers = #tpu.dot_dimension_numbers<[1], [0], [0], [1], [0, 0, 1, 1], [], []>} : vector<16x24xf32>, vector<24x32xf32>, vector<16x32xf32> -> vector<16x32xf32>
    %cst_371 = arith.constant dense<0.000000e+00> : vector<16x96xf32>
    %1307 = tpu.matmul %1306, %1300, %cst_371 {dimension_numbers = #tpu.dot_dimension_numbers<[1], [0], [0], [1], [0, 0, 1, 1], [], []>} : vector<16x32xf32>, vector<32x96xf32>, vector<16x96xf32> -> vector<16x96xf32>
    %1308 = arith.addf %1307, %1296 : vector<16x96xf32>
    %cst_372 = arith.constant dense<0.000000e+00> : vector<16x96xf32>
    %1309 = tpu.matmul %1276, %1301, %cst_372 {dimension_numbers = #tpu.dot_dimension_numbers<[1], [0], [0], [1], [0, 0, 1, 1], [], []>} : vector<16x32xf32>, vector<32x96xf32>, vector<16x96xf32> -> vector<16x96xf32>
    %1310 = vector.extract_strided_slice %1308 {offsets = [0, 0], sizes = [16, 64], strides = [1, 1]} : vector<16x96xf32> to vector<16x64xf32>
    %1311 = vector.extract_strided_slice %1309 {offsets = [0, 0], sizes = [16, 64], strides = [1, 1]} : vector<16x96xf32> to vector<16x64xf32>
    %1312 = arith.addf %1310, %1311 : vector<16x64xf32>
    %1313 = arith.negf %1312 : vector<16x64xf32>
    %1314 = math.exp %1313 : vector<16x64xf32>
    %cst_373 = arith.constant 1.000000e+00 : f32
    %1315 = vector.broadcast %cst_373 : f32 to vector<16x64xf32>
    %1316 = arith.addf %1315, %1314 : vector<16x64xf32>
    %1317 = arith.divf %1315, %1316 : vector<16x64xf32>
    %1318 = vector.extract_strided_slice %1317 {offsets = [0, 0], sizes = [16, 32], strides = [1, 1]} : vector<16x64xf32> to vector<16x32xf32>
    %1319 = vector.extract_strided_slice %1317 {offsets = [0, 32], sizes = [16, 32], strides = [1, 1]} : vector<16x64xf32> to vector<16x32xf32>
    %1320 = vector.extract_strided_slice %1308 {offsets = [0, 64], sizes = [16, 32], strides = [1, 1]} : vector<16x96xf32> to vector<16x32xf32>
    %1321 = vector.extract_strided_slice %1309 {offsets = [0, 64], sizes = [16, 32], strides = [1, 1]} : vector<16x96xf32> to vector<16x32xf32>
    %1322 = arith.addf %1321, %1299 : vector<16x32xf32>
    %1323 = arith.mulf %1318, %1322 : vector<16x32xf32>
    %1324 = arith.addf %1320, %1323 : vector<16x32xf32>
    %1325 = math.tanh %1324 : vector<16x32xf32>
    %cst_374 = arith.constant 1.000000e+00 : f32
    %1326 = vector.broadcast %cst_374 : f32 to vector<16x32xf32>
    %1327 = arith.subf %1326, %1319 : vector<16x32xf32>
    %1328 = arith.mulf %1327, %1325 : vector<16x32xf32>
    %1329 = arith.mulf %1319, %1276 : vector<16x32xf32>
    %1330 = arith.addf %1328, %1329 : vector<16x32xf32>
    %cst_375 = arith.constant dense<0.000000e+00> : vector<24x32xf32>
    %1331 = tpu.matmul %1282, %1330, %cst_375 {dimension_numbers = #tpu.dot_dimension_numbers<[1], [0], [0], [1], [0, 0, 1, 1], [], []>} : vector<24x16xf32>, vector<16x32xf32>, vector<24x32xf32> -> vector<24x32xf32>
    %c0_376 = arith.constant 0 : index
    %c0_377 = arith.constant 0 : index
    %1332 = vector.load %arg17[%c0_376, %c0_377] : memref<32x32xf32, #tpu.memory_space<vmem>>, vector<32x32xf32>
    %cst_378 = arith.constant dense<0.000000e+00> : vector<24x32xf32>
    %1333 = tpu.matmul %1331, %1332, %cst_378 {dimension_numbers = #tpu.dot_dimension_numbers<[1], [0], [0], [1], [0, 0, 1, 1], [], []>} : vector<24x32xf32>, vector<32x32xf32>, vector<24x32xf32> -> vector<24x32xf32>
    %1334 = arith.addf %1333, %1293 : vector<24x32xf32>
    %cst_379 = arith.constant dense<0.000000e+00> : vector<16x32xf32>
    %1335 = tpu.matmul %1288, %1334, %cst_379 {dimension_numbers = #tpu.dot_dimension_numbers<[1], [0], [0], [1], [0, 0, 1, 1], [], []>} : vector<16x24xf32>, vector<24x32xf32>, vector<16x32xf32> -> vector<16x32xf32>
    %cst_380 = arith.constant dense<0.000000e+00> : vector<16x96xf32>
    %1336 = tpu.matmul %1335, %1300, %cst_380 {dimension_numbers = #tpu.dot_dimension_numbers<[1], [0], [0], [1], [0, 0, 1, 1], [], []>} : vector<16x32xf32>, vector<32x96xf32>, vector<16x96xf32> -> vector<16x96xf32>
    %1337 = arith.addf %1336, %1296 : vector<16x96xf32>
    %cst_381 = arith.constant dense<0.000000e+00> : vector<16x96xf32>
    %1338 = tpu.matmul %1330, %1301, %cst_381 {dimension_numbers = #tpu.dot_dimension_numbers<[1], [0], [0], [1], [0, 0, 1, 1], [], []>} : vector<16x32xf32>, vector<32x96xf32>, vector<16x96xf32> -> vector<16x96xf32>
    %1339 = vector.extract_strided_slice %1337 {offsets = [0, 0], sizes = [16, 64], strides = [1, 1]} : vector<16x96xf32> to vector<16x64xf32>
    %1340 = vector.extract_strided_slice %1338 {offsets = [0, 0], sizes = [16, 64], strides = [1, 1]} : vector<16x96xf32> to vector<16x64xf32>
    %1341 = arith.addf %1339, %1340 : vector<16x64xf32>
    %1342 = arith.negf %1341 : vector<16x64xf32>
    %1343 = math.exp %1342 : vector<16x64xf32>
    %cst_382 = arith.constant 1.000000e+00 : f32
    %1344 = vector.broadcast %cst_382 : f32 to vector<16x64xf32>
    %1345 = arith.addf %1344, %1343 : vector<16x64xf32>
    %1346 = arith.divf %1344, %1345 : vector<16x64xf32>
    %1347 = vector.extract_strided_slice %1346 {offsets = [0, 0], sizes = [16, 32], strides = [1, 1]} : vector<16x64xf32> to vector<16x32xf32>
    %1348 = vector.extract_strided_slice %1346 {offsets = [0, 32], sizes = [16, 32], strides = [1, 1]} : vector<16x64xf32> to vector<16x32xf32>
    %1349 = vector.extract_strided_slice %1337 {offsets = [0, 64], sizes = [16, 32], strides = [1, 1]} : vector<16x96xf32> to vector<16x32xf32>
    %1350 = vector.extract_strided_slice %1338 {offsets = [0, 64], sizes = [16, 32], strides = [1, 1]} : vector<16x96xf32> to vector<16x32xf32>
    %1351 = arith.addf %1350, %1299 : vector<16x32xf32>
    %1352 = arith.mulf %1347, %1351 : vector<16x32xf32>
    %1353 = arith.addf %1349, %1352 : vector<16x32xf32>
    %1354 = math.tanh %1353 : vector<16x32xf32>
    %cst_383 = arith.constant 1.000000e+00 : f32
    %1355 = vector.broadcast %cst_383 : f32 to vector<16x32xf32>
    %1356 = arith.subf %1355, %1348 : vector<16x32xf32>
    %1357 = arith.mulf %1356, %1354 : vector<16x32xf32>
    %1358 = arith.mulf %1348, %1330 : vector<16x32xf32>
    %1359 = arith.addf %1357, %1358 : vector<16x32xf32>
    %cst_384 = arith.constant dense<0.000000e+00> : vector<24x32xf32>
    %1360 = tpu.matmul %1282, %1359, %cst_384 {dimension_numbers = #tpu.dot_dimension_numbers<[1], [0], [0], [1], [0, 0, 1, 1], [], []>} : vector<24x16xf32>, vector<16x32xf32>, vector<24x32xf32> -> vector<24x32xf32>
    %c0_385 = arith.constant 0 : index
    %c0_386 = arith.constant 0 : index
    %1361 = vector.load %arg17[%c0_385, %c0_386] : memref<32x32xf32, #tpu.memory_space<vmem>>, vector<32x32xf32>
    %cst_387 = arith.constant dense<0.000000e+00> : vector<24x32xf32>
    %1362 = tpu.matmul %1360, %1361, %cst_387 {dimension_numbers = #tpu.dot_dimension_numbers<[1], [0], [0], [1], [0, 0, 1, 1], [], []>} : vector<24x32xf32>, vector<32x32xf32>, vector<24x32xf32> -> vector<24x32xf32>
    %1363 = arith.addf %1362, %1293 : vector<24x32xf32>
    %cst_388 = arith.constant dense<0.000000e+00> : vector<16x32xf32>
    %1364 = tpu.matmul %1288, %1363, %cst_388 {dimension_numbers = #tpu.dot_dimension_numbers<[1], [0], [0], [1], [0, 0, 1, 1], [], []>} : vector<16x24xf32>, vector<24x32xf32>, vector<16x32xf32> -> vector<16x32xf32>
    %cst_389 = arith.constant dense<0.000000e+00> : vector<16x96xf32>
    %1365 = tpu.matmul %1364, %1300, %cst_389 {dimension_numbers = #tpu.dot_dimension_numbers<[1], [0], [0], [1], [0, 0, 1, 1], [], []>} : vector<16x32xf32>, vector<32x96xf32>, vector<16x96xf32> -> vector<16x96xf32>
    %1366 = arith.addf %1365, %1296 : vector<16x96xf32>
    %cst_390 = arith.constant dense<0.000000e+00> : vector<16x96xf32>
    %1367 = tpu.matmul %1359, %1301, %cst_390 {dimension_numbers = #tpu.dot_dimension_numbers<[1], [0], [0], [1], [0, 0, 1, 1], [], []>} : vector<16x32xf32>, vector<32x96xf32>, vector<16x96xf32> -> vector<16x96xf32>
    %1368 = vector.extract_strided_slice %1366 {offsets = [0, 0], sizes = [16, 64], strides = [1, 1]} : vector<16x96xf32> to vector<16x64xf32>
    %1369 = vector.extract_strided_slice %1367 {offsets = [0, 0], sizes = [16, 64], strides = [1, 1]} : vector<16x96xf32> to vector<16x64xf32>
    %1370 = arith.addf %1368, %1369 : vector<16x64xf32>
    %1371 = arith.negf %1370 : vector<16x64xf32>
    %1372 = math.exp %1371 : vector<16x64xf32>
    %cst_391 = arith.constant 1.000000e+00 : f32
    %1373 = vector.broadcast %cst_391 : f32 to vector<16x64xf32>
    %1374 = arith.addf %1373, %1372 : vector<16x64xf32>
    %1375 = arith.divf %1373, %1374 : vector<16x64xf32>
    %1376 = vector.extract_strided_slice %1375 {offsets = [0, 0], sizes = [16, 32], strides = [1, 1]} : vector<16x64xf32> to vector<16x32xf32>
    %1377 = vector.extract_strided_slice %1375 {offsets = [0, 32], sizes = [16, 32], strides = [1, 1]} : vector<16x64xf32> to vector<16x32xf32>
    %1378 = vector.extract_strided_slice %1366 {offsets = [0, 64], sizes = [16, 32], strides = [1, 1]} : vector<16x96xf32> to vector<16x32xf32>
    %1379 = vector.extract_strided_slice %1367 {offsets = [0, 64], sizes = [16, 32], strides = [1, 1]} : vector<16x96xf32> to vector<16x32xf32>
    %1380 = arith.addf %1379, %1299 : vector<16x32xf32>
    %1381 = arith.mulf %1376, %1380 : vector<16x32xf32>
    %1382 = arith.addf %1378, %1381 : vector<16x32xf32>
    %1383 = math.tanh %1382 : vector<16x32xf32>
    %cst_392 = arith.constant 1.000000e+00 : f32
    %1384 = vector.broadcast %cst_392 : f32 to vector<16x32xf32>
    %1385 = arith.subf %1384, %1377 : vector<16x32xf32>
    %1386 = arith.mulf %1385, %1383 : vector<16x32xf32>
    %1387 = arith.mulf %1377, %1359 : vector<16x32xf32>
    %1388 = arith.addf %1386, %1387 : vector<16x32xf32>
    %c0_393 = arith.constant 0 : index
    %c0_394 = arith.constant 0 : index
    %1389 = vector.load %arg32[%c0_393, %c0_394] : memref<16x32xf32, #tpu.memory_space<vmem>>, vector<16x32xf32>
    tpu.vector_store %arg32[%c0_393, %c0_394], %1388 {strides = array<i32>} : memref<16x32xf32, #tpu.memory_space<vmem>>, vector<16x32xf32>,
    %c0_395 = arith.constant 0 : index
    %c0_396 = arith.constant 0 : index
    %1390 = vector.load %arg24[%c0_395, %c0_396] : memref<32x64xf32, #tpu.memory_space<vmem>>, vector<32x64xf32>
    %cst_397 = arith.constant dense<0.000000e+00> : vector<16x64xf32>
    %1391 = tpu.matmul %1388, %1390, %cst_397 {dimension_numbers = #tpu.dot_dimension_numbers<[1], [0], [0], [1], [0, 0, 1, 1], [], []>} : vector<16x32xf32>, vector<32x64xf32>, vector<16x64xf32> -> vector<16x64xf32>
    %c0_398 = arith.constant 0 : index
    %c0_399 = arith.constant 0 : index
    %1392 = vector.load %arg25[%c0_398, %c0_399] : memref<1x64xf32, #tpu.memory_space<vmem>>, vector<1x64xf32>
    %1393 = vector.broadcast %1392 : vector<1x64xf32> to vector<16x64xf32>
    %1394 = arith.addf %1391, %1393 : vector<16x64xf32>
    %1395 = arith.negf %1394 : vector<16x64xf32>
    %1396 = math.exp %1395 : vector<16x64xf32>
    %cst_400 = arith.constant 1.000000e+00 : f32
    %1397 = vector.broadcast %cst_400 : f32 to vector<16x64xf32>
    %1398 = arith.addf %1397, %1396 : vector<16x64xf32>
    %1399 = arith.divf %1397, %1398 : vector<16x64xf32>
    %c0_401 = arith.constant 0 : index
    %c0_402 = arith.constant 0 : index
    %1400 = vector.load %arg26[%c0_401, %c0_402] : memref<32x64xf32, #tpu.memory_space<vmem>>, vector<32x64xf32>
    %cst_403 = arith.constant dense<0.000000e+00> : vector<16x64xf32>
    %1401 = tpu.matmul %1388, %1400, %cst_403 {dimension_numbers = #tpu.dot_dimension_numbers<[1], [0], [0], [1], [0, 0, 1, 1], [], []>} : vector<16x32xf32>, vector<32x64xf32>, vector<16x64xf32> -> vector<16x64xf32>
    %c0_404 = arith.constant 0 : index
    %c0_405 = arith.constant 0 : index
    %1402 = vector.load %arg27[%c0_404, %c0_405] : memref<1x64xf32, #tpu.memory_space<vmem>>, vector<1x64xf32>
    %1403 = vector.broadcast %1402 : vector<1x64xf32> to vector<16x64xf32>
    %1404 = arith.addf %1401, %1403 : vector<16x64xf32>
    %1405 = arith.mulf %1399, %1404 : vector<16x64xf32>
    %1406 = tpu.iota {dimensions = array<i32: 0>} : vector<2x16xi32>
    %c0_406 = arith.constant 0 : index
    %c0_407 = arith.constant 0 : index
    %1407 = vector.load %arg5[%c0_406, %c0_407] : memref<1x16xi32, #tpu.memory_space<vmem>>, vector<1x16xi32>
    %1408 = vector.broadcast %1407 : vector<1x16xi32> to vector<2x16xi32>
    %1409 = arith.cmpi eq, %1406, %1408 : vector<2x16xi32>
    %1410 = arith.extui %1409 : vector<2x16xi1> to vector<2x16xi32>
    %1411 = arith.sitofp %1410 : vector<2x16xi32> to vector<2x16xf32>
    %cst_408 = arith.constant dense<0.000000e+00> : vector<2x64xf32>
    %1412 = tpu.matmul %1411, %1405, %cst_408 {dimension_numbers = #tpu.dot_dimension_numbers<[1], [0], [0], [1], [0, 0, 1, 1], [], []>} : vector<2x16xf32>, vector<16x64xf32>, vector<2x64xf32> -> vector<2x64xf32>
    %c0_409 = arith.constant 0 : index
    %c0_410 = arith.constant 0 : index
    %1413 = vector.load %arg28[%c0_409, %c0_410] : memref<32x32xf32, #tpu.memory_space<vmem>>, vector<32x32xf32>
    %cst_411 = arith.constant dense<0.000000e+00> : vector<2x32xf32>
    %1414 = tpu.matmul %1050, %1413, %cst_411 {dimension_numbers = #tpu.dot_dimension_numbers<[1], [0], [0], [1], [0, 0, 1, 1], [], []>} : vector<2x32xf32>, vector<32x32xf32>, vector<2x32xf32> -> vector<2x32xf32>
    %c0_412 = arith.constant 0 : index
    %c0_413 = arith.constant 0 : index
    %1415 = vector.load %arg29[%c0_412, %c0_413] : memref<32x32xf32, #tpu.memory_space<vmem>>, vector<32x32xf32>
    %cst_414 = arith.constant dense<0.000000e+00> : vector<2x32xf32>
    %1416 = tpu.matmul %1258, %1415, %cst_414 {dimension_numbers = #tpu.dot_dimension_numbers<[1], [0], [0], [1], [0, 0, 1, 1], [], []>} : vector<2x32xf32>, vector<32x32xf32>, vector<2x32xf32> -> vector<2x32xf32>
    %1417 = arith.addf %1414, %1416 : vector<2x32xf32>
    %c0_415 = arith.constant 0 : index
    %c0_416 = arith.constant 0 : index
    %1418 = vector.load %arg30[%c0_415, %c0_416] : memref<64x32xf32, #tpu.memory_space<vmem>>, vector<64x32xf32>
    %cst_417 = arith.constant dense<0.000000e+00> : vector<2x32xf32>
    %1419 = tpu.matmul %1412, %1418, %cst_417 {dimension_numbers = #tpu.dot_dimension_numbers<[1], [0], [0], [1], [0, 0, 1, 1], [], []>} : vector<2x64xf32>, vector<64x32xf32>, vector<2x32xf32> -> vector<2x32xf32>
    %1420 = arith.addf %1417, %1419 : vector<2x32xf32>
    %c0_418 = arith.constant 0 : index
    %c0_419 = arith.constant 0 : index
    %1421 = vector.load %arg31[%c0_418, %c0_419] : memref<1x32xf32, #tpu.memory_space<vmem>>, vector<1x32xf32>
    %1422 = vector.broadcast %1421 : vector<1x32xf32> to vector<2x32xf32>
    %1423 = arith.addf %1420, %1422 : vector<2x32xf32>
    %c0_420 = arith.constant 0 : index
    %c0_421 = arith.constant 0 : index
    %1424 = vector.load %arg33[%c0_420, %c0_421] : memref<2x32xf32, #tpu.memory_space<vmem>>, vector<2x32xf32>
    tpu.vector_store %arg33[%c0_420, %c0_421], %1423 {strides = array<i32>} : memref<2x32xf32, #tpu.memory_space<vmem>>, vector<2x32xf32>,
    return
  }
}

</mosaic_0001>

<bundles_post_ra>
// kernel: forward.1
= control target key start
LH: loop header
LB: loop body
LE: loop exit
PB: predicated region body
PF: predicated region fallthrough
CT: control target
= control target key end

     0   :  { %s12366_s6 = smov 1   ;;  %s12367_s10 = smov 2   ;;  %s14158_s0 = inlined_call_operand.smem [shape: u32[34], index: -1, kind: input, shape index: {}] }
   0x1   :  { %s12437_s5 = sld [smem:[%s14158_s0]]   ;;  %s12368_s14 = smov 3  }
   0x2   :  { %s12442_s9 = sld [smem:[%s14158_s0 + %s12366_s6]]   ;;  %s12369_s18 = smov 4  }
   0x3   :  { %s12447_s13 = sld [smem:[%s14158_s0 + %s12367_s10]]   ;;  %s12370_s22 = smov 5  }
   0x4   :  { %s12452_s17 = sld [smem:[%s14158_s0 + %s12368_s14]]   ;;  %s12371_s26 = smov 6  }
   0x5   :  { %s12457_s21 = sld [smem:[%s14158_s0 + %s12369_s18]]   ;;  %s12372_s30 = smov 7  }
   0x6   :  { %s12462_s25 = sld [smem:[%s14158_s0 + %s12370_s22]]   ;;  %s12373_s4 = smov 8  }
   0x7   :  { %14170 = sst [smem:[#allocation51_spill]] %s12437_s5  ;;  %s12374_s10 = smov 9  }
   0x8   :  { %14171 = sst [smem:[#allocation52_spill]] %s12442_s9  ;;  %s12375_s15 = smov 10  }
   0x9   :  { %14172 = sst [smem:[#allocation53_spill]] %s12447_s13  ;;  %s12376_s20 = smov 11  }
   0xa   :  { %14173 = sst [smem:[#allocation54_spill]] %s12452_s17  ;;  %s12378_s1 = smov 13  }
   0xb   :  { %14174 = sst [smem:[#allocation55_spill]] %s12457_s21  ;;  %s12379_s7 = smov 14  }
   0xc   :  { %14175 = sst [smem:[#allocation56_spill]] %s12462_s25  ;;  %s12381_s22 = smov 16  }
   0xd   :  { %s12467_s29 = sld [smem:[%s14158_s0 + %s12371_s26]]   ;;  %s12377_s26 = smov 12  }
   0xe   :  { %s12472_s3 = sld [smem:[%s14158_s0 + %s12372_s30]]   ;;  %s12382_s28 = smov 17  }
   0xf   :  { %s12477_s8 = sld [smem:[%s14158_s0 + %s12373_s4]]  }
  0x10   :  { %s12482_s14 = sld [smem:[%s14158_s0 + %s12374_s10]]  }
  0x11   :  { %s12487_s19 = sld [smem:[%s14158_s0 + %s12375_s15]]   ;;  %s12380_s15 = smov 15  }
  0x12   :  { %s12492_s24 = sld [smem:[%s14158_s0 + %s12376_s20]]  }
  0x13   :  { %s12497_s30 = sld [smem:[%s14158_s0 + %s12377_s26]]  }
  0x14   :  { %s12502_s6 = sld [smem:[%s14158_s0 + %s12378_s1]]  }
  0x15   :  { %14176 = sst [smem:[#allocation57_spill]] %s12477_s8 }
  0x16   :  { %14177 = sst [smem:[#allocation58_spill]] %s12482_s14 }
  0x17   :  { %s12507_s12 = sld [smem:[%s14158_s0 + %s12379_s7]]   ;;  %s12383_s7 = smov 18  }
  0x18   :  { %s12512_s20 = sld [smem:[%s14158_s0 + %s12380_s15]]   ;;  %s12384_s15 = smov 19  }
  0x19   :  { %s12517_s27 = sld [smem:[%s14158_s0 + %s12381_s22]]   ;;  %s12385_s22 = smov 20  }
  0x1a   :  { %s12522_s4 = sld [smem:[%s14158_s0 + %s12382_s28]]   ;;  %s12386_s28 = smov 21  }
  0x1b   :  { %s12527_s25 = sld [smem:[%s14158_s0 + %s12383_s7]]   ;;  %s12387_s7 = smov 22  }
  0x1c   :  { %s12532_s21 = sld [smem:[%s14158_s0 + %s12384_s15]]   ;;  %s12388_s15 = smov 23  }
  0x1d   :  { %s12537_s17 = sld [smem:[%s14158_s0 + %s12385_s22]]   ;;  %s12389_s22 = smov 24  }
  0x1e   :  { %s12542_s13 = sld [smem:[%s14158_s0 + %s12386_s28]]   ;;  %s12390_s28 = smov 25  }
  0x1f   :  { %s12547_s14 = sld [smem:[%s14158_s0 + %s12387_s7]]   ;;  %s12391_s7 = smov 26  }
  0x20   :  { %s12557_s8 = sld [smem:[%s14158_s0 + %s12389_s22]]   ;;  %s12393_s22 = smov 28  }
  0x21   :  { %14178 = sst [smem:[#allocation59_spill]] %s12527_s25 }
  0x22   :  { %14179 = sst [smem:[#allocation60_spill]] %s12532_s21 }
  0x23   :  { %s12552_s21 = sld [smem:[%s14158_s0 + %s12388_s15]]   ;;  %s12392_s15 = smov 27  }
  0x24   :  { %14180 = sst [smem:[#allocation61_spill]] %s12542_s13 }
  0x25   :  { %s12562_s5 = sld [smem:[%s14158_s0 + %s12390_s28]]   ;;  %s12394_s28 = smov 29  }
  0x26   :  { %14182 = sst [smem:[#allocation63_spill]] %s12557_s8 }
  0x27   :  { %s12567_s9 = sld [smem:[%s14158_s0 + %s12391_s7]]   ;;  %s12395_s7 = smov 30  }
  0x28   :  { %s12577_s8 = sld [smem:[%s14158_s0 + %s12393_s22]]   ;;  %s12397_s22 = smov 32  }
  0x29   :  { %14181 = sst [smem:[#allocation62_spill]] %s12552_s21 }
  0x2a   :  { %s12572_s21 = sld [smem:[%s14158_s0 + %s12392_s15]]   ;;  %s12396_s15 = smov 31  }
  0x2b   :  { %14183 = sst [smem:[#allocation64_spill]] %s12562_s5 }
  0x2c   :  { %s12582_s5 = sld [smem:[%s14158_s0 + %s12394_s28]]   ;;  %s12398_s28 = smov 33  }
  0x2d   :  { %s12587_s13 = sld [smem:[%s14158_s0 + %s12395_s7]]  }
  0x2e   :  { %14185 = sst [smem:[#allocation66_spill]] %s12577_s8 }
  0x2f   :  { %s12597_s8 = sld [smem:[%s14158_s0 + %s12397_s22]]  }
  0x30   :  { %14184 = sst [smem:[#allocation65_spill]] %s12572_s21 }
  0x31   :  { %s12592_s21 = sld [smem:[%s14158_s0 + %s12396_s15]]  }
  0x32   :  { %s12602_s25 = sld [smem:[%s14158_s0 + %s12398_s28]]  }
  0x33   :  { %73 = vsyncpa [#allocation7], 0 }
  0x34   :  { %74 = vsyncpa [#allocation10], 0 }
  0x35   :  { %75 = vsyncpa [#allocation13], 0 }
  0x36   :  { %76 = vsyncpa [#allocation16], 0 }
  0x37   :  { %77 = vsyncpa [#allocation19], 0 }
  0x38   :  { %78 = vsyncpa [#allocation22], 0 }
  0x39   :  { %79 = vsyncpa [#allocation25], 0 }
  0x3a   :  { %80 = vsyncpa [#allocation28], 0 }
  0x3b   :  { %81 = vsyncpa [#allocation31], 0 }
  0x3c   :  { %82 = vsyncpa [#allocation34], 0 }
  0x3d   :  { %83 = vsyncpa [#allocation8], 0 }
  0x3e   :  { %84 = vsyncpa [#allocation38], 0  ;;  %s12399_s7 = smov [#allocation9]   ;;  %s11880_s0 = scalar_lea.hbm %s12472_s3, 128 }
  0x3f   :  { %s115_s10 = sshll.u32 %s12399_s7, 4  ;;  %p11881_p0 = scmp.ne.s32.totalorder %s12472_s3, %s11880_s0  ;;  %s116_s10 = int_to_ptr.vmem [resolvable:$true] %s115_s10 }
  0x40   :  { %p11884_p1 = scmp.lt.u32.totalorder %s11880_s0, %s12472_s3 }
  0x42   :  { %p11886_p2 = pnand %p11884_p1, %p11881_p0 }
  0x44   :  { %11889 = shalt.err (!%p11886_p2)
}
  0x45   :  { %s11890_s11 = scalar_lea.vmem %s116_s10, 128  ;;  %p11895_p4 = scmp.lt.s32.totalorder %s116_s10, %s116_s10 }
  0x46   :  { %p11891_p3 = scmp.ne.s32.totalorder %s116_s10, %s11890_s11  ;;  %p11896_p5 = scmp.lt.s32.totalorder %s11890_s11, %s11890_s11 }
  0x48   :  { %p11897_p6 = por %p11896_p5, %p11895_p4 }
  0x4a   :  { %p11898_p7 = pnand %p11897_p6, %p11891_p3 }
  0x4c   :  { %11901 = shalt.err (!%p11898_p7)
}
  0x4d   :  { %118 = dma.hbm_to_vmem [thread:$0]  %s12472_s3, 128, %s116_s10, [#allocation10]  }
  0x4e   :  { %s12400_s15 = smov [#allocation12]   ;;  %s12401_s18 = smov [#allocation15]  }
  0x4f   :  { %s140_s16 = sshll.u32 %s12400_s15, 4  ;;  %s163_s22 = sshll.u32 %s12401_s18, 4  ;;  %s141_s16 = int_to_ptr.vmem [resolvable:$true] %s140_s16  ;;  %s164_s22 = int_to_ptr.vmem [resolvable:$true] %s163_s22 }
  0x50   :  { %s11902_s23 = scalar_lea.hbm %s12492_s24, 3072 }
  0x51   :  { %p11903_p8 = scmp.ne.s32.totalorder %s12492_s24, %s11902_s23  ;;  %p11906_p9 = scmp.lt.u32.totalorder %s11902_s23, %s12492_s24 }
  0x53   :  { %p11908_p10 = pnand %p11906_p9, %p11903_p8 }
  0x55   :  { %11911 = shalt.err (!%p11908_p10)
}
  0x56   :  { %s11912_s26 = scalar_lea.vmem %s141_s16, 3072  ;;  %p11917_p12 = scmp.lt.s32.totalorder %s141_s16, %s141_s16 }
  0x57   :  { %p11913_p11 = scmp.ne.s32.totalorder %s141_s16, %s11912_s26  ;;  %p11918_p13 = scmp.lt.s32.totalorder %s11912_s26, %s11912_s26 }
  0x59   :  { %p11919_p0 = por %p11918_p13, %p11917_p12 }
  0x5b   :  { %p11920_p1 = pnand %p11919_p0, %p11913_p11 }
  0x5d   :  { %11923 = shalt.err (!%p11920_p1)
}
  0x5e   :  { %s12402_s28 = smov 128   ;;  %s12403_s3 = smov 8  }
  0x5f   :  { %146 = dma.hbm_to_vmem [thread:$0]  %s12492_s24, 3072, %s141_s16, [#allocation13], %s12402_s28, %s12402_s28, %s12403_s3  }
  0x60   :  { %s11924_s1 = scalar_lea.hbm %s12502_s6, 128 }
  0x61   :  { %p11925_p2 = scmp.ne.s32.totalorder %s12502_s6, %s11924_s1  ;;  %p11928_p3 = scmp.lt.u32.totalorder %s11924_s1, %s12502_s6 }
  0x63   :  { %p11930_p4 = pnand %p11928_p3, %p11925_p2 }
  0x65   :  { %11933 = shalt.err (!%p11930_p4)
}
  0x66   :  { %s11934_s2 = scalar_lea.vmem %s164_s22, 128  ;;  %p11939_p6 = scmp.lt.s32.totalorder %s164_s22, %s164_s22 }
  0x67   :  { %p11935_p5 = scmp.ne.s32.totalorder %s164_s22, %s11934_s2  ;;  %p11940_p7 = scmp.lt.s32.totalorder %s11934_s2, %s11934_s2 }
  0x69   :  { %p11941_p8 = por %p11940_p7, %p11939_p6 }
  0x6b   :  { %p11942_p9 = pnand %p11941_p8, %p11935_p5 }
  0x6d   :  { %11945 = shalt.err (!%p11942_p9)
}
  0x6e   :  { %166 = dma.hbm_to_vmem [thread:$0]  %s12502_s6, 128, %s164_s22, [#allocation16]  }
  0x6f   :  { %s12404_s7 = smov [#allocation18]   ;;  %s12405_s10 = smov [#allocation21]  }
  0x70   :  { %s184_s24 = sshll.u32 %s12404_s7, 4  ;;  %s206_s0 = sshll.u32 %s12405_s10, 4  ;;  %s185_s24 = int_to_ptr.vmem [resolvable:$true] %s184_s24  ;;  %s207_s0 = int_to_ptr.vmem [resolvable:$true] %s206_s0 }
  0x71   :  { %s11946_s11 = scalar_lea.hbm %s12512_s20, 512 }
  0x72   :  { %p11947_p10 = scmp.ne.s32.totalorder %s12512_s20, %s11946_s11  ;;  %p11950_p11 = scmp.lt.u32.totalorder %s11946_s11, %s12512_s20 }
  0x74   :  { %p11952_p12 = pnand %p11950_p11, %p11947_p10 }
  0x76   :  { %11955 = shalt.err (!%p11952_p12)
}
  0x77   :  { %s11956_s15 = scalar_lea.vmem %s185_s24, 512  ;;  %p11961_p0 = scmp.lt.s32.totalorder %s185_s24, %s185_s24 }
  0x78   :  { %p11957_p13 = scmp.ne.s32.totalorder %s185_s24, %s11956_s15  ;;  %p11962_p1 = scmp.lt.s32.totalorder %s11956_s15, %s11956_s15 }
  0x7a   :  { %p11963_p2 = por %p11962_p1, %p11961_p0 }
  0x7c   :  { %p11964_p3 = pnand %p11963_p2, %p11957_p13 }
  0x7e   :  { %11967 = shalt.err (!%p11964_p3)
}
  0x7f   :  { %190 = dma.hbm_to_vmem [thread:$0]  %s12512_s20, 512, %s185_s24, [#allocation19], %s12402_s28, %s12402_s28, %s12403_s3  }
  0x80   :  { %s11968_s6 = scalar_lea.hbm %s12522_s4, 512 }
  0x81   :  { %p11969_p4 = scmp.ne.s32.totalorder %s12522_s4, %s11968_s6  ;;  %p11972_p5 = scmp.lt.u32.totalorder %s11968_s6, %s12522_s4 }
  0x83   :  { %p11974_p6 = pnand %p11972_p5, %p11969_p4 }
  0x85   :  { %11977 = shalt.err (!%p11974_p6)
}
  0x86   :  { %s11978_s16 = scalar_lea.vmem %s207_s0, 512  ;;  %p11983_p8 = scmp.lt.s32.totalorder %s207_s0, %s207_s0 }
  0x87   :  { %p11979_p7 = scmp.ne.s32.totalorder %s207_s0, %s11978_s16  ;;  %p11984_p9 = scmp.lt.s32.totalorder %s11978_s16, %s11978_s16 }
  0x89   :  { %p11985_p10 = por %p11984_p9, %p11983_p8 }
  0x8b   :  { %p11986_p11 = pnand %p11985_p10, %p11979_p7 }
  0x8d   :  { %11989 = shalt.err (!%p11986_p11)
}
  0x8e   :  { %212 = dma.hbm_to_vmem [thread:$0]  %s12522_s4, 512, %s207_s0, [#allocation22], %s12402_s28, %s12402_s28, %s12403_s3  }
  0x8f   :  { %s12406_s20 = smov [#allocation24]   ;;  %s12407_s22 = smov [#allocation27]  }
  0x90   :  { %s232_s18 = sshll.u32 %s12406_s20, 4  ;;  %s257_s23 = sshll.u32 %s12407_s22, 4  ;;  %s233_s18 = int_to_ptr.vmem [resolvable:$true] %s232_s18  ;;  %s258_s23 = int_to_ptr.vmem [resolvable:$true] %s257_s23 }
  0x91   :  { %s11990_s26 = scalar_lea.hbm %s12537_s17, 512 }
  0x92   :  { %p11991_p12 = scmp.ne.s32.totalorder %s12537_s17, %s11990_s26  ;;  %p11994_p13 = scmp.lt.u32.totalorder %s11990_s26, %s12537_s17 }
  0x94   :  { %p11996_p0 = pnand %p11994_p13, %p11991_p12 }
  0x96   :  { %11999 = shalt.err (!%p11996_p0)
}
  0x97   :  { %s12000_s1 = scalar_lea.vmem %s233_s18, 512  ;;  %p12005_p2 = scmp.lt.s32.totalorder %s233_s18, %s233_s18 }
  0x98   :  { %p12001_p1 = scmp.ne.s32.totalorder %s233_s18, %s12000_s1  ;;  %p12006_p3 = scmp.lt.s32.totalorder %s12000_s1, %s12000_s1 }
  0x9a   :  { %p12007_p4 = por %p12006_p3, %p12005_p2 }
  0x9c   :  { %p12008_p5 = pnand %p12007_p4, %p12001_p1 }
  0x9e   :  { %12011 = shalt.err (!%p12008_p5)
}
  0x9f   :  { %238 = dma.hbm_to_vmem [thread:$0]  %s12537_s17, 512, %s233_s18, [#allocation25], %s12402_s28, %s12402_s28, %s12403_s3  }
  0xa0   :  { %s12012_s4 = scalar_lea.hbm %s12547_s14, 16 }
  0xa1   :  { %p12013_p6 = scmp.ne.s32.totalorder %s12547_s14, %s12012_s4  ;;  %p12016_p7 = scmp.lt.u32.totalorder %s12012_s4, %s12547_s14 }
  0xa3   :  { %p12018_p8 = pnand %p12016_p7, %p12013_p6 }
  0xa5   :  { %12021 = shalt.err (!%p12018_p8)
}
  0xa6   :  { %s12022_s2 = scalar_lea.vmem %s258_s23, 16  ;;  %s12026_s7 = scalar_lea.vmem %s258_s23, 32 }
  0xa7   :  { %p12023_p9 = scmp.ne.s32.totalorder %s258_s23, %s12022_s2  ;;  %p12027_p10 = scmp.lt.s32.totalorder %s258_s23, %s258_s23 }
  0xa8   :  { %p12028_p11 = scmp.lt.s32.totalorder %s12026_s7, %s12022_s2 }
  0xaa   :  { %p12029_p12 = por %p12028_p11, %p12027_p10 }
  0xac   :  { %p12030_p13 = pnand %p12029_p12, %p12023_p9 }
  0xae   :  { %12033 = shalt.err (!%p12030_p13)
}
  0xaf   :  { %260 = dma.hbm_to_vmem [thread:$0]  %s12547_s14, 16, %s258_s23, [#allocation28]  }
  0xb0   :  { %s12408_s17 = smov [#allocation30]   ;;  %s12409_s10 = smov [#allocation33]  }
  0xb1   :  { %s280_s24 = sshll.u32 %s12408_s17, 4  ;;  %s306_s0 = sshll.u32 %s12409_s10, 4  ;;  %s281_s24 = int_to_ptr.vmem [resolvable:$true] %s280_s24  ;;  %s307_s0 = int_to_ptr.vmem [resolvable:$true] %s306_s0 }
  0xb2   :  { %s12034_s11 = scalar_lea.hbm %s12567_s9, 512 }
  0xb3   :  { %p12035_p0 = scmp.ne.s32.totalorder %s12567_s9, %s12034_s11  ;;  %p12038_p1 = scmp.lt.u32.totalorder %s12034_s11, %s12567_s9 }
  0xb5   :  { %p12040_p2 = pnand %p12038_p1, %p12035_p0 }
  0xb7   :  { %12043 = shalt.err (!%p12040_p2)
}
  0xb8   :  { %s12044_s15 = scalar_lea.vmem %s281_s24, 512  ;;  %p12049_p4 = scmp.lt.s32.totalorder %s281_s24, %s281_s24 }
  0xb9   :  { %p12045_p3 = scmp.ne.s32.totalorder %s281_s24, %s12044_s15  ;;  %p12050_p5 = scmp.lt.s32.totalorder %s12044_s15, %s12044_s15 }
  0xbb   :  { %p12051_p6 = por %p12050_p5, %p12049_p4 }
  0xbd   :  { %p12052_p7 = pnand %p12051_p6, %p12045_p3 }
  0xbf   :  { %12055 = shalt.err (!%p12052_p7)
}
  0xc0   :  { %286 = dma.hbm_to_vmem [thread:$0]  %s12567_s9, 512, %s281_s24, [#allocation31], %s12402_s28, %s12402_s28, %s12403_s3  }
  0xc1   :  { %s12056_s14 = scalar_lea.hbm %s12582_s5, 512 }
  0xc2   :  { %p12057_p8 = scmp.ne.s32.totalorder %s12582_s5, %s12056_s14  ;;  %p12060_p9 = scmp.lt.u32.totalorder %s12056_s14, %s12582_s5 }
  0xc4   :  { %p12062_p10 = pnand %p12060_p9, %p12057_p8 }
  0xc6   :  { %12065 = shalt.err (!%p12062_p10)
}
  0xc7   :  { %s12066_s6 = scalar_lea.vmem %s307_s0, 512  ;;  %p12071_p12 = scmp.lt.s32.totalorder %s307_s0, %s307_s0 }
  0xc8   :  { %p12067_p11 = scmp.ne.s32.totalorder %s307_s0, %s12066_s6  ;;  %p12072_p13 = scmp.lt.s32.totalorder %s12066_s6, %s12066_s6 }
  0xca   :  { %p12073_p0 = por %p12072_p13, %p12071_p12 }
  0xcc   :  { %p12074_p1 = pnand %p12073_p0, %p12067_p11 }
  0xce   :  { %12077 = shalt.err (!%p12074_p1)
}
  0xcf   :  { %312 = dma.hbm_to_vmem [thread:$0]  %s12582_s5, 512, %s307_s0, [#allocation34], %s12402_s28, %s12402_s28, %s12403_s3  }
  0xd0   :  { %s12410_s9 = smov [#allocation6]   ;;  %s12411_s20 = smov [#allocation11]  }
  0xd1   :  { %s102_s16 = sshll.u32 %s12410_s9, 4  ;;  %s128_s18 = sshll.u32 %s12411_s20, 4  ;;  %s103_s16 = int_to_ptr.vmem [resolvable:$true] %s102_s16  ;;  %s129_s18 = int_to_ptr.vmem [resolvable:$true] %s128_s18 }
  0xd2   :  { %s12078_s22 = scalar_lea.hbm %s12467_s29, 256 }
  0xd3   :  { %p12079_p2 = scmp.ne.s32.totalorder %s12467_s29, %s12078_s22  ;;  %p12082_p3 = scmp.lt.u32.totalorder %s12078_s22, %s12467_s29 }
  0xd5   :  { %p12084_p4 = pnand %p12082_p3, %p12079_p2 }
  0xd7   :  { %12087 = shalt.err (!%p12084_p4)
}
  0xd8   :  { %s12088_s23 = scalar_lea.vmem %s103_s16, 256  ;;  %p12093_p6 = scmp.lt.s32.totalorder %s103_s16, %s103_s16 }
  0xd9   :  { %p12089_p5 = scmp.ne.s32.totalorder %s103_s16, %s12088_s23  ;;  %p12094_p7 = scmp.lt.s32.totalorder %s12088_s23, %s12088_s23 }
  0xdb   :  { %p12095_p8 = por %p12094_p7, %p12093_p6 }
  0xdd   :  { %p12096_p9 = pnand %p12095_p8, %p12089_p5 }
  0xdf   :  { %12099 = shalt.err (!%p12096_p9)
}
  0xe0   :  { %108 = dma.hbm_to_vmem [thread:$0]  %s12467_s29, 256, %s103_s16, [#allocation7], %s12402_s28, %s12402_s28, %s12403_s3  }
  0xe1   :  { %s12100_s5 = scalar_lea.hbm %s12487_s19, 2048 }
  0xe2   :  { %p12101_p10 = scmp.ne.s32.totalorder %s12487_s19, %s12100_s5  ;;  %p12104_p11 = scmp.lt.u32.totalorder %s12100_s5, %s12487_s19 }
  0xe4   :  { %p12106_p12 = pnand %p12104_p11, %p12101_p10 }
  0xe6   :  { %12109 = shalt.err (!%p12106_p12)
}
  0xe7   :  { %s12110_s26 = scalar_lea.vmem %s129_s18, 2048  ;;  %p12115_p0 = scmp.lt.s32.totalorder %s129_s18, %s129_s18 }
  0xe8   :  { %p12111_p13 = scmp.ne.s32.totalorder %s129_s18, %s12110_s26  ;;  %p12116_p1 = scmp.lt.s32.totalorder %s12110_s26, %s12110_s26 }
  0xea   :  { %p12117_p2 = por %p12116_p1, %p12115_p0 }
  0xec   :  { %p12118_p3 = pnand %p12117_p2, %p12111_p13 }
  0xee   :  { %12121 = shalt.err (!%p12118_p3)
}
  0xef   :  { %134 = dma.hbm_to_vmem [thread:$0]  %s12487_s19, 2048, %s129_s18, [#allocation10], %s12402_s28, %s12402_s28, %s12403_s3  }
  0xf0   :  { %s12412_s29 = smov [#allocation14]   ;;  %s12413_s4 = smov [#allocation17]  }
  0xf1   :  { %s153_s1 = sshll.u32 %s12412_s29, 4  ;;  %s172_s2 = sshll.u32 %s12413_s4, 4  ;;  %s154_s1 = int_to_ptr.vmem [resolvable:$true] %s153_s1  ;;  %s173_s2 = int_to_ptr.vmem [resolvable:$true] %s172_s2 }
  0xf2   :  { %s12122_s7 = scalar_lea.hbm %s12497_s30, 128 }
  0xf3   :  { %p12123_p4 = scmp.ne.s32.totalorder %s12497_s30, %s12122_s7  ;;  %p12126_p5 = scmp.lt.u32.totalorder %s12122_s7, %s12497_s30 }
  0xf5   :  { %p12128_p6 = pnand %p12126_p5, %p12123_p4 }
  0xf7   :  { %12131 = shalt.err (!%p12128_p6)
}
  0xf8   :  { %s12132_s17 = scalar_lea.vmem %s154_s1, 128  ;;  %p12137_p8 = scmp.lt.s32.totalorder %s154_s1, %s154_s1 }
  0xf9   :  { %p12133_p7 = scmp.ne.s32.totalorder %s154_s1, %s12132_s17  ;;  %p12138_p9 = scmp.lt.s32.totalorder %s12132_s17, %s12132_s17 }
  0xfb   :  { %p12139_p10 = por %p12138_p9, %p12137_p8 }
  0xfd   :  { %p12140_p11 = pnand %p12139_p10, %p12133_p7 }
  0xff   :  { %12143 = shalt.err (!%p12140_p11)
}
 0x100   :  { %156 = dma.hbm_to_vmem [thread:$0]  %s12497_s30, 128, %s154_s1, [#allocation13]  }
 0x101   :  { %s12144_s19 = scalar_lea.hbm %s12507_s12, 512 }
 0x102   :  { %p12145_p12 = scmp.ne.s32.totalorder %s12507_s12, %s12144_s19  ;;  %p12148_p13 = scmp.lt.u32.totalorder %s12144_s19, %s12507_s12 }
 0x104   :  { %p12150_p0 = pnand %p12148_p13, %p12145_p12 }
 0x106   :  { %12153 = shalt.err (!%p12150_p0)
}
 0x107   :  { %s12154_s24 = scalar_lea.vmem %s173_s2, 512  ;;  %p12159_p2 = scmp.lt.s32.totalorder %s173_s2, %s173_s2 }
 0x108   :  { %p12155_p1 = scmp.ne.s32.totalorder %s173_s2, %s12154_s24  ;;  %p12160_p3 = scmp.lt.s32.totalorder %s12154_s24, %s12154_s24 }
 0x10a   :  { %p12161_p4 = por %p12160_p3, %p12159_p2 }
 0x10c   :  { %p12162_p5 = pnand %p12161_p4, %p12155_p1 }
 0x10e   :  { %12165 = shalt.err (!%p12162_p5)
}
 0x10f   :  { %178 = dma.hbm_to_vmem [thread:$0]  %s12507_s12, 512, %s173_s2, [#allocation16], %s12402_s28, %s12402_s28, %s12403_s3  }
 0x110   :  { %s12414_s30 = smov [#allocation20]   ;;  %s12415_s0 = smov [#allocation23]  }
 0x111   :  { %s197_s10 = sshll.u32 %s12414_s30, 4  ;;  %s218_s11 = sshll.u32 %s12415_s0, 4  ;;  %s198_s10 = int_to_ptr.vmem [resolvable:$true] %s197_s10  ;;  %s219_s11 = int_to_ptr.vmem [resolvable:$true] %s218_s11 }
 0x112   :  { %s12166_s15 = scalar_lea.hbm %s12517_s27, 16 }
 0x113   :  { %p12167_p6 = scmp.ne.s32.totalorder %s12517_s27, %s12166_s15  ;;  %p12170_p7 = scmp.lt.u32.totalorder %s12166_s15, %s12517_s27 }
 0x115   :  { %p12172_p8 = pnand %p12170_p7, %p12167_p6 }
 0x117   :  { %12175 = shalt.err (!%p12172_p8)
}
 0x118   :  { %s12176_s14 = scalar_lea.vmem %s198_s10, 16  ;;  %s12180_s6 = scalar_lea.vmem %s198_s10, 32 }
 0x119   :  { %p12177_p9 = scmp.ne.s32.totalorder %s198_s10, %s12176_s14  ;;  %p12181_p10 = scmp.lt.s32.totalorder %s198_s10, %s198_s10 }
 0x11a   :  { %p12182_p11 = scmp.lt.s32.totalorder %s12180_s6, %s12176_s14 }
 0x11c   :  { %p12183_p12 = por %p12182_p11, %p12181_p10 }
 0x11e   :  { %p12184_p13 = pnand %p12183_p12, %p12177_p9 }
 0x120   :  { %12187 = shalt.err (!%p12184_p13)
}
 0x121   :  { %s14186_s12 = sld [smem:[#allocation59_spill]] }
 0x122   :  { %200 = dma.hbm_to_vmem [thread:$0]  %s12517_s27, 16, %s198_s10, [#allocation19]  }
 0x127   :  { %s12188_s9 = scalar_lea.hbm %s14186_s12, 512 }
 0x128   :  { %p12189_p0 = scmp.ne.s32.totalorder %s14186_s12, %s12188_s9  ;;  %p12192_p1 = scmp.lt.u32.totalorder %s12188_s9, %s14186_s12 }
 0x12a   :  { %p12194_p2 = pnand %p12192_p1, %p12189_p0 }
 0x12c   :  { %12197 = shalt.err (!%p12194_p2)
}
 0x12d   :  { %s12198_s16 = scalar_lea.vmem %s219_s11, 512  ;;  %p12203_p4 = scmp.lt.s32.totalorder %s219_s11, %s219_s11 }
 0x12e   :  { %p12199_p3 = scmp.ne.s32.totalorder %s219_s11, %s12198_s16  ;;  %p12204_p5 = scmp.lt.s32.totalorder %s12198_s16, %s12198_s16 }
 0x130   :  { %p12205_p6 = por %p12204_p5, %p12203_p4 }
 0x132   :  { %p12206_p7 = pnand %p12205_p6, %p12199_p3 }
 0x134   :  { %12209 = shalt.err (!%p12206_p7)
}
 0x135   :  { %s14187_s20 = sld [smem:[#allocation61_spill]]  ;;  %s12416_s27 = smov [#allocation26]  }
 0x136   :  { %224 = dma.hbm_to_vmem [thread:$0]  %s14186_s12, 512, %s219_s11, [#allocation22], %s12402_s28, %s12402_s28, %s12403_s3  }
 0x137   :  { %s244_s18 = sshll.u32 %s12416_s27, 4  ;;  %s12417_s22 = smov [#allocation29]   ;;  %s245_s18 = int_to_ptr.vmem [resolvable:$true] %s244_s18 }
 0x138   :  { %s267_s23 = sshll.u32 %s12417_s22, 4  ;;  %s268_s23 = int_to_ptr.vmem [resolvable:$true] %s267_s23 }
 0x13b   :  { %s12210_s5 = scalar_lea.hbm %s14187_s20, 512 }
 0x13c   :  { %p12211_p8 = scmp.ne.s32.totalorder %s14187_s20, %s12210_s5  ;;  %p12214_p9 = scmp.lt.u32.totalorder %s12210_s5, %s14187_s20 }
 0x13e   :  { %p12216_p10 = pnand %p12214_p9, %p12211_p8 }
 0x140   :  { %12219 = shalt.err (!%p12216_p10)
}
 0x141   :  { %s12220_s26 = scalar_lea.vmem %s245_s18, 512  ;;  %p12225_p12 = scmp.lt.s32.totalorder %s245_s18, %s245_s18 }
 0x142   :  { %p12221_p11 = scmp.ne.s32.totalorder %s245_s18, %s12220_s26  ;;  %p12226_p13 = scmp.lt.s32.totalorder %s12220_s26, %s12220_s26 }
 0x144   :  { %p12227_p0 = por %p12226_p13, %p12225_p12 }
 0x146   :  { %p12228_p1 = pnand %p12227_p0, %p12221_p11 }
 0x148   :  { %12231 = shalt.err (!%p12228_p1)
}
 0x149   :  { %s14188_s29 = sld [smem:[#allocation62_spill]] }
 0x14a   :  { %250 = dma.hbm_to_vmem [thread:$0]  %s14187_s20, 512, %s245_s18, [#allocation25], %s12402_s28, %s12402_s28, %s12403_s3  }
 0x14f   :  { %s12232_s1 = scalar_lea.hbm %s14188_s29, 16 }
 0x150   :  { %p12233_p2 = scmp.ne.s32.totalorder %s14188_s29, %s12232_s1  ;;  %p12236_p3 = scmp.lt.u32.totalorder %s12232_s1, %s14188_s29 }
 0x152   :  { %p12238_p4 = pnand %p12236_p3, %p12233_p2 }
 0x154   :  { %12241 = shalt.err (!%p12238_p4)
}
 0x155   :  { %s12242_s4 = scalar_lea.vmem %s268_s23, 16  ;;  %s12246_s2 = scalar_lea.vmem %s268_s23, 32 }
 0x156   :  { %p12243_p5 = scmp.ne.s32.totalorder %s268_s23, %s12242_s4  ;;  %p12247_p6 = scmp.lt.s32.totalorder %s268_s23, %s268_s23 }
 0x157   :  { %p12248_p7 = scmp.lt.s32.totalorder %s12246_s2, %s12242_s4 }
 0x159   :  { %p12249_p8 = por %p12248_p7, %p12247_p6 }
 0x15b   :  { %p12250_p9 = pnand %p12249_p8, %p12243_p5 }
 0x15d   :  { %12253 = shalt.err (!%p12250_p9)
}
 0x15e   :  { %s14189_s7 = sld [smem:[#allocation66_spill]]  ;;  %s12418_s17 = smov [#allocation32]  }
 0x15f   :  { %270 = dma.hbm_to_vmem [thread:$0]  %s14188_s29, 16, %s268_s23, [#allocation28]  }
 0x160   :  { %s294_s19 = sshll.u32 %s12418_s17, 4  ;;  %s12419_s24 = smov [#allocation35]   ;;  %s295_s19 = int_to_ptr.vmem [resolvable:$true] %s294_s19 }
 0x161   :  { %s321_s30 = sshll.u32 %s12419_s24, 4  ;;  %s322_s30 = int_to_ptr.vmem [resolvable:$true] %s321_s30 }
 0x164   :  { %s12254_s10 = scalar_lea.hbm %s14189_s7, 512 }
 0x165   :  { %p12255_p10 = scmp.ne.s32.totalorder %s14189_s7, %s12254_s10  ;;  %p12258_p11 = scmp.lt.u32.totalorder %s12254_s10, %s14189_s7 }
 0x167   :  { %p12260_p12 = pnand %p12258_p11, %p12255_p10 }
 0x169   :  { %12263 = shalt.err (!%p12260_p12)
}
 0x16a   :  { %s12264_s0 = scalar_lea.vmem %s295_s19, 512  ;;  %p12269_p0 = scmp.lt.s32.totalorder %s295_s19, %s295_s19 }
 0x16b   :  { %p12265_p13 = scmp.ne.s32.totalorder %s295_s19, %s12264_s0  ;;  %p12270_p1 = scmp.lt.s32.totalorder %s12264_s0, %s12264_s0 }
 0x16d   :  { %p12271_p2 = por %p12270_p1, %p12269_p0 }
 0x16f   :  { %p12272_p3 = pnand %p12271_p2, %p12265_p13 }
 0x171   :  { %12275 = shalt.err (!%p12272_p3)
}
 0x172   :  { %300 = dma.hbm_to_vmem [thread:$0]  %s14189_s7, 512, %s295_s19, [#allocation31], %s12402_s28, %s12402_s28, %s12403_s3  }
 0x173   :  { %s12276_s11 = scalar_lea.hbm %s12592_s21, 16 }
 0x174   :  { %p12277_p4 = scmp.ne.s32.totalorder %s12592_s21, %s12276_s11  ;;  %p12280_p5 = scmp.lt.u32.totalorder %s12276_s11, %s12592_s21 }
 0x176   :  { %p12282_p6 = pnand %p12280_p5, %p12277_p4 }
 0x178   :  { %12285 = shalt.err (!%p12282_p6)
}
 0x179   :  { %s12286_s15 = scalar_lea.vmem %s322_s30, 16  ;;  %s12290_s14 = scalar_lea.vmem %s322_s30, 32 }
 0x17a   :  { %p12287_p7 = scmp.ne.s32.totalorder %s322_s30, %s12286_s15  ;;  %p12291_p8 = scmp.lt.s32.totalorder %s322_s30, %s322_s30 }
 0x17b   :  { %p12292_p9 = scmp.lt.s32.totalorder %s12290_s14, %s12286_s15 }
 0x17d   :  { %p12293_p10 = por %p12292_p9, %p12291_p8 }
 0x17f   :  { %p12294_p11 = pnand %p12293_p10, %p12287_p7 }
 0x181   :  { %12297 = shalt.err (!%p12294_p11)
}
 0x182   :  { %324 = dma.hbm_to_vmem [thread:$0]  %s12592_s21, 16, %s322_s30, [#allocation34]  }
 0x183   :  { %12342 = dma.done.wait [#allocation7], 256  }
 0x184   :  { %12343 = vsyncadd [#allocation7], 4294967040 }
 0x185   :  { %12344 = dma.done.wait [#allocation10], 2176  }
 0x186   :  { %12345 = vsyncadd [#allocation10], 4294965120 }
 0x187   :  { %12346 = dma.done.wait [#allocation13], 3200  }
 0x188   :  { %12347 = vsyncadd [#allocation13], 4294964096 }
 0x189   :  { %12348 = dma.done.wait [#allocation16], 640  }
 0x18a   :  { %12349 = vsyncadd [#allocation16], 4294966656 }
 0x18b   :  { %12350 = dma.done.wait [#allocation19], 528  }
 0x18c   :  { %12351 = vsyncadd [#allocation19], 4294966768 }
 0x18d   :  { %12352 = dma.done.wait [#allocation22], 1024  }
 0x18e   :  { %12353 = vsyncadd [#allocation22], 4294966272 }
 0x18f   :  { %12354 = dma.done.wait [#allocation25], 1024  }
 0x190   :  { %12355 = vsyncadd [#allocation25], 4294966272 }
 0x191   :  { %12356 = dma.done.wait [#allocation28], 32  }
 0x192   :  { %12357 = vsyncadd [#allocation28], 4294967264 }
 0x193   :  { %12358 = dma.done.wait [#allocation31], 1024  }
 0x194   :  { %12359 = vsyncadd [#allocation31], 4294966272 }
 0x195   :  { %12360 = dma.done.wait [#allocation34], 528  }
 0x196   :  { %12361 = vsyncadd [#allocation34], 4294966768  ;;  %s14190_s21 = sld [smem:[#allocation52_spill]]  ;;  %s14191_s6 = sld [smem:[#allocation51_spill]]  ;;  %v12420_v0 = vmov 0   ;;  %v12421_v1 = vmov 0.0   ;;  %v382_v14 = vlaneseq }
 0x197   :  { %11547 = vset.pattern.permute.xlu1 %v12420_v0  ;;  %11546 = vset.pattern.permute.xlu0 %v12420_v0  ;;  %s14192_s12 = sld [smem:[#allocation57_spill]]  ;;  %v503_v5 = vld [vmem:[#allocation9] sm:$0xff]  ;;  %vm12422_vm0 = vmmov 0   ;;  %v398_v7 = vld [vmem:[#allocation6] sm:$0xff]  ;;  %v399_v8 = vld [vmem:[#allocation6 + $0x8] sm:$0xff]  ;;  %vm400_vm1 = vcmask 130048  }
 0x198   :  { %9997 = vmatprep.subr.mxu1 %v12421_v1  ;;  %9999 = vmatprep.mubr.msk.f32.mxu1 %vm12422_vm0, %v12421_v1  ;;  %v10945_v9 = vpack.c.bf16 %v399_v8, %v398_v7  ;;  %v12727_v15 = vand.u32 127, %v382_v14  ;;  %vm504_vm2 = vcmask 64512   ;;  %v685_v29 = vld [vmem:[#allocation12] sm:$0xff]  ;;  %v686_v30 = vld [vmem:[#allocation12 + $0x8] sm:$0xff]  ;;  %v12423_v32 = vmov 0.0|0.0   ;;  %v687_v33 = vld [vmem:[#allocation12 + $0x10] sm:$0xff] }
 0x199   :  { %9998 = vmatpush3.msra.mxu1 %v503_v5  ;;  %v12752_v31 = vpack.c.bf16 %v686_v30, %v685_v29  ;;  %v688_v34 = vld [vmem:[#allocation12 + $0x18] sm:$0xff]  ;;  %v9325_v36 = vld [vmem:[#allocation15] ss:$0 sm:$0xff]  ;;  %s12424_s9 = smov 64   ;;  %vm603_vm8 = vcmask 261120   ;;  %s12425_s16 = smov 96  }
 0x19a   :  { %10946 = vmatprep.subr.bf16.mxu0 %v10945_v9  ;;  %v12758_v35 = vpack.c.bf16 %v688_v34, %v687_v33  ;;  %v9322_v45 = vld [vmem:[#allocation14] ss:$0 sm:$0xff]  ;;  %vm802_vm9 = vcmask 254976   ;;  %vm1027_vm10 = vcmask 259076   ;;  %s14193_s20 = sld [smem:[#allocation58_spill]]  ;;  %vm1141_vm11 = vcmask 261126  }
 0x19b   :  { %10948 = vmatpush3.bf16.msra.mxu0 %v10945_v9  ;;  %vm913_vm12 = vcmask 257026   ;;  %s14194_s27 = sld [smem:[#allocation53_spill]]  ;;  %s14195_s18 = sld [smem:[#allocation54_spill]] }
 0x19c   :  { %v482_v2 = vld [vmem:[%s14190_s21] sm:$0xff]  ;;  %v483_v4 = vld [vmem:[%s14190_s21 + $0x8] sm:$0xff]  ;;  %v484_v10 = vld [vmem:[%s14190_s21 + $0x10] sm:$0xff]  ;;  %10963 = vmatprep.subr.bf16.mxu0 %v12423_v32  ;;  %s14196_s22 = sld [smem:[#allocation55_spill]]  ;;  %s14197_s23 = sld [smem:[#allocation60_spill]] }
 0x19d   :  { %v384_v3 = vld [vmem:[%s14191_s6] sm:$0xff]  ;;  %486 = vperm.xlu1 %11547, %v482_v2   ;;  %v385_v6 = vld [vmem:[%s14191_s6 + $0x8] sm:$0xff]  ;;  %v596_v16 = vld [vmem:[%s14192_s12 + $0x10] sm:$0xff]  ;;  %s12426_s5 = smov 32   ;;  %s14198_s26 = sld [smem:[#allocation63_spill]] }
 0x19e   :  { %387 = vperm.xlu0 %11546, %v384_v3   ;;  %v594_v11 = vld [vmem:[%s14192_s12] sm:$0xff]  ;;  %v595_v12 = vld [vmem:[%s14192_s12 + $0x8] sm:$0xff]  ;;  %v597_v17 = vld [vmem:[%s14192_s12 + $0x18] sm:$0xff]  ;;  %s14199_s29 = sld [smem:[#allocation64_spill]]  ;;  %s14200_s1 = sld [smem:[#allocation65_spill]] }
 0x19f   :  { %v10949_v13 = vpack.c.bf16 %v595_v12, %v594_v11  ;;  %v10953_v20 = vpack.c.bf16 %v597_v17, %v596_v16  ;;  %s14201_s4 = sld [smem:[#allocation56_spill]] }
 0x1a1   :  { %489 = vperm.xlu1 %11547, %v483_v4   ;;  %10950 = vmatprep.subr.bf16.mxu1 %v10949_v13 }
 0x1a2   :  { %390 = vperm.xlu0 %11546, %v385_v6  }
 0x1a5   :  { %775 = vrot.lane.b32.xlu1 %v9325_v36, %s12424_s9 }
 0x1a6   :  { %492 = vperm.xlu0 %11546, %v484_v10  }
 0x21c   :  { %v487_v18 = vpop.permute.xlu1 %486 }
 0x21d   :  { %v388_v19 = vpop.permute.xlu0 %387  ;;  %vm494_vm3 = vcmp.eq.s32.totalorder %v12727_v15, %v487_v18 }
 0x21e   :  { %vm392_vm4 = vcmp.eq.s32.totalorder %v12727_v15, %v388_v19  ;;  %v9316_v21 = vsel %vm494_vm3, 1.0, %v12421_v1 }
 0x21f   :  { %v9312_v22 = vsel %vm392_vm4, 1.0, %v12421_v1  ;;  %10000 = vmatmul.mubr.msk.f32.vlgmr.msra.gmra.mrb[0].mxu1 %vm504_vm2, %v9316_v21 }
 0x220   :  { %9994 = vmatprep.mubr.msk.f32.mxu0 %vm400_vm1, %v9312_v22  ;;  %v490_v23 = vpop.permute.xlu1 %489  ;;  %10002 = vmatprep.mubr.msk.f32.mxu1 %vm12422_vm0, %v12421_v1 }
 0x221   :  { %v391_v24 = vpop.permute.xlu0 %390  ;;  %10952 = vmatpush3.bf16.msra.mxu1 %v10949_v13  ;;  %vm495_vm5 = vcmp.eq.s32.totalorder %v12727_v15, %v490_v23 }
 0x222   :  { %vm393_vm6 = vcmp.eq.s32.totalorder %v12727_v15, %v391_v24  ;;  %10954 = vmatprep.subr.bf16.mxu1 %v10953_v20  ;;  %v9317_v25 = vsel %vm495_vm5, 1.0, %v12421_v1  ;;  %vm7472_vm5 = vcmask 195584  }
 0x223   :  { %v9313_v26 = vsel %vm393_vm6, 1.0, %v12421_v1  ;;  %10003 = vmatmul.mubr.msk.f32.gmra.mrb[2].mxu1 %vm504_vm2, %v9317_v25 }
 0x224   :  { %9995 = vmatmul.mubr.msk.f32.vlgmr.msra.gmra.mrb[0].mxu0 %vm400_vm1, %v9313_v26  ;;  %10005 = vmatprep.mubr.msk.f32.mxu1 %vm12422_vm0, %v12421_v1  ;;  %v12792_v49 = vpop.permute.xlu1 %775 }
 0x225   :  { %v493_v27 = vpop.permute.xlu0 %492  ;;  %10956 = vmatpush3.bf16.msra.mxu1 %v10953_v20  ;;  %10038 = vmatprep.mubr.msk.f32.mxu0 %vm12422_vm0, %v12421_v1 }
 0x226   :  { %vm496_vm7 = vcmp.eq.s32.totalorder %v12727_v15, %v493_v27  ;;  %10957 = vmatprep.subr.bf16.mxu1 %v12423_v32  ;;  %10965 = vmatpush3.bf16.msra.mxu0 %v12752_v31 }
 0x227   :  { %v9318_v28 = vsel %vm496_vm7, 1.0, %v12421_v1  ;;  %10966 = vmatprep.subr.bf16.mxu0 %v12423_v32 }
 0x228   :  { %10006 = vmatmul.mubr.msk.f32.gmra.mrb[4].mxu1 %vm504_vm2, %v9318_v28 }
 0x22a   :  { %10968 = vmatpush3.bf16.msra.mxu0 %v12758_v35 }
 0x22b   :  { %10975 = vmatprep.subr.bf16.mxu0 %v12423_v32 }
 0x2f2   :  { %v12763_v37 = vpop.f32.mrb[0].mxu1 }
 0x2f3   :  { %v10001_v38 = vpop.f32.mrb[1].mxu1 }
 0x2f6   :  { %v12767_v40 = vpop.f32.mrb[2].mxu1 }
 0x2f7   :  { %v12765_v39 = vpop.f32.mrb[0].mxu0  ;;  %v10004_v42 = vpop.f32.mrb[3].mxu1 }
 0x2f8   :  { %v12769_v41 = vpop.f32.mrb[1].mxu0 }
 0x2f9   :  { %10016 = vmatprep.mubr.msk.f32.mxu1 %vm603_vm8, %v12769_v41 }
 0x2fa   :  { %10017 = vmatmul.mubr.msk.f32.vlgmr.msra.gmra.mrb[6].mxu1 %vm603_vm8, %v12765_v39 }
 0x2fb   :  { %10959 = vmatpush3.bf16.msra.mxu1 %v12752_v31  ;;  %v12776_v43 = vpop.f32.mrb[4].mxu1  ;;  %10027 = vmatprep.mubr.msk.f32.mxu1 %vm12422_vm0, %v12421_v1 }
 0x2fc   :  { %v10007_v44 = vpop.f32.mrb[5].mxu1  ;;  %10960 = vmatprep.subr.bf16.mxu1 %v12423_v32 }
 0x2ff   :  { %10962 = vmatpush3.bf16.msra.mxu1 %v12758_v35 }
 0x300   :  { %10969 = vmatprep.subr.bf16.mxu1 %v12423_v32 }
 0x302   :  { %10028 = vmatmul.mubr.f32.vlgmr.msra.gmra.mrb[8].mxu1 %v12421_v1 }
 0x303   :  { %10971 = vmatpush3.bf16.msra.mxu1 %v12752_v31  ;;  %10049 = vmatprep.mubr.msk.f32.mxu1 %vm12422_vm0, %v12421_v1 }
 0x304   :  { %10972 = vmatprep.subr.bf16.mxu1 %v12423_v32 }
 0x307   :  { %10974 = vmatpush3.bf16.msra.mxu1 %v12758_v35 }
 0x308   :  { %10981 = vmatprep.subr.bf16.mxu1 %v12423_v32 }
 0x3cd   :  { %v10018_v46 = vpop.f32.mrb[6].mxu1 }
 0x3ce   :  { %v12790_v47 = vadd.f32 %v10018_v46, %v9322_v45  ;;  %v676_v48 = vpop.f32.mrb[7].mxu1 }
 0x3cf   :  { %v12796_v53 = vadd.f32 %v9322_v45, %v676_v48 }
 0x3d5   :  { %v763_v50 = vpop.f32.mrb[8].mxu1 }
 0x3d6   :  { %v778_v51 = vadd.f32 %v12792_v49, %v763_v50  ;;  %v10029_v52 = vpop.f32.mrb[9].mxu1  ;;  %v767_v54 = vadd.f32 %v763_v50, %v12796_v53 }
 0x3d8   :  { %780 = vrot.lane.b32.xlu0 %v778_v51, %s12424_s9  ;;  %v9326_v55 = vmul.f32 -1.442695, %v767_v54 }
 0x3da   :  { %11548 = vpow2.f32 %v9326_v55 }
 0x3e4   :  { %v11549_v56 = vpop.eup %11548 }
 0x3e5   :  { %v771_v57 = vadd.f32 1.0, %v11549_v56 }
 0x3e7   :  { %11550 = vrcp.f32 %v771_v57 }
 0x3f1   :  { %v11551_v58 = vpop.eup %11550 }
 0x3f2   :  { %v790_v0 = vsub.f32 1.0, %v11551_v58  ;;  %v796_v3 = vmul.f32 0.0, %v11551_v58 }
 0x44a   :  { %v781_v59 = vpop.permute.xlu0 %780 }
 0x44b   :  { %v783_v60 = vmul.f32 %v11551_v58, %v781_v59 }
 0x44d   :  { %785 = vrot.lane.b32.xlu1 %v783_v60, %s12424_s9 }
 0x4bf   :  { %v786_v61 = vpop.permute.xlu1 %785 }
 0x4c0   :  { %v788_v62 = vadd.f32 %v786_v61, %v12796_v53 }
 0x4c2   :  { %11552 = vtanh.f32 %v788_v62 }
 0x4cc   :  { %v11553_v63 = vpop.eup %11552 }
 0x4cd   :  { %792 = vrot.lane.b32.xlu0 %v11553_v63, %s12425_s16 }
 0x53f   :  { %v793_v2 = vpop.permute.xlu0 %792 }
 0x540   :  { %v795_v4 = vmul.f32 %v793_v2, %v790_v0 }
 0x542   :  { %v797_v5 = vadd.f32 %v796_v3, %v795_v4 }
 0x544   :  { %799 = vrot.lane.b32.xlu1 %v797_v5, %s12425_s16  ;;  %v905_v24 = vrot.slane %v797_v5, 6 }
 0x5b6   :  { %v800_v6 = vpop.permute.xlu1 %799 }
 0x5b7   :  { %803 = vst.msk [vmem:[#allocation2] sm:$0x3] %vm802_vm9, %v800_v6  ;;  %10039 = vmatmul.mubr.msk.f32.vlgmr.msra.gmra.mrb[2].mxu0 %vm603_vm8, %v800_v6 }
 0x5b8   :  { %10977 = vmatpush3.bf16.msra.mxu0 %v12752_v31  ;;  %10060 = vmatprep.mubr.msk.f32.mxu0 %vm12422_vm0, %v12421_v1 }
 0x5b9   :  { %10978 = vmatprep.subr.bf16.mxu0 %v12423_v32 }
 0x5bc   :  { %10980 = vmatpush3.bf16.msra.mxu0 %v12758_v35 }
 0x5bd   :  { %10987 = vmatprep.subr.bf16.mxu0 %v12423_v32 }
 0x68a   :  { %v872_v7 = vpop.f32.mrb[2].mxu0 }
 0x68b   :  { %v886_v8 = vadd.f32 %v872_v7, %v12792_v49  ;;  %v10040_v9 = vpop.f32.mrb[3].mxu0  ;;  %v877_v11 = vrot.slane %v872_v7, 6 }
 0x68d   :  { %v888_v10 = vrot.slane %v886_v8, 6  ;;  %v879_v12 = vadd.f32 %v877_v11, %v12796_v53 }
 0x68f   :  { %889 = vrot.lane.b32.xlu0 %v888_v10, %s12424_s9  ;;  %v9328_v13 = vmul.f32 -1.442695, %v879_v12 }
 0x691   :  { %11554 = vpow2.f32 %v9328_v13 }
 0x69b   :  { %v11555_v16 = vpop.eup %11554 }
 0x69c   :  { %v883_v17 = vadd.f32 1.0, %v11555_v16 }
 0x69e   :  { %11556 = vrcp.f32 %v883_v17 }
 0x6a8   :  { %v11557_v18 = vpop.eup %11556 }
 0x6a9   :  { %v899_v25 = vsub.f32 1.0, %v11557_v18  ;;  %v907_v28 = vmul.f32 %v11557_v18, %v905_v24 }
 0x701   :  { %v890_v19 = vpop.permute.xlu0 %889 }
 0x702   :  { %v892_v20 = vmul.f32 %v11557_v18, %v890_v19 }
 0x704   :  { %894 = vrot.lane.b32.xlu1 %v892_v20, %s12424_s9 }
 0x776   :  { %v895_v21 = vpop.permute.xlu1 %894 }
 0x777   :  { %v897_v22 = vadd.f32 %v895_v21, %v12796_v53 }
 0x779   :  { %11558 = vtanh.f32 %v897_v22 }
 0x783   :  { %v11559_v23 = vpop.eup %11558 }
 0x784   :  { %901 = vrot.lane.b32.xlu0 %v11559_v23, %s12425_s16 }
 0x7f6   :  { %v902_v26 = vpop.permute.xlu0 %901 }
 0x7f7   :  { %v904_v27 = vmul.f32 %v902_v26, %v899_v25 }
 0x7f9   :  { %v12817_v29 = vadd.f32 %v907_v28, %v904_v27 }
 0x7fb   :  { %v915_v30 = vrot.slane %v12817_v29, 2  ;;  %v1019_v59 = vrot.slane %v12817_v29, 6 }
 0x7fd   :  { %916 = vrot.lane.b32.xlu1 %v915_v30, %s12425_s16 }
 0x86f   :  { %v917_v33 = vpop.permute.xlu1 %916 }
 0x870   :  { %10050 = vmatmul.mubr.msk.f32.vlgmr.msra.gmra.mrb[10].mxu1 %vm603_vm8, %v917_v33 }
 0x871   :  { %10983 = vmatpush3.bf16.msra.mxu1 %v12752_v31  ;;  %10071 = vmatprep.mubr.msk.f32.mxu1 %vm12422_vm0, %v12421_v1 }
 0x872   :  { %10984 = vmatprep.subr.bf16.mxu1 %v12423_v32 }
 0x875   :  { %10986 = vmatpush3.bf16.msra.mxu1 %v12758_v35 }
 0x876   :  { %10993 = vmatprep.subr.bf16.mxu1 %v12423_v32 }
 0x943   :  { %v986_v34 = vpop.f32.mrb[10].mxu1 }
 0x944   :  { %v1000_v36 = vadd.f32 %v986_v34, %v12792_v49  ;;  %v10051_v38 = vpop.f32.mrb[11].mxu1  ;;  %v991_v44 = vrot.slane %v986_v34, 4 }
 0x946   :  { %v1002_v42 = vrot.slane %v1000_v36, 4  ;;  %v993_v45 = vadd.f32 %v991_v44, %v12796_v53 }
 0x948   :  { %1003 = vrot.lane.b32.xlu0 %v1002_v42, %s12424_s9  ;;  %v9330_v46 = vmul.f32 -1.442695, %v993_v45 }
 0x94a   :  { %11560 = vpow2.f32 %v9330_v46 }
 0x954   :  { %v11561_v48 = vpop.eup %11560 }
 0x955   :  { %v997_v50 = vadd.f32 1.0, %v11561_v48 }
 0x957   :  { %11562 = vrcp.f32 %v997_v50 }
 0x961   :  { %v11563_v51 = vpop.eup %11562 }
 0x962   :  { %v1013_v58 = vsub.f32 1.0, %v11563_v51  ;;  %v1021_v61 = vmul.f32 %v11563_v51, %v1019_v59 }
 0x9ba   :  { %v1004_v52 = vpop.permute.xlu0 %1003 }
 0x9bb   :  { %v1006_v54 = vmul.f32 %v11563_v51, %v1004_v52 }
 0x9bd   :  { %1008 = vrot.lane.b32.xlu1 %v1006_v54, %s12424_s9 }
 0xa2f   :  { %v1009_v55 = vpop.permute.xlu1 %1008 }
 0xa30   :  { %v1011_v56 = vadd.f32 %v1009_v55, %v12796_v53 }
 0xa32   :  { %11564 = vtanh.f32 %v1011_v56 }
 0xa3c   :  { %v11565_v57 = vpop.eup %11564 }
 0xa3d   :  { %1015 = vrot.lane.b32.xlu0 %v11565_v57, %s12425_s16 }
 0xaaf   :  { %v1016_v60 = vpop.permute.xlu0 %1015 }
 0xab0   :  { %v1018_v62 = vmul.f32 %v1016_v60, %v1013_v58 }
 0xab2   :  { %v12835_v63 = vadd.f32 %v1021_v61, %v1018_v62 }
 0xab4   :  { %v1029_v0 = vrot.slane %v12835_v63, 4  ;;  %v1133_v21 = vrot.slane %v12835_v63, 6 }
 0xab6   :  { %1030 = vrot.lane.b32.xlu1 %v1029_v0, %s12425_s16 }
 0xb28   :  { %v1031_v2 = vpop.permute.xlu1 %1030 }
 0xb29   :  { %10061 = vmatmul.mubr.msk.f32.vlgmr.msra.gmra.mrb[4].mxu0 %vm603_vm8, %v1031_v2 }
 0xb2a   :  { %10989 = vmatpush3.bf16.msra.mxu0 %v12752_v31  ;;  %10082 = vmatprep.mubr.msk.f32.mxu0 %vm12422_vm0, %v12421_v1 }
 0xb2b   :  { %10990 = vmatprep.subr.bf16.mxu0 %v12423_v32 }
 0xb2e   :  { %10992 = vmatpush3.bf16.msra.mxu0 %v12758_v35 }
 0xb2f   :  { %10999 = vmatprep.subr.bf16.mxu0 %v12423_v32 }
 0xbfc   :  { %v1100_v3 = vpop.f32.mrb[4].mxu0 }
 0xbfd   :  { %v1114_v4 = vadd.f32 %v1100_v3, %v12792_v49  ;;  %v10062_v5 = vpop.f32.mrb[5].mxu0  ;;  %v1105_v7 = vrot.slane %v1100_v3, 2 }
 0xbff   :  { %v1116_v6 = vrot.slane %v1114_v4, 2  ;;  %v1107_v8 = vadd.f32 %v1105_v7, %v12796_v53 }
 0xc01   :  { %1117 = vrot.lane.b32.xlu0 %v1116_v6, %s12424_s9  ;;  %v9332_v9 = vmul.f32 -1.442695, %v1107_v8  ;;  %v9341_v8 = vld [vmem:[%s14192_s12 + $0x20] sm:$0xff] }
 0xc03   :  { %11566 = vpow2.f32 %v9332_v9  ;;  %v9342_v9 = vld [vmem:[%s14192_s12 + $0x28] sm:$0xff] }
 0xc0d   :  { %v11567_v10 = vpop.eup %11566 }
 0xc0e   :  { %v1111_v11 = vadd.f32 1.0, %v11567_v10  ;;  %v11005_v10 = vpack.c.bf16 %v9342_v9, %v9341_v8 }
 0xc10   :  { %11568 = vrcp.f32 %v1111_v11 }
 0xc1a   :  { %v11569_v12 = vpop.eup %11568 }
 0xc1b   :  { %v1127_v20 = vsub.f32 1.0, %v11569_v12  ;;  %v1135_v23 = vmul.f32 %v11569_v12, %v1133_v21  ;;  %v9343_v21 = vld [vmem:[%s14192_s12 + $0x30] sm:$0xff] }
 0xc73   :  { %v1118_v13 = vpop.permute.xlu0 %1117 }
 0xc74   :  { %v1120_v16 = vmul.f32 %v11569_v12, %v1118_v13 }
 0xc76   :  { %1122 = vrot.lane.b32.xlu1 %v1120_v16, %s12424_s9 }
 0xce8   :  { %v1123_v17 = vpop.permute.xlu1 %1122 }
 0xce9   :  { %v1125_v18 = vadd.f32 %v1123_v17, %v12796_v53 }
 0xceb   :  { %11570 = vtanh.f32 %v1125_v18 }
 0xcf5   :  { %v11571_v19 = vpop.eup %11570 }
 0xcf6   :  { %1129 = vrot.lane.b32.xlu0 %v11571_v19, %s12425_s16 }
 0xd68   :  { %v1130_v22 = vpop.permute.xlu0 %1129 }
 0xd69   :  { %v1132_v24 = vmul.f32 %v1130_v22, %v1127_v20  ;;  %v9344_v22 = vld [vmem:[%s14192_s12 + $0x38] sm:$0xff] }
 0xd6b   :  { %v12853_v25 = vadd.f32 %v1135_v23, %v1132_v24  ;;  %v11009_v23 = vpack.c.bf16 %v9344_v22, %v9343_v21 }
 0xd6d   :  { %v1143_v26 = vrot.slane %v12853_v25, 6 }
 0xd6f   :  { %1144 = vrot.lane.b32.xlu1 %v1143_v26, %s12425_s16 }
 0xde1   :  { %v1145_v27 = vpop.permute.xlu1 %1144 }
 0xde2   :  { %10072 = vmatmul.mubr.msk.f32.vlgmr.msra.gmra.mrb[12].mxu1 %vm603_vm8, %v1145_v27 }
 0xde3   :  { %10995 = vmatpush3.bf16.msra.mxu1 %v12752_v31  ;;  %10093 = vmatprep.mubr.msk.f32.mxu1 %vm12422_vm0, %v12421_v1 }
 0xde4   :  { %10996 = vmatprep.subr.bf16.mxu1 %v12423_v32 }
 0xde7   :  { %10998 = vmatpush3.bf16.msra.mxu1 %v12758_v35 }
 0xde8   :  { %11006 = vmatprep.subr.bf16.mxu1 %v11005_v10 }
 0xeb5   :  { %v1214_v53 = vpop.f32.mrb[12].mxu1 }
 0xeb6   :  { %v1225_v28 = vadd.f32 %v1214_v53, %v12792_v49  ;;  %v10073_v30 = vpop.f32.mrb[13].mxu1  ;;  %v1218_v33 = vadd.f32 %v1214_v53, %v12790_v47 }
 0xeb7   :  { %v9345_v30 = vld [vmem:[#allocation14 + $0x1] ss:$0 sm:$0xff] }
 0xeb8   :  { %1227 = vrot.lane.b32.xlu0 %v1225_v28, %s12424_s9  ;;  %v9334_v34 = vmul.f32 -1.442695, %v1218_v33 }
 0xeba   :  { %11572 = vpow2.f32 %v9334_v34 }
 0xec4   :  { %v11573_v36 = vpop.eup %11572 }
 0xec5   :  { %v1222_v38 = vadd.f32 1.0, %v11573_v36 }
 0xec7   :  { %11574 = vrcp.f32 %v1222_v38 }
 0xed1   :  { %v11575_v42 = vpop.eup %11574 }
 0xed2   :  { %v1237_v51 = vsub.f32 1.0, %v11575_v42  ;;  %v1244_v54 = vmul.f32 %v11575_v42, %v1143_v26 }
 0xf2a   :  { %v1228_v44 = vpop.permute.xlu0 %1227 }
 0xf2b   :  { %v1230_v45 = vmul.f32 %v11575_v42, %v1228_v44 }
 0xf2d   :  { %1232 = vrot.lane.b32.xlu1 %v1230_v45, %s12424_s9 }
 0xf9f   :  { %v1233_v46 = vpop.permute.xlu1 %1232 }
 0xfa0   :  { %v1235_v48 = vadd.f32 %v1233_v46, %v12790_v47 }
 0xfa2   :  { %11576 = vtanh.f32 %v1235_v48 }
 0xfac   :  { %v11577_v50 = vpop.eup %11576 }
 0xfad   :  { %1239 = vrot.lane.b32.xlu0 %v11577_v50, %s12425_s16 }
0x101f   :  { %v1240_v52 = vpop.permute.xlu0 %1239 }
0x1020   :  { %v1242_v55 = vmul.f32 %v1240_v52, %v1237_v51 }
0x1022   :  { %v1245_v56 = vadd.f32 %v1244_v54, %v1242_v55  ;;  %v1673_v54 = vld [vmem:[#allocation12 + $0x20] sm:$0xff]  ;;  %v1674_v55 = vld [vmem:[#allocation12 + $0x28] sm:$0xff] }
0x1024   :  { %1247 = vrot.lane.b32.xlu1 %v1245_v56, %s12425_s16  ;;  %v1352_v12 = vrot.slane %v1245_v56, 6  ;;  %v12908_v56 = vpack.c.bf16 %v1674_v55, %v1673_v54 }
0x1096   :  { %v1248_v57 = vpop.permute.xlu1 %1247 }
0x1097   :  { %1250 = vst.msk [vmem:[#allocation2 + $0x8] sm:$0x3] %vm802_vm9, %v1248_v57  ;;  %10083 = vmatmul.mubr.msk.f32.vlgmr.msra.gmra.mrb[6].mxu0 %vm603_vm8, %v1248_v57  ;;  %v1675_v57 = vld [vmem:[#allocation12 + $0x30] sm:$0xff] }
0x1098   :  { %11001 = vmatpush3.bf16.msra.mxu0 %v12752_v31  ;;  %10104 = vmatprep.mubr.msk.f32.mxu0 %vm12422_vm0, %v12421_v1 }
0x1099   :  { %11002 = vmatprep.subr.bf16.mxu0 %v12423_v32 }
0x109c   :  { %11004 = vmatpush3.bf16.msra.mxu0 %v12758_v35 }
0x109d   :  { %11013 = vmatprep.subr.bf16.mxu0 %v12423_v32 }
0x116a   :  { %v1319_v58 = vpop.f32.mrb[6].mxu0 }
0x116b   :  { %v1333_v59 = vadd.f32 %v1319_v58, %v12792_v49  ;;  %v10084_v60 = vpop.f32.mrb[7].mxu0  ;;  %v1324_v62 = vrot.slane %v1319_v58, 6  ;;  %v1676_v58 = vld [vmem:[#allocation12 + $0x38] sm:$0xff] }
0x116d   :  { %v1335_v61 = vrot.slane %v1333_v59, 6  ;;  %v1326_v31 = vadd.f32 %v1324_v62, %v12790_v47  ;;  %v12912_v59 = vpack.c.bf16 %v1676_v58, %v1675_v57 }
0x116f   :  { %1336 = vrot.lane.b32.xlu0 %v1335_v61, %s12424_s9  ;;  %v9336_v0 = vmul.f32 -1.442695, %v1326_v31 }
0x1171   :  { %11578 = vpow2.f32 %v9336_v0 }
0x117b   :  { %v11579_v2 = vpop.eup %11578 }
0x117c   :  { %v1330_v3 = vadd.f32 1.0, %v11579_v2  ;;  %v9348_v2 = vld [vmem:[#allocation15 + $0x1] ss:$0 sm:$0xff] }
0x117e   :  { %11580 = vrcp.f32 %v1330_v3 }
0x1188   :  { %v11581_v35 = vpop.eup %11580 }
0x1189   :  { %v1346_v13 = vsub.f32 1.0, %v11581_v35  ;;  %v1354_v18 = vmul.f32 %v11581_v35, %v1352_v12 }
0x11e1   :  { %v1337_v4 = vpop.permute.xlu0 %1336 }
0x11e2   :  { %v1339_v5 = vmul.f32 %v11581_v35, %v1337_v4 }
0x11e4   :  { %1341 = vrot.lane.b32.xlu1 %v1339_v5, %s12424_s9 }
0x1256   :  { %v1342_v6 = vpop.permute.xlu1 %1341 }
0x1257   :  { %v1344_v7 = vadd.f32 %v1342_v6, %v12790_v47 }
0x1259   :  { %11582 = vtanh.f32 %v1344_v7 }
0x1263   :  { %v11583_v11 = vpop.eup %11582 }
0x1264   :  { %1348 = vrot.lane.b32.xlu0 %v11583_v11, %s12425_s16 }
0x12d6   :  { %v1349_v16 = vpop.permute.xlu0 %1348 }
0x12d7   :  { %v1351_v17 = vmul.f32 %v1349_v16, %v1346_v13 }
0x12d9   :  { %v12886_v19 = vadd.f32 %v1354_v18, %v1351_v17 }
0x12db   :  { %v1361_v20 = vrot.slane %v12886_v19, 2  ;;  %v1465_v61 = vrot.slane %v12886_v19, 6 }
0x12dd   :  { %1362 = vrot.lane.b32.xlu1 %v1361_v20, %s12425_s16 }
0x134f   :  { %v1363_v24 = vpop.permute.xlu1 %1362 }
0x1350   :  { %10094 = vmatmul.mubr.msk.f32.vlgmr.msra.gmra.mrb[14].mxu1 %vm603_vm8, %v1363_v24 }
0x1351   :  { %11008 = vmatpush3.bf16.msra.mxu1 %v11005_v10  ;;  %10115 = vmatprep.mubr.msk.f32.mxu1 %vm603_vm8, %v12769_v41 }
0x1352   :  { %11010 = vmatprep.subr.bf16.mxu1 %v11009_v23 }
0x1355   :  { %11012 = vmatpush3.bf16.msra.mxu1 %v11009_v23 }
0x1356   :  { %11019 = vmatprep.subr.bf16.mxu1 %v12423_v32 }
0x1358   :  { %10116 = vmatmul.mubr.msk.f32.vlgmr.msra.gmra.mrb[16].mxu1 %vm603_vm8, %v12765_v39 }
0x1359   :  { %10137 = vmatprep.mubr.msk.f32.mxu1 %vm12422_vm0, %v12421_v1  ;;  %11021 = vmatpush3.bf16.msra.mxu1 %v12908_v56 }
0x135a   :  { %11022 = vmatprep.subr.bf16.mxu1 %v12423_v32 }
0x135d   :  { %11024 = vmatpush3.bf16.msra.mxu1 %v12912_v59 }
0x135e   :  { %11031 = vmatprep.subr.bf16.mxu1 %v12423_v32 }
0x1423   :  { %v1432_v26 = vpop.f32.mrb[14].mxu1 }
0x1424   :  { %v1446_v27 = vadd.f32 %v1432_v26, %v12792_v49  ;;  %v10095_v53 = vpop.f32.mrb[15].mxu1  ;;  %v1437_v36 = vrot.slane %v1432_v26, 4 }
0x1426   :  { %v1448_v28 = vrot.slane %v1446_v27, 4  ;;  %v1439_v38 = vadd.f32 %v1437_v36, %v12790_v47 }
0x1428   :  { %1449 = vrot.lane.b32.xlu0 %v1448_v28, %s12424_s9  ;;  %v9338_v42 = vmul.f32 -1.442695, %v1439_v38 }
0x142a   :  { %11584 = vpow2.f32 %v9338_v42 }
0x142b   :  { %v10117_v33 = vpop.f32.mrb[16].mxu1 }
0x142c   :  { %v1663_v41 = vpop.f32.mrb[17].mxu1  ;;  %v12942_v13 = vadd.f32 %v10117_v33, %v9345_v30 }
0x142d   :  { %v12902_v34 = vadd.f32 %v9345_v30, %v1663_v41 }
0x1434   :  { %v11585_v39 = vpop.eup %11584 }
0x1435   :  { %v1443_v44 = vadd.f32 1.0, %v11585_v39 }
0x1437   :  { %11586 = vrcp.f32 %v1443_v44 }
0x1441   :  { %v11587_v45 = vpop.eup %11586 }
0x1442   :  { %v1459_v60 = vsub.f32 1.0, %v11587_v45  ;;  %v1467_v31 = vmul.f32 %v11587_v45, %v1465_v61 }
0x149a   :  { %v1450_v46 = vpop.permute.xlu0 %1449 }
0x149b   :  { %v1452_v48 = vmul.f32 %v11587_v45, %v1450_v46 }
0x149d   :  { %1454 = vrot.lane.b32.xlu1 %v1452_v48, %s12424_s9 }
0x150f   :  { %v1455_v50 = vpop.permute.xlu1 %1454 }
0x1510   :  { %v1457_v51 = vadd.f32 %v1455_v50, %v12790_v47 }
0x1512   :  { %11588 = vtanh.f32 %v1457_v51 }
0x151c   :  { %v11589_v52 = vpop.eup %11588 }
0x151d   :  { %1461 = vrot.lane.b32.xlu0 %v11589_v52, %s12425_s16 }
0x1521   :  { %1763 = vrot.lane.b32.xlu0 %v9348_v2, %s12424_s9 }
0x158f   :  { %v1462_v62 = vpop.permute.xlu0 %1461 }
0x1590   :  { %v1464_v0 = vmul.f32 %v1462_v62, %v1459_v60 }
0x1592   :  { %v12917_v3 = vadd.f32 %v1467_v31, %v1464_v0 }
0x1593   :  { %v12938_v7 = vpop.permute.xlu0 %1763 }
0x1594   :  { %v1474_v35 = vrot.slane %v12917_v3, 4 }
0x1596   :  { %1475 = vrot.lane.b32.xlu1 %v1474_v35, %s12425_s16 }
0x1608   :  { %v1476_v4 = vpop.permute.xlu1 %1475 }
0x1609   :  { %10105 = vmatmul.mubr.msk.f32.vlgmr.msra.gmra.mrb[8].mxu0 %vm603_vm8, %v1476_v4 }
0x160a   :  { %11015 = vmatpush3.bf16.msra.mxu0 %v12908_v56  ;;  %10126 = vmatprep.mubr.msk.f32.mxu0 %vm12422_vm0, %v12421_v1 }
0x160b   :  { %11016 = vmatprep.subr.bf16.mxu0 %v12423_v32 }
0x160e   :  { %11018 = vmatpush3.bf16.msra.mxu0 %v12912_v59 }
0x160f   :  { %11025 = vmatprep.subr.bf16.mxu0 %v12423_v32 }
0x1611   :  { %10127 = vmatmul.mubr.f32.vlgmr.msra.gmra.mrb[10].mxu0 %v12421_v1 }
0x1612   :  { %11027 = vmatpush3.bf16.msra.mxu0 %v12908_v56  ;;  %10148 = vmatprep.mubr.msk.f32.mxu0 %vm12422_vm0, %v12421_v1 }
0x1613   :  { %11028 = vmatprep.subr.bf16.mxu0 %v12423_v32 }
0x1616   :  { %11030 = vmatpush3.bf16.msra.mxu0 %v12912_v59 }
0x1617   :  { %11037 = vmatprep.subr.bf16.mxu0 %v12423_v32 }
0x16dc   :  { %v12936_v5 = vpop.f32.mrb[8].mxu0 }
0x16dd   :  { %v10106_v6 = vpop.f32.mrb[9].mxu0 }
0x16e4   :  { %v1748_v8 = vpop.f32.mrb[10].mxu0 }
0x16e5   :  { %v10128_v9 = vpop.f32.mrb[11].mxu0  ;;  %v1766_v10 = vadd.f32 %v12938_v7, %v1748_v8  ;;  %v1753_v12 = vrot.slane %v1748_v8, 2 }
0x16e7   :  { %v1768_v11 = vrot.slane %v1766_v10, 2  ;;  %v1755_v16 = vadd.f32 %v1753_v12, %v12942_v13 }
0x16e9   :  { %1769 = vrot.lane.b32.xlu1 %v1768_v11, %s12424_s9  ;;  %v9349_v17 = vmul.f32 -1.442695, %v1755_v16 }
0x16eb   :  { %11590 = vpow2.f32 %v9349_v17 }
0x16f5   :  { %v11591_v18 = vpop.eup %11590 }
0x16f6   :  { %v1759_v20 = vadd.f32 1.0, %v11591_v18 }
0x16f8   :  { %11592 = vrcp.f32 %v1759_v20 }
0x1702   :  { %v11593_v21 = vpop.eup %11592 }
0x1703   :  { %v1779_v53 = vsub.f32 1.0, %v11593_v21  ;;  %v1785_v30 = vmul.f32 0.0, %v11593_v21 }
0x175b   :  { %v1770_v22 = vpop.permute.xlu1 %1769 }
0x175c   :  { %v1772_v23 = vmul.f32 %v11593_v21, %v1770_v22 }
0x175e   :  { %1774 = vrot.lane.b32.xlu0 %v1772_v23, %s12424_s9 }
0x17d0   :  { %v1775_v24 = vpop.permute.xlu0 %1774 }
0x17d1   :  { %v1777_v26 = vadd.f32 %v1775_v24, %v12942_v13 }
0x17d3   :  { %11594 = vtanh.f32 %v1777_v26 }
0x17dd   :  { %v11595_v27 = vpop.eup %11594 }
0x17de   :  { %1781 = vrot.lane.b32.xlu1 %v11595_v27, %s12425_s16 }
0x1850   :  { %v1782_v28 = vpop.permute.xlu1 %1781 }
0x1851   :  { %v1784_v33 = vmul.f32 %v1782_v28, %v1779_v53 }
0x1853   :  { %v12948_v41 = vadd.f32 %v1785_v30, %v1784_v33 }
0x1855   :  { %v1792_v36 = vrot.slane %v12948_v41, 6  ;;  %v1896_v31 = vrot.slane %v12948_v41, 2 }
0x1857   :  { %1793 = vrot.lane.b32.xlu0 %v1792_v36, %s12425_s16 }
0x18c9   :  { %v1794_v38 = vpop.permute.xlu0 %1793 }
0x18ca   :  { %10138 = vmatmul.mubr.msk.f32.vlgmr.msra.gmra.mrb[18].mxu1 %vm603_vm8, %v1794_v38 }
0x18cb   :  { %11033 = vmatpush3.bf16.msra.mxu1 %v12908_v56  ;;  %10159 = vmatprep.mubr.msk.f32.mxu1 %vm12422_vm0, %v12421_v1 }
0x18cc   :  { %11034 = vmatprep.subr.bf16.mxu1 %v12423_v32 }
0x18cf   :  { %11036 = vmatpush3.bf16.msra.mxu1 %v12912_v59 }
0x18d0   :  { %11043 = vmatprep.subr.bf16.mxu1 %v12423_v32 }
0x199d   :  { %v1863_v42 = vpop.f32.mrb[18].mxu1 }
0x199e   :  { %v1877_v39 = vadd.f32 %v1863_v42, %v12938_v7  ;;  %v10139_v44 = vpop.f32.mrb[19].mxu1  ;;  %v1868_v46 = vrot.slane %v1863_v42, 4 }
0x19a0   :  { %v1879_v45 = vrot.slane %v1877_v39, 4  ;;  %v1870_v48 = vadd.f32 %v1868_v46, %v12942_v13 }
0x19a2   :  { %1880 = vrot.lane.b32.xlu1 %v1879_v45, %s12424_s9  ;;  %v9351_v50 = vmul.f32 -1.442695, %v1870_v48 }
0x19a4   :  { %11596 = vpow2.f32 %v9351_v50 }
0x19ae   :  { %v11597_v51 = vpop.eup %11596 }
0x19af   :  { %v1874_v52 = vadd.f32 1.0, %v11597_v51 }
0x19b1   :  { %11598 = vrcp.f32 %v1874_v52 }
0x19bb   :  { %v11599_v54 = vpop.eup %11598 }
0x19bc   :  { %v1890_v62 = vsub.f32 1.0, %v11599_v54  ;;  %v1898_v2 = vmul.f32 %v11599_v54, %v1896_v31 }
0x1a14   :  { %v1881_v55 = vpop.permute.xlu1 %1880 }
0x1a15   :  { %v1883_v57 = vmul.f32 %v11599_v54, %v1881_v55 }
0x1a17   :  { %1885 = vrot.lane.b32.xlu0 %v1883_v57, %s12424_s9 }
0x1a89   :  { %v1886_v58 = vpop.permute.xlu0 %1885 }
0x1a8a   :  { %v1888_v60 = vadd.f32 %v1886_v58, %v12942_v13 }
0x1a8c   :  { %11600 = vtanh.f32 %v1888_v60 }
0x1a96   :  { %v11601_v61 = vpop.eup %11600 }
0x1a97   :  { %1892 = vrot.lane.b32.xlu1 %v11601_v61, %s12425_s16 }
0x1b09   :  { %v1893_v0 = vpop.permute.xlu1 %1892 }
0x1b0a   :  { %v1895_v35 = vmul.f32 %v1893_v0, %v1890_v62 }
0x1b0c   :  { %v12966_v4 = vadd.f32 %v1898_v2, %v1895_v35 }
0x1b0e   :  { %v1905_v6 = vrot.slane %v12966_v4, 4  ;;  %v2009_v30 = vrot.slane %v12966_v4, 2 }
0x1b10   :  { %1906 = vrot.lane.b32.xlu0 %v1905_v6, %s12425_s16 }
0x1b82   :  { %v1907_v8 = vpop.permute.xlu0 %1906 }
0x1b83   :  { %10149 = vmatmul.mubr.msk.f32.vlgmr.msra.gmra.mrb[12].mxu0 %vm603_vm8, %v1907_v8 }
0x1b84   :  { %11039 = vmatpush3.bf16.msra.mxu0 %v12908_v56  ;;  %10170 = vmatprep.mubr.msk.f32.mxu0 %vm12422_vm0, %v12421_v1 }
0x1b85   :  { %11040 = vmatprep.subr.bf16.mxu0 %v12423_v32 }
0x1b88   :  { %11042 = vmatpush3.bf16.msra.mxu0 %v12912_v59 }
0x1b89   :  { %11049 = vmatprep.subr.bf16.mxu0 %v12423_v32 }
0x1c56   :  { %v1976_v9 = vpop.f32.mrb[12].mxu0 }
0x1c57   :  { %v1990_v10 = vadd.f32 %v1976_v9, %v12938_v7  ;;  %v10150_v11 = vpop.f32.mrb[13].mxu0  ;;  %v1981_v16 = vrot.slane %v1976_v9, 6 }
0x1c59   :  { %v1992_v12 = vrot.slane %v1990_v10, 6  ;;  %v1983_v17 = vadd.f32 %v1981_v16, %v12942_v13 }
0x1c5b   :  { %1993 = vrot.lane.b32.xlu1 %v1992_v12, %s12424_s9  ;;  %v9353_v18 = vmul.f32 -1.442695, %v1983_v17 }
0x1c5d   :  { %11602 = vpow2.f32 %v9353_v18 }
0x1c67   :  { %v11603_v20 = vpop.eup %11602 }
0x1c68   :  { %v1987_v21 = vadd.f32 1.0, %v11603_v20 }
0x1c6a   :  { %11604 = vrcp.f32 %v1987_v21 }
0x1c74   :  { %v11605_v22 = vpop.eup %11604 }
0x1c75   :  { %v2003_v28 = vsub.f32 1.0, %v11605_v22  ;;  %v2011_v36 = vmul.f32 %v11605_v22, %v2009_v30 }
0x1ccd   :  { %v1994_v23 = vpop.permute.xlu1 %1993 }
0x1cce   :  { %v1996_v24 = vmul.f32 %v11605_v22, %v1994_v23 }
0x1cd0   :  { %1998 = vrot.lane.b32.xlu0 %v1996_v24, %s12424_s9 }
0x1d42   :  { %v1999_v26 = vpop.permute.xlu0 %1998 }
0x1d43   :  { %v2001_v27 = vadd.f32 %v1999_v26, %v12942_v13 }
0x1d45   :  { %11606 = vtanh.f32 %v2001_v27 }
0x1d4f   :  { %v11607_v53 = vpop.eup %11606 }
0x1d50   :  { %2005 = vrot.lane.b32.xlu1 %v11607_v53, %s12425_s16 }
0x1dc2   :  { %v2006_v33 = vpop.permute.xlu1 %2005 }
0x1dc3   :  { %v2008_v38 = vmul.f32 %v2006_v33, %v2003_v28 }
0x1dc5   :  { %v12984_v42 = vadd.f32 %v2011_v36, %v2008_v38 }
0x1dc7   :  { %v2018_v39 = vrot.slane %v12984_v42, 2 }
0x1dc9   :  { %2019 = vrot.lane.b32.xlu0 %v2018_v39, %s12425_s16 }
0x1e3b   :  { %v2020_v44 = vpop.permute.xlu0 %2019 }
0x1e3c   :  { %10160 = vmatmul.mubr.msk.f32.vlgmr.msra.gmra.mrb[20].mxu1 %vm603_vm8, %v2020_v44 }
0x1e3d   :  { %11045 = vmatpush3.bf16.msra.mxu1 %v12908_v56  ;;  %10181 = vmatprep.mubr.msk.f32.mxu1 %vm12422_vm0, %v12421_v1 }
0x1e3e   :  { %11046 = vmatprep.subr.bf16.mxu1 %v12423_v32 }
0x1e41   :  { %11048 = vmatpush3.bf16.msra.mxu1 %v12912_v59 }
0x1e42   :  { %11055 = vmatprep.subr.bf16.mxu1 %v12423_v32 }
0x1f0f   :  { %v2089_v45 = vpop.f32.mrb[20].mxu1 }
0x1f10   :  { %v2100_v46 = vadd.f32 %v2089_v45, %v12938_v7  ;;  %v10161_v48 = vpop.f32.mrb[21].mxu1  ;;  %v2093_v50 = vadd.f32 %v2089_v45, %v12942_v13 }
0x1f12   :  { %2102 = vrot.lane.b32.xlu1 %v2100_v46, %s12424_s9  ;;  %v9355_v51 = vmul.f32 -1.442695, %v2093_v50 }
0x1f14   :  { %11608 = vpow2.f32 %v9355_v51 }
0x1f1e   :  { %v11609_v52 = vpop.eup %11608 }
0x1f1f   :  { %v2097_v54 = vadd.f32 1.0, %v11609_v52 }
0x1f21   :  { %11610 = vrcp.f32 %v2097_v54 }
0x1f2b   :  { %v11611_v55 = vpop.eup %11610 }
0x1f2c   :  { %v2112_v31 = vsub.f32 1.0, %v11611_v55  ;;  %v2119_v2 = vmul.f32 %v11611_v55, %v2018_v39 }
0x1f84   :  { %v2103_v57 = vpop.permute.xlu1 %2102 }
0x1f85   :  { %v2105_v58 = vmul.f32 %v11611_v55, %v2103_v57 }
0x1f87   :  { %2107 = vrot.lane.b32.xlu0 %v2105_v58, %s12424_s9 }
0x1ff9   :  { %v2108_v60 = vpop.permute.xlu0 %2107 }
0x1ffa   :  { %v2110_v61 = vadd.f32 %v2108_v60, %v12942_v13 }
0x1ffc   :  { %11612 = vtanh.f32 %v2110_v61 }
0x2006   :  { %v11613_v62 = vpop.eup %11612 }
0x2007   :  { %2114 = vrot.lane.b32.xlu1 %v11613_v62, %s12425_s16 }
0x2079   :  { %v2115_v0 = vpop.permute.xlu1 %2114 }
0x207a   :  { %v2117_v35 = vmul.f32 %v2115_v0, %v2112_v31 }
0x207c   :  { %v2120_v6 = vadd.f32 %v2119_v2, %v2117_v35 }
0x207e   :  { %2122 = vrot.lane.b32.xlu0 %v2120_v6, %s12425_s16  ;;  %v2227_v53 = vrot.slane %v2120_v6, 2 }
0x20f0   :  { %v2123_v8 = vpop.permute.xlu0 %2122 }
0x20f1   :  { %2125 = vst.msk [vmem:[#allocation3 + $0x8] sm:$0x3] %vm802_vm9, %v2123_v8  ;;  %10171 = vmatmul.mubr.msk.f32.vlgmr.msra.gmra.mrb[14].mxu0 %vm603_vm8, %v2123_v8 }
0x20f2   :  { %11051 = vmatpush3.bf16.msra.mxu0 %v12908_v56  ;;  %10192 = vmatprep.mubr.msk.f32.mxu0 %vm12422_vm0, %v12421_v1 }
0x20f3   :  { %11052 = vmatprep.subr.bf16.mxu0 %v12423_v32 }
0x20f6   :  { %11054 = vmatpush3.bf16.msra.mxu0 %v12912_v59 }
0x21c4   :  { %v2194_v13 = vpop.f32.mrb[14].mxu0 }
0x21c5   :  { %v2208_v9 = vadd.f32 %v2194_v13, %v12938_v7  ;;  %v10172_v10 = vpop.f32.mrb[15].mxu0  ;;  %v2199_v12 = vrot.slane %v2194_v13, 2 }
0x21c7   :  { %v2210_v11 = vrot.slane %v2208_v9, 2  ;;  %v2201_v16 = vadd.f32 %v2199_v12, %v12902_v34 }
0x21c9   :  { %2211 = vrot.lane.b32.xlu1 %v2210_v11, %s12424_s9  ;;  %v9357_v17 = vmul.f32 -1.442695, %v2201_v16 }
0x21cb   :  { %11614 = vpow2.f32 %v9357_v17 }
0x21d5   :  { %v11615_v18 = vpop.eup %11614 }
0x21d6   :  { %v2205_v20 = vadd.f32 1.0, %v11615_v18 }
0x21d8   :  { %11616 = vrcp.f32 %v2205_v20 }
0x21e2   :  { %v11617_v21 = vpop.eup %11616 }
0x21e3   :  { %v2221_v28 = vsub.f32 1.0, %v11617_v21  ;;  %v2229_v33 = vmul.f32 %v11617_v21, %v2227_v53 }
0x223b   :  { %v2212_v22 = vpop.permute.xlu1 %2211 }
0x223c   :  { %v2214_v23 = vmul.f32 %v11617_v21, %v2212_v22 }
0x223e   :  { %2216 = vrot.lane.b32.xlu0 %v2214_v23, %s12424_s9 }
0x22b0   :  { %v2217_v24 = vpop.permute.xlu0 %2216 }
0x22b1   :  { %v2219_v26 = vadd.f32 %v2217_v24, %v12902_v34 }
0x22b3   :  { %11618 = vtanh.f32 %v2219_v26 }
0x22bd   :  { %v11619_v27 = vpop.eup %11618 }
0x22be   :  { %2223 = vrot.lane.b32.xlu1 %v11619_v27, %s12425_s16 }
0x2330   :  { %v2224_v30 = vpop.permute.xlu1 %2223 }
0x2331   :  { %v2226_v36 = vmul.f32 %v2224_v30, %v2221_v28 }
0x2333   :  { %v13015_v38 = vadd.f32 %v2229_v33, %v2226_v36 }
0x2335   :  { %v2236_v39 = vrot.slane %v13015_v38, 6  ;;  %v2340_v0 = vrot.slane %v13015_v38, 2 }
0x2337   :  { %2237 = vrot.lane.b32.xlu0 %v2236_v39, %s12425_s16 }
0x23a9   :  { %v2238_v44 = vpop.permute.xlu0 %2237 }
0x23aa   :  { %10182 = vmatmul.mubr.msk.f32.vlgmr.msra.gmra.mrb[22].mxu1 %vm603_vm8, %v2238_v44 }
0x23ab   :  { %11057 = vmatpush3.bf16.msra.mxu1 %v12908_v56  ;;  %10203 = vmatprep.mubr.msk.f32.mxu1 %vm12422_vm0, %v12421_v1 }
0x23ac   :  { %11058 = vmatprep.subr.bf16.mxu1 %v12423_v32 }
0x23af   :  { %11060 = vmatpush3.bf16.msra.mxu1 %v12912_v59 }
0x23b0   :  { %11077 = vmatprep.subr.bf16.mxu1 %v12423_v32 }
0x247d   :  { %v2307_v45 = vpop.f32.mrb[22].mxu1 }
0x247e   :  { %v2321_v46 = vadd.f32 %v2307_v45, %v12938_v7  ;;  %v10183_v48 = vpop.f32.mrb[23].mxu1  ;;  %v2312_v51 = vrot.slane %v2307_v45, 4 }
0x2480   :  { %v2323_v50 = vrot.slane %v2321_v46, 4  ;;  %v2314_v52 = vadd.f32 %v2312_v51, %v12902_v34  ;;  %v1559_v46 = vadd.f32 %v12936_v5, %v12792_v49  ;;  %v1550_v51 = vrot.slane %v12936_v5, 2 }
0x2482   :  { %2324 = vrot.lane.b32.xlu1 %v2323_v50, %s12424_s9  ;;  %v9359_v56 = vmul.f32 -1.442695, %v2314_v52  ;;  %v1561_v50 = vrot.slane %v1559_v46, 2  ;;  %v1552_v52 = vadd.f32 %v1550_v51, %v12790_v47  ;;  %v2575_v46 = vld [vmem:[%s14193_s20 + $0x8] sm:$0xff] }
0x2484   :  { %11620 = vpow2.f32 %v9359_v56  ;;  %v9340_v56 = vmul.f32 -1.442695, %v1552_v52 }
0x248e   :  { %v11621_v54 = vpop.eup %11620 }
0x248f   :  { %v2318_v55 = vadd.f32 1.0, %v11621_v54 }
0x2491   :  { %11622 = vrcp.f32 %v2318_v55 }
0x249b   :  { %v11623_v57 = vpop.eup %11622 }
0x249c   :  { %v2334_v31 = vsub.f32 1.0, %v11623_v57  ;;  %v2342_v35 = vmul.f32 %v11623_v57, %v2340_v0 }
0x24f4   :  { %v2325_v58 = vpop.permute.xlu1 %2324 }
0x24f5   :  { %v2327_v59 = vmul.f32 %v11623_v57, %v2325_v58 }
0x24f7   :  { %2329 = vrot.lane.b32.xlu0 %v2327_v59, %s12424_s9 }
0x2569   :  { %v2330_v60 = vpop.permute.xlu0 %2329 }
0x256a   :  { %v2332_v61 = vadd.f32 %v2330_v60, %v12902_v34 }
0x256c   :  { %11624 = vtanh.f32 %v2332_v61 }
0x2576   :  { %v11625_v62 = vpop.eup %11624 }
0x2577   :  { %2336 = vrot.lane.b32.xlu1 %v11625_v62, %s12425_s16 }
0x25e9   :  { %v2337_v2 = vpop.permute.xlu1 %2336 }
0x25ea   :  { %v2339_v6 = vmul.f32 %v2337_v2, %v2334_v31 }
0x25ec   :  { %v2343_v8 = vadd.f32 %v2342_v35, %v2339_v6 }
0x25ee   :  { %v2349_v13 = vrot.slane %v2343_v8, 4  ;;  %v2453_v33 = vrot.slane %v2343_v8, 2 }
0x25f0   :  { %2350 = vrot.lane.b32.xlu0 %v2349_v13, %s12425_s16 }
0x2662   :  { %v2351_v9 = vpop.permute.xlu0 %2350 }
0x2663   :  { %10193 = vmatmul.mubr.msk.f32.vlgmr.msra.gmra.mrb[16].mxu0 %vm603_vm8, %v2351_v9 }
0x2736   :  { %v2420_v10 = vpop.f32.mrb[16].mxu0 }
0x2737   :  { %v2434_v11 = vadd.f32 %v2420_v10, %v12938_v7  ;;  %v10194_v12 = vpop.f32.mrb[17].mxu0  ;;  %v2425_v17 = vrot.slane %v2420_v10, 6 }
0x2739   :  { %v2436_v16 = vrot.slane %v2434_v11, 6  ;;  %v2427_v18 = vadd.f32 %v2425_v17, %v12902_v34  ;;  %v2752_v17 = vld [vmem:[#allocation12 + $0x40] sm:$0xff] }
0x273b   :  { %2437 = vrot.lane.b32.xlu1 %v2436_v16, %s12424_s9  ;;  %v9361_v20 = vmul.f32 -1.442695, %v2427_v18  ;;  %v2753_v18 = vld [vmem:[#allocation12 + $0x48] sm:$0xff] }
0x273d   :  { %11626 = vpow2.f32 %v9361_v20  ;;  %v2754_v20 = vld [vmem:[#allocation12 + $0x50] sm:$0xff] }
0x2747   :  { %v11627_v21 = vpop.eup %11626 }
0x2748   :  { %v2431_v22 = vadd.f32 1.0, %v11627_v21  ;;  %v2755_v21 = vld [vmem:[#allocation12 + $0x58] sm:$0xff] }
0x274a   :  { %11628 = vrcp.f32 %v2431_v22  ;;  %v13080_v22 = vpack.c.bf16 %v2755_v21, %v2754_v20 }
0x2754   :  { %v11629_v23 = vpop.eup %11628 }
0x2755   :  { %v2447_v30 = vsub.f32 1.0, %v11629_v23  ;;  %v2455_v39 = vmul.f32 %v11629_v23, %v2453_v33 }
0x27ad   :  { %v2438_v24 = vpop.permute.xlu1 %2437 }
0x27ae   :  { %v2440_v26 = vmul.f32 %v11629_v23, %v2438_v24 }
0x27b0   :  { %2442 = vrot.lane.b32.xlu0 %v2440_v26, %s12424_s9 }
0x2822   :  { %v2443_v27 = vpop.permute.xlu0 %2442 }
0x2823   :  { %v2445_v53 = vadd.f32 %v2443_v27, %v12902_v34  ;;  %v2580_v27 = vld [vmem:[#allocation11 + $0x10] sm:$0xff] }
0x2825   :  { %11630 = vtanh.f32 %v2445_v53  ;;  %v2581_v53 = vld [vmem:[#allocation11 + $0x18] sm:$0xff] }
0x2826   :  { %11632 = vpow2.f32 %v9340_v56 }
0x282f   :  { %v11631_v28 = vpop.eup %11630 }
0x2830   :  { %2449 = vrot.lane.b32.xlu1 %v11631_v28, %s12425_s16  ;;  %v11633_v54 = vpop.eup %11632  ;;  %v11065_v28 = vpack.c.bf16 %v2581_v53, %v2580_v27 }
0x2831   :  { %v1556_v55 = vadd.f32 1.0, %v11633_v54  ;;  %v9369_v54 = vld [vmem:[#allocation15 + $0x2] ss:$0 sm:$0xff] }
0x2833   :  { %11634 = vrcp.f32 %v1556_v55 }
0x283d   :  { %v11635_v49 = vpop.eup %11634 }
0x28a2   :  { %v2450_v36 = vpop.permute.xlu1 %2449 }
0x28a3   :  { %v2452_v44 = vmul.f32 %v2450_v36, %v2447_v30 }
0x28a5   :  { %v13041_v45 = vadd.f32 %v2455_v39, %v2452_v44  ;;  %v2574_v44 = vld [vmem:[%s14193_s20] sm:$0xff] }
0x28a7   :  { %v2462_v48 = vrot.slane %v13041_v45, 2 }
0x28a9   :  { %2463 = vrot.lane.b32.xlu0 %v2462_v48, %s12425_s16 }
0x28ad   :  { %1562 = vrot.lane.b32.xlu0 %v1561_v50, %s12424_s9  ;;  %v11069_v50 = vpack.c.bf16 %v2575_v46, %v2574_v44 }
0x291b   :  { %v2464_v57 = vpop.permute.xlu0 %2463 }
0x291c   :  { %10204 = vmatmul.mubr.msk.f32.vlgmr.msra.gmra.mrb[24].mxu1 %vm603_vm8, %v2464_v57 }
0x291d   :  { %10236 = vmatprep.mubr.msk.f32.mxu1 %vm12422_vm0, %v12421_v1 }
0x291f   :  { %v1563_v58 = vpop.permute.xlu0 %1562 }
0x2920   :  { %v1565_v59 = vmul.f32 %v11635_v49, %v1563_v58 }
0x2922   :  { %1567 = vrot.lane.b32.xlu0 %v1565_v59, %s12424_s9 }
0x2994   :  { %v1568_v60 = vpop.permute.xlu0 %1567 }
0x2995   :  { %v1570_v5 = vadd.f32 %v1568_v60, %v12790_v47  ;;  %v2577_v60 = vld [vmem:[%s14193_s20 + $0x18] sm:$0xff] }
0x2997   :  { %11636 = vtanh.f32 %v1570_v5 }
0x29a1   :  { %v11637_v61 = vpop.eup %11636 }
0x29a2   :  { %1574 = vrot.lane.b32.xlu0 %v11637_v61, %s12425_s16 }
0x29a6   :  { %2345 = vrot.lane.b32.xlu0 %v2343_v8, %s12425_s16 }
0x29aa   :  { %1901 = vrot.lane.b32.xlu0 %v12966_v4, %s12425_s16 }
0x29ef   :  { %v2533_v62 = vpop.f32.mrb[24].mxu1 }
0x29f0   :  { %v2544_v31 = vadd.f32 %v2533_v62, %v12938_v7  ;;  %v10205_v0 = vpop.f32.mrb[25].mxu1  ;;  %v2537_v6 = vadd.f32 %v2533_v62, %v12902_v34 }
0x29f2   :  { %2546 = vrot.lane.b32.xlu1 %v2544_v31, %s12424_s9  ;;  %v9363_v8 = vmul.f32 -1.442695, %v2537_v6 }
0x29f4   :  { %11638 = vpow2.f32 %v9363_v8  ;;  %v9368_v8 = vld [vmem:[#allocation14 + $0x2] ss:$0 sm:$0xff] }
0x29fe   :  { %v11639_v13 = vpop.eup %11638 }
0x29ff   :  { %v2541_v4 = vadd.f32 1.0, %v11639_v13 }
0x2a01   :  { %11640 = vrcp.f32 %v2541_v4 }
0x2a0b   :  { %v11641_v9 = vpop.eup %11640 }
0x2a0c   :  { %v2556_v30 = vsub.f32 1.0, %v11641_v9  ;;  %v2563_v36 = vmul.f32 %v11641_v9, %v2462_v48 }
0x2a14   :  { %v1575_v2 = vpop.permute.xlu0 %1574 }
0x2a18   :  { %v2346_v35 = vpop.permute.xlu0 %2345 }
0x2a19   :  { %2348 = vst.msk [vmem:[#allocation3] sm:$0x30] %vm1027_vm10, %v2346_v35 }
0x2a1c   :  { %v1902_v47 = vpop.permute.xlu0 %1901 }
0x2a1d   :  { %1904 = vst.msk [vmem:[#allocation3 + $0x8] sm:$0x30] %vm1027_vm10, %v1902_v47 }
0x2a64   :  { %v2547_v7 = vpop.permute.xlu1 %2546 }
0x2a65   :  { %v2549_v10 = vmul.f32 %v11641_v9, %v2547_v7 }
0x2a67   :  { %2551 = vrot.lane.b32.xlu1 %v2549_v10, %s12424_s9 }
0x2ad9   :  { %v2552_v11 = vpop.permute.xlu1 %2551 }
0x2ada   :  { %v2554_v12 = vadd.f32 %v2552_v11, %v12902_v34  ;;  %v13077_v34 = vpack.c.bf16 %v2753_v18, %v2752_v17 }
0x2adc   :  { %11642 = vtanh.f32 %v2554_v12  ;;  %11079 = vmatpush3.bf16.msra.mxu1 %v13077_v34 }
0x2add   :  { %11080 = vmatprep.subr.bf16.mxu1 %v12423_v32 }
0x2ae0   :  { %11082 = vmatpush3.bf16.msra.mxu1 %v13080_v22 }
0x2ae1   :  { %11083 = vmatprep.subr.bf16.mxu1 %v12423_v32 }
0x2ae3   :  { %10237 = vmatmul.mubr.f32.vlgmr.msra.gmra.mrb[26].mxu1 %v12421_v1 }
0x2ae4   :  { %11085 = vmatpush3.bf16.msra.mxu1 %v13077_v34  ;;  %10247 = vmatprep.mubr.msk.f32.mxu1 %vm12422_vm0, %v12421_v1 }
0x2ae5   :  { %11086 = vmatprep.subr.bf16.mxu1 %v12423_v32 }
0x2ae6   :  { %v11643_v16 = vpop.eup %11642 }
0x2ae7   :  { %2558 = vrot.lane.b32.xlu1 %v11643_v16, %s12425_s16 }
0x2ae8   :  { %11088 = vmatpush3.bf16.msra.mxu1 %v13080_v22 }
0x2ae9   :  { %11095 = vmatprep.subr.bf16.mxu1 %v12423_v32 }
0x2aeb   :  { %2232 = vrot.lane.b32.xlu1 %v13015_v38, %s12425_s16  ;;  %v1572_v38 = vsub.f32 1.0, %v11635_v49 }
0x2aed   :  { %v1577_v23 = vmul.f32 %v1575_v2, %v1572_v38 }
0x2aef   :  { %2458 = vrot.lane.b32.xlu1 %v13041_v45, %s12425_s16 }
0x2af3   :  { %1788 = vrot.lane.b32.xlu1 %v12948_v41, %s12425_s16  ;;  %v1578_v41 = vrot.slane %v12917_v3, 6 }
0x2af7   :  { %2014 = vrot.lane.b32.xlu1 %v12984_v42, %s12425_s16  ;;  %v1580_v42 = vmul.f32 %v11635_v49, %v1578_v41 }
0x2af9   :  { %v1581_v24 = vadd.f32 %v1580_v42, %v1577_v23 }
0x2afb   :  { %1024 = vrot.lane.b32.xlu1 %v12835_v63, %s12425_s16  ;;  %v2578_v63 = vld [vmem:[#allocation11] sm:$0xff] }
0x2aff   :  { %1357 = vrot.lane.b32.xlu1 %v12886_v19, %s12425_s16  ;;  %v2579_v19 = vld [vmem:[#allocation11 + $0x8] sm:$0xff] }
0x2b00   :  { %v11061_v26 = vpack.c.bf16 %v2579_v19, %v2578_v63 }
0x2b02   :  { %11062 = vmatprep.subr.bf16.mxu0 %v11061_v26 }
0x2b03   :  { %1583 = vrot.lane.b32.xlu1 %v1581_v24, %s12425_s16  ;;  %11064 = vmatpush3.bf16.msra.mxu0 %v11061_v26 }
0x2b04   :  { %11066 = vmatprep.subr.bf16.mxu0 %v11065_v28 }
0x2b07   :  { %11068 = vmatpush3.bf16.msra.mxu0 %v11065_v28 }
0x2b08   :  { %11070 = vmatprep.subr.bf16.mxu0 %v11069_v50 }
0x2b59   :  { %v2559_v33 = vpop.permute.xlu1 %2558 }
0x2b5a   :  { %v2561_v39 = vmul.f32 %v2559_v33, %v2556_v30 }
0x2b5c   :  { %v2564_v51 = vadd.f32 %v2563_v36, %v2561_v39 }
0x2b5d   :  { %v2233_v52 = vpop.permute.xlu1 %2232 }
0x2b5e   :  { %2235 = vst.msk [vmem:[#allocation3] sm:$0xc0] %vm1141_vm11, %v2233_v52  ;;  %2566 = vrot.lane.b32.xlu0 %v2564_v51, %s12425_s16 }
0x2b61   :  { %v2459_v56 = vpop.permute.xlu1 %2458 }
0x2b62   :  { %2461 = vst.msk [vmem:[#allocation3] sm:$0xc] %vm913_vm12, %v2459_v56  ;;  %910 = vrot.lane.b32.xlu0 %v12817_v29, %s12425_s16 }
0x2b65   :  { %v1789_v45 = vpop.permute.xlu1 %1788 }
0x2b66   :  { %1791 = vst.msk [vmem:[#allocation3 + $0x8] sm:$0xc0] %vm1141_vm11, %v1789_v45  ;;  %1138 = vrot.lane.b32.xlu0 %v12853_v25, %s12425_s16 }
0x2b69   :  { %v2015_v48 = vpop.permute.xlu1 %2014 }
0x2b6a   :  { %2017 = vst.msk [vmem:[#allocation3 + $0x8] sm:$0xc] %vm913_vm12, %v2015_v48  ;;  %1470 = vrot.lane.b32.xlu0 %v12917_v3, %s12425_s16  ;;  %v2576_v3 = vld [vmem:[%s14193_s20 + $0x10] sm:$0xff] }
0x2b6b   :  { %v11073_v62 = vpack.c.bf16 %v2577_v60, %v2576_v3 }
0x2b6d   :  { %v1025_v55 = vpop.permute.xlu1 %1024 }
0x2b6e   :  { %1028 = vst.msk [vmem:[#allocation2] sm:$0x30] %vm1027_vm10, %v1025_v55  ;;  %2839 = vrot.lane.b32.xlu0 %v9369_v54, %s12424_s9 }
0x2b71   :  { %v1358_v29 = vpop.permute.xlu1 %1357  ;;  %v13126_v31 = vld [vmem:[#allocation3 + $0x8] sm:$0xff] }
0x2b72   :  { %1360 = vst.msk [vmem:[#allocation2 + $0x8] sm:$0xc] %vm913_vm12, %v1358_v29 }
0x2b75   :  { %v1584_v57 = vpop.permute.xlu1 %1583 }
0x2b76   :  { %1586 = vst.msk [vmem:[#allocation2 + $0x8] sm:$0xc0] %vm1141_vm11, %v1584_v57 }
0x2bb6   :  { %v2827_v49 = vpop.f32.mrb[26].mxu1 }
0x2bb7   :  { %v10238_v59 = vpop.f32.mrb[27].mxu1 }
0x2bd0   :  { %v2567_v25 = vpop.permute.xlu0 %2566 }
0x2bd1   :  { %2569 = vst.msk [vmem:[#allocation3] sm:$0x3] %vm802_vm9, %v2567_v25 }
0x2bd4   :  { %v911_v58 = vpop.permute.xlu0 %910 }
0x2bd5   :  { %914 = vst.msk [vmem:[#allocation2] sm:$0xc] %vm913_vm12, %v911_v58 }
0x2bd8   :  { %v1139_v5 = vpop.permute.xlu0 %1138  ;;  %v13121_v61 = vld [vmem:[#allocation3] sm:$0xff] }
0x2bd9   :  { %1142 = vst.msk [vmem:[#allocation2] sm:$0xc0] %vm1141_vm11, %v1139_v5  ;;  %10214 = vmatprep.mubr.msk.f32.mxu0 %vm603_vm8, %v13121_v61 }
0x2bda   :  { %10215 = vmatmul.mubr.msk.f32.vlgmr.msra.gmra.mrb[18].mxu0 %vm603_vm8, %v13126_v31 }
0x2bdb   :  { %11072 = vmatpush3.bf16.msra.mxu0 %v11069_v50 }
0x2bdc   :  { %v1471_v0 = vpop.permute.xlu0 %1470  ;;  %11074 = vmatprep.subr.bf16.mxu0 %v11073_v62 }
0x2bdd   :  { %1473 = vst.msk [vmem:[#allocation2 + $0x8] sm:$0x30] %vm1027_vm10, %v1471_v0 }
0x2bdf   :  { %11076 = vmatpush3.bf16.msra.mxu0 %v11073_v62 }
0x2be0   :  { %v13131_v2 = vld [vmem:[#allocation2] sm:$0xff]  ;;  %v13133_v35 = vpop.permute.xlu0 %2839  ;;  %11089 = vmatprep.subr.bf16.mxu0 %v12423_v32 }
0x2be1   :  { %10225 = vmatprep.mubr.msk.f32.mxu0 %vm603_vm8, %v13131_v2  ;;  %v2842_v47 = vadd.f32 %v13133_v35, %v2827_v49 }
0x2be3   :  { %2844 = vrot.lane.b32.xlu1 %v2842_v47, %s12424_s9 }
0x2be4   :  { %v13140_v6 = vld [vmem:[#allocation2 + $0x8] sm:$0xff] }
0x2be5   :  { %10226 = vmatmul.mubr.msk.f32.vlgmr.msra.gmra.mrb[18].mxu0 %vm603_vm8, %v13140_v6 }
0x2be6   :  { %11091 = vmatpush3.bf16.msra.mxu0 %v13077_v34  ;;  %10258 = vmatprep.mubr.msk.f32.mxu0 %vm12422_vm0, %v12421_v1 }
0x2be7   :  { %11092 = vmatprep.subr.bf16.mxu0 %v12423_v32 }
0x2bea   :  { %11094 = vmatpush3.bf16.msra.mxu0 %v13080_v22 }
0x2beb   :  { %11101 = vmatprep.subr.bf16.mxu0 %v12423_v32 }
0x2c55   :  { %v2845_v17 = vpop.permute.xlu1 %2844 }
0x2cb8   :  { %v10227_v13 = vpop.f32.mrb[18].mxu0 }
0x2cb9   :  { %v13150_v4 = vadd.f32 %v10227_v13, %v9368_v8  ;;  %v2735_v9 = vpop.f32.mrb[19].mxu0 }
0x2cba   :  { %v13152_v7 = vadd.f32 %v9368_v8, %v2735_v9 }
0x2cbc   :  { %v2831_v10 = vadd.f32 %v2827_v49, %v13152_v7 }
0x2cbe   :  { %v9370_v11 = vmul.f32 -1.442695, %v2831_v10 }
0x2cc0   :  { %11644 = vpow2.f32 %v9370_v11 }
0x2cca   :  { %v11645_v12 = vpop.eup %11644 }
0x2ccb   :  { %v2835_v16 = vadd.f32 1.0, %v11645_v12 }
0x2ccd   :  { %11646 = vrcp.f32 %v2835_v16 }
0x2cd7   :  { %v11647_v18 = vpop.eup %11646 }
0x2cd8   :  { %v2847_v20 = vmul.f32 %v11647_v18, %v2845_v17  ;;  %v2854_v23 = vsub.f32 1.0, %v11647_v18  ;;  %v2860_v24 = vmul.f32 0.0, %v11647_v18 }
0x2cda   :  { %2849 = vrot.lane.b32.xlu0 %v2847_v20, %s12424_s9 }
0x2d4c   :  { %v2850_v21 = vpop.permute.xlu0 %2849 }
0x2d4d   :  { %v2852_v38 = vadd.f32 %v2850_v21, %v13152_v7 }
0x2d4f   :  { %11648 = vtanh.f32 %v2852_v38 }
0x2d59   :  { %v11649_v41 = vpop.eup %11648 }
0x2d5a   :  { %2856 = vrot.lane.b32.xlu1 %v11649_v41, %s12425_s16 }
0x2dcc   :  { %v2857_v42 = vpop.permute.xlu1 %2856 }
0x2dcd   :  { %v2859_v63 = vmul.f32 %v2857_v42, %v2854_v23 }
0x2dcf   :  { %v2861_v19 = vadd.f32 %v2860_v24, %v2859_v63 }
0x2dd1   :  { %2863 = vrot.lane.b32.xlu0 %v2861_v19, %s12425_s16  ;;  %v2968_v54 = vrot.slane %v2861_v19, 6 }
0x2e43   :  { %v2864_v26 = vpop.permute.xlu0 %2863 }
0x2e44   :  { %2866 = vst.msk [vmem:[#allocation4] sm:$0x3] %vm802_vm9, %v2864_v26  ;;  %10248 = vmatmul.mubr.msk.f32.vlgmr.msra.gmra.mrb[28].mxu1 %vm603_vm8, %v2864_v26 }
0x2e45   :  { %11097 = vmatpush3.bf16.msra.mxu1 %v13077_v34  ;;  %10269 = vmatprep.mubr.msk.f32.mxu1 %vm12422_vm0, %v12421_v1 }
0x2e46   :  { %11098 = vmatprep.subr.bf16.mxu1 %v12423_v32 }
0x2e49   :  { %11100 = vmatpush3.bf16.msra.mxu1 %v13080_v22 }
0x2e4a   :  { %11107 = vmatprep.subr.bf16.mxu1 %v12423_v32 }
0x2f17   :  { %v2935_v27 = vpop.f32.mrb[28].mxu1 }
0x2f18   :  { %v2949_v53 = vadd.f32 %v2935_v27, %v13133_v35  ;;  %v10249_v28 = vpop.f32.mrb[29].mxu1  ;;  %v2940_v33 = vrot.slane %v2935_v27, 6 }
0x2f1a   :  { %v2951_v30 = vrot.slane %v2949_v53, 6  ;;  %v2942_v36 = vadd.f32 %v2940_v33, %v13152_v7 }
0x2f1c   :  { %2952 = vrot.lane.b32.xlu1 %v2951_v30, %s12424_s9  ;;  %v9372_v39 = vmul.f32 -1.442695, %v2942_v36 }
0x2f1e   :  { %11650 = vpow2.f32 %v9372_v39 }
0x2f28   :  { %v11651_v44 = vpop.eup %11650 }
0x2f29   :  { %v2946_v46 = vadd.f32 1.0, %v11651_v44 }
0x2f2b   :  { %11652 = vrcp.f32 %v2946_v46 }
0x2f35   :  { %v11653_v50 = vpop.eup %11652 }
0x2f36   :  { %v2962_v55 = vsub.f32 1.0, %v11653_v50  ;;  %v2970_v57 = vmul.f32 %v11653_v50, %v2968_v54 }
0x2f8e   :  { %v2953_v51 = vpop.permute.xlu1 %2952 }
0x2f8f   :  { %v2955_v52 = vmul.f32 %v11653_v50, %v2953_v51 }
0x2f91   :  { %2957 = vrot.lane.b32.xlu0 %v2955_v52, %s12424_s9 }
0x3003   :  { %v2958_v56 = vpop.permute.xlu0 %2957 }
0x3004   :  { %v2960_v45 = vadd.f32 %v2958_v56, %v13152_v7 }
0x3006   :  { %11654 = vtanh.f32 %v2960_v45 }
0x3010   :  { %v11655_v48 = vpop.eup %11654 }
0x3011   :  { %2964 = vrot.lane.b32.xlu1 %v11655_v48, %s12425_s16 }
0x3083   :  { %v2965_v29 = vpop.permute.xlu1 %2964 }
0x3084   :  { %v2967_v25 = vmul.f32 %v2965_v29, %v2962_v55 }
0x3086   :  { %v13173_v49 = vadd.f32 %v2970_v57, %v2967_v25 }
0x3088   :  { %v2977_v58 = vrot.slane %v13173_v49, 2  ;;  %v3081_v21 = vrot.slane %v13173_v49, 6 }
0x308a   :  { %2978 = vrot.lane.b32.xlu0 %v2977_v58, %s12425_s16 }
0x30fc   :  { %v2979_v59 = vpop.permute.xlu0 %2978 }
0x30fd   :  { %10259 = vmatmul.mubr.msk.f32.vlgmr.msra.gmra.mrb[20].mxu0 %vm603_vm8, %v2979_v59 }
0x30fe   :  { %11103 = vmatpush3.bf16.msra.mxu0 %v13077_v34  ;;  %10280 = vmatprep.mubr.msk.f32.mxu0 %vm12422_vm0, %v12421_v1 }
0x30ff   :  { %11104 = vmatprep.subr.bf16.mxu0 %v12423_v32 }
0x3102   :  { %11106 = vmatpush3.bf16.msra.mxu0 %v13080_v22 }
0x3103   :  { %11113 = vmatprep.subr.bf16.mxu0 %v12423_v32 }
0x31d0   :  { %v3048_v3 = vpop.f32.mrb[20].mxu0 }
0x31d1   :  { %v3062_v60 = vadd.f32 %v3048_v3, %v13133_v35  ;;  %v10260_v5 = vpop.f32.mrb[21].mxu0  ;;  %v3053_v0 = vrot.slane %v3048_v3, 4 }
0x31d3   :  { %v3064_v62 = vrot.slane %v3062_v60, 4  ;;  %v3055_v47 = vadd.f32 %v3053_v0, %v13152_v7 }
0x31d5   :  { %3065 = vrot.lane.b32.xlu1 %v3064_v62, %s12424_s9  ;;  %v9374_v8 = vmul.f32 -1.442695, %v3055_v47 }
0x31d7   :  { %11656 = vpow2.f32 %v9374_v8 }
0x31e1   :  { %v11657_v13 = vpop.eup %11656 }
0x31e2   :  { %v3059_v9 = vadd.f32 1.0, %v11657_v13 }
0x31e4   :  { %11658 = vrcp.f32 %v3059_v9 }
0x31ee   :  { %v11659_v10 = vpop.eup %11658 }
0x31ef   :  { %v3075_v20 = vsub.f32 1.0, %v11659_v10  ;;  %v3083_v41 = vmul.f32 %v11659_v10, %v3081_v21 }
0x3247   :  { %v3066_v11 = vpop.permute.xlu1 %3065 }
0x3248   :  { %v3068_v12 = vmul.f32 %v11659_v10, %v3066_v11 }
0x324a   :  { %3070 = vrot.lane.b32.xlu0 %v3068_v12, %s12424_s9 }
0x32bc   :  { %v3071_v16 = vpop.permute.xlu0 %3070 }
0x32bd   :  { %v3073_v17 = vadd.f32 %v3071_v16, %v13152_v7 }
0x32bf   :  { %11660 = vtanh.f32 %v3073_v17 }
0x32c9   :  { %v11661_v18 = vpop.eup %11660 }
0x32ca   :  { %3077 = vrot.lane.b32.xlu1 %v11661_v18, %s12425_s16 }
0x333c   :  { %v3078_v38 = vpop.permute.xlu1 %3077 }
0x333d   :  { %v3080_v23 = vmul.f32 %v3078_v38, %v3075_v20 }
0x333f   :  { %v13191_v42 = vadd.f32 %v3083_v41, %v3080_v23 }
0x3341   :  { %v3090_v24 = vrot.slane %v13191_v42, 4  ;;  %v3194_v48 = vrot.slane %v13191_v42, 6 }
0x3343   :  { %3091 = vrot.lane.b32.xlu0 %v3090_v24, %s12425_s16 }
0x33b5   :  { %v3092_v63 = vpop.permute.xlu0 %3091 }
0x33b6   :  { %10270 = vmatmul.mubr.msk.f32.vlgmr.msra.gmra.mrb[30].mxu1 %vm603_vm8, %v3092_v63 }
0x33b7   :  { %11109 = vmatpush3.bf16.msra.mxu1 %v13077_v34  ;;  %10291 = vmatprep.mubr.msk.f32.mxu1 %vm12422_vm0, %v12421_v1 }
0x33b8   :  { %11110 = vmatprep.subr.bf16.mxu1 %v12423_v32 }
0x33bb   :  { %11112 = vmatpush3.bf16.msra.mxu1 %v13080_v22 }
0x33bc   :  { %11119 = vmatprep.subr.bf16.mxu1 %v12423_v32 }
0x3489   :  { %v3161_v19 = vpop.f32.mrb[30].mxu1 }
0x348a   :  { %v3175_v26 = vadd.f32 %v3161_v19, %v13133_v35  ;;  %v10271_v27 = vpop.f32.mrb[31].mxu1  ;;  %v3166_v28 = vrot.slane %v3161_v19, 2 }
0x348c   :  { %v3177_v53 = vrot.slane %v3175_v26, 2  ;;  %v3168_v30 = vadd.f32 %v3166_v28, %v13152_v7 }
0x348e   :  { %3178 = vrot.lane.b32.xlu1 %v3177_v53, %s12424_s9  ;;  %v9376_v33 = vmul.f32 -1.442695, %v3168_v30 }
0x3490   :  { %11662 = vpow2.f32 %v9376_v33 }
0x349a   :  { %v11663_v36 = vpop.eup %11662 }
0x349b   :  { %v3172_v39 = vadd.f32 1.0, %v11663_v36  ;;  %v3653_v36 = vld [vmem:[#allocation11 + $0x20] sm:$0xff] }
0x349d   :  { %11664 = vrcp.f32 %v3172_v39  ;;  %v3654_v39 = vld [vmem:[#allocation11 + $0x28] sm:$0xff] }
0x34a7   :  { %v11665_v44 = vpop.eup %11664 }
0x34a8   :  { %v3188_v45 = vsub.f32 1.0, %v11665_v44  ;;  %v3196_v55 = vmul.f32 %v11665_v44, %v3194_v48 }
0x3500   :  { %v3179_v46 = vpop.permute.xlu1 %3178 }
0x3501   :  { %v3181_v50 = vmul.f32 %v11665_v44, %v3179_v46  ;;  %v11125_v44 = vpack.c.bf16 %v3654_v39, %v3653_v36 }
0x3503   :  { %3183 = vrot.lane.b32.xlu0 %v3181_v50, %s12424_s9 }
0x3575   :  { %v3184_v51 = vpop.permute.xlu0 %3183 }
0x3576   :  { %v3186_v52 = vadd.f32 %v3184_v51, %v13152_v7 }
0x3578   :  { %11666 = vtanh.f32 %v3186_v52 }
0x3582   :  { %v11667_v56 = vpop.eup %11666 }
0x3583   :  { %3190 = vrot.lane.b32.xlu1 %v11667_v56, %s12425_s16 }
0x35f5   :  { %v3191_v54 = vpop.permute.xlu1 %3190 }
0x35f6   :  { %v3193_v29 = vmul.f32 %v3191_v54, %v3188_v45 }
0x35f8   :  { %v13209_v57 = vadd.f32 %v3196_v55, %v3193_v29  ;;  %v3655_v55 = vld [vmem:[#allocation11 + $0x30] sm:$0xff]  ;;  %v3656_v29 = vld [vmem:[#allocation11 + $0x38] sm:$0xff] }
0x35fa   :  { %v3203_v25 = vrot.slane %v13209_v57, 6 }
0x35fc   :  { %3204 = vrot.lane.b32.xlu0 %v3203_v25, %s12425_s16 }
0x366e   :  { %v3205_v58 = vpop.permute.xlu0 %3204 }
0x366f   :  { %10281 = vmatmul.mubr.msk.f32.vlgmr.msra.gmra.mrb[22].mxu0 %vm603_vm8, %v3205_v58 }
0x3670   :  { %11115 = vmatpush3.bf16.msra.mxu0 %v13077_v34  ;;  %10302 = vmatprep.mubr.msk.f32.mxu0 %vm12422_vm0, %v12421_v1 }
0x3671   :  { %11116 = vmatprep.subr.bf16.mxu0 %v12423_v32 }
0x3674   :  { %11118 = vmatpush3.bf16.msra.mxu0 %v13080_v22 }
0x3675   :  { %11126 = vmatprep.subr.bf16.mxu0 %v11125_v44 }
0x3742   :  { %v3274_v7 = vpop.f32.mrb[22].mxu0 }
0x3743   :  { %v3285_v59 = vadd.f32 %v3274_v7, %v13133_v35  ;;  %v10282_v3 = vpop.f32.mrb[23].mxu0  ;;  %v3278_v60 = vadd.f32 %v3274_v7, %v13150_v4  ;;  %v9385_v7 = vld [vmem:[%s14193_s20 + $0x20] sm:$0xff] }
0x3745   :  { %3287 = vrot.lane.b32.xlu1 %v3285_v59, %s12424_s9  ;;  %v9378_v5 = vmul.f32 -1.442695, %v3278_v60  ;;  %v9386_v59 = vld [vmem:[%s14193_s20 + $0x28] sm:$0xff]  ;;  %v9387_v60 = vld [vmem:[%s14193_s20 + $0x30] sm:$0xff] }
0x3746   :  { %v11133_v3 = vpack.c.bf16 %v9386_v59, %v9385_v7 }
0x3747   :  { %11668 = vpow2.f32 %v9378_v5  ;;  %v9388_v5 = vld [vmem:[%s14193_s20 + $0x38] sm:$0xff] }
0x3751   :  { %v11669_v62 = vpop.eup %11668 }
0x3752   :  { %v3282_v0 = vadd.f32 1.0, %v11669_v62  ;;  %v11137_v62 = vpack.c.bf16 %v9388_v5, %v9387_v60 }
0x3754   :  { %11670 = vrcp.f32 %v3282_v0 }
0x375e   :  { %v11671_v47 = vpop.eup %11670 }
0x375f   :  { %v3297_v12 = vsub.f32 1.0, %v11671_v47  ;;  %v3304_v17 = vmul.f32 %v11671_v47, %v3203_v25  ;;  %v11129_v25 = vpack.c.bf16 %v3656_v29, %v3655_v55 }
0x37b7   :  { %v3288_v8 = vpop.permute.xlu1 %3287 }
0x37b8   :  { %v3290_v13 = vmul.f32 %v11671_v47, %v3288_v8 }
0x37ba   :  { %3292 = vrot.lane.b32.xlu0 %v3290_v13, %s12424_s9 }
0x382c   :  { %v3293_v9 = vpop.permute.xlu0 %3292 }
0x382d   :  { %v3295_v10 = vadd.f32 %v3293_v9, %v13150_v4 }
0x382f   :  { %11672 = vtanh.f32 %v3295_v10 }
0x3839   :  { %v11673_v11 = vpop.eup %11672 }
0x383a   :  { %3299 = vrot.lane.b32.xlu1 %v11673_v11, %s12425_s16 }
0x38ac   :  { %v3300_v16 = vpop.permute.xlu1 %3299 }
0x38ad   :  { %v3302_v18 = vmul.f32 %v3300_v16, %v3297_v12 }
0x38af   :  { %v3305_v20 = vadd.f32 %v3304_v17, %v3302_v18 }
0x38b1   :  { %3307 = vrot.lane.b32.xlu0 %v3305_v20, %s12425_s16  ;;  %v3412_v50 = vrot.slane %v3305_v20, 6 }
0x3923   :  { %v3308_v21 = vpop.permute.xlu0 %3307 }
0x3924   :  { %3310 = vst.msk [vmem:[#allocation4 + $0x8] sm:$0x3] %vm802_vm9, %v3308_v21  ;;  %10292 = vmatmul.mubr.msk.f32.vlgmr.msra.gmra.mrb[32].mxu1 %vm603_vm8, %v3308_v21 }
0x3925   :  { %11121 = vmatpush3.bf16.msra.mxu1 %v13077_v34  ;;  %10313 = vmatprep.mubr.msk.f32.mxu1 %vm12422_vm0, %v12421_v1 }
0x3926   :  { %11122 = vmatprep.subr.bf16.mxu1 %v12423_v32 }
0x3929   :  { %11124 = vmatpush3.bf16.msra.mxu1 %v13080_v22 }
0x392a   :  { %11141 = vmatprep.subr.bf16.mxu1 %v12423_v32 }
0x39f7   :  { %v3379_v38 = vpop.f32.mrb[32].mxu1 }
0x39f8   :  { %v3393_v41 = vadd.f32 %v3379_v38, %v13133_v35  ;;  %v10293_v23 = vpop.f32.mrb[33].mxu1  ;;  %v3384_v63 = vrot.slane %v3379_v38, 6 }
0x39f9   :  { %v3815_v23 = vld [vmem:[#allocation12 + $0x60] sm:$0xff] }
0x39fa   :  { %v3395_v24 = vrot.slane %v3393_v41, 6  ;;  %v3386_v19 = vadd.f32 %v3384_v63, %v13150_v4 }
0x39fc   :  { %3396 = vrot.lane.b32.xlu1 %v3395_v24, %s12424_s9  ;;  %v9380_v34 = vmul.f32 -1.442695, %v3386_v19  ;;  %v3816_v24 = vld [vmem:[#allocation12 + $0x68] sm:$0xff]  ;;  %v3817_v19 = vld [vmem:[#allocation12 + $0x70] sm:$0xff] }
0x39fd   :  { %v13268_v63 = vpack.c.bf16 %v3816_v24, %v3815_v23 }
0x39fe   :  { %11674 = vpow2.f32 %v9380_v34  ;;  %v3818_v34 = vld [vmem:[#allocation12 + $0x78] sm:$0xff] }
0x3a08   :  { %v11675_v26 = vpop.eup %11674 }
0x3a09   :  { %v3390_v27 = vadd.f32 1.0, %v11675_v26  ;;  %v13272_v26 = vpack.c.bf16 %v3818_v34, %v3817_v19 }
0x3a0b   :  { %11676 = vrcp.f32 %v3390_v27 }
0x3a15   :  { %v11677_v53 = vpop.eup %11676 }
0x3a16   :  { %v3406_v51 = vsub.f32 1.0, %v11677_v53  ;;  %v3414_v56 = vmul.f32 %v11677_v53, %v3412_v50 }
0x3a6e   :  { %v3397_v28 = vpop.permute.xlu1 %3396 }
0x3a6f   :  { %v3399_v22 = vmul.f32 %v11677_v53, %v3397_v28 }
0x3a71   :  { %3401 = vrot.lane.b32.xlu0 %v3399_v22, %s12424_s9 }
0x3ae3   :  { %v3402_v30 = vpop.permute.xlu0 %3401 }
0x3ae4   :  { %v3404_v33 = vadd.f32 %v3402_v30, %v13150_v4 }
0x3ae6   :  { %11678 = vtanh.f32 %v3404_v33  ;;  %v9394_v33 = vld [vmem:[#allocation15 + $0x3] ss:$0 sm:$0xff] }
0x3af0   :  { %v11679_v46 = vpop.eup %11678 }
0x3af1   :  { %3408 = vrot.lane.b32.xlu1 %v11679_v46, %s12425_s16 }
0x3b63   :  { %v3409_v52 = vpop.permute.xlu1 %3408 }
0x3b64   :  { %v3411_v45 = vmul.f32 %v3409_v52, %v3406_v51 }
0x3b66   :  { %v13240_v48 = vadd.f32 %v3414_v56, %v3411_v45 }
0x3b68   :  { %v3421_v54 = vrot.slane %v13240_v48, 2  ;;  %v3525_v53 = vrot.slane %v13240_v48, 6 }
0x3b6a   :  { %3422 = vrot.lane.b32.xlu0 %v3421_v54, %s12425_s16 }
0x3bdc   :  { %v3423_v58 = vpop.permute.xlu0 %3422 }
0x3bdd   :  { %10303 = vmatmul.mubr.msk.f32.vlgmr.msra.gmra.mrb[24].mxu0 %vm603_vm8, %v3423_v58 }
0x3bde   :  { %11128 = vmatpush3.bf16.msra.mxu0 %v11125_v44  ;;  %10324 = vmatprep.mubr.msk.f32.mxu0 %vm603_vm8, %v13121_v61 }
0x3bdf   :  { %11130 = vmatprep.subr.bf16.mxu0 %v11129_v25 }
0x3be2   :  { %11132 = vmatpush3.bf16.msra.mxu0 %v11129_v25 }
0x3be3   :  { %11134 = vmatprep.subr.bf16.mxu0 %v11133_v3 }
0x3be5   :  { %10325 = vmatmul.mubr.msk.f32.vlgmr.msra.gmra.mrb[26].mxu0 %vm603_vm8, %v13126_v31  ;;  %v9393_v31 = vld [vmem:[#allocation14 + $0x3] ss:$0 sm:$0xff] }
0x3be6   :  { %11136 = vmatpush3.bf16.msra.mxu0 %v11133_v3  ;;  %10335 = vmatprep.mubr.msk.f32.mxu0 %vm603_vm8, %v13131_v2 }
0x3be7   :  { %11138 = vmatprep.subr.bf16.mxu0 %v11137_v62 }
0x3bea   :  { %11140 = vmatpush3.bf16.msra.mxu0 %v11137_v62 }
0x3beb   :  { %11153 = vmatprep.subr.bf16.mxu0 %v12423_v32 }
0x3bed   :  { %10336 = vmatmul.mubr.msk.f32.vlgmr.msra.gmra.mrb[26].mxu0 %vm603_vm8, %v13140_v6 }
0x3bee   :  { %10368 = vmatprep.mubr.msk.f32.mxu0 %vm12422_vm0, %v12421_v1  ;;  %11155 = vmatpush3.bf16.msra.mxu0 %v13268_v63 }
0x3bef   :  { %11156 = vmatprep.subr.bf16.mxu0 %v12423_v32 }
0x3bf2   :  { %11158 = vmatpush3.bf16.msra.mxu0 %v13272_v26 }
0x3bf3   :  { %11165 = vmatprep.subr.bf16.mxu0 %v12423_v32 }
0x3cb0   :  { %v3492_v61 = vpop.f32.mrb[24].mxu0 }
0x3cb1   :  { %v3506_v0 = vadd.f32 %v3492_v61, %v13133_v35  ;;  %v10304_v47 = vpop.f32.mrb[25].mxu0  ;;  %v3497_v10 = vrot.slane %v3492_v61, 4 }
0x3cb3   :  { %v3508_v8 = vrot.slane %v3506_v0, 4  ;;  %v3499_v11 = vadd.f32 %v3497_v10, %v13150_v4 }
0x3cb5   :  { %3509 = vrot.lane.b32.xlu1 %v3508_v8, %s12424_s9  ;;  %v9382_v12 = vmul.f32 -1.442695, %v3499_v11 }
0x3cb7   :  { %11680 = vpow2.f32 %v9382_v12 }
0x3cc0   :  { %v10337_v13 = vpop.f32.mrb[26].mxu0 }
0x3cc1   :  { %v3798_v2 = vpop.f32.mrb[27].mxu0  ;;  %v11681_v6 = vpop.eup %11680  ;;  %v13302_v29 = vadd.f32 %v10337_v13, %v9393_v31 }
0x3cc2   :  { %v13262_v9 = vadd.f32 %v9393_v31, %v3798_v2  ;;  %v3503_v16 = vadd.f32 1.0, %v11681_v6 }
0x3cc4   :  { %11682 = vrcp.f32 %v3503_v16 }
0x3cce   :  { %v11683_v17 = vpop.eup %11682 }
0x3ccf   :  { %v3519_v27 = vsub.f32 1.0, %v11683_v17  ;;  %v3527_v22 = vmul.f32 %v11683_v17, %v3525_v53 }
0x3d27   :  { %v3510_v18 = vpop.permute.xlu1 %3509 }
0x3d28   :  { %v3512_v20 = vmul.f32 %v11683_v17, %v3510_v18 }
0x3d2a   :  { %3514 = vrot.lane.b32.xlu0 %v3512_v20, %s12424_s9 }
0x3d9c   :  { %v3515_v21 = vpop.permute.xlu0 %3514 }
0x3d9d   :  { %v3517_v38 = vadd.f32 %v3515_v21, %v13150_v4 }
0x3d9f   :  { %11684 = vtanh.f32 %v3517_v38 }
0x3da9   :  { %v11685_v41 = vpop.eup %11684 }
0x3daa   :  { %3521 = vrot.lane.b32.xlu1 %v11685_v41, %s12425_s16 }
0x3dae   :  { %3905 = vrot.lane.b32.xlu1 %v9394_v33, %s12424_s9 }
0x3e1c   :  { %v3522_v28 = vpop.permute.xlu1 %3521 }
0x3e1d   :  { %v3524_v30 = vmul.f32 %v3522_v28, %v3519_v27 }
0x3e1f   :  { %v13277_v36 = vadd.f32 %v3527_v22, %v3524_v30 }
0x3e20   :  { %v13298_v51 = vpop.permute.xlu1 %3905 }
0x3e21   :  { %v3534_v39 = vrot.slane %v13277_v36, 4 }
0x3e23   :  { %3535 = vrot.lane.b32.xlu0 %v3534_v39, %s12425_s16 }
0x3e95   :  { %v3536_v44 = vpop.permute.xlu0 %3535 }
0x3e96   :  { %10314 = vmatmul.mubr.msk.f32.vlgmr.msra.gmra.mrb[34].mxu1 %vm603_vm8, %v3536_v44 }
0x3e97   :  { %11143 = vmatpush3.bf16.msra.mxu1 %v13268_v63  ;;  %10346 = vmatprep.mubr.msk.f32.mxu1 %vm12422_vm0, %v12421_v1 }
0x3e98   :  { %11144 = vmatprep.subr.bf16.mxu1 %v12423_v32 }
0x3e9b   :  { %11146 = vmatpush3.bf16.msra.mxu1 %v13272_v26 }
0x3e9c   :  { %11147 = vmatprep.subr.bf16.mxu1 %v12423_v32 }
0x3e9e   :  { %10347 = vmatmul.mubr.f32.vlgmr.msra.gmra.mrb[36].mxu1 %v12421_v1 }
0x3e9f   :  { %11149 = vmatpush3.bf16.msra.mxu1 %v13268_v63  ;;  %10357 = vmatprep.mubr.msk.f32.mxu1 %vm12422_vm0, %v12421_v1 }
0x3ea0   :  { %11150 = vmatprep.subr.bf16.mxu1 %v12423_v32 }
0x3ea3   :  { %11152 = vmatpush3.bf16.msra.mxu1 %v13272_v26 }
0x3ea4   :  { %11159 = vmatprep.subr.bf16.mxu1 %v12423_v32 }
0x3f69   :  { %v13296_v46 = vpop.f32.mrb[34].mxu1 }
0x3f6a   :  { %v10315_v50 = vpop.f32.mrb[35].mxu1 }
0x3f71   :  { %v3890_v52 = vpop.f32.mrb[36].mxu1 }
0x3f72   :  { %v3908_v56 = vadd.f32 %v13298_v51, %v3890_v52  ;;  %v10348_v45 = vpop.f32.mrb[37].mxu1  ;;  %v3895_v55 = vrot.slane %v3890_v52, 2 }
0x3f74   :  { %v3910_v54 = vrot.slane %v3908_v56, 2  ;;  %v3897_v25 = vadd.f32 %v3895_v55, %v13302_v29 }
0x3f76   :  { %3911 = vrot.lane.b32.xlu0 %v3910_v54, %s12424_s9  ;;  %v9395_v58 = vmul.f32 -1.442695, %v3897_v25 }
0x3f78   :  { %11686 = vpow2.f32 %v9395_v58 }
0x3f82   :  { %v11687_v7 = vpop.eup %11686 }
0x3f83   :  { %v3901_v59 = vadd.f32 1.0, %v11687_v7 }
0x3f85   :  { %11688 = vrcp.f32 %v3901_v59 }
0x3f8f   :  { %v11689_v3 = vpop.eup %11688 }
0x3f90   :  { %v3921_v47 = vsub.f32 1.0, %v11689_v3  ;;  %v3927_v31 = vmul.f32 0.0, %v11689_v3 }
0x3fe8   :  { %v3912_v60 = vpop.permute.xlu0 %3911 }
0x3fe9   :  { %v3914_v5 = vmul.f32 %v11689_v3, %v3912_v60 }
0x3feb   :  { %3916 = vrot.lane.b32.xlu1 %v3914_v5, %s12424_s9 }
0x405d   :  { %v3917_v62 = vpop.permute.xlu1 %3916 }
0x405e   :  { %v3919_v61 = vadd.f32 %v3917_v62, %v13302_v29 }
0x4060   :  { %11690 = vtanh.f32 %v3919_v61 }
0x406a   :  { %v11691_v0 = vpop.eup %11690 }
0x406b   :  { %3923 = vrot.lane.b32.xlu0 %v11691_v0, %s12425_s16 }
0x40dd   :  { %v3924_v8 = vpop.permute.xlu0 %3923 }
0x40de   :  { %v3926_v13 = vmul.f32 %v3924_v8, %v3921_v47 }
0x40e0   :  { %v13308_v2 = vadd.f32 %v3927_v31, %v3926_v13 }
0x40e2   :  { %v3934_v10 = vrot.slane %v13308_v2, 6  ;;  %v4038_v22 = vrot.slane %v13308_v2, 2 }
0x40e4   :  { %3935 = vrot.lane.b32.xlu1 %v3934_v10, %s12425_s16 }
0x4156   :  { %v3936_v11 = vpop.permute.xlu1 %3935 }
0x4157   :  { %10358 = vmatmul.mubr.msk.f32.vlgmr.msra.gmra.mrb[38].mxu1 %vm603_vm8, %v3936_v11 }
0x4158   :  { %11161 = vmatpush3.bf16.msra.mxu1 %v13268_v63  ;;  %10379 = vmatprep.mubr.msk.f32.mxu1 %vm12422_vm0, %v12421_v1 }
0x4159   :  { %11162 = vmatprep.subr.bf16.mxu1 %v12423_v32 }
0x415c   :  { %11164 = vmatpush3.bf16.msra.mxu1 %v13272_v26 }
0x415d   :  { %11171 = vmatprep.subr.bf16.mxu1 %v12423_v32 }
0x422a   :  { %v4005_v12 = vpop.f32.mrb[38].mxu1 }
0x422b   :  { %v4019_v6 = vadd.f32 %v4005_v12, %v13298_v51  ;;  %v10359_v16 = vpop.f32.mrb[39].mxu1  ;;  %v4010_v18 = vrot.slane %v4005_v12, 4 }
0x422d   :  { %v4021_v17 = vrot.slane %v4019_v6, 4  ;;  %v4012_v20 = vadd.f32 %v4010_v18, %v13302_v29 }
0x422f   :  { %4022 = vrot.lane.b32.xlu0 %v4021_v17, %s12424_s9  ;;  %v9397_v21 = vmul.f32 -1.442695, %v4012_v20 }
0x4231   :  { %11692 = vpow2.f32 %v9397_v21 }
0x423b   :  { %v11693_v38 = vpop.eup %11692 }
0x423c   :  { %v4016_v41 = vadd.f32 1.0, %v11693_v38 }
0x423e   :  { %11694 = vrcp.f32 %v4016_v41 }
0x4248   :  { %v11695_v23 = vpop.eup %11694 }
0x4249   :  { %v4032_v28 = vsub.f32 1.0, %v11695_v23  ;;  %v4040_v33 = vmul.f32 %v11695_v23, %v4038_v22 }
0x42a1   :  { %v4023_v24 = vpop.permute.xlu0 %4022 }
0x42a2   :  { %v4025_v19 = vmul.f32 %v11695_v23, %v4023_v24 }
0x42a4   :  { %4027 = vrot.lane.b32.xlu1 %v4025_v19, %s12424_s9 }
0x4316   :  { %v4028_v34 = vpop.permute.xlu1 %4027 }
0x4317   :  { %v4030_v27 = vadd.f32 %v4028_v34, %v13302_v29 }
0x4319   :  { %11696 = vtanh.f32 %v4030_v27 }
0x4323   :  { %v11697_v53 = vpop.eup %11696 }
0x4324   :  { %4034 = vrot.lane.b32.xlu0 %v11697_v53, %s12425_s16 }
0x4396   :  { %v4035_v30 = vpop.permute.xlu0 %4034 }
0x4397   :  { %v4037_v39 = vmul.f32 %v4035_v30, %v4032_v28 }
0x4399   :  { %v13326_v44 = vadd.f32 %v4040_v33, %v4037_v39 }
0x439b   :  { %v4047_v50 = vrot.slane %v13326_v44, 4  ;;  %v4151_v31 = vrot.slane %v13326_v44, 2 }
0x439d   :  { %4048 = vrot.lane.b32.xlu1 %v4047_v50, %s12425_s16 }
0x440f   :  { %v4049_v52 = vpop.permute.xlu1 %4048 }
0x4410   :  { %10369 = vmatmul.mubr.msk.f32.vlgmr.msra.gmra.mrb[28].mxu0 %vm603_vm8, %v4049_v52 }
0x4411   :  { %11167 = vmatpush3.bf16.msra.mxu0 %v13268_v63  ;;  %10390 = vmatprep.mubr.msk.f32.mxu0 %vm12422_vm0, %v12421_v1 }
0x4412   :  { %11168 = vmatprep.subr.bf16.mxu0 %v12423_v32 }
0x4415   :  { %11170 = vmatpush3.bf16.msra.mxu0 %v13272_v26 }
0x4416   :  { %11177 = vmatprep.subr.bf16.mxu0 %v12423_v32 }
0x44e3   :  { %v4118_v56 = vpop.f32.mrb[28].mxu0 }
0x44e4   :  { %v4132_v45 = vadd.f32 %v4118_v56, %v13298_v51  ;;  %v10370_v54 = vpop.f32.mrb[29].mxu0  ;;  %v4123_v25 = vrot.slane %v4118_v56, 6 }
0x44e6   :  { %v4134_v55 = vrot.slane %v4132_v45, 6  ;;  %v4125_v58 = vadd.f32 %v4123_v25, %v13302_v29 }
0x44e8   :  { %4135 = vrot.lane.b32.xlu0 %v4134_v55, %s12424_s9  ;;  %v9399_v7 = vmul.f32 -1.442695, %v4125_v58 }
0x44ea   :  { %11698 = vpow2.f32 %v9399_v7 }
0x44f4   :  { %v11699_v59 = vpop.eup %11698 }
0x44f5   :  { %v4129_v3 = vadd.f32 1.0, %v11699_v59 }
0x44f7   :  { %11700 = vrcp.f32 %v4129_v3 }
0x4501   :  { %v11701_v60 = vpop.eup %11700 }
0x4502   :  { %v4145_v8 = vsub.f32 1.0, %v11701_v60  ;;  %v4153_v10 = vmul.f32 %v11701_v60, %v4151_v31 }
0x455a   :  { %v4136_v5 = vpop.permute.xlu0 %4135 }
0x455b   :  { %v4138_v62 = vmul.f32 %v11701_v60, %v4136_v5 }
0x455d   :  { %4140 = vrot.lane.b32.xlu1 %v4138_v62, %s12424_s9 }
0x45cf   :  { %v4141_v61 = vpop.permute.xlu1 %4140 }
0x45d0   :  { %v4143_v0 = vadd.f32 %v4141_v61, %v13302_v29 }
0x45d2   :  { %11702 = vtanh.f32 %v4143_v0 }
0x45dc   :  { %v11703_v47 = vpop.eup %11702 }
0x45dd   :  { %4147 = vrot.lane.b32.xlu0 %v11703_v47, %s12425_s16 }
0x464f   :  { %v4148_v13 = vpop.permute.xlu0 %4147 }
0x4650   :  { %v4150_v11 = vmul.f32 %v4148_v13, %v4145_v8 }
0x4652   :  { %v13344_v12 = vadd.f32 %v4153_v10, %v4150_v11 }
0x4654   :  { %v4160_v6 = vrot.slane %v13344_v12, 2 }
0x4656   :  { %4161 = vrot.lane.b32.xlu1 %v4160_v6, %s12425_s16 }
0x46c8   :  { %v4162_v16 = vpop.permute.xlu1 %4161 }
0x46c9   :  { %10380 = vmatmul.mubr.msk.f32.vlgmr.msra.gmra.mrb[40].mxu1 %vm603_vm8, %v4162_v16 }
0x46ca   :  { %11173 = vmatpush3.bf16.msra.mxu1 %v13268_v63  ;;  %10401 = vmatprep.mubr.msk.f32.mxu1 %vm12422_vm0, %v12421_v1 }
0x46cb   :  { %11174 = vmatprep.subr.bf16.mxu1 %v12423_v32 }
0x46ce   :  { %11176 = vmatpush3.bf16.msra.mxu1 %v13272_v26 }
0x46cf   :  { %11183 = vmatprep.subr.bf16.mxu1 %v12423_v32 }
0x479c   :  { %v4231_v17 = vpop.f32.mrb[40].mxu1 }
0x479d   :  { %v4242_v18 = vadd.f32 %v4231_v17, %v13298_v51  ;;  %v10381_v20 = vpop.f32.mrb[41].mxu1  ;;  %v4235_v21 = vadd.f32 %v4231_v17, %v13302_v29 }
0x479f   :  { %4244 = vrot.lane.b32.xlu0 %v4242_v18, %s12424_s9  ;;  %v9401_v38 = vmul.f32 -1.442695, %v4235_v21 }
0x47a1   :  { %11704 = vpow2.f32 %v9401_v38 }
0x47ab   :  { %v11705_v41 = vpop.eup %11704 }
0x47ac   :  { %v4239_v23 = vadd.f32 1.0, %v11705_v41 }
0x47ae   :  { %11706 = vrcp.f32 %v4239_v23 }
0x47b8   :  { %v11707_v24 = vpop.eup %11706 }
0x47b9   :  { %v4254_v22 = vsub.f32 1.0, %v11707_v24  ;;  %v4261_v33 = vmul.f32 %v11707_v24, %v4160_v6 }
0x4811   :  { %v4245_v19 = vpop.permute.xlu0 %4244 }
0x4812   :  { %v4247_v34 = vmul.f32 %v11707_v24, %v4245_v19 }
0x4814   :  { %4249 = vrot.lane.b32.xlu1 %v4247_v34, %s12424_s9 }
0x4886   :  { %v4250_v27 = vpop.permute.xlu1 %4249 }
0x4887   :  { %v4252_v53 = vadd.f32 %v4250_v27, %v13302_v29 }
0x4889   :  { %11708 = vtanh.f32 %v4252_v53 }
0x4893   :  { %v11709_v28 = vpop.eup %11708 }
0x4894   :  { %4256 = vrot.lane.b32.xlu0 %v11709_v28, %s12425_s16 }
0x4906   :  { %v4257_v30 = vpop.permute.xlu0 %4256 }
0x4907   :  { %v4259_v39 = vmul.f32 %v4257_v30, %v4254_v22 }
0x4909   :  { %v4262_v50 = vadd.f32 %v4261_v33, %v4259_v39 }
0x490b   :  { %4264 = vrot.lane.b32.xlu1 %v4262_v50, %s12425_s16  ;;  %v4369_v47 = vrot.slane %v4262_v50, 2 }
0x497d   :  { %v4265_v52 = vpop.permute.xlu1 %4264 }
0x497e   :  { %4267 = vst.msk [vmem:[#allocation5 + $0x8] sm:$0x3] %vm802_vm9, %v4265_v52  ;;  %10391 = vmatmul.mubr.msk.f32.vlgmr.msra.gmra.mrb[30].mxu0 %vm603_vm8, %v4265_v52 }
0x497f   :  { %11179 = vmatpush3.bf16.msra.mxu0 %v13268_v63  ;;  %10412 = vmatprep.mubr.msk.f32.mxu0 %vm12422_vm0, %v12421_v1 }
0x4980   :  { %11180 = vmatprep.subr.bf16.mxu0 %v12423_v32 }
0x4983   :  { %11182 = vmatpush3.bf16.msra.mxu0 %v13272_v26 }
0x4a51   :  { %v4336_v29 = vpop.f32.mrb[30].mxu0 }
0x4a52   :  { %v4350_v56 = vadd.f32 %v4336_v29, %v13298_v51  ;;  %v10392_v45 = vpop.f32.mrb[31].mxu0  ;;  %v4341_v55 = vrot.slane %v4336_v29, 2 }
0x4a54   :  { %v4352_v54 = vrot.slane %v4350_v56, 2  ;;  %v4343_v25 = vadd.f32 %v4341_v55, %v13262_v9 }
0x4a56   :  { %4353 = vrot.lane.b32.xlu0 %v4352_v54, %s12424_s9  ;;  %v9403_v58 = vmul.f32 -1.442695, %v4343_v25 }
0x4a58   :  { %11710 = vpow2.f32 %v9403_v58 }
0x4a62   :  { %v11711_v7 = vpop.eup %11710 }
0x4a63   :  { %v4347_v59 = vadd.f32 1.0, %v11711_v7 }
0x4a65   :  { %11712 = vrcp.f32 %v4347_v59 }
0x4a6f   :  { %v11713_v3 = vpop.eup %11712 }
0x4a70   :  { %v4363_v8 = vsub.f32 1.0, %v11713_v3  ;;  %v4371_v10 = vmul.f32 %v11713_v3, %v4369_v47 }
0x4ac8   :  { %v4354_v60 = vpop.permute.xlu0 %4353 }
0x4ac9   :  { %v4356_v5 = vmul.f32 %v11713_v3, %v4354_v60 }
0x4acb   :  { %4358 = vrot.lane.b32.xlu1 %v4356_v5, %s12424_s9 }
0x4b3d   :  { %v4359_v62 = vpop.permute.xlu1 %4358 }
0x4b3e   :  { %v4361_v61 = vadd.f32 %v4359_v62, %v13262_v9 }
0x4b40   :  { %11714 = vtanh.f32 %v4361_v61 }
0x4b4a   :  { %v11715_v0 = vpop.eup %11714 }
0x4b4b   :  { %4365 = vrot.lane.b32.xlu0 %v11715_v0, %s12425_s16 }
0x4bbd   :  { %v4366_v31 = vpop.permute.xlu0 %4365 }
0x4bbe   :  { %v4368_v13 = vmul.f32 %v4366_v31, %v4363_v8 }
0x4bc0   :  { %v13375_v11 = vadd.f32 %v4371_v10, %v4368_v13 }
0x4bc2   :  { %v4378_v6 = vrot.slane %v13375_v11, 6  ;;  %v4482_v30 = vrot.slane %v13375_v11, 2 }
0x4bc4   :  { %4379 = vrot.lane.b32.xlu1 %v4378_v6, %s12425_s16 }
0x4c36   :  { %v4380_v16 = vpop.permute.xlu1 %4379 }
0x4c37   :  { %10402 = vmatmul.mubr.msk.f32.vlgmr.msra.gmra.mrb[42].mxu1 %vm603_vm8, %v4380_v16 }
0x4c38   :  { %11185 = vmatpush3.bf16.msra.mxu1 %v13268_v63  ;;  %10423 = vmatprep.mubr.msk.f32.mxu1 %vm12422_vm0, %v12421_v1 }
0x4c39   :  { %11186 = vmatprep.subr.bf16.mxu1 %v12423_v32 }
0x4c3c   :  { %11188 = vmatpush3.bf16.msra.mxu1 %v13272_v26 }
0x4c3d   :  { %11205 = vmatprep.subr.bf16.mxu1 %v12423_v32 }
0x4d0a   :  { %v4449_v17 = vpop.f32.mrb[42].mxu1 }
0x4d0b   :  { %v4463_v18 = vadd.f32 %v4449_v17, %v13298_v51  ;;  %v10403_v20 = vpop.f32.mrb[43].mxu1  ;;  %v4454_v38 = vrot.slane %v4449_v17, 4 }
0x4d0d   :  { %v4465_v21 = vrot.slane %v4463_v18, 4  ;;  %v4456_v41 = vadd.f32 %v4454_v38, %v13262_v9  ;;  %v3619_v18 = vadd.f32 %v13296_v46, %v13133_v35  ;;  %v3610_v38 = vrot.slane %v13296_v46, 2 }
0x4d0f   :  { %4466 = vrot.lane.b32.xlu0 %v4465_v21, %s12424_s9  ;;  %v9405_v63 = vmul.f32 -1.442695, %v4456_v41  ;;  %v3621_v21 = vrot.slane %v3619_v18, 2  ;;  %v3612_v41 = vadd.f32 %v3610_v38, %v13150_v4  ;;  %v9411_v18 = vld [vmem:[%s14193_s20 + $0x48] sm:$0xff] }
0x4d11   :  { %11716 = vpow2.f32 %v9405_v63  ;;  %v9384_v63 = vmul.f32 -1.442695, %v3612_v41 }
0x4d1b   :  { %v11717_v23 = vpop.eup %11716 }
0x4d1c   :  { %v4460_v24 = vadd.f32 1.0, %v11717_v23 }
0x4d1e   :  { %11718 = vrcp.f32 %v4460_v24 }
0x4d28   :  { %v11719_v19 = vpop.eup %11718 }
0x4d29   :  { %v4476_v22 = vsub.f32 1.0, %v11719_v19  ;;  %v4484_v39 = vmul.f32 %v11719_v19, %v4482_v30 }
0x4d81   :  { %v4467_v34 = vpop.permute.xlu0 %4466 }
0x4d82   :  { %v4469_v26 = vmul.f32 %v11719_v19, %v4467_v34 }
0x4d84   :  { %4471 = vrot.lane.b32.xlu1 %v4469_v26, %s12424_s9 }
0x4df6   :  { %v4472_v27 = vpop.permute.xlu1 %4471 }
0x4df7   :  { %v4474_v53 = vadd.f32 %v4472_v27, %v13262_v9 }
0x4df9   :  { %11720 = vtanh.f32 %v4474_v53 }
0x4e03   :  { %v11721_v28 = vpop.eup %11720 }
0x4e04   :  { %4478 = vrot.lane.b32.xlu0 %v11721_v28, %s12425_s16 }
0x4e76   :  { %v4479_v33 = vpop.permute.xlu0 %4478 }
0x4e77   :  { %v4481_v50 = vmul.f32 %v4479_v33, %v4476_v22 }
0x4e79   :  { %v4485_v52 = vadd.f32 %v4484_v39, %v4481_v50 }
0x4e7b   :  { %v4491_v29 = vrot.slane %v4485_v52, 4  ;;  %v4595_v13 = vrot.slane %v4485_v52, 2 }
0x4e7d   :  { %4492 = vrot.lane.b32.xlu1 %v4491_v29, %s12425_s16 }
0x4eef   :  { %v4493_v56 = vpop.permute.xlu1 %4492 }
0x4ef0   :  { %10413 = vmatmul.mubr.msk.f32.vlgmr.msra.gmra.mrb[32].mxu0 %vm603_vm8, %v4493_v56 }
0x4fc3   :  { %v4562_v45 = vpop.f32.mrb[32].mxu0 }
0x4fc4   :  { %v4576_v54 = vadd.f32 %v4562_v45, %v13298_v51  ;;  %v10414_v55 = vpop.f32.mrb[33].mxu0  ;;  %v4567_v58 = vrot.slane %v4562_v45, 6 }
0x4fc6   :  { %v4578_v25 = vrot.slane %v4576_v54, 6  ;;  %v4569_v7 = vadd.f32 %v4567_v58, %v13262_v9  ;;  %v4896_v58 = vld [vmem:[#allocation12 + $0x80] sm:$0xff] }
0x4fc8   :  { %4579 = vrot.lane.b32.xlu0 %v4578_v25, %s12424_s9  ;;  %v9407_v59 = vmul.f32 -1.442695, %v4569_v7  ;;  %v4897_v7 = vld [vmem:[#allocation12 + $0x88] sm:$0xff] }
0x4fca   :  { %11722 = vpow2.f32 %v9407_v59  ;;  %v4898_v59 = vld [vmem:[#allocation12 + $0x90] sm:$0xff] }
0x4fd4   :  { %v11723_v3 = vpop.eup %11722 }
0x4fd5   :  { %v4573_v60 = vadd.f32 1.0, %v11723_v3  ;;  %v4899_v3 = vld [vmem:[#allocation12 + $0x98] sm:$0xff] }
0x4fd7   :  { %11724 = vrcp.f32 %v4573_v60  ;;  %v13440_v60 = vpack.c.bf16 %v4899_v3, %v4898_v59 }
0x4fe1   :  { %v11725_v5 = vpop.eup %11724 }
0x4fe2   :  { %v4589_v31 = vsub.f32 1.0, %v11725_v5  ;;  %v4597_v6 = vmul.f32 %v11725_v5, %v4595_v13 }
0x503a   :  { %v4580_v62 = vpop.permute.xlu0 %4579 }
0x503b   :  { %v4582_v61 = vmul.f32 %v11725_v5, %v4580_v62 }
0x503d   :  { %4584 = vrot.lane.b32.xlu1 %v4582_v61, %s12424_s9 }
0x50af   :  { %v4585_v0 = vpop.permute.xlu1 %4584 }
0x50b0   :  { %v4587_v47 = vadd.f32 %v4585_v0, %v13262_v9  ;;  %v4724_v0 = vld [vmem:[#allocation11 + $0x50] sm:$0xff] }
0x50b2   :  { %11726 = vtanh.f32 %v4587_v47  ;;  %v4725_v47 = vld [vmem:[#allocation11 + $0x58] sm:$0xff] }
0x50b3   :  { %11728 = vpow2.f32 %v9384_v63 }
0x50bc   :  { %v11727_v8 = vpop.eup %11726 }
0x50bd   :  { %4591 = vrot.lane.b32.xlu0 %v11727_v8, %s12425_s16  ;;  %v11729_v23 = vpop.eup %11728  ;;  %v11193_v8 = vpack.c.bf16 %v4725_v47, %v4724_v0 }
0x50be   :  { %v3616_v24 = vadd.f32 1.0, %v11729_v23 }
0x50c0   :  { %11730 = vrcp.f32 %v3616_v24 }
0x50ca   :  { %v11731_v35 = vpop.eup %11730 }
0x512f   :  { %v4592_v10 = vpop.permute.xlu0 %4591 }
0x5130   :  { %v4594_v16 = vmul.f32 %v4592_v10, %v4589_v31 }
0x5132   :  { %v13401_v17 = vadd.f32 %v4597_v6, %v4594_v16  ;;  %v9410_v16 = vld [vmem:[%s14193_s20 + $0x40] sm:$0xff] }
0x5134   :  { %v4604_v20 = vrot.slane %v13401_v17, 2 }
0x5136   :  { %4605 = vrot.lane.b32.xlu1 %v4604_v20, %s12425_s16 }
0x513a   :  { %3622 = vrot.lane.b32.xlu1 %v3621_v21, %s12424_s9  ;;  %v11197_v21 = vpack.c.bf16 %v9411_v18, %v9410_v16 }
0x51a8   :  { %v4606_v19 = vpop.permute.xlu1 %4605 }
0x51a9   :  { %10424 = vmatmul.mubr.msk.f32.vlgmr.msra.gmra.mrb[44].mxu1 %vm603_vm8, %v4606_v19 }
0x51aa   :  { %10456 = vmatprep.mubr.msk.f32.mxu1 %vm12422_vm0, %v12421_v1 }
0x51ac   :  { %v3623_v34 = vpop.permute.xlu1 %3622 }
0x51ad   :  { %v3625_v26 = vmul.f32 %v11731_v35, %v3623_v34 }
0x51af   :  { %3627 = vrot.lane.b32.xlu1 %v3625_v26, %s12424_s9 }
0x5221   :  { %v3628_v27 = vpop.permute.xlu1 %3627 }
0x5222   :  { %v3630_v46 = vadd.f32 %v3628_v27, %v13150_v4  ;;  %v9413_v27 = vld [vmem:[%s14193_s20 + $0x58] sm:$0xff] }
0x5224   :  { %11732 = vtanh.f32 %v3630_v46 }
0x522e   :  { %v11733_v53 = vpop.eup %11732 }
0x522f   :  { %3634 = vrot.lane.b32.xlu1 %v11733_v53, %s12425_s16 }
0x5233   :  { %4487 = vrot.lane.b32.xlu1 %v4485_v52, %s12425_s16 }
0x5237   :  { %4043 = vrot.lane.b32.xlu1 %v13326_v44, %s12425_s16 }
0x527c   :  { %v4675_v28 = vpop.f32.mrb[44].mxu1 }
0x527d   :  { %v4686_v22 = vadd.f32 %v4675_v28, %v13298_v51  ;;  %v10425_v30 = vpop.f32.mrb[45].mxu1  ;;  %v4679_v50 = vadd.f32 %v4675_v28, %v13262_v9 }
0x527f   :  { %4688 = vrot.lane.b32.xlu0 %v4686_v22, %s12424_s9  ;;  %v9409_v29 = vmul.f32 -1.442695, %v4679_v50 }
0x5281   :  { %11734 = vpow2.f32 %v9409_v29  ;;  %v9418_v29 = vld [vmem:[#allocation14 + $0x4] ss:$0 sm:$0xff] }
0x528b   :  { %v11735_v52 = vpop.eup %11734 }
0x528c   :  { %v4683_v56 = vadd.f32 1.0, %v11735_v52 }
0x528e   :  { %11736 = vrcp.f32 %v4683_v56 }
0x5298   :  { %v11737_v44 = vpop.eup %11736 }
0x5299   :  { %v4698_v31 = vsub.f32 1.0, %v11737_v44  ;;  %v4705_v10 = vmul.f32 %v11737_v44, %v4604_v20  ;;  %v9419_v20 = vld [vmem:[#allocation15 + $0x4] ss:$0 sm:$0xff] }
0x52a1   :  { %v3635_v33 = vpop.permute.xlu1 %3634 }
0x52a5   :  { %v4488_v39 = vpop.permute.xlu1 %4487 }
0x52a6   :  { %4490 = vst.msk [vmem:[#allocation5] sm:$0x30] %vm1027_vm10, %v4488_v39 }
0x52a9   :  { %v4044_v4 = vpop.permute.xlu1 %4043 }
0x52aa   :  { %4046 = vst.msk [vmem:[#allocation5 + $0x8] sm:$0x30] %vm1027_vm10, %v4044_v4 }
0x52f1   :  { %v4689_v45 = vpop.permute.xlu0 %4688 }
0x52f2   :  { %v4691_v51 = vmul.f32 %v11737_v44, %v4689_v45 }
0x52f4   :  { %4693 = vrot.lane.b32.xlu0 %v4691_v51, %s12424_s9 }
0x5366   :  { %v4694_v54 = vpop.permute.xlu0 %4693 }
0x5367   :  { %v4696_v55 = vadd.f32 %v4694_v54, %v13262_v9  ;;  %v13437_v9 = vpack.c.bf16 %v4897_v7, %v4896_v58 }
0x5369   :  { %11738 = vtanh.f32 %v4696_v55  ;;  %11207 = vmatpush3.bf16.msra.mxu1 %v13437_v9 }
0x536a   :  { %11208 = vmatprep.subr.bf16.mxu1 %v12423_v32 }
0x536d   :  { %11210 = vmatpush3.bf16.msra.mxu1 %v13440_v60 }
0x536e   :  { %11211 = vmatprep.subr.bf16.mxu1 %v12423_v32 }
0x5370   :  { %10457 = vmatmul.mubr.f32.vlgmr.msra.gmra.mrb[46].mxu1 %v12421_v1 }
0x5371   :  { %11213 = vmatpush3.bf16.msra.mxu1 %v13437_v9  ;;  %10467 = vmatprep.mubr.msk.f32.mxu1 %vm12422_vm0, %v12421_v1 }
0x5372   :  { %11214 = vmatprep.subr.bf16.mxu1 %v12423_v32 }
0x5373   :  { %v11739_v25 = vpop.eup %11738 }
0x5374   :  { %4700 = vrot.lane.b32.xlu0 %v11739_v25, %s12425_s16 }
0x5375   :  { %11216 = vmatpush3.bf16.msra.mxu1 %v13440_v60 }
0x5376   :  { %11223 = vmatprep.subr.bf16.mxu1 %v12423_v32 }
0x5378   :  { %4374 = vrot.lane.b32.xlu0 %v13375_v11, %s12425_s16  ;;  %v3632_v11 = vsub.f32 1.0, %v11731_v35 }
0x537a   :  { %v3637_v5 = vmul.f32 %v3635_v33, %v3632_v11 }
0x537c   :  { %4600 = vrot.lane.b32.xlu0 %v13401_v17, %s12425_s16 }
0x5380   :  { %3930 = vrot.lane.b32.xlu0 %v13308_v2, %s12425_s16  ;;  %v3638_v2 = vrot.slane %v13277_v36, 6 }
0x5384   :  { %4156 = vrot.lane.b32.xlu0 %v13344_v12, %s12425_s16  ;;  %v3640_v12 = vmul.f32 %v11731_v35, %v3638_v2 }
0x5386   :  { %v3641_v62 = vadd.f32 %v3640_v12, %v3637_v5 }
0x5388   :  { %3086 = vrot.lane.b32.xlu0 %v13191_v42, %s12425_s16  ;;  %v4722_v42 = vld [vmem:[#allocation11 + $0x40] sm:$0xff] }
0x538c   :  { %3417 = vrot.lane.b32.xlu0 %v13240_v48, %s12425_s16  ;;  %v4723_v48 = vld [vmem:[#allocation11 + $0x48] sm:$0xff] }
0x538d   :  { %v11189_v61 = vpack.c.bf16 %v4723_v48, %v4722_v42 }
0x538f   :  { %11190 = vmatprep.subr.bf16.mxu0 %v11189_v61 }
0x5390   :  { %3643 = vrot.lane.b32.xlu0 %v3641_v62, %s12425_s16  ;;  %11192 = vmatpush3.bf16.msra.mxu0 %v11189_v61 }
0x5391   :  { %11194 = vmatprep.subr.bf16.mxu0 %v11193_v8 }
0x5394   :  { %11196 = vmatpush3.bf16.msra.mxu0 %v11193_v8 }
0x5395   :  { %11198 = vmatprep.subr.bf16.mxu0 %v11197_v21 }
0x53e6   :  { %v4701_v13 = vpop.permute.xlu0 %4700 }
0x53e7   :  { %v4703_v6 = vmul.f32 %v4701_v13, %v4698_v31 }
0x53e9   :  { %v4706_v38 = vadd.f32 %v4705_v10, %v4703_v6 }
0x53ea   :  { %v4375_v41 = vpop.permute.xlu0 %4374 }
0x53eb   :  { %4377 = vst.msk [vmem:[#allocation5] sm:$0xc0] %vm1141_vm11, %v4375_v41  ;;  %4708 = vrot.lane.b32.xlu1 %v4706_v38, %s12425_s16 }
0x53ee   :  { %v4601_v63 = vpop.permute.xlu0 %4600 }
0x53ef   :  { %4603 = vst.msk [vmem:[#allocation5] sm:$0xc] %vm913_vm12, %v4601_v63  ;;  %2973 = vrot.lane.b32.xlu1 %v13173_v49, %s12425_s16 }
0x53f2   :  { %v3931_v23 = vpop.permute.xlu0 %3930 }
0x53f3   :  { %3933 = vst.msk [vmem:[#allocation5 + $0x8] sm:$0xc0] %vm1141_vm11, %v3931_v23  ;;  %3199 = vrot.lane.b32.xlu1 %v13209_v57, %s12425_s16 }
0x53f6   :  { %v4157_v17 = vpop.permute.xlu0 %4156 }
0x53f7   :  { %4159 = vst.msk [vmem:[#allocation5 + $0x8] sm:$0xc] %vm913_vm12, %v4157_v17  ;;  %3530 = vrot.lane.b32.xlu1 %v13277_v36, %s12425_s16  ;;  %v9412_v36 = vld [vmem:[%s14193_s20 + $0x50] sm:$0xff] }
0x53f8   :  { %v11201_v28 = vpack.c.bf16 %v9413_v27, %v9412_v36 }
0x53fa   :  { %v3087_v24 = vpop.permute.xlu0 %3086 }
0x53fb   :  { %3089 = vst.msk [vmem:[#allocation4] sm:$0x30] %vm1027_vm10, %v3087_v24  ;;  %4983 = vrot.lane.b32.xlu1 %v9419_v20, %s12424_s9 }
0x53fe   :  { %v3418_v49 = vpop.permute.xlu0 %3417  ;;  %v13486_v22 = vld [vmem:[#allocation5 + $0x8] sm:$0xff] }
0x53ff   :  { %3420 = vst.msk [vmem:[#allocation4 + $0x8] sm:$0xc] %vm913_vm12, %v3418_v49 }
0x5402   :  { %v3644_v19 = vpop.permute.xlu0 %3643 }
0x5403   :  { %3646 = vst.msk [vmem:[#allocation4 + $0x8] sm:$0xc0] %vm1141_vm11, %v3644_v19 }
0x5443   :  { %v4971_v35 = vpop.f32.mrb[46].mxu1 }
0x5444   :  { %v10458_v26 = vpop.f32.mrb[47].mxu1 }
0x545d   :  { %v4709_v57 = vpop.permute.xlu1 %4708 }
0x545e   :  { %4711 = vst.msk [vmem:[#allocation5] sm:$0x3] %vm802_vm9, %v4709_v57 }
0x5461   :  { %v2974_v34 = vpop.permute.xlu1 %2973 }
0x5462   :  { %2976 = vst.msk [vmem:[#allocation4] sm:$0xc] %vm913_vm12, %v2974_v34 }
0x5465   :  { %v3200_v46 = vpop.permute.xlu1 %3199  ;;  %v13481_v53 = vld [vmem:[#allocation5] sm:$0xff] }
0x5466   :  { %3202 = vst.msk [vmem:[#allocation4] sm:$0xc0] %vm1141_vm11, %v3200_v46  ;;  %10434 = vmatprep.mubr.msk.f32.mxu0 %vm603_vm8, %v13481_v53 }
0x5467   :  { %10435 = vmatmul.mubr.msk.f32.vlgmr.msra.gmra.mrb[34].mxu0 %vm603_vm8, %v13486_v22 }
0x5468   :  { %11200 = vmatpush3.bf16.msra.mxu0 %v11197_v21 }
0x5469   :  { %v3531_v30 = vpop.permute.xlu1 %3530  ;;  %11202 = vmatprep.subr.bf16.mxu0 %v11201_v28 }
0x546a   :  { %3533 = vst.msk [vmem:[#allocation4 + $0x8] sm:$0x30] %vm1027_vm10, %v3531_v30 }
0x546c   :  { %11204 = vmatpush3.bf16.msra.mxu0 %v11201_v28 }
0x546d   :  { %v13491_v33 = vld [vmem:[#allocation4] sm:$0xff]  ;;  %v13493_v39 = vpop.permute.xlu1 %4983  ;;  %11217 = vmatprep.subr.bf16.mxu0 %v12423_v32 }
0x546e   :  { %10445 = vmatprep.mubr.msk.f32.mxu0 %vm603_vm8, %v13491_v33  ;;  %v4986_v4 = vadd.f32 %v13493_v39, %v4971_v35 }
0x5470   :  { %4988 = vrot.lane.b32.xlu0 %v4986_v4, %s12424_s9 }
0x5471   :  { %v13500_v50 = vld [vmem:[#allocation4 + $0x8] sm:$0xff] }
0x5472   :  { %10446 = vmatmul.mubr.msk.f32.vlgmr.msra.gmra.mrb[34].mxu0 %vm603_vm8, %v13500_v50 }
0x5473   :  { %11219 = vmatpush3.bf16.msra.mxu0 %v13437_v9  ;;  %10478 = vmatprep.mubr.msk.f32.mxu0 %vm12422_vm0, %v12421_v1 }
0x5474   :  { %11220 = vmatprep.subr.bf16.mxu0 %v12423_v32 }
0x5477   :  { %11222 = vmatpush3.bf16.msra.mxu0 %v13440_v60 }
0x5478   :  { %11229 = vmatprep.subr.bf16.mxu0 %v12423_v32 }
0x54e2   :  { %v4989_v58 = vpop.permute.xlu0 %4988 }
0x5545   :  { %v10447_v52 = vpop.f32.mrb[34].mxu0 }
0x5546   :  { %v13510_v56 = vadd.f32 %v10447_v52, %v9418_v29  ;;  %v4879_v44 = vpop.f32.mrb[35].mxu0 }
0x5547   :  { %v13512_v45 = vadd.f32 %v9418_v29, %v4879_v44 }
0x5549   :  { %v4975_v51 = vadd.f32 %v4971_v35, %v13512_v45 }
0x554b   :  { %v9420_v54 = vmul.f32 -1.442695, %v4975_v51 }
0x554d   :  { %11740 = vpow2.f32 %v9420_v54 }
0x5557   :  { %v11741_v55 = vpop.eup %11740 }
0x5558   :  { %v4979_v25 = vadd.f32 1.0, %v11741_v55 }
0x555a   :  { %11742 = vrcp.f32 %v4979_v25 }
0x5564   :  { %v11743_v7 = vpop.eup %11742 }
0x5565   :  { %v4991_v59 = vmul.f32 %v11743_v7, %v4989_v58  ;;  %v4998_v5 = vsub.f32 1.0, %v11743_v7  ;;  %v5004_v62 = vmul.f32 0.0, %v11743_v7 }
0x5567   :  { %4993 = vrot.lane.b32.xlu1 %v4991_v59, %s12424_s9 }
0x55d9   :  { %v4994_v3 = vpop.permute.xlu1 %4993 }
0x55da   :  { %v4996_v11 = vadd.f32 %v4994_v3, %v13512_v45 }
0x55dc   :  { %11744 = vtanh.f32 %v4996_v11 }
0x55e6   :  { %v11745_v2 = vpop.eup %11744 }
0x55e7   :  { %5000 = vrot.lane.b32.xlu0 %v11745_v2, %s12425_s16 }
0x5659   :  { %v5001_v12 = vpop.permute.xlu0 %5000 }
0x565a   :  { %v5003_v42 = vmul.f32 %v5001_v12, %v4998_v5 }
0x565c   :  { %v5005_v48 = vadd.f32 %v5004_v62, %v5003_v42 }
0x565e   :  { %5007 = vrot.lane.b32.xlu1 %v5005_v48, %s12425_s16  ;;  %v5112_v20 = vrot.slane %v5005_v48, 6 }
0x56d0   :  { %v5008_v61 = vpop.permute.xlu1 %5007 }
0x56d1   :  { %5010 = vst.msk [vmem:[#allocation2] sm:$0x3] %vm802_vm9, %v5008_v61  ;;  %10468 = vmatmul.mubr.msk.f32.vlgmr.msra.gmra.mrb[48].mxu1 %vm603_vm8, %v5008_v61 }
0x56d2   :  { %11225 = vmatpush3.bf16.msra.mxu1 %v13437_v9  ;;  %10489 = vmatprep.mubr.msk.f32.mxu1 %vm12422_vm0, %v12421_v1 }
0x56d3   :  { %11226 = vmatprep.subr.bf16.mxu1 %v12423_v32 }
0x56d6   :  { %11228 = vmatpush3.bf16.msra.mxu1 %v13440_v60 }
0x56d7   :  { %11235 = vmatprep.subr.bf16.mxu1 %v12423_v32 }
0x57a4   :  { %v5079_v0 = vpop.f32.mrb[48].mxu1 }
0x57a5   :  { %v5093_v47 = vadd.f32 %v5079_v0, %v13493_v39  ;;  %v10469_v8 = vpop.f32.mrb[49].mxu1  ;;  %v5084_v13 = vrot.slane %v5079_v0, 6 }
0x57a7   :  { %v5095_v31 = vrot.slane %v5093_v47, 6  ;;  %v5086_v10 = vadd.f32 %v5084_v13, %v13512_v45 }
0x57a9   :  { %5096 = vrot.lane.b32.xlu0 %v5095_v31, %s12424_s9  ;;  %v9422_v6 = vmul.f32 -1.442695, %v5086_v10 }
0x57ab   :  { %11746 = vpow2.f32 %v9422_v6 }
0x57b5   :  { %v11747_v16 = vpop.eup %11746 }
0x57b6   :  { %v5090_v18 = vadd.f32 1.0, %v11747_v16 }
0x57b8   :  { %11748 = vrcp.f32 %v5090_v18 }
0x57c2   :  { %v11749_v21 = vpop.eup %11748 }
0x57c3   :  { %v5106_v24 = vsub.f32 1.0, %v11749_v21  ;;  %v5114_v19 = vmul.f32 %v11749_v21, %v5112_v20 }
0x581b   :  { %v5097_v38 = vpop.permute.xlu0 %5096 }
0x581c   :  { %v5099_v41 = vmul.f32 %v11749_v21, %v5097_v38 }
0x581e   :  { %5101 = vrot.lane.b32.xlu1 %v5099_v41, %s12424_s9 }
0x5890   :  { %v5102_v63 = vpop.permute.xlu1 %5101 }
0x5891   :  { %v5104_v23 = vadd.f32 %v5102_v63, %v13512_v45 }
0x5893   :  { %11750 = vtanh.f32 %v5104_v23 }
0x589d   :  { %v11751_v17 = vpop.eup %11750 }
0x589e   :  { %5108 = vrot.lane.b32.xlu0 %v11751_v17, %s12425_s16 }
0x5910   :  { %v5109_v49 = vpop.permute.xlu0 %5108 }
0x5911   :  { %v5111_v57 = vmul.f32 %v5109_v49, %v5106_v24 }
0x5913   :  { %v13533_v35 = vadd.f32 %v5114_v19, %v5111_v57 }
0x5915   :  { %v5121_v34 = vrot.slane %v13533_v35, 2  ;;  %v5225_v3 = vrot.slane %v13533_v35, 6 }
0x5917   :  { %5122 = vrot.lane.b32.xlu1 %v5121_v34, %s12425_s16 }
0x5989   :  { %v5123_v26 = vpop.permute.xlu1 %5122 }
0x598a   :  { %10479 = vmatmul.mubr.msk.f32.vlgmr.msra.gmra.mrb[36].mxu0 %vm603_vm8, %v5123_v26 }
0x598b   :  { %11231 = vmatpush3.bf16.msra.mxu0 %v13437_v9  ;;  %10500 = vmatprep.mubr.msk.f32.mxu0 %vm12422_vm0, %v12421_v1 }
0x598c   :  { %11232 = vmatprep.subr.bf16.mxu0 %v12423_v32 }
0x598f   :  { %11234 = vmatpush3.bf16.msra.mxu0 %v13440_v60 }
0x5990   :  { %11241 = vmatprep.subr.bf16.mxu0 %v12423_v32 }
0x5a5d   :  { %v5192_v36 = vpop.f32.mrb[36].mxu0 }
0x5a5e   :  { %v5206_v27 = vadd.f32 %v5192_v36, %v13493_v39  ;;  %v10480_v46 = vpop.f32.mrb[37].mxu0  ;;  %v5197_v30 = vrot.slane %v5192_v36, 4 }
0x5a60   :  { %v5208_v28 = vrot.slane %v5206_v27, 4  ;;  %v5199_v4 = vadd.f32 %v5197_v30, %v13512_v45 }
0x5a62   :  { %5209 = vrot.lane.b32.xlu0 %v5208_v28, %s12424_s9  ;;  %v9424_v29 = vmul.f32 -1.442695, %v5199_v4 }
0x5a64   :  { %11752 = vpow2.f32 %v9424_v29 }
0x5a6e   :  { %v11753_v52 = vpop.eup %11752 }
0x5a6f   :  { %v5203_v44 = vadd.f32 1.0, %v11753_v52 }
0x5a71   :  { %11754 = vrcp.f32 %v5203_v44 }
0x5a7b   :  { %v11755_v51 = vpop.eup %11754 }
0x5a7c   :  { %v5219_v59 = vsub.f32 1.0, %v11755_v51  ;;  %v5227_v2 = vmul.f32 %v11755_v51, %v5225_v3 }
0x5ad4   :  { %v5210_v54 = vpop.permute.xlu0 %5209 }
0x5ad5   :  { %v5212_v55 = vmul.f32 %v11755_v51, %v5210_v54 }
0x5ad7   :  { %5214 = vrot.lane.b32.xlu1 %v5212_v55, %s12424_s9 }
0x5b49   :  { %v5215_v25 = vpop.permute.xlu1 %5214 }
0x5b4a   :  { %v5217_v58 = vadd.f32 %v5215_v25, %v13512_v45 }
0x5b4c   :  { %11756 = vtanh.f32 %v5217_v58 }
0x5b56   :  { %v11757_v7 = vpop.eup %11756 }
0x5b57   :  { %5221 = vrot.lane.b32.xlu0 %v11757_v7, %s12425_s16 }
0x5bc9   :  { %v5222_v11 = vpop.permute.xlu0 %5221 }
0x5bca   :  { %v5224_v5 = vmul.f32 %v5222_v11, %v5219_v59 }
0x5bcc   :  { %v13551_v12 = vadd.f32 %v5227_v2, %v5224_v5 }
0x5bce   :  { %v5234_v62 = vrot.slane %v13551_v12, 4  ;;  %v5338_v17 = vrot.slane %v13551_v12, 6 }
0x5bd0   :  { %5235 = vrot.lane.b32.xlu1 %v5234_v62, %s12425_s16 }
0x5c42   :  { %v5236_v42 = vpop.permute.xlu1 %5235 }
0x5c43   :  { %10490 = vmatmul.mubr.msk.f32.vlgmr.msra.gmra.mrb[50].mxu1 %vm603_vm8, %v5236_v42 }
0x5c44   :  { %11237 = vmatpush3.bf16.msra.mxu1 %v13437_v9  ;;  %10511 = vmatprep.mubr.msk.f32.mxu1 %vm12422_vm0, %v12421_v1 }
0x5c45   :  { %11238 = vmatprep.subr.bf16.mxu1 %v12423_v32 }
0x5c48   :  { %11240 = vmatpush3.bf16.msra.mxu1 %v13440_v60 }
0x5c49   :  { %11247 = vmatprep.subr.bf16.mxu1 %v12423_v32 }
0x5d16   :  { %v5305_v48 = vpop.f32.mrb[50].mxu1 }
0x5d17   :  { %v5319_v61 = vadd.f32 %v5305_v48, %v13493_v39  ;;  %v10491_v0 = vpop.f32.mrb[51].mxu1  ;;  %v5310_v8 = vrot.slane %v5305_v48, 2 }
0x5d19   :  { %v5321_v47 = vrot.slane %v5319_v61, 2  ;;  %v5312_v31 = vadd.f32 %v5310_v8, %v13512_v45 }
0x5d1b   :  { %5322 = vrot.lane.b32.xlu0 %v5321_v47, %s12424_s9  ;;  %v9426_v13 = vmul.f32 -1.442695, %v5312_v31 }
0x5d1d   :  { %11758 = vpow2.f32 %v9426_v13 }
0x5d27   :  { %v11759_v10 = vpop.eup %11758 }
0x5d28   :  { %v5316_v6 = vadd.f32 1.0, %v11759_v10  ;;  %v5797_v10 = vld [vmem:[#allocation11 + $0x60] sm:$0xff] }
0x5d2a   :  { %11760 = vrcp.f32 %v5316_v6  ;;  %v5798_v6 = vld [vmem:[#allocation11 + $0x68] sm:$0xff] }
0x5d34   :  { %v11761_v16 = vpop.eup %11760 }
0x5d35   :  { %v5332_v23 = vsub.f32 1.0, %v11761_v16  ;;  %v5340_v24 = vmul.f32 %v11761_v16, %v5338_v17 }
0x5d8d   :  { %v5323_v18 = vpop.permute.xlu0 %5322 }
0x5d8e   :  { %v5325_v21 = vmul.f32 %v11761_v16, %v5323_v18  ;;  %v11253_v16 = vpack.c.bf16 %v5798_v6, %v5797_v10 }
0x5d90   :  { %5327 = vrot.lane.b32.xlu1 %v5325_v21, %s12424_s9 }
0x5e02   :  { %v5328_v38 = vpop.permute.xlu1 %5327 }
0x5e03   :  { %v5330_v41 = vadd.f32 %v5328_v38, %v13512_v45 }
0x5e05   :  { %11762 = vtanh.f32 %v5330_v41 }
0x5e0f   :  { %v11763_v63 = vpop.eup %11762 }
0x5e10   :  { %5334 = vrot.lane.b32.xlu0 %v11763_v63, %s12425_s16 }
0x5e82   :  { %v5335_v20 = vpop.permute.xlu0 %5334 }
0x5e83   :  { %v5337_v49 = vmul.f32 %v5335_v20, %v5332_v23 }
0x5e85   :  { %v13569_v19 = vadd.f32 %v5340_v24, %v5337_v49  ;;  %v5799_v24 = vld [vmem:[#allocation11 + $0x70] sm:$0xff]  ;;  %v5800_v49 = vld [vmem:[#allocation11 + $0x78] sm:$0xff] }
0x5e87   :  { %v5347_v57 = vrot.slane %v13569_v19, 6 }
0x5e89   :  { %5348 = vrot.lane.b32.xlu1 %v5347_v57, %s12425_s16 }
0x5efb   :  { %v5349_v34 = vpop.permute.xlu1 %5348 }
0x5efc   :  { %10501 = vmatmul.mubr.msk.f32.vlgmr.msra.gmra.mrb[38].mxu0 %vm603_vm8, %v5349_v34 }
0x5efd   :  { %11243 = vmatpush3.bf16.msra.mxu0 %v13437_v9  ;;  %10522 = vmatprep.mubr.msk.f32.mxu0 %vm12422_vm0, %v12421_v1 }
0x5efe   :  { %11244 = vmatprep.subr.bf16.mxu0 %v12423_v32 }
0x5f01   :  { %11246 = vmatpush3.bf16.msra.mxu0 %v13440_v60 }
0x5f02   :  { %11254 = vmatprep.subr.bf16.mxu0 %v11253_v16 }
0x5fcf   :  { %v5418_v45 = vpop.f32.mrb[38].mxu0 }
0x5fd0   :  { %v5429_v26 = vadd.f32 %v5418_v45, %v13493_v39  ;;  %v10502_v36 = vpop.f32.mrb[39].mxu0  ;;  %v5422_v27 = vadd.f32 %v5418_v45, %v13510_v56  ;;  %v9435_v45 = vld [vmem:[%s14193_s20 + $0x60] sm:$0xff] }
0x5fd2   :  { %5431 = vrot.lane.b32.xlu0 %v5429_v26, %s12424_s9  ;;  %v9428_v46 = vmul.f32 -1.442695, %v5422_v27  ;;  %v9436_v26 = vld [vmem:[%s14193_s20 + $0x68] sm:$0xff]  ;;  %v9437_v27 = vld [vmem:[%s14193_s20 + $0x70] sm:$0xff] }
0x5fd3   :  { %v11261_v36 = vpack.c.bf16 %v9436_v26, %v9435_v45 }
0x5fd4   :  { %11764 = vpow2.f32 %v9428_v46  ;;  %v9438_v46 = vld [vmem:[%s14193_s20 + $0x78] sm:$0xff] }
0x5fde   :  { %v11765_v28 = vpop.eup %11764 }
0x5fdf   :  { %v5426_v30 = vadd.f32 1.0, %v11765_v28  ;;  %v11265_v28 = vpack.c.bf16 %v9438_v46, %v9437_v27 }
0x5fe1   :  { %11766 = vrcp.f32 %v5426_v30 }
0x5feb   :  { %v11767_v4 = vpop.eup %11766 }
0x5fec   :  { %v5441_v55 = vsub.f32 1.0, %v11767_v4  ;;  %v5448_v58 = vmul.f32 %v11767_v4, %v5347_v57  ;;  %v11257_v57 = vpack.c.bf16 %v5800_v49, %v5799_v24 }
0x6044   :  { %v5432_v29 = vpop.permute.xlu0 %5431 }
0x6045   :  { %v5434_v52 = vmul.f32 %v11767_v4, %v5432_v29 }
0x6047   :  { %5436 = vrot.lane.b32.xlu1 %v5434_v52, %s12424_s9 }
0x60b9   :  { %v5437_v44 = vpop.permute.xlu1 %5436 }
0x60ba   :  { %v5439_v51 = vadd.f32 %v5437_v44, %v13510_v56 }
0x60bc   :  { %11768 = vtanh.f32 %v5439_v51 }
0x60c6   :  { %v11769_v54 = vpop.eup %11768 }
0x60c7   :  { %5443 = vrot.lane.b32.xlu0 %v11769_v54, %s12425_s16 }
0x6139   :  { %v5444_v25 = vpop.permute.xlu0 %5443 }
0x613a   :  { %v5446_v7 = vmul.f32 %v5444_v25, %v5441_v55 }
0x613c   :  { %v5449_v59 = vadd.f32 %v5448_v58, %v5446_v7 }
0x613e   :  { %5451 = vrot.lane.b32.xlu1 %v5449_v59, %s12425_s16  ;;  %v5556_v21 = vrot.slane %v5449_v59, 6 }
0x61b0   :  { %v5452_v3 = vpop.permute.xlu1 %5451 }
0x61b1   :  { %5454 = vst.msk [vmem:[#allocation2 + $0x8] sm:$0x3] %vm802_vm9, %v5452_v3  ;;  %10512 = vmatmul.mubr.msk.f32.vlgmr.msra.gmra.mrb[52].mxu1 %vm603_vm8, %v5452_v3 }
0x61b2   :  { %11249 = vmatpush3.bf16.msra.mxu1 %v13437_v9  ;;  %10533 = vmatprep.mubr.msk.f32.mxu1 %vm12422_vm0, %v12421_v1 }
0x61b3   :  { %11250 = vmatprep.subr.bf16.mxu1 %v12423_v32 }
0x61b6   :  { %11252 = vmatpush3.bf16.msra.mxu1 %v13440_v60 }
0x61b7   :  { %11269 = vmatprep.subr.bf16.mxu1 %v12423_v32 }
0x6284   :  { %v5523_v11 = vpop.f32.mrb[52].mxu1 }
0x6285   :  { %v5537_v2 = vadd.f32 %v5523_v11, %v13493_v39  ;;  %v10513_v5 = vpop.f32.mrb[53].mxu1  ;;  %v5528_v42 = vrot.slane %v5523_v11, 6 }
0x6286   :  { %v5959_v5 = vld [vmem:[#allocation12 + $0xa0] sm:$0xff] }
0x6287   :  { %v5539_v62 = vrot.slane %v5537_v2, 6  ;;  %v5530_v48 = vadd.f32 %v5528_v42, %v13510_v56 }
0x6289   :  { %5540 = vrot.lane.b32.xlu0 %v5539_v62, %s12424_s9  ;;  %v9430_v9 = vmul.f32 -1.442695, %v5530_v48  ;;  %v5960_v62 = vld [vmem:[#allocation12 + $0xa8] sm:$0xff]  ;;  %v5961_v48 = vld [vmem:[#allocation12 + $0xb0] sm:$0xff] }
0x628a   :  { %v13628_v42 = vpack.c.bf16 %v5960_v62, %v5959_v5 }
0x628b   :  { %11770 = vpow2.f32 %v9430_v9  ;;  %v5962_v9 = vld [vmem:[#allocation12 + $0xb8] sm:$0xff] }
0x6295   :  { %v11771_v61 = vpop.eup %11770 }
0x6296   :  { %v5534_v0 = vadd.f32 1.0, %v11771_v61  ;;  %v13632_v61 = vpack.c.bf16 %v5962_v9, %v5961_v48 }
0x6298   :  { %11772 = vrcp.f32 %v5534_v0 }
0x62a2   :  { %v11773_v47 = vpop.eup %11772 }
0x62a3   :  { %v5550_v38 = vsub.f32 1.0, %v11773_v47  ;;  %v5558_v63 = vmul.f32 %v11773_v47, %v5556_v21 }
0x62fb   :  { %v5541_v8 = vpop.permute.xlu0 %5540 }
0x62fc   :  { %v5543_v60 = vmul.f32 %v11773_v47, %v5541_v8 }
0x62fe   :  { %5545 = vrot.lane.b32.xlu1 %v5543_v60, %s12424_s9 }
0x6370   :  { %v5546_v31 = vpop.permute.xlu1 %5545 }
0x6371   :  { %v5548_v13 = vadd.f32 %v5546_v31, %v13510_v56 }
0x6373   :  { %11774 = vtanh.f32 %v5548_v13  ;;  %v9444_v13 = vld [vmem:[#allocation15 + $0x5] ss:$0 sm:$0xff] }
0x637d   :  { %v11775_v18 = vpop.eup %11774 }
0x637e   :  { %5552 = vrot.lane.b32.xlu0 %v11775_v18, %s12425_s16 }
0x63f0   :  { %v5553_v41 = vpop.permute.xlu0 %5552 }
0x63f1   :  { %v5555_v23 = vmul.f32 %v5553_v41, %v5550_v38 }
0x63f3   :  { %v13600_v17 = vadd.f32 %v5558_v63, %v5555_v23 }
0x63f5   :  { %v5565_v20 = vrot.slane %v13600_v17, 2  ;;  %v5669_v47 = vrot.slane %v13600_v17, 6 }
0x63f7   :  { %5566 = vrot.lane.b32.xlu1 %v5565_v20, %s12425_s16 }
0x6469   :  { %v5567_v34 = vpop.permute.xlu1 %5566 }
0x646a   :  { %10523 = vmatmul.mubr.msk.f32.vlgmr.msra.gmra.mrb[40].mxu0 %vm603_vm8, %v5567_v34 }
0x646b   :  { %11256 = vmatpush3.bf16.msra.mxu0 %v11253_v16  ;;  %10544 = vmatprep.mubr.msk.f32.mxu0 %vm603_vm8, %v13481_v53 }
0x646c   :  { %11258 = vmatprep.subr.bf16.mxu0 %v11257_v57 }
0x646f   :  { %11260 = vmatpush3.bf16.msra.mxu0 %v11257_v57 }
0x6470   :  { %11262 = vmatprep.subr.bf16.mxu0 %v11261_v36 }
0x6472   :  { %10545 = vmatmul.mubr.msk.f32.vlgmr.msra.gmra.mrb[42].mxu0 %vm603_vm8, %v13486_v22  ;;  %v9443_v22 = vld [vmem:[#allocation14 + $0x5] ss:$0 sm:$0xff] }
0x6473   :  { %11264 = vmatpush3.bf16.msra.mxu0 %v11261_v36  ;;  %10555 = vmatprep.mubr.msk.f32.mxu0 %vm603_vm8, %v13491_v33 }
0x6474   :  { %11266 = vmatprep.subr.bf16.mxu0 %v11265_v28 }
0x6477   :  { %11268 = vmatpush3.bf16.msra.mxu0 %v11265_v28 }
0x6478   :  { %11281 = vmatprep.subr.bf16.mxu0 %v12423_v32 }
0x647a   :  { %10556 = vmatmul.mubr.msk.f32.vlgmr.msra.gmra.mrb[42].mxu0 %vm603_vm8, %v13500_v50 }
0x647b   :  { %10588 = vmatprep.mubr.msk.f32.mxu0 %vm12422_vm0, %v12421_v1  ;;  %11283 = vmatpush3.bf16.msra.mxu0 %v13628_v42 }
0x647c   :  { %11284 = vmatprep.subr.bf16.mxu0 %v12423_v32 }
0x647f   :  { %11286 = vmatpush3.bf16.msra.mxu0 %v13632_v61 }
0x6480   :  { %11293 = vmatprep.subr.bf16.mxu0 %v12423_v32 }
0x653d   :  { %v5636_v53 = vpop.f32.mrb[40].mxu0 }
0x653e   :  { %v5650_v30 = vadd.f32 %v5636_v53, %v13493_v39  ;;  %v10524_v4 = vpop.f32.mrb[41].mxu0  ;;  %v5641_v51 = vrot.slane %v5636_v53, 4 }
0x6540   :  { %v5652_v29 = vrot.slane %v5650_v30, 4  ;;  %v5643_v54 = vadd.f32 %v5641_v51, %v13510_v56 }
0x6542   :  { %5653 = vrot.lane.b32.xlu0 %v5652_v29, %s12424_s9  ;;  %v9432_v55 = vmul.f32 -1.442695, %v5643_v54 }
0x6544   :  { %11776 = vpow2.f32 %v9432_v55 }
0x654d   :  { %v10557_v52 = vpop.f32.mrb[42].mxu0 }
0x654e   :  { %v5942_v33 = vpop.f32.mrb[43].mxu0  ;;  %v11777_v50 = vpop.eup %11776  ;;  %v13662_v49 = vadd.f32 %v10557_v52, %v9443_v22 }
0x654f   :  { %v13622_v44 = vadd.f32 %v9443_v22, %v5942_v33  ;;  %v5647_v25 = vadd.f32 1.0, %v11777_v50 }
0x6551   :  { %11778 = vrcp.f32 %v5647_v25 }
0x655b   :  { %v11779_v58 = vpop.eup %11778 }
0x655c   :  { %v5663_v0 = vsub.f32 1.0, %v11779_v58  ;;  %v5671_v60 = vmul.f32 %v11779_v58, %v5669_v47 }
0x65b4   :  { %v5654_v7 = vpop.permute.xlu0 %5653 }
0x65b5   :  { %v5656_v59 = vmul.f32 %v11779_v58, %v5654_v7 }
0x65b7   :  { %5658 = vrot.lane.b32.xlu1 %v5656_v59, %s12424_s9 }
0x6629   :  { %v5659_v3 = vpop.permute.xlu1 %5658 }
0x662a   :  { %v5661_v11 = vadd.f32 %v5659_v3, %v13510_v56 }
0x662c   :  { %11780 = vtanh.f32 %v5661_v11 }
0x6636   :  { %v11781_v2 = vpop.eup %11780 }
0x6637   :  { %5665 = vrot.lane.b32.xlu0 %v11781_v2, %s12425_s16 }
0x663b   :  { %6049 = vrot.lane.b32.xlu0 %v9444_v13, %s12424_s9 }
0x66a9   :  { %v5666_v8 = vpop.permute.xlu0 %5665 }
0x66aa   :  { %v5668_v31 = vmul.f32 %v5666_v8, %v5663_v0 }
0x66ac   :  { %v13637_v10 = vadd.f32 %v5671_v60, %v5668_v31 }
0x66ad   :  { %v13658_v38 = vpop.permute.xlu0 %6049 }
0x66ae   :  { %v5678_v6 = vrot.slane %v13637_v10, 4 }
0x66b0   :  { %5679 = vrot.lane.b32.xlu1 %v5678_v6, %s12425_s16 }
0x6722   :  { %v5680_v16 = vpop.permute.xlu1 %5679 }
0x6723   :  { %10534 = vmatmul.mubr.msk.f32.vlgmr.msra.gmra.mrb[54].mxu1 %vm603_vm8, %v5680_v16 }
0x6724   :  { %11271 = vmatpush3.bf16.msra.mxu1 %v13628_v42  ;;  %10566 = vmatprep.mubr.msk.f32.mxu1 %vm12422_vm0, %v12421_v1 }
0x6725   :  { %11272 = vmatprep.subr.bf16.mxu1 %v12423_v32 }
0x6728   :  { %11274 = vmatpush3.bf16.msra.mxu1 %v13632_v61 }
0x6729   :  { %11275 = vmatprep.subr.bf16.mxu1 %v12423_v32 }
0x672b   :  { %10567 = vmatmul.mubr.f32.vlgmr.msra.gmra.mrb[56].mxu1 %v12421_v1 }
0x672c   :  { %11277 = vmatpush3.bf16.msra.mxu1 %v13628_v42  ;;  %10577 = vmatprep.mubr.msk.f32.mxu1 %vm12422_vm0, %v12421_v1 }
0x672d   :  { %11278 = vmatprep.subr.bf16.mxu1 %v12423_v32 }
0x6730   :  { %11280 = vmatpush3.bf16.msra.mxu1 %v13632_v61 }
0x6731   :  { %11287 = vmatprep.subr.bf16.mxu1 %v12423_v32 }
0x67f6   :  { %v13656_v18 = vpop.f32.mrb[54].mxu1 }
0x67f7   :  { %v10535_v21 = vpop.f32.mrb[55].mxu1 }
0x67fe   :  { %v6034_v41 = vpop.f32.mrb[56].mxu1 }
0x67ff   :  { %v6052_v63 = vadd.f32 %v13658_v38, %v6034_v41  ;;  %v10568_v23 = vpop.f32.mrb[57].mxu1  ;;  %v6039_v24 = vrot.slane %v6034_v41, 2 }
0x6801   :  { %v6054_v20 = vrot.slane %v6052_v63, 2  ;;  %v6041_v57 = vadd.f32 %v6039_v24, %v13662_v49 }
0x6803   :  { %6055 = vrot.lane.b32.xlu1 %v6054_v20, %s12424_s9  ;;  %v9445_v34 = vmul.f32 -1.442695, %v6041_v57 }
0x6805   :  { %11782 = vpow2.f32 %v9445_v34 }
0x680f   :  { %v11783_v45 = vpop.eup %11782 }
0x6810   :  { %v6045_v26 = vadd.f32 1.0, %v11783_v45 }
0x6812   :  { %11784 = vrcp.f32 %v6045_v26 }
0x681c   :  { %v11785_v36 = vpop.eup %11784 }
0x681d   :  { %v6065_v4 = vsub.f32 1.0, %v11785_v36  ;;  %v6071_v22 = vmul.f32 0.0, %v11785_v36 }
0x6875   :  { %v6056_v27 = vpop.permute.xlu1 %6055 }
0x6876   :  { %v6058_v46 = vmul.f32 %v11785_v36, %v6056_v27 }
0x6878   :  { %6060 = vrot.lane.b32.xlu0 %v6058_v46, %s12424_s9 }
0x68ea   :  { %v6061_v28 = vpop.permute.xlu0 %6060 }
0x68eb   :  { %v6063_v53 = vadd.f32 %v6061_v28, %v13662_v49 }
0x68ed   :  { %11786 = vtanh.f32 %v6063_v53 }
0x68f7   :  { %v11787_v30 = vpop.eup %11786 }
0x68f8   :  { %6067 = vrot.lane.b32.xlu1 %v11787_v30, %s12425_s16 }
0x696a   :  { %v6068_v29 = vpop.permute.xlu1 %6067 }
0x696b   :  { %v6070_v52 = vmul.f32 %v6068_v29, %v6065_v4 }
0x696d   :  { %v13668_v33 = vadd.f32 %v6071_v22, %v6070_v52 }
0x696f   :  { %v6078_v51 = vrot.slane %v13668_v33, 6  ;;  %v6182_v60 = vrot.slane %v13668_v33, 2 }
0x6971   :  { %6079 = vrot.lane.b32.xlu0 %v6078_v51, %s12425_s16 }
0x69e3   :  { %v6080_v54 = vpop.permute.xlu0 %6079 }
0x69e4   :  { %10578 = vmatmul.mubr.msk.f32.vlgmr.msra.gmra.mrb[58].mxu1 %vm603_vm8, %v6080_v54 }
0x69e5   :  { %11289 = vmatpush3.bf16.msra.mxu1 %v13628_v42  ;;  %10599 = vmatprep.mubr.msk.f32.mxu1 %vm12422_vm0, %v12421_v1 }
0x69e6   :  { %11290 = vmatprep.subr.bf16.mxu1 %v12423_v32 }
0x69e9   :  { %11292 = vmatpush3.bf16.msra.mxu1 %v13632_v61 }
0x69ea   :  { %11299 = vmatprep.subr.bf16.mxu1 %v12423_v32 }
0x6ab7   :  { %v6149_v55 = vpop.f32.mrb[58].mxu1 }
0x6ab8   :  { %v6163_v50 = vadd.f32 %v6149_v55, %v13658_v38  ;;  %v10579_v25 = vpop.f32.mrb[59].mxu1  ;;  %v6154_v7 = vrot.slane %v6149_v55, 4 }
0x6aba   :  { %v6165_v58 = vrot.slane %v6163_v50, 4  ;;  %v6156_v59 = vadd.f32 %v6154_v7, %v13662_v49 }
0x6abc   :  { %6166 = vrot.lane.b32.xlu1 %v6165_v58, %s12424_s9  ;;  %v9447_v3 = vmul.f32 -1.442695, %v6156_v59 }
0x6abe   :  { %11788 = vpow2.f32 %v9447_v3 }
0x6ac8   :  { %v11789_v11 = vpop.eup %11788 }
0x6ac9   :  { %v6160_v2 = vadd.f32 1.0, %v11789_v11 }
0x6acb   :  { %11790 = vrcp.f32 %v6160_v2 }
0x6ad5   :  { %v11791_v5 = vpop.eup %11790 }
0x6ad6   :  { %v6176_v8 = vsub.f32 1.0, %v11791_v5  ;;  %v6184_v13 = vmul.f32 %v11791_v5, %v6182_v60 }
0x6b2e   :  { %v6167_v62 = vpop.permute.xlu1 %6166 }
0x6b2f   :  { %v6169_v48 = vmul.f32 %v11791_v5, %v6167_v62 }
0x6b31   :  { %6171 = vrot.lane.b32.xlu0 %v6169_v48, %s12424_s9 }
0x6ba3   :  { %v6172_v9 = vpop.permute.xlu0 %6171 }
0x6ba4   :  { %v6174_v0 = vadd.f32 %v6172_v9, %v13662_v49 }
0x6ba6   :  { %11792 = vtanh.f32 %v6174_v0 }
0x6bb0   :  { %v11793_v47 = vpop.eup %11792 }
0x6bb1   :  { %6178 = vrot.lane.b32.xlu1 %v11793_v47, %s12425_s16 }
0x6c23   :  { %v6179_v31 = vpop.permute.xlu1 %6178 }
0x6c24   :  { %v6181_v6 = vmul.f32 %v6179_v31, %v6176_v8 }
0x6c26   :  { %v13686_v16 = vadd.f32 %v6184_v13, %v6181_v6 }
0x6c28   :  { %v6191_v21 = vrot.slane %v13686_v16, 4  ;;  %v6295_v22 = vrot.slane %v13686_v16, 2 }
0x6c2a   :  { %6192 = vrot.lane.b32.xlu0 %v6191_v21, %s12425_s16 }
0x6c9c   :  { %v6193_v41 = vpop.permute.xlu0 %6192 }
0x6c9d   :  { %10589 = vmatmul.mubr.msk.f32.vlgmr.msra.gmra.mrb[44].mxu0 %vm603_vm8, %v6193_v41 }
0x6c9e   :  { %11295 = vmatpush3.bf16.msra.mxu0 %v13628_v42  ;;  %10610 = vmatprep.mubr.msk.f32.mxu0 %vm12422_vm0, %v12421_v1 }
0x6c9f   :  { %11296 = vmatprep.subr.bf16.mxu0 %v12423_v32 }
0x6ca2   :  { %11298 = vmatpush3.bf16.msra.mxu0 %v13632_v61 }
0x6ca3   :  { %11305 = vmatprep.subr.bf16.mxu0 %v12423_v32 }
0x6d70   :  { %v6262_v63 = vpop.f32.mrb[44].mxu0 }
0x6d71   :  { %v6276_v23 = vadd.f32 %v6262_v63, %v13658_v38  ;;  %v10590_v20 = vpop.f32.mrb[45].mxu0  ;;  %v6267_v57 = vrot.slane %v6262_v63, 6 }
0x6d73   :  { %v6278_v24 = vrot.slane %v6276_v23, 6  ;;  %v6269_v34 = vadd.f32 %v6267_v57, %v13662_v49 }
0x6d75   :  { %6279 = vrot.lane.b32.xlu1 %v6278_v24, %s12424_s9  ;;  %v9449_v45 = vmul.f32 -1.442695, %v6269_v34 }
0x6d77   :  { %11794 = vpow2.f32 %v9449_v45 }
0x6d81   :  { %v11795_v26 = vpop.eup %11794 }
0x6d82   :  { %v6273_v36 = vadd.f32 1.0, %v11795_v26 }
0x6d84   :  { %11796 = vrcp.f32 %v6273_v36 }
0x6d8e   :  { %v11797_v27 = vpop.eup %11796 }
0x6d8f   :  { %v6289_v29 = vsub.f32 1.0, %v11797_v27  ;;  %v6297_v51 = vmul.f32 %v11797_v27, %v6295_v22 }
0x6de7   :  { %v6280_v46 = vpop.permute.xlu1 %6279 }
0x6de8   :  { %v6282_v28 = vmul.f32 %v11797_v27, %v6280_v46 }
0x6dea   :  { %6284 = vrot.lane.b32.xlu0 %v6282_v28, %s12424_s9 }
0x6e5c   :  { %v6285_v53 = vpop.permute.xlu0 %6284 }
0x6e5d   :  { %v6287_v30 = vadd.f32 %v6285_v53, %v13662_v49 }
0x6e5f   :  { %11798 = vtanh.f32 %v6287_v30 }
0x6e69   :  { %v11799_v4 = vpop.eup %11798 }
0x6e6a   :  { %6291 = vrot.lane.b32.xlu1 %v11799_v4, %s12425_s16 }
0x6edc   :  { %v6292_v52 = vpop.permute.xlu1 %6291 }
0x6edd   :  { %v6294_v54 = vmul.f32 %v6292_v52, %v6289_v29 }
0x6edf   :  { %v13704_v55 = vadd.f32 %v6297_v51, %v6294_v54 }
0x6ee1   :  { %v6304_v50 = vrot.slane %v13704_v55, 2 }
0x6ee3   :  { %6305 = vrot.lane.b32.xlu0 %v6304_v50, %s12425_s16 }
0x6f55   :  { %v6306_v25 = vpop.permute.xlu0 %6305 }
0x6f56   :  { %10600 = vmatmul.mubr.msk.f32.vlgmr.msra.gmra.mrb[60].mxu1 %vm603_vm8, %v6306_v25 }
0x6f57   :  { %11301 = vmatpush3.bf16.msra.mxu1 %v13628_v42  ;;  %10621 = vmatprep.mubr.msk.f32.mxu1 %vm12422_vm0, %v12421_v1 }
0x6f58   :  { %11302 = vmatprep.subr.bf16.mxu1 %v12423_v32 }
0x6f5b   :  { %11304 = vmatpush3.bf16.msra.mxu1 %v13632_v61 }
0x6f5c   :  { %11311 = vmatprep.subr.bf16.mxu1 %v12423_v32 }
0x7029   :  { %v6375_v58 = vpop.f32.mrb[60].mxu1 }
0x702a   :  { %v6386_v7 = vadd.f32 %v6375_v58, %v13658_v38  ;;  %v10601_v59 = vpop.f32.mrb[61].mxu1  ;;  %v6379_v3 = vadd.f32 %v6375_v58, %v13662_v49 }
0x702c   :  { %6388 = vrot.lane.b32.xlu1 %v6386_v7, %s12424_s9  ;;  %v9451_v11 = vmul.f32 -1.442695, %v6379_v3 }
0x702e   :  { %11800 = vpow2.f32 %v9451_v11 }
0x7038   :  { %v11801_v2 = vpop.eup %11800 }
0x7039   :  { %v6383_v5 = vadd.f32 1.0, %v11801_v2 }
0x703b   :  { %11802 = vrcp.f32 %v6383_v5 }
0x7045   :  { %v11803_v62 = vpop.eup %11802 }
0x7046   :  { %v6398_v60 = vsub.f32 1.0, %v11803_v62  ;;  %v6405_v13 = vmul.f32 %v11803_v62, %v6304_v50 }
0x709e   :  { %v6389_v48 = vpop.permute.xlu1 %6388 }
0x709f   :  { %v6391_v9 = vmul.f32 %v11803_v62, %v6389_v48 }
0x70a1   :  { %6393 = vrot.lane.b32.xlu0 %v6391_v9, %s12424_s9 }
0x7113   :  { %v6394_v0 = vpop.permute.xlu0 %6393 }
0x7114   :  { %v6396_v47 = vadd.f32 %v6394_v0, %v13662_v49 }
0x7116   :  { %11804 = vtanh.f32 %v6396_v47 }
0x7120   :  { %v11805_v8 = vpop.eup %11804 }
0x7121   :  { %6400 = vrot.lane.b32.xlu1 %v11805_v8, %s12425_s16 }
0x7193   :  { %v6401_v31 = vpop.permute.xlu1 %6400 }
0x7194   :  { %v6403_v6 = vmul.f32 %v6401_v31, %v6398_v60 }
0x7196   :  { %v6406_v21 = vadd.f32 %v6405_v13, %v6403_v6 }
0x7198   :  { %6408 = vrot.lane.b32.xlu0 %v6406_v21, %s12425_s16  ;;  %v6513_v4 = vrot.slane %v6406_v21, 2 }
0x720a   :  { %v6409_v41 = vpop.permute.xlu0 %6408 }
0x720b   :  { %6411 = vst.msk [vmem:[#allocation3 + $0x8] sm:$0x3] %vm802_vm9, %v6409_v41  ;;  %10611 = vmatmul.mubr.msk.f32.vlgmr.msra.gmra.mrb[46].mxu0 %vm603_vm8, %v6409_v41 }
0x720c   :  { %11307 = vmatpush3.bf16.msra.mxu0 %v13628_v42  ;;  %10632 = vmatprep.mubr.msk.f32.mxu0 %vm12422_vm0, %v12421_v1 }
0x720d   :  { %11308 = vmatprep.subr.bf16.mxu0 %v12423_v32 }
0x7210   :  { %11310 = vmatpush3.bf16.msra.mxu0 %v13632_v61 }
0x72de   :  { %v6480_v49 = vpop.f32.mrb[46].mxu0 }
0x72df   :  { %v6494_v63 = vadd.f32 %v6480_v49, %v13658_v38  ;;  %v10612_v23 = vpop.f32.mrb[47].mxu0  ;;  %v6485_v24 = vrot.slane %v6480_v49, 2 }
0x72e1   :  { %v6496_v20 = vrot.slane %v6494_v63, 2  ;;  %v6487_v57 = vadd.f32 %v6485_v24, %v13622_v44 }
0x72e3   :  { %6497 = vrot.lane.b32.xlu1 %v6496_v20, %s12424_s9  ;;  %v9453_v34 = vmul.f32 -1.442695, %v6487_v57 }
0x72e5   :  { %11806 = vpow2.f32 %v9453_v34 }
0x72ef   :  { %v11807_v45 = vpop.eup %11806 }
0x72f0   :  { %v6491_v26 = vadd.f32 1.0, %v11807_v45 }
0x72f2   :  { %11808 = vrcp.f32 %v6491_v26 }
0x72fc   :  { %v11809_v36 = vpop.eup %11808 }
0x72fd   :  { %v6507_v29 = vsub.f32 1.0, %v11809_v36  ;;  %v6515_v51 = vmul.f32 %v11809_v36, %v6513_v4 }
0x7355   :  { %v6498_v27 = vpop.permute.xlu1 %6497 }
0x7356   :  { %v6500_v46 = vmul.f32 %v11809_v36, %v6498_v27 }
0x7358   :  { %6502 = vrot.lane.b32.xlu0 %v6500_v46, %s12424_s9 }
0x73ca   :  { %v6503_v28 = vpop.permute.xlu0 %6502 }
0x73cb   :  { %v6505_v53 = vadd.f32 %v6503_v28, %v13622_v44 }
0x73cd   :  { %11810 = vtanh.f32 %v6505_v53 }
0x73d7   :  { %v11811_v30 = vpop.eup %11810 }
0x73d8   :  { %6509 = vrot.lane.b32.xlu1 %v11811_v30, %s12425_s16 }
0x744a   :  { %v6510_v22 = vpop.permute.xlu1 %6509 }
0x744b   :  { %v6512_v52 = vmul.f32 %v6510_v22, %v6507_v29 }
0x744d   :  { %v13735_v54 = vadd.f32 %v6515_v51, %v6512_v52 }
0x744f   :  { %v6522_v50 = vrot.slane %v13735_v54, 6  ;;  %v6626_v31 = vrot.slane %v13735_v54, 2 }
0x7451   :  { %6523 = vrot.lane.b32.xlu0 %v6522_v50, %s12425_s16 }
0x74c3   :  { %v6524_v25 = vpop.permute.xlu0 %6523 }
0x74c4   :  { %10622 = vmatmul.mubr.msk.f32.vlgmr.msra.gmra.mrb[62].mxu1 %vm603_vm8, %v6524_v25 }
0x74c5   :  { %11313 = vmatpush3.bf16.msra.mxu1 %v13628_v42  ;;  %10643 = vmatprep.mubr.msk.f32.mxu1 %vm12422_vm0, %v12421_v1 }
0x74c6   :  { %11314 = vmatprep.subr.bf16.mxu1 %v12423_v32 }
0x74c9   :  { %11316 = vmatpush3.bf16.msra.mxu1 %v13632_v61 }
0x7597   :  { %v6593_v58 = vpop.f32.mrb[62].mxu1 }
0x7598   :  { %v6607_v7 = vadd.f32 %v6593_v58, %v13658_v38  ;;  %v10623_v59 = vpop.f32.mrb[63].mxu1  ;;  %v6598_v11 = vrot.slane %v6593_v58, 4 }
0x759a   :  { %v6609_v3 = vrot.slane %v6607_v7, 4  ;;  %v6600_v2 = vadd.f32 %v6598_v11, %v13622_v44  ;;  %v5763_v7 = vadd.f32 %v13656_v18, %v13493_v39  ;;  %v5754_v11 = vrot.slane %v13656_v18, 2 }
0x759c   :  { %6610 = vrot.lane.b32.xlu1 %v6609_v3, %s12424_s9  ;;  %v9455_v5 = vmul.f32 -1.442695, %v6600_v2  ;;  %v5765_v3 = vrot.slane %v5763_v7, 2  ;;  %v5756_v2 = vadd.f32 %v5754_v11, %v13510_v56 }
0x759e   :  { %11812 = vpow2.f32 %v9455_v5  ;;  %v9434_v5 = vmul.f32 -1.442695, %v5756_v2  ;;  %v7134_v2 = vld [vmem:[%s14195_s18] sm:$0xff] }
0x75a8   :  { %v11813_v42 = vpop.eup %11812 }
0x75a9   :  { %v6604_v62 = vadd.f32 1.0, %v11813_v42 }
0x75ab   :  { %11814 = vrcp.f32 %v6604_v62 }
0x75b5   :  { %v11815_v48 = vpop.eup %11814 }
0x75b6   :  { %v6620_v60 = vsub.f32 1.0, %v11815_v48  ;;  %v6628_v6 = vmul.f32 %v11815_v48, %v6626_v31 }
0x760e   :  { %v6611_v9 = vpop.permute.xlu1 %6610 }
0x760f   :  { %v6613_v0 = vmul.f32 %v11815_v48, %v6611_v9 }
0x7611   :  { %6615 = vrot.lane.b32.xlu0 %v6613_v0, %s12424_s9 }
0x7683   :  { %v6616_v61 = vpop.permute.xlu0 %6615 }
0x7684   :  { %v6618_v47 = vadd.f32 %v6616_v61, %v13622_v44 }
0x7686   :  { %11816 = vtanh.f32 %v6618_v47 }
0x7690   :  { %v11817_v8 = vpop.eup %11816 }
0x7691   :  { %6622 = vrot.lane.b32.xlu1 %v11817_v8, %s12425_s16 }
0x7703   :  { %v6623_v13 = vpop.permute.xlu1 %6622 }
0x7704   :  { %v6625_v21 = vmul.f32 %v6623_v13, %v6620_v60 }
0x7706   :  { %v6629_v41 = vadd.f32 %v6628_v6, %v6625_v21 }
0x7708   :  { %v6635_v49 = vrot.slane %v6629_v41, 4  ;;  %v6739_v52 = vrot.slane %v6629_v41, 2 }
0x770a   :  { %6636 = vrot.lane.b32.xlu0 %v6635_v49, %s12425_s16 }
0x777c   :  { %v6637_v63 = vpop.permute.xlu0 %6636 }
0x777d   :  { %10633 = vmatmul.mubr.msk.f32.vlgmr.msra.gmra.mrb[48].mxu0 %vm603_vm8, %v6637_v63 }
0x7850   :  { %v6706_v23 = vpop.f32.mrb[48].mxu0 }
0x7851   :  { %v6720_v20 = vadd.f32 %v6706_v23, %v13658_v38  ;;  %v10634_v24 = vpop.f32.mrb[49].mxu0  ;;  %v6711_v34 = vrot.slane %v6706_v23, 6 }
0x7853   :  { %v6722_v57 = vrot.slane %v6720_v20, 6  ;;  %v6713_v45 = vadd.f32 %v6711_v34, %v13622_v44 }
0x7855   :  { %6723 = vrot.lane.b32.xlu1 %v6722_v57, %s12424_s9  ;;  %v9457_v26 = vmul.f32 -1.442695, %v6713_v45 }
0x7857   :  { %11818 = vpow2.f32 %v9457_v26 }
0x7861   :  { %v11819_v36 = vpop.eup %11818 }
0x7862   :  { %v6717_v27 = vadd.f32 1.0, %v11819_v36  ;;  %v7135_v36 = vld [vmem:[%s14195_s18 + $0x8] sm:$0xff] }
0x7864   :  { %11820 = vrcp.f32 %v6717_v27  ;;  %v6865_v27 = vld [vmem:[#allocation18 + $0x8] sm:$0xff] }
0x786e   :  { %v11821_v46 = vpop.eup %11820 }
0x786f   :  { %v6733_v22 = vsub.f32 1.0, %v11821_v46  ;;  %v6741_v50 = vmul.f32 %v11821_v46, %v6739_v52  ;;  %v6859_v52 = vld [vmem:[#allocation17 + $0x8] sm:$0xff] }
0x78c7   :  { %v6724_v28 = vpop.permute.xlu1 %6723 }
0x78c8   :  { %v6726_v53 = vmul.f32 %v11821_v46, %v6724_v28  ;;  %v6867_v28 = vld [vmem:[#allocation18 + $0x18] sm:$0xff] }
0x78ca   :  { %6728 = vrot.lane.b32.xlu0 %v6726_v53, %s12424_s9 }
0x793c   :  { %v6729_v30 = vpop.permute.xlu0 %6728 }
0x793d   :  { %v6731_v4 = vadd.f32 %v6729_v30, %v13622_v44 }
0x793f   :  { %11822 = vtanh.f32 %v6731_v4 }
0x7940   :  { %11824 = vpow2.f32 %v9434_v5 }
0x7949   :  { %v11823_v29 = vpop.eup %11822 }
0x794a   :  { %6735 = vrot.lane.b32.xlu1 %v11823_v29, %s12425_s16  ;;  %v11825_v42 = vpop.eup %11824 }
0x794b   :  { %v5760_v62 = vadd.f32 1.0, %v11825_v42 }
0x794d   :  { %11826 = vrcp.f32 %v5760_v62  ;;  %v6860_v62 = vld [vmem:[#allocation17 + $0x10] sm:$0xff] }
0x7957   :  { %v11827_v39 = vpop.eup %11826 }
0x7958   :  { %v5776_v34 = vsub.f32 1.0, %v11827_v39 }
0x79bc   :  { %v6736_v51 = vpop.permute.xlu1 %6735 }
0x79bd   :  { %v6738_v25 = vmul.f32 %v6736_v51, %v6733_v22  ;;  %v6858_v22 = vld [vmem:[#allocation17] sm:$0xff] }
0x79be   :  { %v11325_v51 = vpack.c.bf16 %v6859_v52, %v6858_v22 }
0x79bf   :  { %v13760_v58 = vadd.f32 %v6741_v50, %v6738_v25 }
0x79c1   :  { %v6748_v59 = vrot.slane %v13760_v58, 2 }
0x79c3   :  { %6749 = vrot.lane.b32.xlu0 %v6748_v59, %s12425_s16 }
0x79c7   :  { %5766 = vrot.lane.b32.xlu0 %v5765_v3, %s12424_s9  ;;  %v7039_v3 = vld [vmem:[%s14194_s27] sm:$0xff] }
0x7a35   :  { %v6750_v48 = vpop.permute.xlu0 %6749 }
0x7a36   :  { %10644 = vmatmul.mubr.msk.f32.vlgmr.msra.gmra.mrb[64].mxu1 %vm603_vm8, %v6750_v48  ;;  %v6861_v48 = vld [vmem:[#allocation17 + $0x18] sm:$0xff] }
0x7a39   :  { %v5767_v9 = vpop.permute.xlu0 %5766 }
0x7a3a   :  { %v5769_v0 = vmul.f32 %v11827_v39, %v5767_v9 }
0x7a3c   :  { %5771 = vrot.lane.b32.xlu0 %v5769_v0, %s12424_s9  ;;  %v11329_v0 = vpack.c.bf16 %v6861_v48, %v6860_v62  ;;  %v7285_v62 = vld [vmem:[#allocation24 + $0x18] sm:$0xff] }
0x7aae   :  { %v5772_v61 = vpop.permute.xlu0 %5771 }
0x7aaf   :  { %v5774_v47 = vadd.f32 %v5772_v61, %v13510_v56 }
0x7ab1   :  { %11828 = vtanh.f32 %v5774_v47 }
0x7abb   :  { %v11829_v18 = vpop.eup %11828 }
0x7abc   :  { %5778 = vrot.lane.b32.xlu0 %v11829_v18, %s12425_s16 }
0x7ac0   :  { %6631 = vrot.lane.b32.xlu0 %v6629_v41, %s12425_s16 }
0x7ac4   :  { %6187 = vrot.lane.b32.xlu0 %v13686_v16, %s12425_s16 }
0x7b09   :  { %v6819_v8 = vpop.f32.mrb[64].mxu1 }
0x7b0a   :  { %v6830_v60 = vadd.f32 %v6819_v8, %v13658_v38  ;;  %v10645_v31 = vpop.f32.mrb[65].mxu1  ;;  %v6823_v21 = vadd.f32 %v6819_v8, %v13622_v44 }
0x7b0c   :  { %6832 = vrot.lane.b32.xlu1 %v6830_v60, %s12424_s9  ;;  %v9459_v49 = vmul.f32 -1.442695, %v6823_v21 }
0x7b0e   :  { %11830 = vpow2.f32 %v9459_v49 }
0x7b18   :  { %v11831_v41 = vpop.eup %11830 }
0x7b19   :  { %v6827_v63 = vadd.f32 1.0, %v11831_v41 }
0x7b1b   :  { %11832 = vrcp.f32 %v6827_v63 }
0x7b25   :  { %v11833_v16 = vpop.eup %11832 }
0x7b26   :  { %v6849_v4 = vmul.f32 %v11833_v16, %v6748_v59 }
0x7b2e   :  { %v5779_v13 = vpop.permute.xlu0 %5778 }
0x7b2f   :  { %v5781_v45 = vmul.f32 %v5779_v13, %v5776_v34  ;;  %v9464_v13 = vld [vmem:[#allocation20] ss:$0 sm:$0xff] }
0x7b32   :  { %v6632_v6 = vpop.permute.xlu0 %6631 }
0x7b33   :  { %6634 = vst.msk [vmem:[#allocation3] sm:$0x30] %vm1027_vm10, %v6632_v6 }
0x7b36   :  { %v6188_v56 = vpop.permute.xlu0 %6187 }
0x7b37   :  { %6190 = vst.msk [vmem:[#allocation3 + $0x8] sm:$0x30] %vm1027_vm10, %v6188_v56 }
0x7b7e   :  { %v6833_v23 = vpop.permute.xlu1 %6832 }
0x7b7f   :  { %v6835_v38 = vmul.f32 %v11833_v16, %v6833_v23  ;;  %v7170_v23 = vld [vmem:[#allocation23 + $0x8] sm:$0xff] }
0x7b81   :  { %6837 = vrot.lane.b32.xlu1 %v6835_v38, %s12424_s9 }
0x7bf3   :  { %v6838_v20 = vpop.permute.xlu1 %6837 }
0x7bf4   :  { %v6840_v24 = vadd.f32 %v6838_v20, %v13622_v44  ;;  %v5782_v44 = vrot.slane %v13637_v10, 6  ;;  %v7171_v20 = vld [vmem:[#allocation23 + $0x10] sm:$0xff] }
0x7bf6   :  { %11834 = vtanh.f32 %v6840_v24  ;;  %v5784_v26 = vmul.f32 %v11827_v39, %v5782_v44  ;;  %v7172_v24 = vld [vmem:[#allocation23 + $0x18] sm:$0xff]  ;;  %v7379_v44 = vld [vmem:[#allocation21] sm:$0xff] }
0x7bf7   :  { %v11341_v34 = vpack.c.bf16 %v7172_v24, %v7171_v20 }
0x7c00   :  { %v11835_v57 = vpop.eup %11834 }
0x7c01   :  { %6844 = vrot.lane.b32.xlu1 %v11835_v57, %s12425_s16 }
0x7c05   :  { %6518 = vrot.lane.b32.xlu1 %v13735_v54, %s12425_s16  ;;  %v13799_v54 = vadd.f32 %v5784_v26, %v5781_v45  ;;  %v7380_v45 = vld [vmem:[#allocation21 + $0x8] sm:$0xff]  ;;  %v7381_v26 = vld [vmem:[#allocation21 + $0x10] sm:$0xff] }
0x7c09   :  { %6744 = vrot.lane.b32.xlu1 %v13760_v58, %s12425_s16 }
0x7c0d   :  { %6074 = vrot.lane.b32.xlu1 %v13668_v33, %s12425_s16  ;;  %v7040_v33 = vld [vmem:[%s14194_s27 + $0x8] sm:$0xff] }
0x7c11   :  { %6300 = vrot.lane.b32.xlu1 %v13704_v55, %s12425_s16  ;;  %v6864_v55 = vld [vmem:[#allocation18] sm:$0xff] }
0x7c12   :  { %v11317_v46 = vpack.c.bf16 %v6865_v27, %v6864_v55 }
0x7c14   :  { %11318 = vmatprep.subr.bf16.mxu0 %v11317_v46 }
0x7c15   :  { %5230 = vrot.lane.b32.xlu1 %v13551_v12, %s12425_s16  ;;  %11320 = vmatpush3.bf16.msra.mxu0 %v11317_v46  ;;  %v6866_v12 = vld [vmem:[#allocation18 + $0x10] sm:$0xff] }
0x7c16   :  { %v11321_v53 = vpack.c.bf16 %v6867_v28, %v6866_v12 }
0x7c18   :  { %11322 = vmatprep.subr.bf16.mxu0 %v11321_v53 }
0x7c19   :  { %5561 = vrot.lane.b32.xlu1 %v13600_v17, %s12425_s16  ;;  %11324 = vmatpush3.bf16.msra.mxu0 %v11321_v53  ;;  %v6842_v17 = vsub.f32 1.0, %v11833_v16  ;;  %v7169_v16 = vld [vmem:[#allocation23] sm:$0xff] }
0x7c1a   :  { %11326 = vmatprep.subr.bf16.mxu0 %v11325_v51  ;;  %v11338_v38 = vpack.c.bf16 %v7170_v23, %v7169_v16  ;;  %v7288_v23 = vld [vmem:[#allocation26 + $0x10] sm:$0xff] }
0x7c1d   :  { %5787 = vrot.lane.b32.xlu1 %v13799_v54, %s12425_s16 }
0x7c21   :  { %7045 = vperm.xlu1 %11547, %v7040_v33   ;;  %v13861_v33 = vpack.c.bf16 %v7380_v45, %v7379_v44 }
0x7c25   :  { %7141 = vperm.xlu1 %11547, %v7135_v36  }
0x7c73   :  { %v6845_v30 = vpop.permute.xlu1 %6844 }
0x7c74   :  { %v6847_v29 = vmul.f32 %v6845_v30, %v6842_v17 }
0x7c76   :  { %v6850_v50 = vadd.f32 %v6849_v4, %v6847_v29 }
0x7c77   :  { %v6519_v25 = vpop.permute.xlu1 %6518 }
0x7c78   :  { %6521 = vst.msk [vmem:[#allocation3] sm:$0xc0] %vm1141_vm11, %v6519_v25  ;;  %6852 = vrot.lane.b32.xlu0 %v6850_v50, %s12425_s16 }
0x7c7b   :  { %v6745_v7 = vpop.permute.xlu1 %6744 }
0x7c7c   :  { %6747 = vst.msk [vmem:[#allocation3] sm:$0xc] %vm913_vm12, %v6745_v7  ;;  %5117 = vrot.lane.b32.xlu0 %v13533_v35, %s12425_s16  ;;  %v7136_v35 = vld [vmem:[%s14195_s18 + $0x10] sm:$0xff] }
0x7c7f   :  { %v6075_v58 = vpop.permute.xlu1 %6074 }
0x7c80   :  { %6077 = vst.msk [vmem:[#allocation3 + $0x8] sm:$0xc0] %vm1141_vm11, %v6075_v58  ;;  %5343 = vrot.lane.b32.xlu0 %v13569_v19, %s12425_s16 }
0x7c83   :  { %v6301_v59 = vpop.permute.xlu1 %6300 }
0x7c84   :  { %6303 = vst.msk [vmem:[#allocation3 + $0x8] sm:$0xc] %vm913_vm12, %v6301_v59  ;;  %5674 = vrot.lane.b32.xlu0 %v13637_v10, %s12425_s16 }
0x7c87   :  { %v5231_v11 = vpop.permute.xlu1 %5230 }
0x7c88   :  { %5233 = vst.msk [vmem:[#allocation2] sm:$0x30] %vm1027_vm10, %v5231_v11  ;;  %7042 = vperm.xlu0 %11546, %v7039_v3   ;;  %v13904_v3 = vshrl.u32 %v382_v14, 7  ;;  %v9472_v11 = vld [vmem:[%s14196_s22] ss:$0 sm:$0xff] }
0x7c89   :  { %v7284_v14 = vld [vmem:[#allocation24 + $0x10] sm:$0xff] }
0x7c8a   :  { %vm7163_vm4 = vcmp.eq.s32.totalorder %v13904_v3, %v9472_v11  ;;  %v13916_v48 = vpack.c.bf16 %v7285_v62, %v7284_v14 }
0x7c8b   :  { %v5562_v5 = vpop.permute.xlu1 %5561  ;;  %v6863_v61 = vld [vmem:[#allocation3 + $0x8] sm:$0xff] }
0x7c8c   :  { %5564 = vst.msk [vmem:[#allocation2 + $0x8] sm:$0xc] %vm913_vm12, %v5562_v5  ;;  %7138 = vperm.xlu0 %11546, %v7134_v2   ;;  %v13909_v2 = vsel %vm7163_vm4, 1.0, %v12421_v1  ;;  %v9480_v5 = vld [vmem:[#allocation29] ss:$0 sm:$0xff] }
0x7c8d   :  { %7730 = vrot.lane.b32.xlu1 %v9480_v5, %s12424_s9 }
0x7c8f   :  { %v5788_v42 = vpop.permute.xlu1 %5787 }
0x7c90   :  { %5790 = vst.msk [vmem:[#allocation2 + $0x8] sm:$0xc0] %vm1141_vm11, %v5788_v42  ;;  %7144 = vperm.xlu0 %11546, %v7136_v35   ;;  %v7282_v35 = vld [vmem:[#allocation24] sm:$0xff]  ;;  %v7283_v42 = vld [vmem:[#allocation24 + $0x8] sm:$0xff] }
0x7ca0   :  { %v7046_v41 = vpop.permute.xlu1 %7045 }
0x7ca1   :  { %vm7048_vm14 = vcmp.eq.s32.totalorder %v12727_v15, %v7046_v41  ;;  %v7287_v41 = vld [vmem:[#allocation26 + $0x8] sm:$0xff] }
0x7ca2   :  { %v9466_v57 = vsel %vm7048_vm14, 1.0, %v12421_v1 }
0x7ca4   :  { %v7142_v46 = vpop.permute.xlu1 %7141 }
0x7ca5   :  { %vm7147_vm2 = vcmp.eq.s32.totalorder %v12727_v15, %v7142_v46  ;;  %v13968_v46 = vld [vmem:[#allocation27] ss:$0 sm:$0xff] }
0x7ca6   :  { %v13884_v30 = vsel %vm7147_vm2, 1.0, %v12421_v1 }
0x7cea   :  { %v13824_v19 = vpop.permute.xlu0 %6852 }
0x7ceb   :  { %6855 = vst.msk [vmem:[#allocation3] sm:$0x3] %vm802_vm9, %v13824_v19 }
0x7cee   :  { %v5118_v10 = vpop.permute.xlu0 %5117 }
0x7cef   :  { %5120 = vst.msk [vmem:[#allocation2] sm:$0xc] %vm913_vm12, %v5118_v10  ;;  %v13914_v10 = vpack.c.bf16 %v7283_v42, %v7282_v35 }
0x7cf2   :  { %v5344_v39 = vpop.permute.xlu0 %5343  ;;  %v6862_v9 = vld [vmem:[#allocation3] sm:$0xff] }
0x7cf3   :  { %5346 = vst.msk [vmem:[#allocation2] sm:$0xc0] %vm1141_vm11, %v5344_v39  ;;  %10654 = vmatprep.mubr.msk.f32.mxu0 %vm603_vm8, %v6862_v9  ;;  %v9475_v39 = vld [vmem:[%s14197_s23] ss:$0 sm:$0xff] }
0x7cf4   :  { %10655 = vmatmul.mubr.msk.f32.vlgmr.msra.gmra.mrb[50].mxu0 %vm603_vm8, %v6863_v61 }
0x7cf5   :  { %11328 = vmatpush3.bf16.msra.mxu0 %v11325_v51 }
0x7cf6   :  { %v5675_v47 = vpop.permute.xlu0 %5674  ;;  %11330 = vmatprep.subr.bf16.mxu0 %v11329_v0 }
0x7cf7   :  { %5677 = vst.msk [vmem:[#allocation2 + $0x8] sm:$0x30] %vm1027_vm10, %v5675_v47  ;;  %vm9155_vm10 = vcmask 523264  }
0x7cf9   :  { %11332 = vmatpush3.bf16.msra.mxu0 %v11329_v0 }
0x7cfa   :  { %v6856_v18 = vld [vmem:[#allocation2] sm:$0xff]  ;;  %11343 = vmatprep.subr.bf16.mxu0 %v12423_v32 }
0x7cfb   :  { %10665 = vmatprep.mubr.msk.f32.mxu0 %vm603_vm8, %v6856_v18 }
0x7cfe   :  { %v6857_v8 = vld [vmem:[#allocation2 + $0x8] sm:$0xff] }
0x7cff   :  { %10666 = vmatmul.mubr.msk.f32.vlgmr.msra.gmra.mrb[50].mxu0 %vm603_vm8, %v6857_v8  ;;  %v13962_v45 = vpop.permute.xlu1 %7730 }
0x7d00   :  { %10696 = vmatprep.mubr.msk.f32.mxu0 %vm12422_vm0, %v12421_v1 }
0x7d07   :  { %v7043_v60 = vpop.permute.xlu0 %7042 }
0x7d08   :  { %vm7047_vm13 = vcmp.eq.s32.totalorder %v12727_v15, %v7043_v60 }
0x7d09   :  { %v9465_v31 = vsel %vm7047_vm13, 1.0, %v12421_v1 }
0x7d0a   :  { %10672 = vmatprep.mubr.msk.f32.mxu1 %vm400_vm1, %v9465_v31 }
0x7dd2   :  { %v10667_v6 = vpop.f32.mrb[50].mxu0 }
0x7dd3   :  { %v7038_v56 = vadd.f32 %v10667_v6, %v9464_v13  ;;  %v7021_v21 = vpop.f32.mrb[51].mxu0 }
0x7dd4   :  { %v7037_v49 = vadd.f32 %v9464_v13, %v7021_v21  ;;  %v7157_v13 = vadd.s32 8, %v13904_v3 }
0x7dd6   :  { %v11333_v63 = vpack.c.bf16 %v7038_v56, %v7037_v49  ;;  %v7286_v49 = vld [vmem:[#allocation26] sm:$0xff]  ;;  %vm7164_vm6 = vcmp.eq.s32.totalorder %v7157_v13, %v9472_v11 }
0x7dd7   :  { %v13934_v20 = vpack.c.bf16 %v7287_v41, %v7286_v49  ;;  %v13937_v24 = vsel %vm7164_vm6, 1.0, %v12421_v1 }
0x7dd8   :  { %11334 = vmatprep.subr.bf16.mxu1 %v11333_v63 }
0x7dd9   :  { %11336 = vmatpush3.bf16.msra.mxu1 %v11333_v63 }
0x7dda   :  { %11337 = vmatprep.subr.bf16.mxu1 %v12423_v32 }
0x7ddc   :  { %10673 = vmatmul.mubr.msk.f32.vlgmr.msra.gmra.mrb[66].mxu1 %vm400_vm1, %v9466_v57 }
0x7ddd   :  { %11339 = vmatpush3.bf16.msra.mxu1 %v11338_v38  ;;  %10683 = vmatprep.mubr.msk.f32.mxu1 %vm12422_vm0, %v12421_v1  ;;  %v7289_v38 = vld [vmem:[#allocation26 + $0x18] sm:$0xff] }
0x7dde   :  { %11340 = vmatprep.subr.bf16.mxu1 %v12423_v32  ;;  %v13939_v57 = vpack.c.bf16 %v7289_v38, %v7288_v23 }
0x7de1   :  { %11342 = vmatpush3.bf16.msra.mxu1 %v11341_v34 }
0x7de2   :  { %11346 = vmatprep.subr.bf16.mxu1 %v12423_v32 }
0x7de4   :  { %10684 = vmatmul.mubr.msk.f32.vlgmr.msra.gmra.mrb[68].mxu1 %vm603_vm8, %v12763_v37  ;;  %v7382_v37 = vld [vmem:[#allocation21 + $0x18] sm:$0xff] }
0x7de5   :  { %10686 = vmatprep.mubr.msk.f32.mxu1 %vm12422_vm0, %v12421_v1  ;;  %11348 = vmatpush3.bf16.msra.mxu1 %v13861_v33  ;;  %v13864_v36 = vpack.c.bf16 %v7382_v37, %v7381_v26 }
0x7de6   :  { %11349 = vmatprep.subr.bf16.mxu1 %v12423_v32 }
0x7de8   :  { %10687 = vmatmul.mubr.msk.f32.gmra.mrb[70].mxu1 %vm603_vm8, %v12767_v40  ;;  %v7139_v40 = vpop.permute.xlu0 %7138 }
0x7de9   :  { %10689 = vmatprep.mubr.msk.f32.mxu1 %vm12422_vm0, %v12421_v1  ;;  %11351 = vmatpush3.bf16.msra.mxu1 %v13864_v36  ;;  %vm7146_vm15 = vcmp.eq.s32.totalorder %v12727_v15, %v7139_v40 }
0x7dea   :  { %v13876_v12 = vsel %vm7146_vm15, 1.0, %v12421_v1  ;;  %11357 = vmatprep.subr.bf16.mxu1 %v13914_v10 }
0x7dec   :  { %10690 = vmatmul.mubr.msk.f32.gmra.mrb[72].mxu1 %vm603_vm8, %v12776_v43  ;;  %v7145_v28 = vpop.permute.xlu0 %7144 }
0x7ded   :  { %10713 = vmatprep.mubr.msk.f32.mxu1 %vm12422_vm0, %v12421_v1  ;;  %vm7148_vm3 = vcmp.eq.s32.totalorder %v12727_v15, %v7145_v28 }
0x7dee   :  { %v13892_v22 = vsel %vm7148_vm3, 1.0, %v12421_v1 }
0x7eaf   :  { %v13868_v55 = vpop.f32.mrb[66].mxu1 }
0x7eb0   :  { %v13870_v43 = vpop.f32.mrb[67].mxu1 }
0x7eb1   :  { %v11344_v27 = vpack.c.bf16 %v13868_v55, %v13870_v43 }
0x7eb3   :  { %11345 = vmatpush3.bf16.msra.mxu0 %v11344_v27 }
0x7eb6   :  { %10697 = vmatmul.mubr.msk.f32.vlgmr.msra.gmra.mrb[52].mxu0 %vm400_vm1, %v13876_v12 }
0x7eb7   :  { %v7255_v53 = vpop.f32.mrb[68].mxu1  ;;  %10699 = vmatprep.mubr.msk.f32.mxu0 %vm12422_vm0, %v12421_v1 }
0x7eb8   :  { %v10685_v17 = vpop.f32.mrb[69].mxu1  ;;  %v13924_v61 = vadd.f32 %v9475_v39, %v7255_v53 }
0x7eba   :  { %10700 = vmatmul.mubr.msk.f32.gmra.mrb[54].mxu0 %vm400_vm1, %v13884_v30 }
0x7ebb   :  { %v7260_v4 = vpop.f32.mrb[70].mxu1  ;;  %10702 = vmatprep.mubr.msk.f32.mxu0 %vm12422_vm0, %v12421_v1 }
0x7ebc   :  { %v10688_v29 = vpop.f32.mrb[71].mxu1  ;;  %v13926_v47 = vadd.f32 %v9475_v39, %v7260_v4 }
0x7ebe   :  { %10703 = vmatmul.mubr.msk.f32.gmra.mrb[56].mxu0 %vm400_vm1, %v13892_v22 }
0x7ebf   :  { %v7265_v52 = vpop.f32.mrb[72].mxu1  ;;  %10728 = vmatprep.mubr.msk.f32.mxu0 %vm7472_vm5, %v13909_v2 }
0x7ec0   :  { %v10691_v51 = vpop.f32.mrb[73].mxu1  ;;  %v13931_v6 = vadd.f32 %v9475_v39, %v7265_v52 }
0x7f89   :  { %v7365_v50 = vpop.f32.mrb[52].mxu0 }
0x7f8a   :  { %v10698_v25 = vpop.f32.mrb[53].mxu0  ;;  %10714 = vmatmul.mubr.msk.f32.vlgmr.msra.gmra.mrb[74].mxu1 %vm603_vm8, %v7365_v50 }
0x7f8b   :  { %10716 = vmatprep.mubr.msk.f32.mxu1 %vm12422_vm0, %v12421_v1  ;;  %11359 = vmatpush3.bf16.msra.mxu1 %v13914_v10 }
0x7f8c   :  { %11361 = vmatprep.subr.bf16.mxu1 %v13916_v48 }
0x7f8d   :  { %v7370_v15 = vpop.f32.mrb[54].mxu0 }
0x7f8e   :  { %v10701_v7 = vpop.f32.mrb[55].mxu0  ;;  %10717 = vmatmul.mubr.msk.f32.gmra.mrb[76].mxu1 %vm603_vm8, %v7370_v15 }
0x7f8f   :  { %10719 = vmatprep.mubr.msk.f32.mxu1 %vm12422_vm0, %v12421_v1  ;;  %11363 = vmatpush3.bf16.msra.mxu1 %v13916_v48 }
0x7f90   :  { %11372 = vmatprep.subr.bf16.mxu1 %v12423_v32 }
0x7f91   :  { %v7375_v58 = vpop.f32.mrb[56].mxu0 }
0x7f92   :  { %v10704_v59 = vpop.f32.mrb[57].mxu0  ;;  %10720 = vmatmul.mubr.msk.f32.gmra.mrb[78].mxu1 %vm603_vm8, %v7375_v58 }
0x805d   :  { %v7458_v9 = vpop.f32.mrb[74].mxu1 }
0x805e   :  { %v10715_v0 = vpop.f32.mrb[75].mxu1  ;;  %v7459_v8 = vadd.f32 %v7458_v9, %v13924_v61 }
0x8061   :  { %v7463_v18 = vpop.f32.mrb[76].mxu1 }
0x8062   :  { %v7464_v60 = vadd.f32 %v7463_v18, %v13926_v47  ;;  %v10718_v31 = vpop.f32.mrb[77].mxu1 }
0x8064   :  { %v11352_v56 = vpack.c.bf16 %v7464_v60, %v7459_v8 }
0x8065   :  { %v7468_v21 = vpop.f32.mrb[78].mxu1 }
0x8066   :  { %v7469_v63 = vadd.f32 %v7468_v21, %v13931_v6  ;;  %v10721_v16 = vpop.f32.mrb[79].mxu1  ;;  %11353 = vmatprep.subr.bf16.mxu0 %v11352_v56 }
0x8067   :  { %11355 = vmatpush3.bf16.msra.mxu0 %v11352_v56 }
0x8068   :  { %10726 = vmatprep.subr.mxu0 %v7469_v63 }
0x806b   :  { %10727 = vmatpush3.msra.mxu0 %v7469_v63 }
0x806c   :  { %10729 = vmatmul.mubr.msk.f32.vlgmr.msra.gmra.mrb[58].mxu0 %vm7472_vm5, %v13937_v24  ;;  %11365 = vmatprep.subr.bf16.mxu0 %v13934_v20 }
0x806d   :  { %11367 = vmatpush3.bf16.msra.mxu0 %v13934_v20  ;;  %10750 = vmatprep.mubr.msk.f32.mxu0 %vm603_vm8, %v13870_v43 }
0x806e   :  { %11369 = vmatprep.subr.bf16.mxu0 %v13939_v57 }
0x8071   :  { %11371 = vmatpush3.bf16.msra.mxu0 %v13939_v57 }
0x8072   :  { %11375 = vmatprep.subr.bf16.mxu0 %v12423_v32 }
0x8074   :  { %10751 = vmatmul.mubr.msk.f32.vlgmr.msra.gmra.mrb[60].mxu0 %vm603_vm8, %v13868_v55 }
0x8075   :  { %11377 = vmatpush3.bf16.msra.mxu0 %v13861_v33  ;;  %10774 = vmatprep.mubr.msk.f32.mxu0 %vm12422_vm0, %v12421_v1 }
0x8076   :  { %11378 = vmatprep.subr.bf16.mxu0 %v12423_v32 }
0x8079   :  { %11380 = vmatpush3.bf16.msra.mxu0 %v13864_v36 }
0x807a   :  { %11386 = vmatprep.subr.bf16.mxu0 %v13914_v10 }
0x813f   :  { %v10730_v34 = vpop.f32.mrb[58].mxu0 }
0x8140   :  { %v7545_v44 = vpop.f32.mrb[59].mxu0 }
0x8141   :  { %10739 = vmatprep.mubr.msk.f32.mxu1 %vm603_vm8, %v7545_v44 }
0x8142   :  { %10740 = vmatmul.mubr.msk.f32.vlgmr.msra.gmra.mrb[80].mxu1 %vm603_vm8, %v10730_v34 }
0x8143   :  { %10757 = vmatprep.mubr.msk.f32.mxu1 %vm12422_vm0, %v12421_v1 }
0x8147   :  { %v10752_v26 = vpop.f32.mrb[60].mxu0 }
0x8148   :  { %v7734_v37 = vadd.f32 %v10752_v26, %v13962_v45  ;;  %v7707_v40 = vpop.f32.mrb[61].mxu0 }
0x8149   :  { %v7733_v27 = vadd.f32 %v13962_v45, %v7707_v40 }
0x814a   :  { %7739 = vrot.lane.b32.xlu1 %v7734_v37, %s12424_s9 }
0x814b   :  { %7737 = vrot.lane.b32.xlu0 %v7733_v27, %s12424_s9 }
0x81bc   :  { %v7740_v11 = vpop.permute.xlu1 %7739 }
0x81bd   :  { %v7738_v35 = vpop.permute.xlu0 %7737 }
0x8215   :  { %v10741_v28 = vpop.f32.mrb[80].mxu1 }
0x8216   :  { %v7632_v53 = vadd.f32 %v10741_v28, %v13968_v46  ;;  %v7626_v17 = vpop.f32.mrb[81].mxu1 }
0x8217   :  { %v7627_v4 = vadd.f32 %v13968_v46, %v7626_v17 }
0x8218   :  { %v7717_v29 = vadd.f32 %v10752_v26, %v7632_v53 }
0x8219   :  { %v7716_v52 = vadd.f32 %v7707_v40, %v7627_v4 }
0x821a   :  { %v9494_v51 = vmul.f32 -1.442695, %v7717_v29 }
0x821b   :  { %v9493_v50 = vmul.f32 -1.442695, %v7716_v52 }
0x821c   :  { %11836 = vpow2.f32 %v9494_v51 }
0x821d   :  { %11838 = vpow2.f32 %v9493_v50 }
0x8226   :  { %v11837_v25 = vpop.eup %11836 }
0x8227   :  { %v11839_v15 = vpop.eup %11838  ;;  %v7725_v7 = vadd.f32 1.0, %v11837_v25 }
0x8228   :  { %v7724_v58 = vadd.f32 1.0, %v11839_v15 }
0x8229   :  { %11840 = vrcp.f32 %v7725_v7 }
0x822a   :  { %11842 = vrcp.f32 %v7724_v58 }
0x8233   :  { %v11841_v59 = vpop.eup %11840 }
0x8234   :  { %v11843_v5 = vpop.eup %11842  ;;  %v7744_v42 = vmul.f32 %v11841_v59, %v7740_v11  ;;  %v7758_v13 = vsub.f32 1.0, %v11841_v59 }
0x8235   :  { %v7743_v14 = vmul.f32 %v11843_v5, %v7738_v35  ;;  %v7757_v56 = vsub.f32 1.0, %v11843_v5 }
0x8236   :  { %7749 = vrot.lane.b32.xlu1 %v7744_v42, %s12424_s9 }
0x8237   :  { %7747 = vrot.lane.b32.xlu0 %v7743_v14, %s12424_s9 }
0x82a8   :  { %v7750_v62 = vpop.permute.xlu1 %7749 }
0x82a9   :  { %v7754_v39 = vadd.f32 %v7750_v62, %v7632_v53  ;;  %v7748_v9 = vpop.permute.xlu0 %7747 }
0x82aa   :  { %v7753_v0 = vadd.f32 %v7748_v9, %v7627_v4 }
0x82ab   :  { %11844 = vtanh.f32 %v7754_v39 }
0x82ac   :  { %11846 = vtanh.f32 %v7753_v0 }
0x82b5   :  { %v11845_v18 = vpop.eup %11844 }
0x82b6   :  { %v11847_v8 = vpop.eup %11846  ;;  %7763 = vrot.lane.b32.xlu1 %v11845_v18, %s12425_s16 }
0x82b7   :  { %7761 = vrot.lane.b32.xlu0 %v11847_v8, %s12425_s16 }
0x82ba   :  { %7771 = vrot.lane.b32.xlu1 %v13868_v55, %s12426_s5 }
0x82bb   :  { %7769 = vrot.lane.b32.xlu0 %v13870_v43, %s12426_s5 }
0x8328   :  { %v7764_v60 = vpop.permute.xlu1 %7763 }
0x8329   :  { %v7762_v31 = vpop.permute.xlu0 %7761  ;;  %v7768_v49 = vmul.f32 %v7764_v60, %v7758_v13 }
0x832a   :  { %v7767_v16 = vmul.f32 %v7762_v31, %v7757_v56 }
0x832c   :  { %v7772_v21 = vpop.permute.xlu1 %7771 }
0x832d   :  { %v7776_v41 = vmul.f32 %v11841_v59, %v7772_v21  ;;  %v7770_v63 = vpop.permute.xlu0 %7769 }
0x832e   :  { %v7775_v23 = vmul.f32 %v11843_v5, %v7770_v63 }
0x832f   :  { %v13978_v38 = vadd.f32 %v7776_v41, %v7768_v49 }
0x8330   :  { %v13980_v34 = vadd.f32 %v7775_v23, %v7767_v16 }
0x8331   :  { %7783 = vrot.lane.b32.xlu1 %v13978_v38, %s12425_s16 }
0x8332   :  { %7781 = vrot.lane.b32.xlu0 %v13980_v34, %s12425_s16 }
0x83a3   :  { %v7784_v55 = vpop.permute.xlu1 %7783 }
0x83a4   :  { %v7782_v43 = vpop.permute.xlu0 %7781 }
0x83a5   :  { %v11373_v44 = vpack.c.bf16 %v7784_v55, %v7782_v43 }
0x83a7   :  { %11374 = vmatpush3.bf16.msra.mxu1 %v11373_v44 }
0x83aa   :  { %10758 = vmatmul.mubr.msk.f32.vlgmr.msra.gmra.mrb[82].mxu1 %vm400_vm1, %v13876_v12 }
0x83ab   :  { %10760 = vmatprep.mubr.msk.f32.mxu1 %vm12422_vm0, %v12421_v1 }
0x83ae   :  { %10761 = vmatmul.mubr.msk.f32.gmra.mrb[84].mxu1 %vm400_vm1, %v13884_v30 }
0x83af   :  { %10763 = vmatprep.mubr.msk.f32.mxu1 %vm12422_vm0, %v12421_v1 }
0x83b2   :  { %10764 = vmatmul.mubr.msk.f32.gmra.mrb[86].mxu1 %vm400_vm1, %v13892_v22 }
0x83b3   :  { %10789 = vmatprep.mubr.msk.f32.mxu1 %vm7472_vm5, %v13909_v2 }
0x847d   :  { %v7853_v26 = vpop.f32.mrb[82].mxu1 }
0x847e   :  { %v10759_v37 = vpop.f32.mrb[83].mxu1  ;;  %10775 = vmatmul.mubr.msk.f32.vlgmr.msra.gmra.mrb[62].mxu0 %vm603_vm8, %v7853_v26 }
0x847f   :  { %10777 = vmatprep.mubr.msk.f32.mxu0 %vm12422_vm0, %v12421_v1  ;;  %11388 = vmatpush3.bf16.msra.mxu0 %v13914_v10 }
0x8480   :  { %11390 = vmatprep.subr.bf16.mxu0 %v13916_v48 }
0x8481   :  { %v7858_v40 = vpop.f32.mrb[84].mxu1 }
0x8482   :  { %v10762_v27 = vpop.f32.mrb[85].mxu1  ;;  %10778 = vmatmul.mubr.msk.f32.gmra.mrb[64].mxu0 %vm603_vm8, %v7858_v40 }
0x8483   :  { %10780 = vmatprep.mubr.msk.f32.mxu0 %vm12422_vm0, %v12421_v1  ;;  %11392 = vmatpush3.bf16.msra.mxu0 %v13916_v48 }
0x8484   :  { %11401 = vmatprep.subr.bf16.mxu0 %v12423_v32 }
0x8485   :  { %v7863_v28 = vpop.f32.mrb[86].mxu1 }
0x8486   :  { %v10765_v53 = vpop.f32.mrb[87].mxu1  ;;  %10781 = vmatmul.mubr.msk.f32.gmra.mrb[66].mxu0 %vm603_vm8, %v7863_v28 }
0x8551   :  { %v7942_v17 = vpop.f32.mrb[62].mxu0 }
0x8552   :  { %v10776_v4 = vpop.f32.mrb[63].mxu0  ;;  %v7943_v52 = vadd.f32 %v7942_v17, %v13924_v61 }
0x8555   :  { %v7947_v29 = vpop.f32.mrb[64].mxu0 }
0x8556   :  { %v7948_v51 = vadd.f32 %v7947_v29, %v13926_v47  ;;  %v10779_v50 = vpop.f32.mrb[65].mxu0 }
0x8558   :  { %v11381_v25 = vpack.c.bf16 %v7948_v51, %v7943_v52 }
0x8559   :  { %v7952_v15 = vpop.f32.mrb[66].mxu0 }
0x855a   :  { %v7953_v7 = vadd.f32 %v7952_v15, %v13931_v6  ;;  %v10782_v58 = vpop.f32.mrb[67].mxu0  ;;  %11382 = vmatprep.subr.bf16.mxu1 %v11381_v25 }
0x855b   :  { %11384 = vmatpush3.bf16.msra.mxu1 %v11381_v25 }
0x855c   :  { %10787 = vmatprep.subr.mxu1 %v7953_v7 }
0x855f   :  { %10788 = vmatpush3.msra.mxu1 %v7953_v7 }
0x8560   :  { %10790 = vmatmul.mubr.msk.f32.vlgmr.msra.gmra.mrb[88].mxu1 %vm7472_vm5, %v13937_v24  ;;  %11394 = vmatprep.subr.bf16.mxu1 %v13934_v20 }
0x8561   :  { %11396 = vmatpush3.bf16.msra.mxu1 %v13934_v20  ;;  %10811 = vmatprep.mubr.msk.f32.mxu1 %vm603_vm8, %v7782_v43 }
0x8562   :  { %11398 = vmatprep.subr.bf16.mxu1 %v13939_v57 }
0x8565   :  { %11400 = vmatpush3.bf16.msra.mxu1 %v13939_v57 }
0x8566   :  { %11404 = vmatprep.subr.bf16.mxu1 %v12423_v32 }
0x8568   :  { %10812 = vmatmul.mubr.msk.f32.vlgmr.msra.gmra.mrb[90].mxu1 %vm603_vm8, %v7784_v55 }
0x8569   :  { %11406 = vmatpush3.bf16.msra.mxu1 %v13861_v33  ;;  %10835 = vmatprep.mubr.msk.f32.mxu1 %vm12422_vm0, %v12421_v1 }
0x856a   :  { %11407 = vmatprep.subr.bf16.mxu1 %v12423_v32 }
0x856d   :  { %11409 = vmatpush3.bf16.msra.mxu1 %v13864_v36 }
0x856e   :  { %11415 = vmatprep.subr.bf16.mxu1 %v13914_v10 }
0x8633   :  { %v10791_v59 = vpop.f32.mrb[88].mxu1 }
0x8634   :  { %v8022_v11 = vpop.f32.mrb[89].mxu1 }
0x8635   :  { %10800 = vmatprep.mubr.msk.f32.mxu0 %vm603_vm8, %v8022_v11 }
0x8636   :  { %10801 = vmatmul.mubr.msk.f32.vlgmr.msra.gmra.mrb[68].mxu0 %vm603_vm8, %v10791_v59 }
0x8637   :  { %10818 = vmatprep.mubr.msk.f32.mxu0 %vm12422_vm0, %v12421_v1 }
0x863b   :  { %v10813_v5 = vpop.f32.mrb[90].mxu1 }
0x863c   :  { %v8206_v33 = vadd.f32 %v10813_v5, %v13962_v45  ;;  %v8182_v35 = vpop.f32.mrb[91].mxu1 }
0x863d   :  { %v8205_v42 = vadd.f32 %v8182_v35, %v13962_v45 }
0x863e   :  { %8211 = vrot.lane.b32.xlu1 %v8206_v33, %s12424_s9 }
0x863f   :  { %8209 = vrot.lane.b32.xlu0 %v8205_v42, %s12424_s9 }
0x86b0   :  { %v8212_v49 = vpop.permute.xlu1 %8211 }
0x86b1   :  { %v8210_v63 = vpop.permute.xlu0 %8209 }
0x8709   :  { %v10802_v36 = vpop.f32.mrb[68].mxu0 }
0x870a   :  { %v8109_v14 = vadd.f32 %v10802_v36, %v13968_v46  ;;  %v8103_v62 = vpop.f32.mrb[69].mxu0 }
0x870b   :  { %v8104_v39 = vadd.f32 %v13968_v46, %v8103_v62 }
0x870c   :  { %v8192_v9 = vadd.f32 %v10813_v5, %v8109_v14 }
0x870d   :  { %v8191_v0 = vadd.f32 %v8182_v35, %v8104_v39 }
0x870e   :  { %v9508_v18 = vmul.f32 -1.442695, %v8192_v9 }
0x870f   :  { %v9507_v8 = vmul.f32 -1.442695, %v8191_v0 }
0x8710   :  { %11848 = vpow2.f32 %v9508_v18 }
0x8711   :  { %11850 = vpow2.f32 %v9507_v8 }
0x871a   :  { %v11849_v60 = vpop.eup %11848 }
0x871b   :  { %v11851_v31 = vpop.eup %11850  ;;  %v8200_v13 = vadd.f32 1.0, %v11849_v60 }
0x871c   :  { %v8199_v56 = vadd.f32 1.0, %v11851_v31 }
0x871d   :  { %11852 = vrcp.f32 %v8200_v13 }
0x871e   :  { %11854 = vrcp.f32 %v8199_v56 }
0x8727   :  { %v11853_v21 = vpop.eup %11852 }
0x8728   :  { %v11855_v41 = vpop.eup %11854  ;;  %v8216_v16 = vmul.f32 %v11853_v21, %v8212_v49  ;;  %v8230_v27 = vsub.f32 1.0, %v11853_v21  ;;  %v8242_v17 = vmul.f32 %v11853_v21, %v13978_v38 }
0x8729   :  { %v8215_v23 = vmul.f32 %v11855_v41, %v8210_v63  ;;  %v8229_v53 = vsub.f32 1.0, %v11855_v41  ;;  %v8241_v52 = vmul.f32 %v11855_v41, %v13980_v34 }
0x872a   :  { %8221 = vrot.lane.b32.xlu1 %v8216_v16, %s12424_s9 }
0x872b   :  { %8219 = vrot.lane.b32.xlu0 %v8215_v23, %s12424_s9 }
0x879c   :  { %v8222_v55 = vpop.permute.xlu1 %8221 }
0x879d   :  { %v8226_v43 = vadd.f32 %v8222_v55, %v8109_v14  ;;  %v8220_v44 = vpop.permute.xlu0 %8219 }
0x879e   :  { %v8225_v26 = vadd.f32 %v8220_v44, %v8104_v39 }
0x879f   :  { %11856 = vtanh.f32 %v8226_v43 }
0x87a0   :  { %11858 = vtanh.f32 %v8225_v26 }
0x87a9   :  { %v11857_v37 = vpop.eup %11856 }
0x87aa   :  { %v11859_v40 = vpop.eup %11858  ;;  %8235 = vrot.lane.b32.xlu1 %v11857_v37, %s12425_s16  ;;  %v8823_v37 = vld [vmem:[#allocation30] sm:$0xff] }
0x87ab   :  { %8233 = vrot.lane.b32.xlu0 %v11859_v40, %s12425_s16  ;;  %v8824_v40 = vld [vmem:[#allocation30 + $0x8] sm:$0xff] }
0x881c   :  { %v8236_v28 = vpop.permute.xlu1 %8235 }
0x881d   :  { %v8240_v4 = vmul.f32 %v8236_v28, %v8230_v27  ;;  %v8234_v29 = vpop.permute.xlu0 %8233  ;;  %v8721_v27 = vld [vmem:[%s14198_s26] sm:$0xff]  ;;  %v11438_v28 = vpack.c.bf16 %v8824_v40, %v8823_v37 }
0x881e   :  { %v8239_v51 = vmul.f32 %v8234_v29, %v8229_v53  ;;  %v8722_v53 = vld [vmem:[%s14198_s26 + $0x8] sm:$0xff] }
0x881f   :  { %v14043_v50 = vadd.f32 %v8242_v17, %v8240_v4  ;;  %v8825_v17 = vld [vmem:[#allocation30 + $0x10] sm:$0xff]  ;;  %v8826_v4 = vld [vmem:[#allocation30 + $0x18] sm:$0xff]  ;;  %v11430_v29 = vpack.c.bf16 %v8722_v53, %v8721_v27 }
0x8820   :  { %v14045_v25 = vadd.f32 %v8241_v52, %v8239_v51  ;;  %v11442_v52 = vpack.c.bf16 %v8826_v4, %v8825_v17  ;;  %v8723_v51 = vld [vmem:[%s14198_s26 + $0x10] sm:$0xff] }
0x8821   :  { %8249 = vrot.lane.b32.xlu1 %v14043_v50, %s12425_s16 }
0x8822   :  { %8247 = vrot.lane.b32.xlu0 %v14045_v25, %s12425_s16 }
0x8893   :  { %v8250_v15 = vpop.permute.xlu1 %8249 }
0x8894   :  { %v8248_v7 = vpop.permute.xlu0 %8247 }
0x8895   :  { %v11402_v58 = vpack.c.bf16 %v8250_v15, %v8248_v7 }
0x8897   :  { %11403 = vmatpush3.bf16.msra.mxu0 %v11402_v58 }
0x889a   :  { %10819 = vmatmul.mubr.msk.f32.vlgmr.msra.gmra.mrb[70].mxu0 %vm400_vm1, %v13876_v12 }
0x889b   :  { %10821 = vmatprep.mubr.msk.f32.mxu0 %vm12422_vm0, %v12421_v1 }
0x889e   :  { %10822 = vmatmul.mubr.msk.f32.gmra.mrb[72].mxu0 %vm400_vm1, %v13884_v30 }
0x889f   :  { %10824 = vmatprep.mubr.msk.f32.mxu0 %vm12422_vm0, %v12421_v1 }
0x88a2   :  { %10825 = vmatmul.mubr.msk.f32.gmra.mrb[74].mxu0 %vm400_vm1, %v13892_v22 }
0x88a3   :  { %10850 = vmatprep.mubr.msk.f32.mxu0 %vm7472_vm5, %v13909_v2 }
0x896d   :  { %v8319_v38 = vpop.f32.mrb[70].mxu0 }
0x896e   :  { %v10820_v34 = vpop.f32.mrb[71].mxu0  ;;  %10836 = vmatmul.mubr.msk.f32.vlgmr.msra.gmra.mrb[92].mxu1 %vm603_vm8, %v8319_v38 }
0x896f   :  { %10838 = vmatprep.mubr.msk.f32.mxu1 %vm12422_vm0, %v12421_v1  ;;  %11417 = vmatpush3.bf16.msra.mxu1 %v13914_v10 }
0x8970   :  { %11419 = vmatprep.subr.bf16.mxu1 %v13916_v48 }
0x8971   :  { %v8324_v12 = vpop.f32.mrb[72].mxu0 }
0x8972   :  { %v10823_v30 = vpop.f32.mrb[73].mxu0  ;;  %10839 = vmatmul.mubr.msk.f32.gmra.mrb[94].mxu1 %vm603_vm8, %v8324_v12 }
0x8973   :  { %10841 = vmatprep.mubr.msk.f32.mxu1 %vm12422_vm0, %v12421_v1  ;;  %11421 = vmatpush3.bf16.msra.mxu1 %v13916_v48 }
0x8974   :  { %11431 = vmatprep.subr.bf16.mxu1 %v11430_v29 }
0x8975   :  { %v8329_v22 = vpop.f32.mrb[74].mxu0 }
0x8976   :  { %v10826_v2 = vpop.f32.mrb[75].mxu0  ;;  %10842 = vmatmul.mubr.msk.f32.gmra.mrb[96].mxu1 %vm603_vm8, %v8329_v22 }
0x8a41   :  { %v8408_v59 = vpop.f32.mrb[92].mxu1 }
0x8a42   :  { %v10837_v11 = vpop.f32.mrb[93].mxu1  ;;  %v8409_v10 = vadd.f32 %v8408_v59, %v13924_v61 }
0x8a45   :  { %v8413_v5 = vpop.f32.mrb[94].mxu1 }
0x8a46   :  { %v8414_v33 = vadd.f32 %v8413_v5, %v13926_v47  ;;  %v10840_v35 = vpop.f32.mrb[95].mxu1 }
0x8a47   :  { %v9072_v35 = vrot.slane %v13799_v54, 6 }
0x8a48   :  { %v11410_v42 = vpack.c.bf16 %v8414_v33, %v8409_v10 }
0x8a49   :  { %v8418_v36 = vpop.f32.mrb[96].mxu1 }
0x8a4a   :  { %v8419_v14 = vadd.f32 %v8418_v36, %v13931_v6  ;;  %v10843_v62 = vpop.f32.mrb[97].mxu1  ;;  %11411 = vmatprep.subr.bf16.mxu0 %v11410_v42  ;;  %v8997_v36 = vld [vmem:[#allocation33 + $0x8] sm:$0xff] }
0x8a4b   :  { %11413 = vmatpush3.bf16.msra.mxu0 %v11410_v42  ;;  %v8996_v42 = vld [vmem:[#allocation33] sm:$0xff] }
0x8a4c   :  { %10848 = vmatprep.subr.mxu0 %v8419_v14  ;;  %v11450_v62 = vpack.c.bf16 %v8997_v36, %v8996_v42 }
0x8a4f   :  { %10849 = vmatpush3.msra.mxu0 %v8419_v14 }
0x8a50   :  { %10851 = vmatmul.mubr.msk.f32.vlgmr.msra.gmra.mrb[76].mxu0 %vm7472_vm5, %v13937_v24  ;;  %11423 = vmatprep.subr.bf16.mxu0 %v13934_v20 }
0x8a51   :  { %11425 = vmatpush3.bf16.msra.mxu0 %v13934_v20  ;;  %10872 = vmatprep.mubr.msk.f32.mxu0 %vm603_vm8, %v8248_v7 }
0x8a52   :  { %11427 = vmatprep.subr.bf16.mxu0 %v13939_v57 }
0x8a55   :  { %11429 = vmatpush3.bf16.msra.mxu0 %v13939_v57 }
0x8a56   :  { %11439 = vmatprep.subr.bf16.mxu0 %v11438_v28 }
0x8a58   :  { %10873 = vmatmul.mubr.msk.f32.vlgmr.msra.gmra.mrb[78].mxu0 %vm603_vm8, %v8250_v15  ;;  %v8724_v15 = vld [vmem:[%s14198_s26 + $0x18] sm:$0xff] }
0x8a59   :  { %v11434_v58 = vpack.c.bf16 %v8724_v15, %v8723_v51  ;;  %11441 = vmatpush3.bf16.msra.mxu0 %v11438_v28  ;;  %v9531_v28 = vld [vmem:[%s14201_s4] ss:$0 sm:$0xff] }
0x8a5a   :  { %11443 = vmatprep.subr.bf16.mxu0 %v11442_v52  ;;  %vm8916_vm7 = vcmp.eq.s32.totalorder %v13904_v3, %v9531_v28 }
0x8a5b   :  { %v9532_v15 = vsel %vm8916_vm7, 1.0, %v12421_v1 }
0x8a5d   :  { %11445 = vmatpush3.bf16.msra.mxu0 %v11442_v52  ;;  %v8993_v52 = vld [vmem:[#allocation32 + $0x8] sm:$0xff] }
0x8a5e   :  { %11449 = vmatprep.subr.bf16.mxu0 %v12423_v32 }
0x8b23   :  { %v10852_v48 = vpop.f32.mrb[76].mxu0 }
0x8b24   :  { %v8488_v61 = vpop.f32.mrb[77].mxu0 }
0x8b25   :  { %10861 = vmatprep.mubr.msk.f32.mxu1 %vm603_vm8, %v8488_v61  ;;  %v9147_v61 = vld [vmem:[%s12587_s13] sm:$0xff] }
0x8b26   :  { %10862 = vmatmul.mubr.msk.f32.vlgmr.msra.gmra.mrb[98].mxu1 %vm603_vm8, %v10852_v48  ;;  %v8998_v48 = vld [vmem:[#allocation33 + $0x10] sm:$0xff] }
0x8b27   :  { %11433 = vmatpush3.bf16.msra.mxu1 %v11430_v29  ;;  %v8992_v29 = vld [vmem:[#allocation32] sm:$0xff] }
0x8b28   :  { %11435 = vmatprep.subr.bf16.mxu1 %v11434_v58 }
0x8b2b   :  { %v10874_v47 = vpop.f32.mrb[78].mxu0  ;;  %11437 = vmatpush3.bf16.msra.mxu1 %v11434_v58  ;;  %v8994_v58 = vld [vmem:[#allocation32 + $0x10] sm:$0xff] }
0x8b2c   :  { %v8672_v6 = vadd.f32 %v10874_v47, %v13962_v45  ;;  %v8648_v24 = vpop.f32.mrb[79].mxu0  ;;  %11446 = vmatprep.subr.bf16.mxu1 %v12423_v32 }
0x8b2d   :  { %v8671_v20 = vadd.f32 %v8648_v24, %v13962_v45 }
0x8b2e   :  { %8677 = vrot.lane.b32.xlu1 %v8672_v6, %s12424_s9  ;;  %v9149_v6 = vld [vmem:[%s12587_s13 + $0x10] sm:$0xff] }
0x8b2f   :  { %8675 = vrot.lane.b32.xlu0 %v8671_v20, %s12424_s9  ;;  %v9150_v20 = vld [vmem:[%s12587_s13 + $0x18] sm:$0xff] }
0x8ba0   :  { %v8678_v41 = vpop.permute.xlu1 %8677 }
0x8ba1   :  { %v8676_v16 = vpop.permute.xlu0 %8675 }
0x8bf9   :  { %v10863_v39 = vpop.f32.mrb[98].mxu1 }
0x8bfa   :  { %v8575_v57 = vadd.f32 %v10863_v39, %v13968_v46  ;;  %v8569_v9 = vpop.f32.mrb[99].mxu1  ;;  %v11465_v39 = vpack.c.bf16 %v9150_v20, %v9149_v6 }
0x8bfb   :  { %v8570_v0 = vadd.f32 %v13968_v46, %v8569_v9  ;;  %v9152_v9 = vld [vmem:[%s12587_s13 + $0x28] sm:$0xff] }
0x8bfc   :  { %v8658_v18 = vadd.f32 %v10874_v47, %v8575_v57  ;;  %v9148_v47 = vld [vmem:[%s12587_s13 + $0x8] sm:$0xff] }
0x8bfd   :  { %v8657_v8 = vadd.f32 %v8648_v24, %v8570_v0  ;;  %v11462_v24 = vpack.c.bf16 %v9148_v47, %v9147_v61 }
0x8bfe   :  { %v9522_v60 = vmul.f32 -1.442695, %v8658_v18  ;;  %v9154_v18 = vld [vmem:[%s12587_s13 + $0x38] sm:$0xff] }
0x8bff   :  { %v9521_v31 = vmul.f32 -1.442695, %v8657_v8 }
0x8c00   :  { %11860 = vpow2.f32 %v9522_v60  ;;  %v9523_v60 = vld [vmem:[%s14199_s29] ss:$0 sm:$0xff] }
0x8c01   :  { %11862 = vpow2.f32 %v9521_v31 }
0x8c0a   :  { %v11861_v13 = vpop.eup %11860 }
0x8c0b   :  { %v11863_v56 = vpop.eup %11862  ;;  %v8666_v21 = vadd.f32 1.0, %v11861_v13 }
0x8c0c   :  { %v8665_v45 = vadd.f32 1.0, %v11863_v56 }
0x8c0d   :  { %11864 = vrcp.f32 %v8666_v21 }
0x8c0e   :  { %11866 = vrcp.f32 %v8665_v45 }
0x8c17   :  { %v11865_v49 = vpop.eup %11864 }
0x8c18   :  { %v11867_v63 = vpop.eup %11866  ;;  %v8682_v23 = vmul.f32 %v11865_v49, %v8678_v41  ;;  %v8696_v34 = vsub.f32 1.0, %v11865_v49  ;;  %v8708_v22 = vmul.f32 %v11865_v49, %v14043_v50 }
0x8c19   :  { %v8681_v46 = vmul.f32 %v11867_v63, %v8676_v16  ;;  %v8695_v30 = vsub.f32 1.0, %v11867_v63  ;;  %v8707_v11 = vmul.f32 %v11867_v63, %v14045_v25  ;;  %v8999_v25 = vld [vmem:[#allocation33 + $0x18] sm:$0xff] }
0x8c1a   :  { %8687 = vrot.lane.b32.xlu1 %v8682_v23, %s12424_s9  ;;  %v11453_v54 = vpack.c.bf16 %v8999_v25, %v8998_v48 }
0x8c1b   :  { %8685 = vrot.lane.b32.xlu0 %v8681_v46, %s12424_s9 }
0x8c8c   :  { %v8688_v55 = vpop.permute.xlu1 %8687 }
0x8c8d   :  { %v8692_v43 = vadd.f32 %v8688_v55, %v8575_v57  ;;  %v8686_v44 = vpop.permute.xlu0 %8685  ;;  %v9151_v57 = vld [vmem:[%s12587_s13 + $0x20] sm:$0xff] }
0x8c8e   :  { %v8691_v26 = vadd.f32 %v8686_v44, %v8570_v0  ;;  %v11468_v0 = vpack.c.bf16 %v9152_v9, %v9151_v57 }
0x8c8f   :  { %11868 = vtanh.f32 %v8692_v43 }
0x8c90   :  { %11870 = vtanh.f32 %v8691_v26  ;;  %v9528_v26 = vld [vmem:[%s14200_s1] ss:$0 sm:$0xff] }
0x8c99   :  { %v11869_v7 = vpop.eup %11868 }
0x8c9a   :  { %v11871_v38 = vpop.eup %11870  ;;  %8701 = vrot.lane.b32.xlu1 %v11869_v7, %s12425_s16  ;;  %v11456_v7 = vpack.c.bf16 %v8993_v52, %v8992_v29 }
0x8c9b   :  { %8699 = vrot.lane.b32.xlu0 %v11871_v38, %s12425_s16  ;;  %v8995_v38 = vld [vmem:[#allocation32 + $0x18] sm:$0xff] }
0x8d0c   :  { %v8702_v12 = vpop.permute.xlu1 %8701 }
0x8d0d   :  { %v8706_v2 = vmul.f32 %v8702_v12, %v8696_v34  ;;  %v8700_v59 = vpop.permute.xlu0 %8699  ;;  %v11459_v34 = vpack.c.bf16 %v8995_v38, %v8994_v58 }
0x8d0e   :  { %v8705_v5 = vmul.f32 %v8700_v59, %v8695_v30 }
0x8d0f   :  { %v8710_v10 = vadd.f32 %v8708_v22, %v8706_v2 }
0x8d10   :  { %v8709_v33 = vadd.f32 %v8707_v11, %v8705_v5 }
0x8d11   :  { %8715 = vrot.lane.b32.xlu1 %v8710_v10, %s12425_s16 }
0x8d12   :  { %8713 = vrot.lane.b32.xlu0 %v8709_v33, %s12425_s16 }
0x8d16   :  { %9073 = vrot.lane.b32.xlu0 %v9072_v35, %s12425_s16 }
0x8d83   :  { %v8716_v14 = vpop.permute.xlu1 %8715 }
0x8d84   :  { %8720 = vst.msk [vmem:[#allocation36 + $0x8] sm:$0xff] %vm603_vm8, %v8716_v14  ;;  %v8714_v50 = vpop.permute.xlu0 %8713 }
0x8d85   :  { %8719 = vst.msk [vmem:[#allocation36] sm:$0xff] %vm603_vm8, %v8714_v50  ;;  %10883 = vmatprep.mubr.msk.f32.mxu1 %vm603_vm8, %v8714_v50  ;;  %10894 = vmatprep.mubr.msk.f32.mxu0 %vm603_vm8, %v8714_v50 }
0x8d86   :  { %10884 = vmatmul.mubr.msk.f32.vlgmr.msra.gmra.mrb[100].mxu1 %vm603_vm8, %v8716_v14  ;;  %10895 = vmatmul.mubr.msk.f32.vlgmr.msra.gmra.mrb[80].mxu0 %vm603_vm8, %v8716_v14 }
0x8d87   :  { %11451 = vmatpush3.bf16.msra.mxu0 %v11450_v62  ;;  %10912 = vmatprep.mubr.msk.f32.mxu0 %vm12422_vm0, %v12421_v1 }
0x8d88   :  { %11452 = vmatprep.subr.bf16.mxu0 %v12423_v32  ;;  %10901 = vmatprep.mubr.msk.f32.mxu1 %vm12422_vm0, %v12421_v1  ;;  %v9074_v3 = vpop.permute.xlu0 %9073 }
0x8d8b   :  { %11454 = vmatpush3.bf16.msra.mxu0 %v11453_v54 }
0x8d8c   :  { %11461 = vmatprep.subr.bf16.mxu0 %v12423_v32 }
0x8d8e   :  { %10913 = vmatmul.mubr.msk.f32.vlgmr.msra.gmra.mrb[82].mxu0 %vm603_vm8, %v13824_v19  ;;  %v9153_v19 = vld [vmem:[%s12587_s13 + $0x30] sm:$0xff]  ;;  %s12427_s13 = smov [#allocation36]  }
0x8d8f   :  { %10942 = vmatprep.mubr.msk.f32.mxu0 %vm12422_vm0, %v12421_v1  ;;  %11463 = vmatpush3.bf16.msra.mxu0 %v11462_v24  ;;  %v11471_v8 = vpack.c.bf16 %v9154_v18, %v9153_v19  ;;  %s9244_s2 = sshll.u32 %s12427_s13, 4  ;;  %s9245_s2 = int_to_ptr.vmem [resolvable:$true] %s9244_s2 }
0x8d90   :  { %11464 = vmatprep.subr.bf16.mxu0 %v12423_v32  ;;  %s12298_s7 = scalar_lea.vmem %s9245_s2, 256  ;;  %p12303_p13 = scmp.lt.s32.totalorder %s9245_s2, %s9245_s2 }
0x8d91   :  { %p12299_p12 = scmp.ne.s32.totalorder %s9245_s2, %s12298_s7  ;;  %p12304_p0 = scmp.lt.s32.totalorder %s12298_s7, %s12298_s7 }
0x8d93   :  { %11466 = vmatpush3.bf16.msra.mxu0 %v11465_v39  ;;  %p12305_p1 = por %p12304_p0, %p12303_p13 }
0x8d94   :  { %11467 = vmatprep.subr.bf16.mxu0 %v12423_v32 }
0x8d95   :  { %p12306_p2 = pnand %p12305_p1, %p12299_p12 }
0x8d97   :  { %11469 = vmatpush3.bf16.msra.mxu0 %v11468_v0 }
0x8d98   :  { %11470 = vmatprep.subr.bf16.mxu0 %v12423_v32 }
0x8d9b   :  { %11472 = vmatpush3.bf16.msra.mxu0 %v11471_v8 }
0x8e59   :  { %v10885_v31 = vpop.f32.mrb[100].mxu1  ;;  %v10896_v13 = vpop.f32.mrb[80].mxu0 }
0x8e5a   :  { %v8808_v56 = vadd.f32 %v10885_v31, %v9523_v60  ;;  %v8802_v21 = vpop.f32.mrb[101].mxu1  ;;  %v8900_v45 = vpop.f32.mrb[81].mxu0  ;;  %v8906_v37 = vadd.f32 %v10896_v13, %v9528_v26 }
0x8e5b   :  { %v8803_v49 = vadd.f32 %v9523_v60, %v8802_v21  ;;  %v8901_v27 = vadd.f32 %v9528_v26, %v8900_v45 }
0x8e5c   :  { %v9527_v41 = vmul.f32 -1.442695, %v8808_v56 }
0x8e5d   :  { %v9526_v63 = vmul.f32 -1.442695, %v8803_v49 }
0x8e5e   :  { %11872 = vpow2.f32 %v9527_v41 }
0x8e5f   :  { %11874 = vpow2.f32 %v9526_v63 }
0x8e61   :  { %v9068_v16 = vpop.f32.mrb[82].mxu0 }
0x8e62   :  { %v10914_v23 = vpop.f32.mrb[83].mxu0 }
0x8e68   :  { %v11873_v46 = vpop.eup %11872 }
0x8e69   :  { %v11875_v55 = vpop.eup %11874  ;;  %v8818_v43 = vadd.f32 1.0, %v11873_v46 }
0x8e6a   :  { %v8817_v44 = vadd.f32 1.0, %v11875_v55 }
0x8e6b   :  { %11876 = vrcp.f32 %v8818_v43 }
0x8e6c   :  { %11878 = vrcp.f32 %v8817_v44 }
0x8e75   :  { %v11877_v40 = vpop.eup %11876 }
0x8e76   :  { %v11879_v53 = vpop.eup %11878  ;;  %v8910_v17 = vmul.f32 %v11877_v40, %v8906_v37 }
0x8e77   :  { %v8909_v4 = vmul.f32 %v11879_v53, %v8901_v27 }
0x8e79   :  { %v11447_v51 = vpack.c.bf16 %v8910_v17, %v8909_v4 }
0x8e7b   :  { %11448 = vmatpush3.bf16.msra.mxu1 %v11447_v51 }
0x8e7c   :  { %11455 = vmatprep.subr.bf16.mxu1 %v12423_v32 }
0x8e7e   :  { %10902 = vmatmul.mubr.msk.f32.vlgmr.msra.gmra.mrb[102].mxu1 %vm400_vm1, %v9532_v15 }
0x8e7f   :  { %11457 = vmatpush3.bf16.msra.mxu1 %v11456_v7  ;;  %10923 = vmatprep.mubr.msk.f32.mxu1 %vm12422_vm0, %v12421_v1 }
0x8e80   :  { %11458 = vmatprep.subr.bf16.mxu1 %v12423_v32 }
0x8e83   :  { %11460 = vmatpush3.bf16.msra.mxu1 %v11459_v34 }
0x8e86   :  { %10924 = vmatmul.mubr.msk.f32.vlgmr.msra.gmra.mrb[104].mxu1 %vm603_vm8, %v9074_v3 }
0x8f51   :  { %v8988_v12 = vpop.f32.mrb[102].mxu1 }
0x8f52   :  { %10943 = vmatmul.mubr.msk.f32.vlgmr.msra.gmra.mrb[84].mxu0 %vm9155_vm10, %v8988_v12  ;;  %v10903_v30 = vpop.f32.mrb[103].mxu1 }
0x8f59   :  { %v9143_v22 = vpop.f32.mrb[104].mxu1 }
0x8f5a   :  { %v9144_v2 = vadd.f32 %v9143_v22, %v9068_v16  ;;  %v10925_v59 = vpop.f32.mrb[105].mxu1 }
0x8f5b   :  { %12309 = shalt.err (!%p12306_p2)
}
0x8f5c   :  { %s12310_s17 = scalar_lea.hbm %s12597_s8, 256 }
0x8f5d   :  { %p12311_p3 = scmp.ne.s32.totalorder %s12597_s8, %s12310_s17  ;;  %p12314_p4 = scmp.lt.u32.totalorder %s12310_s17, %s12597_s8 }
0x8f5f   :  { %p12316_p5 = pnand %p12314_p4, %p12311_p3 }
0x8f61   :  { %12319 = shalt.err (!%p12316_p5)
}
0x8f62   :  { %9250 = dma.vmem_to_hbm [thread:$0]  %s9245_s2, 256, %s12597_s8, [#allocation8], %s12402_s28, %s12402_s28, %s12403_s3   ;;  %v9537_v32 = vld [vmem:[#allocation35] ss:$0 sm:$0xff] }
0x8f63   :  { %s12428_s19 = smov [#allocation37]  }
0x8f64   :  { %s9257_s24 = sshll.u32 %s12428_s19, 4  ;;  %s9258_s24 = int_to_ptr.vmem [resolvable:$true] %s9257_s24 }
0x8f65   :  { %s12320_s30 = scalar_lea.vmem %s9258_s24, 32  ;;  %p12325_p7 = scmp.lt.s32.totalorder %s9258_s24, %s9258_s24 }
0x8f66   :  { %p12321_p6 = scmp.ne.s32.totalorder %s9258_s24, %s12320_s30  ;;  %p12326_p8 = scmp.lt.s32.totalorder %s12320_s30, %s12320_s30 }
0x8f68   :  { %p12327_p9 = por %p12326_p8, %p12325_p7 }
0x8f6a   :  { %p12328_p10 = pnand %p12327_p9, %p12321_p6 }
0x9025   :  { %v9225_v1 = vpop.f32.mrb[84].mxu0 }
0x9026   :  { %v9229_v11 = vadd.f32 %v9225_v1, %v9144_v2  ;;  %v10944_v5 = vpop.f32.mrb[85].mxu0 }
0x9028   :  { %v9237_v10 = vadd.f32 %v9537_v32, %v9229_v11 }
0x902a   :  { %9238 = vst.msk [vmem:[#allocation37] sm:$0x3] %vm802_vm9, %v9237_v10 }
0x902b   :  { %12331 = shalt.err (!%p12328_p10)
}
0x902c   :  { %s12332_s8 = scalar_lea.hbm %s12602_s25, 32 }
0x902d   :  { %p12333_p11 = scmp.ne.s32.totalorder %s12602_s25, %s12332_s8  ;;  %p12336_p12 = scmp.lt.u32.totalorder %s12332_s8, %s12602_s25 }
0x902f   :  { %p12338_p13 = pnand %p12336_p12, %p12333_p11 }
0x9031   :  { %12341 = shalt.err (!%p12338_p13)
}
0x9032   :  { %9260 = dma.vmem_to_hbm [thread:$0]  %s9258_s24, 32, %s12602_s25, [#allocation38]  }
0x9033   :  { %12362 = dma.done.wait [#allocation8], 256  }
0x9034   :  { %12363 = vsyncadd [#allocation8], 4294967040 }
0x9035   :  { %12364 = dma.done.wait [#allocation38], 32  }
0x9036   :  { %12365 = vsyncadd [#allocation38], 4294967264 }
0x9037   :  { %9267 = vsyncpa [#allocation7], 1 }
0x9038   :  { %9268 = vsyncpa [#allocation10], 1 }
0x9039   :  { %9269 = vsyncpa [#allocation13], 1 }
0x903a   :  { %9270 = vsyncpa [#allocation16], 1 }
0x903b   :  { %9271 = vsyncpa [#allocation19], 1 }
0x903c   :  { %9272 = vsyncpa [#allocation22], 1 }
0x903d   :  { %9273 = vsyncpa [#allocation25], 1 }
0x903e   :  { %9274 = vsyncpa [#allocation28], 1 }
0x903f   :  { %9275 = vsyncpa [#allocation31], 1 }
0x9040   :  { %9276 = vsyncpa [#allocation34], 1 }
0x9041   :  { %9277 = vsyncpa [#allocation8], 1 }
0x9042   :  { %9278 = vsyncpa [#allocation38], 1 }

</bundles_post_ra>
